<compile_context>
chip_gen: v7x
topology: tpu7x:2x2x1
jax: 0.10.0
libtpu: 0.0.40
codegen_flags: <defaults>
</compile_context>

<pallas_src>
import functools

import numpy as np
import jax
import jax.numpy as jnp
from jax.experimental import pallas as pl
from jax.experimental.pallas import tpu as pltpu


def _round_up(x, m):
    return (x + m - 1) // m * m


# ---------------------------------------------------------------------------
# Geometry constants (from CamNet.__init__)
# ---------------------------------------------------------------------------
_CAM_ROT = ((0.0, 0.0, 1.0), (1.0, 0.0, 0.0), (0.0, 1.0, 0.0))
# R_camfix = transpose([[1,0,0],[0,-1,0],[0,0,-1]]) == itself (diagonal)
_R_CAMFIX = ((1.0, 0.0, 0.0), (0.0, -1.0, 0.0), (0.0, 0.0, -1.0))
_CAM_MAX_DIST = 1.75
_EPS = 1e-08


# ---------------------------------------------------------------------------
# Pallas kernel 1: single-K-block matmul + fused shift (+ optional ReLU).
# BN scale and bias are pre-folded on the host, so the epilogue is one add.
# ---------------------------------------------------------------------------
def _linear_kernel(x_ref, w_ref, h_ref, o_ref, *, relu, cast_lhs):
    lhs = x_ref[...]
    if cast_lhs:
        lhs = lhs.astype(w_ref.dtype)          # bf16 x bf16 -> f32 accumulate
    out = jnp.dot(lhs, w_ref[...], preferred_element_type=jnp.float32)
    out = out + h_ref[...]
    if relu:
        out = jnp.maximum(out, 0.0)
    o_ref[...] = out


def pallas_linear(x, wp, hp, relu=False):
    """y = [relu](x @ wp + hp) with PRE-PADDED wp:(Kp,Np), hp:(1,Np).

    Returns the padded (Mp, Np) f32 output; callers slice only where needed
    (padded shapes are kept flowing between fused stages).
    """
    M, K = x.shape
    Kp, Np = wp.shape
    tm = min(_round_up(M, 8), 256)
    Mp = _round_up(M, tm)
    # Full-N tile whenever the weight block is small (always true here);
    # fall back to narrower tiles for bigger layers.
    if Kp * Np * wp.dtype.itemsize <= (4 << 20):
        tn = Np
    else:
        tn = 512
        while Np % tn:
            tn //= 2
    grid = (Mp // tm, Np // tn)

    xp = x.astype(jnp.float32)
    if Mp != M or Kp != K:
        xp = jnp.pad(xp, ((0, Mp - M), (0, Kp - K)))

    # TODO(synk): if a real VGG-scale backbone lands (K up to 4608), reintroduce a
    # K grid axis with a VMEM accumulator ("arbitrary" semantics) / set
    # vmem_limit_bytes so the single-K-block weight stream stays under v7x's
    # 64 MiB physical / 32 MiB scoped VMEM.
    return pl.pallas_call(
        functools.partial(_linear_kernel, relu=relu,
                          cast_lhs=(wp.dtype == jnp.bfloat16)),
        out_shape=jax.ShapeDtypeStruct((Mp, Np), jnp.float32),
        grid_spec=pltpu.PrefetchScalarGridSpec(
            num_scalar_prefetch=0,
            grid=grid,
            in_specs=[
                pl.BlockSpec((tm, Kp), lambda i, j: (i, 0)),
                pl.BlockSpec((Kp, tn), lambda i, j: (0, j)),
                pl.BlockSpec((1, tn), lambda i, j: (0, j)),
            ],
            out_specs=pl.BlockSpec((tm, tn), lambda i, j: (i, j)),
        ),
        compiler_params=pltpu.CompilerParams(
            dimension_semantics=("parallel", "parallel")),
    )(xp, wp, hp)


def pallas_conv3x3(x, wp, hp, out_ch):
    """3x3 conv, stride 1, pad 1, NHWC. wp rows indexed (ki*3+kj)*C + c."""
    # TODO(synk): at real VGG-scale resolutions replace im2col (9x HBM blowup)
    # with an in-kernel 9-tap accumulation over the padded image.
    B, H, W, C = x.shape
    xp = jnp.pad(x, ((0, 0), (1, 1), (1, 1), (0, 0)))
    cols = [xp[:, di:di + H, dj:dj + W, :] for di in range(3) for dj in range(3)]
    patches = jnp.concatenate(cols, axis=-1).reshape(B * H * W, 9 * C)
    out = pallas_linear(patches, wp, hp, relu=True)            # (B*H*W, Np)
    return out[:, :out_ch].reshape(B, H, W, out_ch)


def maxpool2(x):                                               # NHWC
    B, H, W, C = x.shape
    return x.reshape(B, H // 2, 2, W // 2, 2, C).max(axis=(2, 4))


# ---------------------------------------------------------------------------
# Pallas kernel 2: fused head (3 matmuls, weights resident in VMEM) +
# ortho6d -> R, transmat assembly, homogeneous point transform, MSE loss.
# ---------------------------------------------------------------------------
def _head_geom_kernel(gf_ref, w1_ref, h1_ref, w2_ref, h2_ref, w3_ref, h3_ref,
                      samp_ref, gt_ref, tm_ref, loss_ref, *, batch):
    bf16 = jnp.bfloat16
    # head chain: (Bp,1024) -> 1024 -> 512 -> 128 (cols 0..6 are real)
    a = jnp.dot(gf_ref[...].astype(bf16), w1_ref[...],
                preferred_element_type=jnp.float32) + h1_ref[...]
    a = jnp.dot(a.astype(bf16), w2_ref[...],
                preferred_element_type=jnp.float32) + h2_ref[...]
    a = jnp.dot(a, w3_ref[...], preferred_element_type=jnp.float32) + h3_ref[...]
    head = a[:batch, :]                      # (B,128): col0 = t, cols1..6 = rot6d

    gt = gt_ref[...]                         # (B,12) flattened gt transmat
    samp = samp_ref[...]                     # (B,3S) = [sx | sy | sz]
    S = samp.shape[1] // 3
    sx = samp[:, 0:S]
    sy = samp[:, S:2 * S]
    sz = samp[:, 2 * S:3 * S]

    t = head[:, 0:1]                         # (B,1)
    zero = jnp.zeros_like(t)
    cam_loc = (_CAM_MAX_DIST * t, zero, zero)      # cat([1.75*t, zeros(2)])
    # pred_translation_inv = -((cam_loc @ CAM_ROT) @ R_camfix)
    tmp = [cam_loc[0] * _CAM_ROT[0][j] + cam_loc[1] * _CAM_ROT[1][j]
           + cam_loc[2] * _CAM_ROT[2][j] for j in range(3)]
    t_inv = [-(tmp[0] * _R_CAMFIX[0][j] + tmp[1] * _R_CAMFIX[1][j]
               + tmp[2] * _R_CAMFIX[2][j]) for j in range(3)]

    def _normalize(v):
        mag = jnp.sqrt(v[0] * v[0] + v[1] * v[1] + v[2] * v[2])
        mag = jnp.maximum(mag, _EPS)
        return [v[0] / mag, v[1] / mag, v[2] / mag]

    def _cross(u, v):
        return [u[1] * v[2] - u[2] * v[1],
                u[2] * v[0] - u[0] * v[2],
                u[0] * v[1] - u[1] * v[0]]

    x_raw = [head[:, 1 + k:2 + k] for k in range(3)]
    y_raw = [head[:, 4 + k:5 + k] for k in range(3)]
    xv = _normalize(x_raw)
    zv = _normalize(_cross(xv, y_raw))
    yv = _cross(zv, xv)

    # rotation matrix columns are [x, y, z]; transmat row 3 is the translation.
    T = [[xv[i], yv[i], zv[i]] for i in range(3)] + [t_inv]     # T[r][c] : (B,1)
    # one lane-dense store instead of 12 single-lane writes
    tm_ref[...] = jnp.concatenate([T[r][c] for r in range(4) for c in range(3)],
                                  axis=1)

    total = jnp.float32(0.0)
    for j in range(3):
        pred_j = sx * T[0][j] + sy * T[1][j] + sz * T[2][j] + T[3][j]
        gt_j = (sx * gt[:, j:j + 1] + sy * gt[:, 3 + j:4 + j]
                + sz * gt[:, 6 + j:7 + j] + gt[:, 9 + j:10 + j])
        d = pred_j - gt_j
        total = total + jnp.sum(d * d)
    loss_ref[0, 0] = total / (batch * S * 3)


def pallas_head_geometry_loss(gf_pad, params, samplings, gt_transmat, batch):
    B, S, _ = samplings.shape
    # pack samplings as one lane-dense (B, 3S) array: [sx | sy | sz]
    samp = samplings.transpose(0, 2, 1).reshape(B, 3 * S).astype(jnp.float32)
    gt_flat = gt_transmat.reshape(B, 12).astype(jnp.float32)
    vmem = pl.BlockSpec(memory_space=pltpu.MemorySpace.VMEM)
    tm_flat, loss = pl.pallas_call(
        functools.partial(_head_geom_kernel, batch=batch),
        out_shape=(jax.ShapeDtypeStruct((B, 12), jnp.float32),
                   jax.ShapeDtypeStruct((1, 1), jnp.float32)),
        in_specs=[vmem] * 9,
        out_specs=(vmem, pl.BlockSpec(memory_space=pltpu.MemorySpace.SMEM)),
    )(gf_pad, params['h1_w'], params['h1_h'], params['h2_w'], params['h2_h'],
      params['h3_w'], params['h3_h'], samp, gt_flat)
    return tm_flat.reshape(B, 4, 3), loss[0, 0]


# ---------------------------------------------------------------------------
# Parameters (deterministic synthetic init; shapes per CamNet.__init__)
# ---------------------------------------------------------------------------
def init_params(key):
    keys = iter(jax.random.split(key, 64))

    def w(shape, std=0.05):
        return (std * jax.random.normal(next(keys), shape)).astype(jnp.float32)

    def bn(n):  # eval-mode BatchNorm1d folded to per-feature scale/shift
        gamma = 1.0 + 0.1 * jax.random.normal(next(keys), (n,))
        beta = 0.1 * jax.random.normal(next(keys), (n,))
        rmean = 0.1 * jax.random.normal(next(keys), (n,))
        rvar = 0.9 + 0.2 * jnp.abs(jax.random.normal(next(keys), (n,)))
        scale = gamma / jnp.sqrt(rvar + 1e-5)
        shift = beta - rmean * scale
        return scale.astype(jnp.float32), shift.astype(jnp.float32)

    p = {}
    # TODO(synk): torchvision vgg16(pretrained=True) backbone is not reproduced
    # (no checkpoint loading allowed); a small deterministic Pallas conv+pool+linear
    # stand-in produces the (B, 1000) "globalfeat" that self.vgg(image) would return.
    # Conv weights are tap-major: row = (ki*3+kj)*C + c (NHWC im2col layout).
    p['c1_w'] = w((9 * 3, 16));          p['c1_b'] = w((16,))
    p['c2_w'] = w((9 * 16, 32));         p['c2_b'] = w((32,))
    p['proj_w'] = w((4 * 4 * 32, 1000)); p['proj_b'] = w((1000,))
    # CamNet's own layers (exact shapes from __init__), stored as (in, out).
    p['m1_fc1_w'] = w((1000, 512));      p['m1_fc1_b'] = w((512,))
    p['m1_fc2_w'] = w((512, 256));       p['m1_fc2_b'] = w((256,))
    p['m1_fc3_w'] = w((256, 1), std=0.05)          # init.normal_(w, 0.0, 0.05)
    p['m1_fc3_b'] = jnp.zeros((1,), jnp.float32)   # init.constant_(b, 0.0)
    p['m2_fc1_w'] = w((1000, 512));      p['m2_fc1_b'] = w((512,))
    p['m2_fc2_w'] = w((512, 256));       p['m2_fc2_b'] = w((256,))
    p['m2_fc3_w'] = w((256, 6));         p['m2_fc3_b'] = w((6,))
    p['bn1_scale'], p['bn1_shift'] = bn(512)
    p['bn2_scale'], p['bn2_shift'] = bn(256)
    p['bn3_scale'], p['bn3_shift'] = bn(512)
    p['bn4_scale'], p['bn4_shift'] = bn(256)
    return p


def prepare_params(p):
    """One-time host-side weight prep:
      * fold BN scale into weight columns, fold bias (and BN shift) into one shift,
      * fuse the two MLP heads (concat fc1, block-diag fc2/fc3),
      * pre-pad everything to block-aligned shapes (no per-forward jnp.pad),
      * cast the large weights to bfloat16 (activations / epilogues stay f32)."""
    f32, bf16 = jnp.float32, jnp.bfloat16

    def fold(w, b, scale=None, shift=None):
        # (xW + b)*scale + shift == x(W*scale) + (b*scale + shift)
        if scale is None:
            return w, b
        return w * scale[None, :], b * scale + shift

    def pack(w, h, k_align, dtype):
        K, N = w.shape
        Kp, Np = _round_up(K, k_align), _round_up(N, 128)
        wp = jnp.pad(w, ((0, Kp - K), (0, Np - N))).astype(dtype)
        hp = jnp.pad(h, (0, Np - N)).astype(f32).reshape(1, Np)
        return wp, hp

    q = {}
    q['c1_w'], q['c1_h'] = pack(*fold(p['c1_w'], p['c1_b']), k_align=8, dtype=f32)
    q['c2_w'], q['c2_h'] = pack(*fold(p['c2_w'], p['c2_b']), k_align=8, dtype=f32)
    q['proj_w'], q['proj_h'] = pack(*fold(p['proj_w'], p['proj_b']),
                                    k_align=128, dtype=bf16)

    # Fused head layer 1: [bn1(m1_fc1) | bn3(m2_fc1)]   (1000 -> 1024), bf16
    w1a, h1a = fold(p['m1_fc1_w'], p['m1_fc1_b'], p['bn1_scale'], p['bn1_shift'])
    w1b, h1b = fold(p['m2_fc1_w'], p['m2_fc1_b'], p['bn3_scale'], p['bn3_shift'])
    q['h1_w'], q['h1_h'] = pack(jnp.concatenate([w1a, w1b], axis=1),
                                jnp.concatenate([h1a, h1b]),
                                k_align=128, dtype=bf16)

    # Fused head layer 2: block-diag [bn2(m1_fc2), bn4(m2_fc2)]  (1024 -> 512), bf16
    w2a, h2a = fold(p['m1_fc2_w'], p['m1_fc2_b'], p['bn2_scale'], p['bn2_shift'])
    w2b, h2b = fold(p['m2_fc2_w'], p['m2_fc2_b'], p['bn4_scale'], p['bn4_shift'])
    z = jnp.zeros((512, 256), f32)
    w2 = jnp.concatenate([jnp.concatenate([w2a, z], axis=1),
                          jnp.concatenate([z, w2b], axis=1)], axis=0)
    q['h2_w'], q['h2_h'] = pack(w2, jnp.concatenate([h2a, h2b]),
                                k_align=128, dtype=bf16)

    # Fused head layer 3: block-diag [m1_fc3, m2_fc3]  (512 -> 7), f32.
    # Column 0 = translation, columns 1:7 = rotation6d.
    w3 = jnp.concatenate(
        [jnp.concatenate([p['m1_fc3_w'], jnp.zeros((256, 6), f32)], axis=1),
         jnp.concatenate([jnp.zeros((256, 1), f32), p['m2_fc3_w']], axis=1)], axis=0)
    h3 = jnp.concatenate([p['m1_fc3_b'], p['m2_fc3_b']])
    q['h3_w'], q['h3_h'] = pack(w3, h3, k_align=128, dtype=f32)
    return q


# ---------------------------------------------------------------------------
# CamNet.forward(image, gt_transmat, samplings) -> (pred_transmat, loss)
# ---------------------------------------------------------------------------
def camnet_forward(params, image, gt_transmat, samplings):
    B = image.shape[0]
    x = image.transpose(0, 2, 3, 1)                 # NCHW -> NHWC once at the entry
    # backbone stand-in for self.vgg(image) -> (B, 1000)   (kept NHWC throughout)
    h = pallas_conv3x3(x, params['c1_w'], params['c1_h'], out_ch=16)
    h = maxpool2(h)
    h = pallas_conv3x3(h, params['c2_w'], params['c2_h'], out_ch=32)
    h = maxpool2(h)
    gf = pallas_linear(h.reshape(B, -1), params['proj_w'], params['proj_h'])
    # gf stays padded (Bp, 1024); the fused head kernel handles the real batch rows.
    return pallas_head_geometry_loss(gf, params, samplings, gt_transmat, batch=B)


# ---------------------------------------------------------------------------
# Pure-JAX reference (same math incl. the bf16 weight quantization used by the
# kernels, but unfused / plain XLA ops) used to verify the Pallas pipeline.
# ---------------------------------------------------------------------------
def reference_forward(params, image, gt_transmat, samplings):
    prec = jax.lax.Precision.HIGHEST
    f32, bf16 = jnp.float32, jnp.bfloat16

    def conv(x, w, b):
        B, H, W, C = x.shape
        xp = jnp.pad(x, ((0, 0), (1, 1), (1, 1), (0, 0)))
        cols = [xp[:, di:di + H, dj:dj + W, :] for di in range(3) for dj in range(3)]
        p = jnp.concatenate(cols, axis=-1).reshape(B * H * W, 9 * C)
        o = jnp.maximum(jnp.dot(p, w, precision=prec) + b, 0.0)
        return o.reshape(B, H, W, -1)

    def lin_bf16(x, w, b, scale=None, shift=None):
        # mirrors the kernel path: BN scale folded into the bf16 weight, bias
        # folded into the f32 shift, bf16 x bf16 matmul with f32 accumulation.
        h = b
        if scale is not None:
            w = w * scale
            h = b * scale + shift
        return jnp.dot(x.astype(bf16), w.astype(bf16),
                       preferred_element_type=f32) + h

    B = image.shape[0]
    x = image.transpose(0, 2, 3, 1)
    h = maxpool2(conv(x, params['c1_w'], params['c1_b']))
    h = maxpool2(conv(h, params['c2_w'], params['c2_b']))
    gf = lin_bf16(h.reshape(B, -1), params['proj_w'], params['proj_b'])
    m1 = lin_bf16(gf, params['m1_fc1_w'], params['m1_fc1_b'],
                  params['bn1_scale'], params['bn1_shift'])
    m1 = lin_bf16(m1, params['m1_fc2_w'], params['m1_fc2_b'],
                  params['bn2_scale'], params['bn2_shift'])
    t = jnp.dot(m1, params['m1_fc3_w'], precision=prec) + params['m1_fc3_b']
    m2 = lin_bf16(gf, params['m2_fc1_w'], params['m2_fc1_b'],
                  params['bn3_scale'], params['bn3_shift'])
    m2 = lin_bf16(m2, params['m2_fc2_w'], params['m2_fc2_b'],
                  params['bn4_scale'], params['bn4_shift'])
    r6 = jnp.dot(m2, params['m2_fc3_w'], precision=prec) + params['m2_fc3_b']

    CAM_ROT = jnp.array(_CAM_ROT, f32)
    R_CAMFIX = jnp.array(_R_CAMFIX, f32)

    def normalize(v):
        mag = jnp.sqrt(jnp.sum(v * v, axis=1, keepdims=True))
        return v / jnp.maximum(mag, _EPS)

    cam_loc = jnp.concatenate([t * _CAM_MAX_DIST, jnp.zeros((B, 2), f32)],
                              axis=1)[:, None, :]
    t_inv = -jnp.einsum('bij,jk,kl->bil', cam_loc, CAM_ROT, R_CAMFIX, precision=prec)
    xv = normalize(r6[:, 0:3])
    zv = normalize(jnp.cross(xv, r6[:, 3:6]))
    yv = jnp.cross(zv, xv)
    R = jnp.stack([xv, yv, zv], axis=2)
    T = jnp.concatenate([R, t_inv], axis=1)                      # (B,4,3)
    ones = jnp.ones((B, samplings.shape[1], 1), f32)
    homop = jnp.concatenate([samplings, ones], axis=2)
    pred_pos = jnp.einsum('bsk,bkj->bsj', homop, T, precision=prec)
    gt_pos = jnp.einsum('bsk,bkj->bsj', homop, gt_transmat, precision=prec)
    return T, jnp.mean((pred_pos - gt_pos) ** 2)


if __name__ == "__main__":
    key = jax.random.PRNGKey(0)
    kp, ki, kg, ks = jax.random.split(key, 4)
    params = init_params(kp)
    fused = prepare_params(params)       # pre-padded / scale-folded / bf16 weights

    B, S = 2, 8
    image = jax.random.normal(ki, (B, 3, 16, 16), jnp.float32)       # NCHW
    gt_transmat = jax.random.normal(kg, (B, 4, 3), jnp.float32)
    samplings = jax.random.normal(ks, (B, S, 3), jnp.float32)

    fwd = jax.jit(camnet_forward)
    pred_transmat, loss = fwd(fused, image, gt_transmat, samplings)
    jax.block_until_ready((pred_transmat, loss))

    ref_T, ref_loss = reference_forward(params, image, gt_transmat, samplings)
    np.testing.assert_allclose(np.asarray(pred_transmat), np.asarray(ref_T),
                               rtol=2e-3, atol=2e-4)
    np.testing.assert_allclose(float(loss), float(ref_loss), rtol=2e-3, atol=2e-4)

    print("KERNEL_OK")
</pallas_src>

<mosaic_0001>
module attributes {stable_mosaic.version = 11 : i64} {
  func.func @_linear_kernel(%arg0: i32, %arg1: i32, %arg2: memref<256x32xf32, #tpu.memory_space<vmem>>, %arg3: memref<32x128xf32, #tpu.memory_space<vmem>>, %arg4: memref<1x128xf32, #tpu.memory_space<vmem>>, %arg5: memref<256x128xf32, #tpu.memory_space<vmem>>) attributes {dimension_semantics = [#tpu.dimension_semantics<parallel>, #tpu.dimension_semantics<parallel>], iteration_bounds = array<i64: 2, 1>, scalar_prefetch = 0 : i64, scratch_operands = 0 : i64, tpu.core_type = #tpu.core_type<tc>, window_params = [{transform_indices = @transform_0, window_bounds = array<i64: 256, 32>}, {transform_indices = @transform_1, window_bounds = array<i64: 32, 128>}, {transform_indices = @transform_2, window_bounds = array<i64: 1, 128>}, {transform_indices = @transform_3, window_bounds = array<i64: 256, 128>}]} {
    %c0 = arith.constant 0 : index
    %c0_0 = arith.constant 0 : index
    %0 = vector.load %arg2[%c0, %c0_0] : memref<256x32xf32, #tpu.memory_space<vmem>>, vector<256x32xf32>
    %c0_1 = arith.constant 0 : index
    %c0_2 = arith.constant 0 : index
    %1 = vector.load %arg3[%c0_1, %c0_2] : memref<32x128xf32, #tpu.memory_space<vmem>>, vector<32x128xf32>
    %cst = arith.constant dense<0.000000e+00> : vector<256x128xf32>
    %2 = tpu.matmul %0, %1, %cst {dimension_numbers = #tpu.dot_dimension_numbers<[1], [0], [0], [1], [0, 0, 1, 1], [], []>} : vector<256x32xf32>, vector<32x128xf32>, vector<256x128xf32> -> vector<256x128xf32>
    %c0_3 = arith.constant 0 : index
    %c0_4 = arith.constant 0 : index
    %3 = vector.load %arg4[%c0_3, %c0_4] : memref<1x128xf32, #tpu.memory_space<vmem>>, vector<1x128xf32>
    %4 = vector.broadcast %3 : vector<1x128xf32> to vector<256x128xf32>
    %5 = arith.addf %2, %4 : vector<256x128xf32>
    %cst_5 = arith.constant 0.000000e+00 : f32
    %6 = vector.broadcast %cst_5 : f32 to vector<256x128xf32>
    %7 = arith.maximumf %5, %6 : vector<256x128xf32>
    %c0_6 = arith.constant 0 : index
    %c0_7 = arith.constant 0 : index
    %8 = vector.load %arg5[%c0_6, %c0_7] : memref<256x128xf32, #tpu.memory_space<vmem>>, vector<256x128xf32>
    tpu.vector_store %arg5[%c0_6, %c0_7], %7 {strides = array<i32>} : memref<256x128xf32, #tpu.memory_space<vmem>>, vector<256x128xf32>,
    return
  }
  func.func @transform_0(%arg0: i32, %arg1: i32) -> (i32, i32) {
    %c0_i32 = arith.constant 0 : i32
    %c0_i32_0 = arith.constant 0 : i32
    return %arg0, %c0_i32 : i32, i32
  }
  func.func @transform_1(%arg0: i32, %arg1: i32) -> (i32, i32) {
    %c0_i32 = arith.constant 0 : i32
    %c0_i32_0 = arith.constant 0 : i32
    return %c0_i32, %arg1 : i32, i32
  }
  func.func @transform_2(%arg0: i32, %arg1: i32) -> (i32, i32) {
    %c0_i32 = arith.constant 0 : i32
    %c0_i32_0 = arith.constant 0 : i32
    return %c0_i32, %arg1 : i32, i32
  }
  func.func @transform_3(%arg0: i32, %arg1: i32) -> (i32, i32) {
    %c0_i32 = arith.constant 0 : i32
    return %arg0, %arg1 : i32, i32
  }
}

module attributes {stable_mosaic.version = 11 : i64} {
  func.func @_linear_kernel(%arg0: i32, %arg1: i32, %arg2: memref<128x144xf32, #tpu.memory_space<vmem>>, %arg3: memref<144x128xf32, #tpu.memory_space<vmem>>, %arg4: memref<1x128xf32, #tpu.memory_space<vmem>>, %arg5: memref<128x128xf32, #tpu.memory_space<vmem>>) attributes {dimension_semantics = [#tpu.dimension_semantics<parallel>, #tpu.dimension_semantics<parallel>], iteration_bounds = array<i64: 1, 1>, scalar_prefetch = 0 : i64, scratch_operands = 0 : i64, tpu.core_type = #tpu.core_type<tc>, window_params = [{transform_indices = @transform_0, window_bounds = array<i64: 128, 144>}, {transform_indices = @transform_1, window_bounds = array<i64: 144, 128>}, {transform_indices = @transform_2, window_bounds = array<i64: 1, 128>}, {transform_indices = @transform_3, window_bounds = array<i64: 128, 128>}]} {
    %c0 = arith.constant 0 : index
    %c0_0 = arith.constant 0 : index
    %0 = vector.load %arg2[%c0, %c0_0] : memref<128x144xf32, #tpu.memory_space<vmem>>, vector<128x144xf32>
    %c0_1 = arith.constant 0 : index
    %c0_2 = arith.constant 0 : index
    %1 = vector.load %arg3[%c0_1, %c0_2] : memref<144x128xf32, #tpu.memory_space<vmem>>, vector<144x128xf32>
    %cst = arith.constant dense<0.000000e+00> : vector<128x128xf32>
    %2 = tpu.matmul %0, %1, %cst {dimension_numbers = #tpu.dot_dimension_numbers<[1], [0], [0], [1], [0, 0, 1, 1], [], []>} : vector<128x144xf32>, vector<144x128xf32>, vector<128x128xf32> -> vector<128x128xf32>
    %c0_3 = arith.constant 0 : index
    %c0_4 = arith.constant 0 : index
    %3 = vector.load %arg4[%c0_3, %c0_4] : memref<1x128xf32, #tpu.memory_space<vmem>>, vector<1x128xf32>
    %4 = vector.broadcast %3 : vector<1x128xf32> to vector<128x128xf32>
    %5 = arith.addf %2, %4 : vector<128x128xf32>
    %cst_5 = arith.constant 0.000000e+00 : f32
    %6 = vector.broadcast %cst_5 : f32 to vector<128x128xf32>
    %7 = arith.maximumf %5, %6 : vector<128x128xf32>
    %c0_6 = arith.constant 0 : index
    %c0_7 = arith.constant 0 : index
    %8 = vector.load %arg5[%c0_6, %c0_7] : memref<128x128xf32, #tpu.memory_space<vmem>>, vector<128x128xf32>
    tpu.vector_store %arg5[%c0_6, %c0_7], %7 {strides = array<i32>} : memref<128x128xf32, #tpu.memory_space<vmem>>, vector<128x128xf32>,
    return
  }
  func.func @transform_0(%arg0: i32, %arg1: i32) -> (i32, i32) {
    %c0_i32 = arith.constant 0 : i32
    %c0_i32_0 = arith.constant 0 : i32
    return %arg0, %c0_i32 : i32, i32
  }
  func.func @transform_1(%arg0: i32, %arg1: i32) -> (i32, i32) {
    %c0_i32 = arith.constant 0 : i32
    %c0_i32_0 = arith.constant 0 : i32
    return %c0_i32, %arg1 : i32, i32
  }
  func.func @transform_2(%arg0: i32, %arg1: i32) -> (i32, i32) {
    %c0_i32 = arith.constant 0 : i32
    %c0_i32_0 = arith.constant 0 : i32
    return %c0_i32, %arg1 : i32, i32
  }
  func.func @transform_3(%arg0: i32, %arg1: i32) -> (i32, i32) {
    %c0_i32 = arith.constant 0 : i32
    return %arg0, %arg1 : i32, i32
  }
}

module attributes {stable_mosaic.version = 11 : i64} {
  func.func @_linear_kernel(%arg0: i32, %arg1: i32, %arg2: memref<8x512xf32, #tpu.memory_space<vmem>>, %arg3: memref<512x1024xbf16, #tpu.memory_space<vmem>>, %arg4: memref<1x1024xf32, #tpu.memory_space<vmem>>, %arg5: memref<8x1024xf32, #tpu.memory_space<vmem>>) attributes {dimension_semantics = [#tpu.dimension_semantics<parallel>, #tpu.dimension_semantics<parallel>], iteration_bounds = array<i64: 1, 1>, scalar_prefetch = 0 : i64, scratch_operands = 0 : i64, tpu.core_type = #tpu.core_type<tc>, window_params = [{transform_indices = @transform_0, window_bounds = array<i64: 8, 512>}, {transform_indices = @transform_1, window_bounds = array<i64: 512, 1024>}, {transform_indices = @transform_2, window_bounds = array<i64: 1, 1024>}, {transform_indices = @transform_3, window_bounds = array<i64: 8, 1024>}]} {
    %c0 = arith.constant 0 : index
    %c0_0 = arith.constant 0 : index
    %0 = vector.load %arg2[%c0, %c0_0] : memref<8x512xf32, #tpu.memory_space<vmem>>, vector<8x512xf32>
    %1 = arith.truncf %0 : vector<8x512xf32> to vector<8x512xbf16>
    %c0_1 = arith.constant 0 : index
    %c0_2 = arith.constant 0 : index
    %2 = vector.load %arg3[%c0_1, %c0_2] : memref<512x1024xbf16, #tpu.memory_space<vmem>>, vector<512x1024xbf16>
    %cst = arith.constant dense<0.000000e+00> : vector<8x1024xf32>
    %3 = tpu.matmul %1, %2, %cst {dimension_numbers = #tpu.dot_dimension_numbers<[1], [0], [0], [1], [0, 0, 1, 1], [], []>} : vector<8x512xbf16>, vector<512x1024xbf16>, vector<8x1024xf32> -> vector<8x1024xf32>
    %c0_3 = arith.constant 0 : index
    %c0_4 = arith.constant 0 : index
    %4 = vector.load %arg4[%c0_3, %c0_4] : memref<1x1024xf32, #tpu.memory_space<vmem>>, vector<1x1024xf32>
    %5 = vector.broadcast %4 : vector<1x1024xf32> to vector<8x1024xf32>
    %6 = arith.addf %3, %5 : vector<8x1024xf32>
    %c0_5 = arith.constant 0 : index
    %c0_6 = arith.constant 0 : index
    %7 = vector.load %arg5[%c0_5, %c0_6] : memref<8x1024xf32, #tpu.memory_space<vmem>>, vector<8x1024xf32>
    tpu.vector_store %arg5[%c0_5, %c0_6], %6 {strides = array<i32>} : memref<8x1024xf32, #tpu.memory_space<vmem>>, vector<8x1024xf32>,
    return
  }
  func.func @transform_0(%arg0: i32, %arg1: i32) -> (i32, i32) {
    %c0_i32 = arith.constant 0 : i32
    %c0_i32_0 = arith.constant 0 : i32
    return %arg0, %c0_i32 : i32, i32
  }
  func.func @transform_1(%arg0: i32, %arg1: i32) -> (i32, i32) {
    %c0_i32 = arith.constant 0 : i32
    %c0_i32_0 = arith.constant 0 : i32
    return %c0_i32, %arg1 : i32, i32
  }
  func.func @transform_2(%arg0: i32, %arg1: i32) -> (i32, i32) {
    %c0_i32 = arith.constant 0 : i32
    %c0_i32_0 = arith.constant 0 : i32
    return %c0_i32, %arg1 : i32, i32
  }
  func.func @transform_3(%arg0: i32, %arg1: i32) -> (i32, i32) {
    %c0_i32 = arith.constant 0 : i32
    return %arg0, %arg1 : i32, i32
  }
}

module attributes {stable_mosaic.version = 11 : i64} {
  func.func @_head_geom_kernel(%arg0: memref<8x1024xf32, #tpu.memory_space<vmem>>, %arg1: memref<1024x1024xbf16, #tpu.memory_space<vmem>>, %arg2: memref<1x1024xf32, #tpu.memory_space<vmem>>, %arg3: memref<1024x512xbf16, #tpu.memory_space<vmem>>, %arg4: memref<1x512xf32, #tpu.memory_space<vmem>>, %arg5: memref<512x128xf32, #tpu.memory_space<vmem>>, %arg6: memref<1x128xf32, #tpu.memory_space<vmem>>, %arg7: memref<2x24xf32, #tpu.memory_space<vmem>>, %arg8: memref<2x12xf32, #tpu.memory_space<vmem>>, %arg9: memref<2x12xf32, #tpu.memory_space<vmem>>, %arg10: memref<1x1xf32, #tpu.memory_space<smem>>) attributes {dimension_semantics = [], scalar_prefetch = 0 : i64, scratch_operands = 0 : i64, tpu.core_type = #tpu.core_type<tc>} {
    %c0 = arith.constant 0 : index
    %c0_0 = arith.constant 0 : index
    %0 = vector.load %arg0[%c0, %c0_0] : memref<8x1024xf32, #tpu.memory_space<vmem>>, vector<8x1024xf32>
    %1 = arith.truncf %0 : vector<8x1024xf32> to vector<8x1024xbf16>
    %c0_1 = arith.constant 0 : index
    %c0_2 = arith.constant 0 : index
    %2 = vector.load %arg1[%c0_1, %c0_2] : memref<1024x1024xbf16, #tpu.memory_space<vmem>>, vector<1024x1024xbf16>
    %cst = arith.constant dense<0.000000e+00> : vector<8x1024xf32>
    %3 = tpu.matmul %1, %2, %cst {dimension_numbers = #tpu.dot_dimension_numbers<[1], [0], [0], [1], [0, 0, 1, 1], [], []>} : vector<8x1024xbf16>, vector<1024x1024xbf16>, vector<8x1024xf32> -> vector<8x1024xf32>
    %c0_3 = arith.constant 0 : index
    %c0_4 = arith.constant 0 : index
    %4 = vector.load %arg2[%c0_3, %c0_4] : memref<1x1024xf32, #tpu.memory_space<vmem>>, vector<1x1024xf32>
    %5 = vector.broadcast %4 : vector<1x1024xf32> to vector<8x1024xf32>
    %6 = arith.addf %3, %5 : vector<8x1024xf32>
    %7 = arith.truncf %6 : vector<8x1024xf32> to vector<8x1024xbf16>
    %c0_5 = arith.constant 0 : index
    %c0_6 = arith.constant 0 : index
    %8 = vector.load %arg3[%c0_5, %c0_6] : memref<1024x512xbf16, #tpu.memory_space<vmem>>, vector<1024x512xbf16>
    %cst_7 = arith.constant dense<0.000000e+00> : vector<8x512xf32>
    %9 = tpu.matmul %7, %8, %cst_7 {dimension_numbers = #tpu.dot_dimension_numbers<[1], [0], [0], [1], [0, 0, 1, 1], [], []>} : vector<8x1024xbf16>, vector<1024x512xbf16>, vector<8x512xf32> -> vector<8x512xf32>
    %c0_8 = arith.constant 0 : index
    %c0_9 = arith.constant 0 : index
    %10 = vector.load %arg4[%c0_8, %c0_9] : memref<1x512xf32, #tpu.memory_space<vmem>>, vector<1x512xf32>
    %11 = vector.broadcast %10 : vector<1x512xf32> to vector<8x512xf32>
    %12 = arith.addf %9, %11 : vector<8x512xf32>
    %c0_10 = arith.constant 0 : index
    %c0_11 = arith.constant 0 : index
    %13 = vector.load %arg5[%c0_10, %c0_11] : memref<512x128xf32, #tpu.memory_space<vmem>>, vector<512x128xf32>
    %cst_12 = arith.constant dense<0.000000e+00> : vector<8x128xf32>
    %14 = tpu.matmul %12, %13, %cst_12 {dimension_numbers = #tpu.dot_dimension_numbers<[1], [0], [0], [1], [0, 0, 1, 1], [], []>} : vector<8x512xf32>, vector<512x128xf32>, vector<8x128xf32> -> vector<8x128xf32>
    %c0_13 = arith.constant 0 : index
    %c0_14 = arith.constant 0 : index
    %15 = vector.load %arg6[%c0_13, %c0_14] : memref<1x128xf32, #tpu.memory_space<vmem>>, vector<1x128xf32>
    %16 = vector.broadcast %15 : vector<1x128xf32> to vector<8x128xf32>
    %17 = arith.addf %14, %16 : vector<8x128xf32>
    %18 = vector.extract_strided_slice %17 {offsets = [0, 0], sizes = [2, 128], strides = [1, 1]} : vector<8x128xf32> to vector<2x128xf32>
    %c0_15 = arith.constant 0 : index
    %c0_16 = arith.constant 0 : index
    %19 = vector.load %arg8[%c0_15, %c0_16] : memref<2x12xf32, #tpu.memory_space<vmem>>, vector<2x12xf32>
    %c0_17 = arith.constant 0 : index
    %c0_18 = arith.constant 0 : index
    %20 = vector.load %arg7[%c0_17, %c0_18] : memref<2x24xf32, #tpu.memory_space<vmem>>, vector<2x24xf32>
    %21 = vector.extract_strided_slice %20 {offsets = [0, 0], sizes = [2, 8], strides = [1, 1]} : vector<2x24xf32> to vector<2x8xf32>
    %22 = vector.extract_strided_slice %20 {offsets = [0, 8], sizes = [2, 8], strides = [1, 1]} : vector<2x24xf32> to vector<2x8xf32>
    %23 = vector.extract_strided_slice %20 {offsets = [0, 16], sizes = [2, 8], strides = [1, 1]} : vector<2x24xf32> to vector<2x8xf32>
    %24 = vector.extract_strided_slice %18 {offsets = [0, 0], sizes = [2, 1], strides = [1, 1]} : vector<2x128xf32> to vector<2x1xf32>
    %cst_19 = arith.constant 0.000000e+00 : f32
    %25 = vector.broadcast %cst_19 : f32 to vector<2x1xf32>
    %cst_20 = arith.constant 1.750000e+00 : f32
    %26 = vector.broadcast %cst_20 : f32 to vector<2x1xf32>
    %27 = arith.mulf %26, %24 : vector<2x1xf32>
    %cst_21 = arith.constant 0.000000e+00 : f32
    %28 = vector.broadcast %cst_21 : f32 to vector<2x1xf32>
    %29 = arith.mulf %27, %28 : vector<2x1xf32>
    %cst_22 = arith.constant 1.000000e+00 : f32
    %30 = vector.broadcast %cst_22 : f32 to vector<2x1xf32>
    %31 = arith.mulf %25, %30 : vector<2x1xf32>
    %32 = arith.addf %29, %31 : vector<2x1xf32>
    %cst_23 = arith.constant 0.000000e+00 : f32
    %33 = vector.broadcast %cst_23 : f32 to vector<2x1xf32>
    %34 = arith.mulf %25, %33 : vector<2x1xf32>
    %35 = arith.addf %32, %34 : vector<2x1xf32>
    %cst_24 = arith.constant 0.000000e+00 : f32
    %36 = vector.broadcast %cst_24 : f32 to vector<2x1xf32>
    %37 = arith.mulf %27, %36 : vector<2x1xf32>
    %cst_25 = arith.constant 0.000000e+00 : f32
    %38 = vector.broadcast %cst_25 : f32 to vector<2x1xf32>
    %39 = arith.mulf %25, %38 : vector<2x1xf32>
    %40 = arith.addf %37, %39 : vector<2x1xf32>
    %cst_26 = arith.constant 1.000000e+00 : f32
    %41 = vector.broadcast %cst_26 : f32 to vector<2x1xf32>
    %42 = arith.mulf %25, %41 : vector<2x1xf32>
    %43 = arith.addf %40, %42 : vector<2x1xf32>
    %cst_27 = arith.constant 1.000000e+00 : f32
    %44 = vector.broadcast %cst_27 : f32 to vector<2x1xf32>
    %45 = arith.mulf %27, %44 : vector<2x1xf32>
    %cst_28 = arith.constant 0.000000e+00 : f32
    %46 = vector.broadcast %cst_28 : f32 to vector<2x1xf32>
    %47 = arith.mulf %25, %46 : vector<2x1xf32>
    %48 = arith.addf %45, %47 : vector<2x1xf32>
    %cst_29 = arith.constant 0.000000e+00 : f32
    %49 = vector.broadcast %cst_29 : f32 to vector<2x1xf32>
    %50 = arith.mulf %25, %49 : vector<2x1xf32>
    %51 = arith.addf %48, %50 : vector<2x1xf32>
    %cst_30 = arith.constant 1.000000e+00 : f32
    %52 = vector.broadcast %cst_30 : f32 to vector<2x1xf32>
    %53 = arith.mulf %35, %52 : vector<2x1xf32>
    %cst_31 = arith.constant 0.000000e+00 : f32
    %54 = vector.broadcast %cst_31 : f32 to vector<2x1xf32>
    %55 = arith.mulf %43, %54 : vector<2x1xf32>
    %56 = arith.addf %53, %55 : vector<2x1xf32>
    %cst_32 = arith.constant 0.000000e+00 : f32
    %57 = vector.broadcast %cst_32 : f32 to vector<2x1xf32>
    %58 = arith.mulf %51, %57 : vector<2x1xf32>
    %59 = arith.addf %56, %58 : vector<2x1xf32>
    %cst_33 = arith.constant 0.000000e+00 : f32
    %60 = vector.broadcast %cst_33 : f32 to vector<2x1xf32>
    %61 = arith.subf %60, %59 : vector<2x1xf32>
    %cst_34 = arith.constant 0.000000e+00 : f32
    %62 = vector.broadcast %cst_34 : f32 to vector<2x1xf32>
    %63 = arith.mulf %35, %62 : vector<2x1xf32>
    %cst_35 = arith.constant -1.000000e+00 : f32
    %64 = vector.broadcast %cst_35 : f32 to vector<2x1xf32>
    %65 = arith.mulf %43, %64 : vector<2x1xf32>
    %66 = arith.addf %63, %65 : vector<2x1xf32>
    %cst_36 = arith.constant 0.000000e+00 : f32
    %67 = vector.broadcast %cst_36 : f32 to vector<2x1xf32>
    %68 = arith.mulf %51, %67 : vector<2x1xf32>
    %69 = arith.addf %66, %68 : vector<2x1xf32>
    %cst_37 = arith.constant 0.000000e+00 : f32
    %70 = vector.broadcast %cst_37 : f32 to vector<2x1xf32>
    %71 = arith.subf %70, %69 : vector<2x1xf32>
    %cst_38 = arith.constant 0.000000e+00 : f32
    %72 = vector.broadcast %cst_38 : f32 to vector<2x1xf32>
    %73 = arith.mulf %35, %72 : vector<2x1xf32>
    %cst_39 = arith.constant 0.000000e+00 : f32
    %74 = vector.broadcast %cst_39 : f32 to vector<2x1xf32>
    %75 = arith.mulf %43, %74 : vector<2x1xf32>
    %76 = arith.addf %73, %75 : vector<2x1xf32>
    %cst_40 = arith.constant -1.000000e+00 : f32
    %77 = vector.broadcast %cst_40 : f32 to vector<2x1xf32>
    %78 = arith.mulf %51, %77 : vector<2x1xf32>
    %79 = arith.addf %76, %78 : vector<2x1xf32>
    %cst_41 = arith.constant 0.000000e+00 : f32
    %80 = vector.broadcast %cst_41 : f32 to vector<2x1xf32>
    %81 = arith.subf %80, %79 : vector<2x1xf32>
    %82 = vector.extract_strided_slice %18 {offsets = [0, 1], sizes = [2, 1], strides = [1, 1]} : vector<2x128xf32> to vector<2x1xf32>
    %83 = vector.extract_strided_slice %18 {offsets = [0, 2], sizes = [2, 1], strides = [1, 1]} : vector<2x128xf32> to vector<2x1xf32>
    %84 = vector.extract_strided_slice %18 {offsets = [0, 3], sizes = [2, 1], strides = [1, 1]} : vector<2x128xf32> to vector<2x1xf32>
    %85 = vector.extract_strided_slice %18 {offsets = [0, 4], sizes = [2, 1], strides = [1, 1]} : vector<2x128xf32> to vector<2x1xf32>
    %86 = vector.extract_strided_slice %18 {offsets = [0, 5], sizes = [2, 1], strides = [1, 1]} : vector<2x128xf32> to vector<2x1xf32>
    %87 = vector.extract_strided_slice %18 {offsets = [0, 6], sizes = [2, 1], strides = [1, 1]} : vector<2x128xf32> to vector<2x1xf32>
    %88 = arith.mulf %82, %82 : vector<2x1xf32>
    %89 = arith.mulf %83, %83 : vector<2x1xf32>
    %90 = arith.addf %88, %89 : vector<2x1xf32>
    %91 = arith.mulf %84, %84 : vector<2x1xf32>
    %92 = arith.addf %90, %91 : vector<2x1xf32>
    %93 = math.sqrt %92 : vector<2x1xf32>
    %cst_42 = arith.constant 9.99999993E-9 : f32
    %94 = vector.broadcast %cst_42 : f32 to vector<2x1xf32>
    %95 = arith.maximumf %93, %94 : vector<2x1xf32>
    %96 = arith.divf %82, %95 : vector<2x1xf32>
    %97 = arith.divf %83, %95 : vector<2x1xf32>
    %98 = arith.divf %84, %95 : vector<2x1xf32>
    %99 = arith.mulf %97, %87 : vector<2x1xf32>
    %100 = arith.mulf %98, %86 : vector<2x1xf32>
    %101 = arith.subf %99, %100 : vector<2x1xf32>
    %102 = arith.mulf %98, %85 : vector<2x1xf32>
    %103 = arith.mulf %96, %87 : vector<2x1xf32>
    %104 = arith.subf %102, %103 : vector<2x1xf32>
    %105 = arith.mulf %96, %86 : vector<2x1xf32>
    %106 = arith.mulf %97, %85 : vector<2x1xf32>
    %107 = arith.subf %105, %106 : vector<2x1xf32>
    %108 = arith.mulf %101, %101 : vector<2x1xf32>
    %109 = arith.mulf %104, %104 : vector<2x1xf32>
    %110 = arith.addf %108, %109 : vector<2x1xf32>
    %111 = arith.mulf %107, %107 : vector<2x1xf32>
    %112 = arith.addf %110, %111 : vector<2x1xf32>
    %113 = math.sqrt %112 : vector<2x1xf32>
    %cst_43 = arith.constant 9.99999993E-9 : f32
    %114 = vector.broadcast %cst_43 : f32 to vector<2x1xf32>
    %115 = arith.maximumf %113, %114 : vector<2x1xf32>
    %116 = arith.divf %101, %115 : vector<2x1xf32>
    %117 = arith.divf %104, %115 : vector<2x1xf32>
    %118 = arith.divf %107, %115 : vector<2x1xf32>
    %119 = arith.mulf %117, %98 : vector<2x1xf32>
    %120 = arith.mulf %118, %97 : vector<2x1xf32>
    %121 = arith.subf %119, %120 : vector<2x1xf32>
    %122 = arith.mulf %118, %96 : vector<2x1xf32>
    %123 = arith.mulf %116, %98 : vector<2x1xf32>
    %124 = arith.subf %122, %123 : vector<2x1xf32>
    %125 = arith.mulf %116, %97 : vector<2x1xf32>
    %126 = arith.mulf %117, %96 : vector<2x1xf32>
    %127 = arith.subf %125, %126 : vector<2x1xf32>
    %128 = tpu.concatenate %96, %121, %116, %97, %124, %117, %98, %127, %118, %61, %71, %81 in 1 : vector<2x1xf32>, vector<2x1xf32>, vector<2x1xf32>, vector<2x1xf32>, vector<2x1xf32>, vector<2x1xf32>, vector<2x1xf32>, vector<2x1xf32>, vector<2x1xf32>, vector<2x1xf32>, vector<2x1xf32>, vector<2x1xf32> -> vector<2x12xf32>
    %c0_44 = arith.constant 0 : index
    %c0_45 = arith.constant 0 : index
    %129 = vector.load %arg9[%c0_44, %c0_45] : memref<2x12xf32, #tpu.memory_space<vmem>>, vector<2x12xf32>
    tpu.vector_store %arg9[%c0_44, %c0_45], %128 {strides = array<i32>} : memref<2x12xf32, #tpu.memory_space<vmem>>, vector<2x12xf32>,
    %130 = vector.broadcast %96 : vector<2x1xf32> to vector<2x8xf32>
    %131 = arith.mulf %21, %130 : vector<2x8xf32>
    %132 = vector.broadcast %97 : vector<2x1xf32> to vector<2x8xf32>
    %133 = arith.mulf %22, %132 : vector<2x8xf32>
    %134 = arith.addf %131, %133 : vector<2x8xf32>
    %135 = vector.broadcast %98 : vector<2x1xf32> to vector<2x8xf32>
    %136 = arith.mulf %23, %135 : vector<2x8xf32>
    %137 = arith.addf %134, %136 : vector<2x8xf32>
    %138 = vector.broadcast %61 : vector<2x1xf32> to vector<2x8xf32>
    %139 = arith.addf %137, %138 : vector<2x8xf32>
    %140 = vector.extract_strided_slice %19 {offsets = [0, 0], sizes = [2, 1], strides = [1, 1]} : vector<2x12xf32> to vector<2x1xf32>
    %141 = vector.broadcast %140 : vector<2x1xf32> to vector<2x8xf32>
    %142 = arith.mulf %21, %141 : vector<2x8xf32>
    %143 = vector.extract_strided_slice %19 {offsets = [0, 3], sizes = [2, 1], strides = [1, 1]} : vector<2x12xf32> to vector<2x1xf32>
    %144 = vector.broadcast %143 : vector<2x1xf32> to vector<2x8xf32>
    %145 = arith.mulf %22, %144 : vector<2x8xf32>
    %146 = arith.addf %142, %145 : vector<2x8xf32>
    %147 = vector.extract_strided_slice %19 {offsets = [0, 6], sizes = [2, 1], strides = [1, 1]} : vector<2x12xf32> to vector<2x1xf32>
    %148 = vector.broadcast %147 : vector<2x1xf32> to vector<2x8xf32>
    %149 = arith.mulf %23, %148 : vector<2x8xf32>
    %150 = arith.addf %146, %149 : vector<2x8xf32>
    %151 = vector.extract_strided_slice %19 {offsets = [0, 9], sizes = [2, 1], strides = [1, 1]} : vector<2x12xf32> to vector<2x1xf32>
    %152 = vector.broadcast %151 : vector<2x1xf32> to vector<2x8xf32>
    %153 = arith.addf %150, %152 : vector<2x8xf32>
    %154 = arith.subf %139, %153 : vector<2x8xf32>
    %155 = arith.mulf %154, %154 : vector<2x8xf32>
    %156 = vector.shape_cast %155 : vector<2x8xf32> to vector<1x2x8xf32>
    %cst_46 = arith.constant dense<0.000000e+00> : vector<1xf32>
    %157 = vector.multi_reduction <add>, %156, %cst_46 [1, 2] : vector<1x2x8xf32> to vector<1xf32>
    %158 = vector.shape_cast %157 : vector<1xf32> to vector<1x1x1xf32>
    %159 = vector.extract %158[0, 0, 0] : f32 from vector<1x1x1xf32>
    %cst_47 = arith.constant 0.000000e+00 : f32
    %160 = arith.addf %cst_47, %159 : f32
    %161 = vector.broadcast %121 : vector<2x1xf32> to vector<2x8xf32>
    %162 = arith.mulf %21, %161 : vector<2x8xf32>
    %163 = vector.broadcast %124 : vector<2x1xf32> to vector<2x8xf32>
    %164 = arith.mulf %22, %163 : vector<2x8xf32>
    %165 = arith.addf %162, %164 : vector<2x8xf32>
    %166 = vector.broadcast %127 : vector<2x1xf32> to vector<2x8xf32>
    %167 = arith.mulf %23, %166 : vector<2x8xf32>
    %168 = arith.addf %165, %167 : vector<2x8xf32>
    %169 = vector.broadcast %71 : vector<2x1xf32> to vector<2x8xf32>
    %170 = arith.addf %168, %169 : vector<2x8xf32>
    %171 = vector.extract_strided_slice %19 {offsets = [0, 1], sizes = [2, 1], strides = [1, 1]} : vector<2x12xf32> to vector<2x1xf32>
    %172 = vector.broadcast %171 : vector<2x1xf32> to vector<2x8xf32>
    %173 = arith.mulf %21, %172 : vector<2x8xf32>
    %174 = vector.extract_strided_slice %19 {offsets = [0, 4], sizes = [2, 1], strides = [1, 1]} : vector<2x12xf32> to vector<2x1xf32>
    %175 = vector.broadcast %174 : vector<2x1xf32> to vector<2x8xf32>
    %176 = arith.mulf %22, %175 : vector<2x8xf32>
    %177 = arith.addf %173, %176 : vector<2x8xf32>
    %178 = vector.extract_strided_slice %19 {offsets = [0, 7], sizes = [2, 1], strides = [1, 1]} : vector<2x12xf32> to vector<2x1xf32>
    %179 = vector.broadcast %178 : vector<2x1xf32> to vector<2x8xf32>
    %180 = arith.mulf %23, %179 : vector<2x8xf32>
    %181 = arith.addf %177, %180 : vector<2x8xf32>
    %182 = vector.extract_strided_slice %19 {offsets = [0, 10], sizes = [2, 1], strides = [1, 1]} : vector<2x12xf32> to vector<2x1xf32>
    %183 = vector.broadcast %182 : vector<2x1xf32> to vector<2x8xf32>
    %184 = arith.addf %181, %183 : vector<2x8xf32>
    %185 = arith.subf %170, %184 : vector<2x8xf32>
    %186 = arith.mulf %185, %185 : vector<2x8xf32>
    %187 = vector.shape_cast %186 : vector<2x8xf32> to vector<1x2x8xf32>
    %cst_48 = arith.constant dense<0.000000e+00> : vector<1xf32>
    %188 = vector.multi_reduction <add>, %187, %cst_48 [1, 2] : vector<1x2x8xf32> to vector<1xf32>
    %189 = vector.shape_cast %188 : vector<1xf32> to vector<1x1x1xf32>
    %190 = vector.extract %189[0, 0, 0] : f32 from vector<1x1x1xf32>
    %191 = arith.addf %160, %190 : f32
    %192 = vector.broadcast %116 : vector<2x1xf32> to vector<2x8xf32>
    %193 = arith.mulf %21, %192 : vector<2x8xf32>
    %194 = vector.broadcast %117 : vector<2x1xf32> to vector<2x8xf32>
    %195 = arith.mulf %22, %194 : vector<2x8xf32>
    %196 = arith.addf %193, %195 : vector<2x8xf32>
    %197 = vector.broadcast %118 : vector<2x1xf32> to vector<2x8xf32>
    %198 = arith.mulf %23, %197 : vector<2x8xf32>
    %199 = arith.addf %196, %198 : vector<2x8xf32>
    %200 = vector.broadcast %81 : vector<2x1xf32> to vector<2x8xf32>
    %201 = arith.addf %199, %200 : vector<2x8xf32>
    %202 = vector.extract_strided_slice %19 {offsets = [0, 2], sizes = [2, 1], strides = [1, 1]} : vector<2x12xf32> to vector<2x1xf32>
    %203 = vector.broadcast %202 : vector<2x1xf32> to vector<2x8xf32>
    %204 = arith.mulf %21, %203 : vector<2x8xf32>
    %205 = vector.extract_strided_slice %19 {offsets = [0, 5], sizes = [2, 1], strides = [1, 1]} : vector<2x12xf32> to vector<2x1xf32>
    %206 = vector.broadcast %205 : vector<2x1xf32> to vector<2x8xf32>
    %207 = arith.mulf %22, %206 : vector<2x8xf32>
    %208 = arith.addf %204, %207 : vector<2x8xf32>
    %209 = vector.extract_strided_slice %19 {offsets = [0, 8], sizes = [2, 1], strides = [1, 1]} : vector<2x12xf32> to vector<2x1xf32>
    %210 = vector.broadcast %209 : vector<2x1xf32> to vector<2x8xf32>
    %211 = arith.mulf %23, %210 : vector<2x8xf32>
    %212 = arith.addf %208, %211 : vector<2x8xf32>
    %213 = vector.extract_strided_slice %19 {offsets = [0, 11], sizes = [2, 1], strides = [1, 1]} : vector<2x12xf32> to vector<2x1xf32>
    %214 = vector.broadcast %213 : vector<2x1xf32> to vector<2x8xf32>
    %215 = arith.addf %212, %214 : vector<2x8xf32>
    %216 = arith.subf %201, %215 : vector<2x8xf32>
    %217 = arith.mulf %216, %216 : vector<2x8xf32>
    %218 = vector.shape_cast %217 : vector<2x8xf32> to vector<1x2x8xf32>
    %cst_49 = arith.constant dense<0.000000e+00> : vector<1xf32>
    %219 = vector.multi_reduction <add>, %218, %cst_49 [1, 2] : vector<1x2x8xf32> to vector<1xf32>
    %220 = vector.shape_cast %219 : vector<1xf32> to vector<1x1x1xf32>
    %221 = vector.extract %220[0, 0, 0] : f32 from vector<1x1x1xf32>
    %222 = arith.addf %191, %221 : f32
    %cst_50 = arith.constant 4.800000e+01 : f32
    %223 = arith.divf %222, %cst_50 : f32
    %c0_51 = arith.constant 0 : index
    %c0_52 = arith.constant 0 : index
    %224 = memref.load %arg10[%c0_51, %c0_52] : memref<1x1xf32, #tpu.memory_space<smem>>
    memref.store %223, %arg10[%c0_51, %c0_52] : memref<1x1xf32, #tpu.memory_space<smem>>
    return
  }
}

</mosaic_0001>

<bundles_post_ra>
// kernel: camnet_forward.4
= control target key start
LH: loop header
LB: loop body
LE: loop exit
PB: predicated region body
PF: predicated region fallthrough
CT: control target
= control target key end

     0   :  { %s974_s12 = smov 0   ;;  %s976_s13 = smov 0   ;;  %s1163_s0 = inlined_call_operand.vmem [shape: f32[512,32], index: 0, kind: input, shape index: {}]   ;;  %s1164_s1 = inlined_call_operand.vmem [shape: f32[32,128], index: 1, kind: input, shape index: {}]   ;;  %s1165_s2 = inlined_call_operand.vmem [shape: f32[1,128], index: 2, kind: input, shape index: {}]   ;;  %s1166_s3 = inlined_call_operand.vmem [shape: f32[512,128], index: 3, kind: output, shape index: {}]  }
   0x1   :  { %s978_s14 = smov 0  }
   0x2 LB: > { %s25_s15 = sadd.s32 1, %s948_s13  ;;  %p762_p0 = scmp.ge.s32.totalorder %s952_s14, 1  ;;  %s952_s14 = sphi %s978_s14, %s13_s14   ;;  %s948_s13 = sphi %s976_s13, %s1168_s13   ;;  %s944_s12 = sphi %s974_s12, %s1167_s12  }
   0x3   : > { %p27_p1 = scmp.ge.s32.totalorder %s25_s15, 2  ;;  %p169_p2 = scmp.lt.s32.totalorder %s952_s14, 3 }
   0x5   : > { %s1170_s15 = smov (%p27_p1, %s25_s15), 0  ;;  %p170_p3 = pnand %p762_p0, %p169_p2 }
   0x6   : > { %v257_v0 = vld [vmem:[%s1164_s1] sm:$0xff] (!%p170_p3)  ;;  %v258_v1 = vld [vmem:[%s1164_s1 + $0x8] sm:$0xff] (!%p170_p3)  ;;  %v259_v2 = vld [vmem:[%s1164_s1 + $0x10] sm:$0xff] (!%p170_p3)  ;;  %s763_s22 = sshll.u32 (!%p170_p3), %s944_s12, 5  ;;  %vm268_vm0 = vcmask (!%p170_p3), 261120  }
   0x7   : > { %173 = sbr.rel (%p170_p3) target bundleno = 266 (0x10a), region = 32  ;;  %v894_v3 = vpack.c.bf16 (!%p170_p3), %v258_v1, %v257_v0  ;;  %v260_v4 = vld [vmem:[%s1164_s1 + $0x18] sm:$0xff] (!%p170_p3)  ;;  %p204_p4 = scmp.lt.s32.totalorder (!%p170_p3), %s763_s22, 63  ;;  %v1081_v38 = vld [vmem:[%s1165_s2] ss:$0 sm:$0xff] (!%p170_p3) }
   0x8   : > { %v898_v5 = vpack.c.bf16 (!%p170_p3), %v260_v4, %v259_v2 }
   0x9   : > { %895 = vmatprep.subr.bf16.mxu0 (!%p170_p3), %v894_v3  ;;  %902 = vmatprep.subr.bf16.mxu1 (!%p170_p3), %v894_v3 }
   0xa   : > { %897 = vmatpush3.bf16.msra.mxu0 (!%p170_p3), %v894_v3  ;;  %904 = vmatpush3.bf16.msra.mxu1 (!%p170_p3), %v894_v3 }
   0xb   : > { %899 = vmatprep.subr.bf16.mxu0 (!%p170_p3), %v898_v5  ;;  %903 = vmatprep.subr.bf16.mxu1 (!%p170_p3), %v898_v5 }
   0xe   : > { %s1172_s22 = smov (!%p204_p4, %s763_s22), 63  ;;  %901 = vmatpush3.bf16.msra.mxu0 %v898_v5  ;;  %905 = vmatpush3.bf16.msra.mxu1 %v898_v5 }
   0xf   : > { %s764_s25 = sshll.u32 %s1172_s22, 3 }
  0x10   : > { %s1012_s28 = scalar_lea.vmem %s1163_s0, %s764_s25  ;;  %s1090_s6 = scalar_lea.vmem %s1166_s3, %s764_s25 }
  0x11   : > { %v225_v6 = vld [vmem:[%s1012_s28] sm:$0xff]  ;;  %v226_v8 = vld [vmem:[%s1012_s28 + $0x8] sm:$0xff]  ;;  %v227_v10 = vld [vmem:[%s1012_s28 + $0x10] sm:$0xff] }
  0x12   : > { %v241_v7 = vld [vmem:[%s1012_s28 + $0x80] sm:$0xff]  ;;  %v242_v9 = vld [vmem:[%s1012_s28 + $0x88] sm:$0xff]  ;;  %846 = vmatprep.mubr.msk.f32.mxu0 %vm268_vm0, %v225_v6  ;;  %v243_v11 = vld [vmem:[%s1012_s28 + $0x90] sm:$0xff] }
  0x13   : > { %870 = vmatprep.mubr.msk.f32.mxu1 %vm268_vm0, %v241_v7  ;;  %847 = vmatmul.mubr.msk.f32.vlgmr.msra.gmra.mrb[0].mxu0 %vm268_vm0, %v226_v8  ;;  %v228_v12 = vld [vmem:[%s1012_s28 + $0x18] sm:$0xff]  ;;  %v229_v14 = vld [vmem:[%s1012_s28 + $0x20] sm:$0xff]  ;;  %v230_v16 = vld [vmem:[%s1012_s28 + $0x28] sm:$0xff] }
  0x14   : > { %871 = vmatmul.mubr.msk.f32.vlgmr.msra.gmra.mrb[0].mxu1 %vm268_vm0, %v242_v9  ;;  %849 = vmatprep.mubr.msk.f32.mxu0 %vm268_vm0, %v227_v10  ;;  %v244_v13 = vld [vmem:[%s1012_s28 + $0x98] sm:$0xff]  ;;  %v245_v15 = vld [vmem:[%s1012_s28 + $0xa0] sm:$0xff]  ;;  %v246_v17 = vld [vmem:[%s1012_s28 + $0xa8] sm:$0xff] }
  0x15   : > { %873 = vmatprep.mubr.msk.f32.mxu1 %vm268_vm0, %v243_v11  ;;  %v231_v18 = vld [vmem:[%s1012_s28 + $0x30] sm:$0xff]  ;;  %v232_v20 = vld [vmem:[%s1012_s28 + $0x38] sm:$0xff]  ;;  %v233_v22 = vld [vmem:[%s1012_s28 + $0x40] sm:$0xff] }
  0x16   : > { %v247_v19 = vld [vmem:[%s1012_s28 + $0xb0] sm:$0xff]  ;;  %v248_v21 = vld [vmem:[%s1012_s28 + $0xb8] sm:$0xff]  ;;  %v249_v23 = vld [vmem:[%s1012_s28 + $0xc0] sm:$0xff] }
  0x17   : > { %850 = vmatmul.mubr.msk.f32.gmra.mrb[2].mxu0 %vm268_vm0, %v228_v12  ;;  %v234_v24 = vld [vmem:[%s1012_s28 + $0x48] sm:$0xff]  ;;  %v235_v26 = vld [vmem:[%s1012_s28 + $0x50] sm:$0xff]  ;;  %v236_v28 = vld [vmem:[%s1012_s28 + $0x58] sm:$0xff] }
  0x18   : > { %874 = vmatmul.mubr.msk.f32.gmra.mrb[2].mxu1 %vm268_vm0, %v244_v13  ;;  %852 = vmatprep.mubr.msk.f32.mxu0 %vm268_vm0, %v229_v14  ;;  %v250_v25 = vld [vmem:[%s1012_s28 + $0xc8] sm:$0xff]  ;;  %v251_v27 = vld [vmem:[%s1012_s28 + $0xd0] sm:$0xff]  ;;  %v252_v29 = vld [vmem:[%s1012_s28 + $0xd8] sm:$0xff] }
  0x19   : > { %876 = vmatprep.mubr.msk.f32.mxu1 %vm268_vm0, %v245_v15  ;;  %v237_v30 = vld [vmem:[%s1012_s28 + $0x60] sm:$0xff]  ;;  %v238_v32 = vld [vmem:[%s1012_s28 + $0x68] sm:$0xff]  ;;  %v239_v34 = vld [vmem:[%s1012_s28 + $0x70] sm:$0xff] }
  0x1a   : > { %v253_v31 = vld [vmem:[%s1012_s28 + $0xe0] sm:$0xff]  ;;  %v254_v33 = vld [vmem:[%s1012_s28 + $0xe8] sm:$0xff]  ;;  %v255_v35 = vld [vmem:[%s1012_s28 + $0xf0] sm:$0xff] }
  0x1b   : > { %853 = vmatmul.mubr.msk.f32.gmra.mrb[4].mxu0 %vm268_vm0, %v230_v16  ;;  %v240_v36 = vld [vmem:[%s1012_s28 + $0x78] sm:$0xff] }
  0x1c   : > { %877 = vmatmul.mubr.msk.f32.gmra.mrb[4].mxu1 %vm268_vm0, %v246_v17  ;;  %855 = vmatprep.mubr.msk.f32.mxu0 %vm268_vm0, %v231_v18  ;;  %v256_v37 = vld [vmem:[%s1012_s28 + $0xf8] sm:$0xff] }
  0x1d   : > { %879 = vmatprep.mubr.msk.f32.mxu1 %vm268_vm0, %v247_v19 }
  0x1f   : > { %856 = vmatmul.mubr.msk.f32.gmra.mrb[6].mxu0 %vm268_vm0, %v232_v20 }
  0x20   : > { %880 = vmatmul.mubr.msk.f32.gmra.mrb[6].mxu1 %vm268_vm0, %v248_v21  ;;  %858 = vmatprep.mubr.msk.f32.mxu0 %vm268_vm0, %v233_v22 }
  0x21   : > { %882 = vmatprep.mubr.msk.f32.mxu1 %vm268_vm0, %v249_v23 }
  0x23   : > { %859 = vmatmul.mubr.msk.f32.gmra.mrb[8].mxu0 %vm268_vm0, %v234_v24 }
  0x24   : > { %883 = vmatmul.mubr.msk.f32.gmra.mrb[8].mxu1 %vm268_vm0, %v250_v25  ;;  %861 = vmatprep.mubr.msk.f32.mxu0 %vm268_vm0, %v235_v26 }
  0x25   : > { %885 = vmatprep.mubr.msk.f32.mxu1 %vm268_vm0, %v251_v27 }
  0x27   : > { %862 = vmatmul.mubr.msk.f32.gmra.mrb[10].mxu0 %vm268_vm0, %v236_v28 }
  0x28   : > { %886 = vmatmul.mubr.msk.f32.gmra.mrb[10].mxu1 %vm268_vm0, %v252_v29  ;;  %864 = vmatprep.mubr.msk.f32.mxu0 %vm268_vm0, %v237_v30 }
  0x29   : > { %888 = vmatprep.mubr.msk.f32.mxu1 %vm268_vm0, %v253_v31 }
  0x2b   : > { %865 = vmatmul.mubr.msk.f32.gmra.mrb[12].mxu0 %vm268_vm0, %v238_v32 }
  0x2c   : > { %889 = vmatmul.mubr.msk.f32.gmra.mrb[12].mxu1 %vm268_vm0, %v254_v33  ;;  %867 = vmatprep.mubr.msk.f32.mxu0 %vm268_vm0, %v239_v34 }
  0x2d   : > { %891 = vmatprep.mubr.msk.f32.mxu1 %vm268_vm0, %v255_v35 }
  0x2f   : > { %868 = vmatmul.mubr.msk.f32.gmra.mrb[14].mxu0 %vm268_vm0, %v240_v36 }
  0x30   : > { %892 = vmatmul.mubr.msk.f32.gmra.mrb[14].mxu1 %vm268_vm0, %v256_v37 }
  0xe6   : > { %v848_v39 = vpop.f32.mrb[0].mxu0 }
  0xe7   : > { %v872_v40 = vpop.f32.mrb[0].mxu1  ;;  %v437_v41 = vadd.f32 %v848_v39, %v1081_v38  ;;  %v431_v43 = vpop.f32.mrb[1].mxu0 }
  0xe8   : > { %v517_v42 = vadd.f32 %v872_v40, %v1081_v38  ;;  %v511_v44 = vpop.f32.mrb[1].mxu1  ;;  %v432_v45 = vadd.f32 %v1081_v38, %v431_v43 }
  0xe9   : > { %v512_v46 = vadd.f32 %v1081_v38, %v511_v44  ;;  %v591_v47 = vmax.f32 %v437_v41, 0.0 }
  0xea   : > { %v607_v48 = vmax.f32 %v517_v42, 0.0  ;;  %v590_v49 = vmax.f32 %v432_v45, 0.0  ;;  %v851_v51 = vpop.f32.mrb[2].mxu0 }
  0xeb   : > { %v606_v50 = vmax.f32 %v512_v46, 0.0  ;;  %v875_v52 = vpop.f32.mrb[2].mxu1  ;;  %623 = vst [vmem:[%s1090_s6 + $0x8] sm:$0xff] %v591_v47  ;;  %v447_v53 = vadd.f32 %v851_v51, %v1081_v38  ;;  %v441_v55 = vpop.f32.mrb[3].mxu0 }
  0xec   : > { %639 = vst [vmem:[%s1090_s6 + $0x88] sm:$0xff] %v607_v48  ;;  %v527_v54 = vadd.f32 %v875_v52, %v1081_v38  ;;  %v521_v56 = vpop.f32.mrb[3].mxu1  ;;  %622 = vst [vmem:[%s1090_s6] sm:$0xff] %v590_v49  ;;  %v442_v57 = vadd.f32 %v1081_v38, %v441_v55 }
  0xed   : > { %638 = vst [vmem:[%s1090_s6 + $0x80] sm:$0xff] %v606_v50  ;;  %v522_v58 = vadd.f32 %v1081_v38, %v521_v56  ;;  %v593_v59 = vmax.f32 %v447_v53, 0.0 }
  0xee   : > { %v609_v60 = vmax.f32 %v527_v54, 0.0  ;;  %v592_v61 = vmax.f32 %v442_v57, 0.0  ;;  %v854_v63 = vpop.f32.mrb[4].mxu0 }
  0xef   : > { %v608_v62 = vmax.f32 %v522_v58, 0.0  ;;  %v878_v0 = vpop.f32.mrb[4].mxu1  ;;  %625 = vst [vmem:[%s1090_s6 + $0x18] sm:$0xff] %v593_v59  ;;  %v457_v1 = vadd.f32 %v854_v63, %v1081_v38  ;;  %v451_v3 = vpop.f32.mrb[5].mxu0 }
  0xf0   : > { %641 = vst [vmem:[%s1090_s6 + $0x98] sm:$0xff] %v609_v60  ;;  %v537_v2 = vadd.f32 %v878_v0, %v1081_v38  ;;  %v531_v4 = vpop.f32.mrb[5].mxu1  ;;  %624 = vst [vmem:[%s1090_s6 + $0x10] sm:$0xff] %v592_v61  ;;  %v452_v5 = vadd.f32 %v1081_v38, %v451_v3 }
  0xf1   : > { %640 = vst [vmem:[%s1090_s6 + $0x90] sm:$0xff] %v608_v62  ;;  %v532_v6 = vadd.f32 %v1081_v38, %v531_v4  ;;  %v595_v7 = vmax.f32 %v457_v1, 0.0 }
  0xf2   : > { %v611_v8 = vmax.f32 %v537_v2, 0.0  ;;  %v594_v9 = vmax.f32 %v452_v5, 0.0  ;;  %v857_v11 = vpop.f32.mrb[6].mxu0 }
  0xf3   : > { %v610_v10 = vmax.f32 %v532_v6, 0.0  ;;  %v881_v12 = vpop.f32.mrb[6].mxu1  ;;  %627 = vst [vmem:[%s1090_s6 + $0x28] sm:$0xff] %v595_v7  ;;  %v467_v13 = vadd.f32 %v857_v11, %v1081_v38  ;;  %v461_v15 = vpop.f32.mrb[7].mxu0 }
  0xf4   : > { %643 = vst [vmem:[%s1090_s6 + $0xa8] sm:$0xff] %v611_v8  ;;  %v547_v14 = vadd.f32 %v881_v12, %v1081_v38  ;;  %v541_v16 = vpop.f32.mrb[7].mxu1  ;;  %626 = vst [vmem:[%s1090_s6 + $0x20] sm:$0xff] %v594_v9  ;;  %v462_v17 = vadd.f32 %v1081_v38, %v461_v15 }
  0xf5   : > { %642 = vst [vmem:[%s1090_s6 + $0xa0] sm:$0xff] %v610_v10  ;;  %v542_v18 = vadd.f32 %v1081_v38, %v541_v16  ;;  %v597_v19 = vmax.f32 %v467_v13, 0.0 }
  0xf6   : > { %v613_v20 = vmax.f32 %v547_v14, 0.0  ;;  %v596_v21 = vmax.f32 %v462_v17, 0.0  ;;  %v860_v23 = vpop.f32.mrb[8].mxu0 }
  0xf7   : > { %v612_v22 = vmax.f32 %v542_v18, 0.0  ;;  %v884_v24 = vpop.f32.mrb[8].mxu1  ;;  %629 = vst [vmem:[%s1090_s6 + $0x38] sm:$0xff] %v597_v19  ;;  %v477_v25 = vadd.f32 %v860_v23, %v1081_v38  ;;  %v471_v27 = vpop.f32.mrb[9].mxu0 }
  0xf8   : > { %645 = vst [vmem:[%s1090_s6 + $0xb8] sm:$0xff] %v613_v20  ;;  %v557_v26 = vadd.f32 %v884_v24, %v1081_v38  ;;  %v551_v28 = vpop.f32.mrb[9].mxu1  ;;  %628 = vst [vmem:[%s1090_s6 + $0x30] sm:$0xff] %v596_v21  ;;  %v472_v29 = vadd.f32 %v1081_v38, %v471_v27 }
  0xf9   : > { %644 = vst [vmem:[%s1090_s6 + $0xb0] sm:$0xff] %v612_v22  ;;  %v552_v30 = vadd.f32 %v1081_v38, %v551_v28  ;;  %v599_v31 = vmax.f32 %v477_v25, 0.0 }
  0xfa   : > { %v615_v32 = vmax.f32 %v557_v26, 0.0  ;;  %v598_v33 = vmax.f32 %v472_v29, 0.0  ;;  %v863_v35 = vpop.f32.mrb[10].mxu0 }
  0xfb   : > { %v614_v34 = vmax.f32 %v552_v30, 0.0  ;;  %v887_v36 = vpop.f32.mrb[10].mxu1  ;;  %631 = vst [vmem:[%s1090_s6 + $0x48] sm:$0xff] %v599_v31  ;;  %v487_v37 = vadd.f32 %v863_v35, %v1081_v38  ;;  %v481_v40 = vpop.f32.mrb[11].mxu0 }
  0xfc   : > { %647 = vst [vmem:[%s1090_s6 + $0xc8] sm:$0xff] %v615_v32  ;;  %v567_v39 = vadd.f32 %v887_v36, %v1081_v38  ;;  %v561_v41 = vpop.f32.mrb[11].mxu1  ;;  %630 = vst [vmem:[%s1090_s6 + $0x40] sm:$0xff] %v598_v33  ;;  %v482_v42 = vadd.f32 %v1081_v38, %v481_v40 }
  0xfd   : > { %646 = vst [vmem:[%s1090_s6 + $0xc0] sm:$0xff] %v614_v34  ;;  %v562_v43 = vadd.f32 %v1081_v38, %v561_v41  ;;  %v601_v44 = vmax.f32 %v487_v37, 0.0 }
  0xfe   : > { %v617_v45 = vmax.f32 %v567_v39, 0.0  ;;  %v600_v46 = vmax.f32 %v482_v42, 0.0  ;;  %v866_v48 = vpop.f32.mrb[12].mxu0 }
  0xff   : > { %v616_v47 = vmax.f32 %v562_v43, 0.0  ;;  %v890_v49 = vpop.f32.mrb[12].mxu1  ;;  %633 = vst [vmem:[%s1090_s6 + $0x58] sm:$0xff] %v601_v44  ;;  %v497_v50 = vadd.f32 %v866_v48, %v1081_v38  ;;  %v491_v52 = vpop.f32.mrb[13].mxu0 }
 0x100   : > { %649 = vst [vmem:[%s1090_s6 + $0xd8] sm:$0xff] %v617_v45  ;;  %v577_v51 = vadd.f32 %v890_v49, %v1081_v38  ;;  %v571_v53 = vpop.f32.mrb[13].mxu1  ;;  %632 = vst [vmem:[%s1090_s6 + $0x50] sm:$0xff] %v600_v46  ;;  %v492_v54 = vadd.f32 %v1081_v38, %v491_v52 }
 0x101   : > { %648 = vst [vmem:[%s1090_s6 + $0xd0] sm:$0xff] %v616_v47  ;;  %v572_v55 = vadd.f32 %v1081_v38, %v571_v53  ;;  %v603_v56 = vmax.f32 %v497_v50, 0.0 }
 0x102   : > { %v619_v57 = vmax.f32 %v577_v51, 0.0  ;;  %v602_v58 = vmax.f32 %v492_v54, 0.0  ;;  %v869_v60 = vpop.f32.mrb[14].mxu0 }
 0x103   : > { %v618_v59 = vmax.f32 %v572_v55, 0.0  ;;  %v893_v61 = vpop.f32.mrb[14].mxu1  ;;  %635 = vst [vmem:[%s1090_s6 + $0x68] sm:$0xff] %v603_v56  ;;  %v507_v62 = vadd.f32 %v869_v60, %v1081_v38  ;;  %v501_v0 = vpop.f32.mrb[15].mxu0 }
 0x104   : > { %651 = vst [vmem:[%s1090_s6 + $0xe8] sm:$0xff] %v619_v57  ;;  %v587_v63 = vadd.f32 %v893_v61, %v1081_v38  ;;  %v581_v1 = vpop.f32.mrb[15].mxu1  ;;  %634 = vst [vmem:[%s1090_s6 + $0x60] sm:$0xff] %v602_v58  ;;  %v502_v2 = vadd.f32 %v1081_v38, %v501_v0 }
 0x105   : > { %650 = vst [vmem:[%s1090_s6 + $0xe0] sm:$0xff] %v618_v59  ;;  %v582_v3 = vadd.f32 %v1081_v38, %v581_v1  ;;  %v605_v4 = vmax.f32 %v507_v62, 0.0 }
 0x106   : > { %v621_v5 = vmax.f32 %v587_v63, 0.0  ;;  %v604_v6 = vmax.f32 %v502_v2, 0.0 }
 0x107   : > { %v620_v7 = vmax.f32 %v582_v3, 0.0  ;;  %637 = vst [vmem:[%s1090_s6 + $0x78] sm:$0xff] %v605_v4 }
 0x108   : > { %653 = vst [vmem:[%s1090_s6 + $0xf8] sm:$0xff] %v621_v5  ;;  %636 = vst [vmem:[%s1090_s6 + $0x70] sm:$0xff] %v604_v6 }
 0x109   : > { %652 = vst [vmem:[%s1090_s6 + $0xf0] sm:$0xff] %v620_v7 }
 0x10a PF: > { %s13_s14 = sadd.s32 1, %s952_s14   ;;  %s1167_s12 = smov %s948_s13 }
 0x10b   : > { %p10_p5 = scmp.ge.s32.totalorder %s13_s14, 4   ;;  %s1168_s13 = smov %s1170_s15 }
 0x10d   :  { %12 = sbr.rel (!%p10_p5) target bundleno = 2 (0x2), region = 68 }

// kernel: camnet_forward.5
= control target key start
LH: loop header
LB: loop body
LE: loop exit
PB: predicated region body
PF: predicated region fallthrough
CT: control target
= control target key end

     0   :  { %v364_v0 = vmov 0.0|0.0   ;;  %vm71_vm0 = vcmask 130048   ;;  %s638_s1 = inlined_call_operand.vmem [shape: f32[144,128], index: 1, kind: input, shape index: {}]   ;;  %s639_s0 = inlined_call_operand.vmem [shape: f32[128,144], index: 0, kind: input, shape index: {}]   ;;  %s640_s2 = inlined_call_operand.vmem [shape: f32[1,128], index: 2, kind: input, shape index: {}]   ;;  %s641_s3 = inlined_call_operand.vmem [shape: f32[128,128], index: 3, kind: output, shape index: {}]  }
   0x1   :  { %318 = vmatprep.subr.bf16.mxu0 %v364_v0  ;;  %345 = vmatprep.subr.bf16.mxu1 %v364_v0  ;;  %v46_v1 = vld [vmem:[%s638_s1] sm:$0xff]  ;;  %v47_v2 = vld [vmem:[%s638_s1 + $0x8] sm:$0xff]  ;;  %v48_v3 = vld [vmem:[%s638_s1 + $0x10] sm:$0xff] }
   0x2   :  { %v319_v4 = vpack.c.bf16 %v47_v2, %v46_v1  ;;  %v49_v5 = vld [vmem:[%s638_s1 + $0x18] sm:$0xff]  ;;  %v50_v7 = vld [vmem:[%s638_s1 + $0x20] sm:$0xff]  ;;  %v51_v8 = vld [vmem:[%s638_s1 + $0x28] sm:$0xff] }
   0x3   :  { %v322_v6 = vpack.c.bf16 %v49_v5, %v48_v3  ;;  %v15_v9 = vld [vmem:[%s639_s0 + $0x8] sm:$0xff]  ;;  %v325_v11 = vpack.c.bf16 %v51_v8, %v50_v7  ;;  %v52_v12 = vld [vmem:[%s638_s1 + $0x30] sm:$0xff]  ;;  %v53_v13 = vld [vmem:[%s638_s1 + $0x38] sm:$0xff] }
   0x4   :  { %320 = vmatpush1.bf16.msra.mxu0 %v319_v4  ;;  %354 = vmatpush1.bf16.msra.mxu1 %v319_v4  ;;  %v31_v10 = vld [vmem:[%s639_s0 + $0x88] sm:$0xff]  ;;  %v328_v14 = vpack.c.bf16 %v53_v13, %v52_v12  ;;  %v54_v15 = vld [vmem:[%s638_s1 + $0x40] sm:$0xff]  ;;  %v56_v18 = vld [vmem:[%s638_s1 + $0x50] sm:$0xff] }
   0x5   :  { %321 = vmatprep.subr.bf16.mxu0 %v364_v0  ;;  %346 = vmatprep.subr.bf16.mxu1 %v364_v0  ;;  %v55_v16 = vld [vmem:[%s638_s1 + $0x48] sm:$0xff]  ;;  %v57_v19 = vld [vmem:[%s638_s1 + $0x58] sm:$0xff]  ;;  %v58_v21 = vld [vmem:[%s638_s1 + $0x60] sm:$0xff] }
   0x6   :  { %302 = vmatprep.mubr.msk.f32.mxu0 %vm71_vm0, %v15_v9  ;;  %310 = vmatprep.mubr.msk.f32.mxu1 %vm71_vm0, %v31_v10  ;;  %v331_v17 = vpack.c.bf16 %v55_v16, %v54_v15  ;;  %v334_v20 = vpack.c.bf16 %v57_v19, %v56_v18  ;;  %v59_v22 = vld [vmem:[%s638_s1 + $0x68] sm:$0xff]  ;;  %v60_v24 = vld [vmem:[%s638_s1 + $0x70] sm:$0xff]  ;;  %v61_v25 = vld [vmem:[%s638_s1 + $0x78] sm:$0xff] }
   0x7   :  { %v337_v23 = vpack.c.bf16 %v59_v22, %v58_v21  ;;  %v340_v26 = vpack.c.bf16 %v61_v25, %v60_v24  ;;  %v62_v27 = vld [vmem:[%s638_s1 + $0x80] sm:$0xff]  ;;  %v63_v28 = vld [vmem:[%s638_s1 + $0x88] sm:$0xff]  ;;  %v17_v32 = vld [vmem:[%s639_s0 + $0x18] sm:$0xff] }
   0x8   :  { %323 = vmatpush1.bf16.msra.mxu0 %v322_v6  ;;  %355 = vmatpush1.bf16.msra.mxu1 %v322_v6  ;;  %v343_v29 = vpack.c.bf16 %v63_v28, %v62_v27  ;;  %v14_v30 = vld [vmem:[%s639_s0] sm:$0xff]  ;;  %v33_v33 = vld [vmem:[%s639_s0 + $0x98] sm:$0xff]  ;;  %v16_v34 = vld [vmem:[%s639_s0 + $0x10] sm:$0xff] }
   0x9   :  { %324 = vmatprep.subr.bf16.mxu0 %v364_v0  ;;  %347 = vmatprep.subr.bf16.mxu1 %v364_v0  ;;  %v30_v31 = vld [vmem:[%s639_s0 + $0x80] sm:$0xff]  ;;  %v32_v35 = vld [vmem:[%s639_s0 + $0x90] sm:$0xff]  ;;  %v19_v36 = vld [vmem:[%s639_s0 + $0x28] sm:$0xff] }
   0xa   :  { %v35_v37 = vld [vmem:[%s639_s0 + $0xa8] sm:$0xff]  ;;  %v18_v38 = vld [vmem:[%s639_s0 + $0x20] sm:$0xff]  ;;  %v21_v40 = vld [vmem:[%s639_s0 + $0x38] sm:$0xff] }
   0xb   :  { %v34_v39 = vld [vmem:[%s639_s0 + $0xa0] sm:$0xff]  ;;  %v37_v41 = vld [vmem:[%s639_s0 + $0xb8] sm:$0xff]  ;;  %v20_v42 = vld [vmem:[%s639_s0 + $0x30] sm:$0xff] }
   0xc   :  { %326 = vmatpush1.bf16.msra.mxu0 %v325_v11  ;;  %356 = vmatpush1.bf16.msra.mxu1 %v325_v11  ;;  %v36_v43 = vld [vmem:[%s639_s0 + $0xb0] sm:$0xff]  ;;  %v23_v44 = vld [vmem:[%s639_s0 + $0x48] sm:$0xff]  ;;  %v22_v46 = vld [vmem:[%s639_s0 + $0x40] sm:$0xff] }
   0xd   :  { %327 = vmatprep.subr.bf16.mxu0 %v364_v0  ;;  %348 = vmatprep.subr.bf16.mxu1 %v364_v0  ;;  %v39_v45 = vld [vmem:[%s639_s0 + $0xc8] sm:$0xff]  ;;  %v38_v47 = vld [vmem:[%s639_s0 + $0xc0] sm:$0xff]  ;;  %v25_v48 = vld [vmem:[%s639_s0 + $0x58] sm:$0xff] }
   0xe   :  { %v41_v49 = vld [vmem:[%s639_s0 + $0xd8] sm:$0xff]  ;;  %v24_v50 = vld [vmem:[%s639_s0 + $0x50] sm:$0xff]  ;;  %v27_v52 = vld [vmem:[%s639_s0 + $0x68] sm:$0xff] }
   0xf   :  { %v40_v51 = vld [vmem:[%s639_s0 + $0xd0] sm:$0xff]  ;;  %v43_v53 = vld [vmem:[%s639_s0 + $0xe8] sm:$0xff]  ;;  %v26_v54 = vld [vmem:[%s639_s0 + $0x60] sm:$0xff] }
  0x10   :  { %329 = vmatpush1.bf16.msra.mxu0 %v328_v14  ;;  %357 = vmatpush1.bf16.msra.mxu1 %v328_v14  ;;  %v42_v55 = vld [vmem:[%s639_s0 + $0xe0] sm:$0xff]  ;;  %v29_v56 = vld [vmem:[%s639_s0 + $0x78] sm:$0xff]  ;;  %v28_v58 = vld [vmem:[%s639_s0 + $0x70] sm:$0xff] }
  0x11   :  { %330 = vmatprep.subr.bf16.mxu0 %v364_v0  ;;  %349 = vmatprep.subr.bf16.mxu1 %v364_v0  ;;  %v45_v57 = vld [vmem:[%s639_s0 + $0xf8] sm:$0xff]  ;;  %v44_v59 = vld [vmem:[%s639_s0 + $0xf0] sm:$0xff]  ;;  %v572_v60 = vld [vmem:[%s640_s2] ss:$0 sm:$0xff] }
  0x14   :  { %332 = vmatpush1.bf16.msra.mxu0 %v331_v17  ;;  %358 = vmatpush1.bf16.msra.mxu1 %v331_v17 }
  0x15   :  { %333 = vmatprep.subr.bf16.mxu0 %v364_v0  ;;  %350 = vmatprep.subr.bf16.mxu1 %v364_v0 }
  0x18   :  { %335 = vmatpush1.bf16.msra.mxu0 %v334_v20  ;;  %359 = vmatpush1.bf16.msra.mxu1 %v334_v20 }
  0x19   :  { %336 = vmatprep.subr.bf16.mxu0 %v364_v0  ;;  %351 = vmatprep.subr.bf16.mxu1 %v364_v0 }
  0x1c   :  { %338 = vmatpush1.bf16.msra.mxu0 %v337_v23  ;;  %360 = vmatpush1.bf16.msra.mxu1 %v337_v23 }
  0x1d   :  { %339 = vmatprep.subr.bf16.mxu0 %v364_v0  ;;  %352 = vmatprep.subr.bf16.mxu1 %v364_v0 }
  0x20   :  { %341 = vmatpush1.bf16.msra.mxu0 %v340_v26  ;;  %361 = vmatpush1.bf16.msra.mxu1 %v340_v26 }
  0x21   :  { %342 = vmatprep.subr.bf16.mxu0 %v364_v0  ;;  %353 = vmatprep.subr.bf16.mxu1 %v364_v0 }
  0x24   :  { %344 = vmatpush1.bf16.msra.mxu0 %v343_v29  ;;  %362 = vmatpush1.bf16.msra.mxu1 %v343_v29 }
  0x27   :  { %185 = vmatmul.mubr.f32.vlgmr.msra.gmra.mrb[0].mxu0 %v14_v30  ;;  %225 = vmatmul.mubr.f32.vlgmr.msra.gmra.mrb[0].mxu1 %v30_v31 }
  0x28   :  { %303 = vmatprep.mubr.msk.f32.mxu0 %vm71_vm0, %v17_v32  ;;  %311 = vmatprep.mubr.msk.f32.mxu1 %vm71_vm0, %v33_v33 }
  0x2b   :  { %190 = vmatmul.mubr.f32.gmra.mrb[2].mxu0 %v16_v34  ;;  %230 = vmatmul.mubr.f32.gmra.mrb[2].mxu1 %v32_v35 }
  0x2c   :  { %304 = vmatprep.mubr.msk.f32.mxu0 %vm71_vm0, %v19_v36  ;;  %312 = vmatprep.mubr.msk.f32.mxu1 %vm71_vm0, %v35_v37 }
  0x2f   :  { %195 = vmatmul.mubr.f32.gmra.mrb[4].mxu0 %v18_v38  ;;  %235 = vmatmul.mubr.f32.gmra.mrb[4].mxu1 %v34_v39 }
  0x30   :  { %305 = vmatprep.mubr.msk.f32.mxu0 %vm71_vm0, %v21_v40  ;;  %313 = vmatprep.mubr.msk.f32.mxu1 %vm71_vm0, %v37_v41 }
  0x33   :  { %200 = vmatmul.mubr.f32.gmra.mrb[6].mxu0 %v20_v42  ;;  %240 = vmatmul.mubr.f32.gmra.mrb[6].mxu1 %v36_v43 }
  0x34   :  { %306 = vmatprep.mubr.msk.f32.mxu0 %vm71_vm0, %v23_v44  ;;  %314 = vmatprep.mubr.msk.f32.mxu1 %vm71_vm0, %v39_v45 }
  0x37   :  { %205 = vmatmul.mubr.f32.gmra.mrb[8].mxu0 %v22_v46  ;;  %245 = vmatmul.mubr.f32.gmra.mrb[8].mxu1 %v38_v47 }
  0x38   :  { %307 = vmatprep.mubr.msk.f32.mxu0 %vm71_vm0, %v25_v48  ;;  %315 = vmatprep.mubr.msk.f32.mxu1 %vm71_vm0, %v41_v49 }
  0x3b   :  { %210 = vmatmul.mubr.f32.gmra.mrb[10].mxu0 %v24_v50  ;;  %250 = vmatmul.mubr.f32.gmra.mrb[10].mxu1 %v40_v51 }
  0x3c   :  { %308 = vmatprep.mubr.msk.f32.mxu0 %vm71_vm0, %v27_v52  ;;  %316 = vmatprep.mubr.msk.f32.mxu1 %vm71_vm0, %v43_v53 }
  0x3f   :  { %215 = vmatmul.mubr.f32.gmra.mrb[12].mxu0 %v26_v54  ;;  %255 = vmatmul.mubr.f32.gmra.mrb[12].mxu1 %v42_v55 }
  0x40   :  { %309 = vmatprep.mubr.msk.f32.mxu0 %vm71_vm0, %v29_v56  ;;  %317 = vmatprep.mubr.msk.f32.mxu1 %vm71_vm0, %v45_v57 }
  0x43   :  { %220 = vmatmul.mubr.f32.gmra.mrb[14].mxu0 %v28_v58  ;;  %260 = vmatmul.mubr.f32.gmra.mrb[14].mxu1 %v44_v59 }
  0xfa   :  { %v186_v61 = vpop.f32.mrb[0].mxu0  ;;  %v226_v62 = vpop.f32.mrb[0].mxu1 }
  0xfb   :  { %v187_v63 = vadd.f32 %v572_v60, %v186_v61  ;;  %v227_v0 = vadd.f32 %v572_v60, %v226_v62  ;;  %v188_v1 = vpop.f32.mrb[1].mxu0  ;;  %v228_v2 = vpop.f32.mrb[1].mxu1 }
  0xfd   :  { %v265_v3 = vmax.f32 %v187_v63, 0.0  ;;  %v273_v4 = vmax.f32 %v227_v0, 0.0 }
  0xfe   :  { %v191_v5 = vpop.f32.mrb[2].mxu0  ;;  %v231_v6 = vpop.f32.mrb[2].mxu1 }
  0xff   :  { %281 = vst [vmem:[%s641_s3] sm:$0xff] %v265_v3  ;;  %289 = vst [vmem:[%s641_s3 + $0x40] sm:$0xff] %v273_v4  ;;  %v192_v7 = vadd.f32 %v572_v60, %v191_v5  ;;  %v232_v8 = vadd.f32 %v572_v60, %v231_v6  ;;  %v193_v9 = vpop.f32.mrb[3].mxu0  ;;  %v233_v10 = vpop.f32.mrb[3].mxu1 }
 0x101   :  { %v266_v11 = vmax.f32 %v192_v7, 0.0  ;;  %v274_v12 = vmax.f32 %v232_v8, 0.0 }
 0x102   :  { %v196_v13 = vpop.f32.mrb[4].mxu0  ;;  %v236_v14 = vpop.f32.mrb[4].mxu1 }
 0x103   :  { %282 = vst [vmem:[%s641_s3 + $0x8] sm:$0xff] %v266_v11  ;;  %290 = vst [vmem:[%s641_s3 + $0x48] sm:$0xff] %v274_v12  ;;  %v197_v15 = vadd.f32 %v572_v60, %v196_v13  ;;  %v237_v16 = vadd.f32 %v572_v60, %v236_v14  ;;  %v198_v17 = vpop.f32.mrb[5].mxu0  ;;  %v238_v18 = vpop.f32.mrb[5].mxu1 }
 0x105   :  { %v267_v19 = vmax.f32 %v197_v15, 0.0  ;;  %v275_v20 = vmax.f32 %v237_v16, 0.0 }
 0x106   :  { %v201_v21 = vpop.f32.mrb[6].mxu0  ;;  %v241_v22 = vpop.f32.mrb[6].mxu1 }
 0x107   :  { %283 = vst [vmem:[%s641_s3 + $0x10] sm:$0xff] %v267_v19  ;;  %291 = vst [vmem:[%s641_s3 + $0x50] sm:$0xff] %v275_v20  ;;  %v202_v23 = vadd.f32 %v572_v60, %v201_v21  ;;  %v242_v24 = vadd.f32 %v572_v60, %v241_v22  ;;  %v203_v25 = vpop.f32.mrb[7].mxu0  ;;  %v243_v26 = vpop.f32.mrb[7].mxu1 }
 0x109   :  { %v268_v27 = vmax.f32 %v202_v23, 0.0  ;;  %v276_v28 = vmax.f32 %v242_v24, 0.0 }
 0x10a   :  { %v206_v29 = vpop.f32.mrb[8].mxu0  ;;  %v246_v30 = vpop.f32.mrb[8].mxu1 }
 0x10b   :  { %284 = vst [vmem:[%s641_s3 + $0x18] sm:$0xff] %v268_v27  ;;  %292 = vst [vmem:[%s641_s3 + $0x58] sm:$0xff] %v276_v28  ;;  %v207_v31 = vadd.f32 %v572_v60, %v206_v29  ;;  %v247_v32 = vadd.f32 %v572_v60, %v246_v30  ;;  %v208_v33 = vpop.f32.mrb[9].mxu0  ;;  %v248_v34 = vpop.f32.mrb[9].mxu1 }
 0x10d   :  { %v269_v35 = vmax.f32 %v207_v31, 0.0  ;;  %v277_v36 = vmax.f32 %v247_v32, 0.0 }
 0x10e   :  { %v211_v37 = vpop.f32.mrb[10].mxu0  ;;  %v251_v38 = vpop.f32.mrb[10].mxu1 }
 0x10f   :  { %285 = vst [vmem:[%s641_s3 + $0x20] sm:$0xff] %v269_v35  ;;  %293 = vst [vmem:[%s641_s3 + $0x60] sm:$0xff] %v277_v36  ;;  %v212_v39 = vadd.f32 %v572_v60, %v211_v37  ;;  %v252_v40 = vadd.f32 %v572_v60, %v251_v38  ;;  %v213_v41 = vpop.f32.mrb[11].mxu0  ;;  %v253_v42 = vpop.f32.mrb[11].mxu1 }
 0x111   :  { %v270_v43 = vmax.f32 %v212_v39, 0.0  ;;  %v278_v44 = vmax.f32 %v252_v40, 0.0 }
 0x112   :  { %v216_v45 = vpop.f32.mrb[12].mxu0  ;;  %v256_v46 = vpop.f32.mrb[12].mxu1 }
 0x113   :  { %286 = vst [vmem:[%s641_s3 + $0x28] sm:$0xff] %v270_v43  ;;  %294 = vst [vmem:[%s641_s3 + $0x68] sm:$0xff] %v278_v44  ;;  %v217_v47 = vadd.f32 %v572_v60, %v216_v45  ;;  %v257_v48 = vadd.f32 %v572_v60, %v256_v46  ;;  %v218_v49 = vpop.f32.mrb[13].mxu0  ;;  %v258_v50 = vpop.f32.mrb[13].mxu1 }
 0x115   :  { %v271_v51 = vmax.f32 %v217_v47, 0.0  ;;  %v279_v52 = vmax.f32 %v257_v48, 0.0 }
 0x116   :  { %v221_v53 = vpop.f32.mrb[14].mxu0  ;;  %v261_v54 = vpop.f32.mrb[14].mxu1 }
 0x117   :  { %287 = vst [vmem:[%s641_s3 + $0x30] sm:$0xff] %v271_v51  ;;  %295 = vst [vmem:[%s641_s3 + $0x70] sm:$0xff] %v279_v52  ;;  %v222_v55 = vadd.f32 %v572_v60, %v221_v53  ;;  %v262_v56 = vadd.f32 %v572_v60, %v261_v54  ;;  %v223_v57 = vpop.f32.mrb[15].mxu0  ;;  %v263_v58 = vpop.f32.mrb[15].mxu1 }
 0x119   :  { %v272_v59 = vmax.f32 %v222_v55, 0.0  ;;  %v280_v61 = vmax.f32 %v262_v56, 0.0 }
 0x11b   :  { %288 = vst [vmem:[%s641_s3 + $0x38] sm:$0xff] %v272_v59  ;;  %296 = vst [vmem:[%s641_s3 + $0x78] sm:$0xff] %v280_v61 }

// kernel: camnet_forward.6
= control target key start
LH: loop header
LB: loop body
LE: loop exit
PB: predicated region body
PF: predicated region fallthrough
CT: control target
= control target key end

     0   :  { %s3071_s1 = inlined_call_operand.vmem [shape: bf16[512,1024], index: 1, kind: input, shape index: {}]   ;;  %s3072_s0 = inlined_call_operand.vmem [shape: f32[8,512], index: 0, kind: input, shape index: {}]   ;;  %s3073_s2 = inlined_call_operand.vmem [shape: f32[1,1024], index: 2, kind: input, shape index: {}]   ;;  %s3074_s3 = inlined_call_operand.vmem [shape: f32[8,1024], index: 3, kind: output, shape index: {}]  }
   0x1   :  { %v22_v0 = vld [vmem:[%s3071_s1] sm:$0xff]  ;;  %v23_v2 = vld [vmem:[%s3071_s1 + $0x8] sm:$0xff] }
   0x2   :  { %v26_v1 = vld [vmem:[%s3071_s1 + $0x20] sm:$0xff]  ;;  %v27_v4 = vld [vmem:[%s3071_s1 + $0x28] sm:$0xff] }
   0x3   :  { %v1941_v3 = vcombine.high %v22_v0, %v26_v1  ;;  %v1940_v5 = vcombine.low %v22_v0, %v26_v1  ;;  %v30_v6 = vld [vmem:[%s3071_s1 + $0x40] sm:$0xff]  ;;  %v1943_v8 = vcombine.high %v23_v2, %v27_v4  ;;  %v1942_v9 = vcombine.low %v23_v2, %v27_v4  ;;  %v31_v11 = vld [vmem:[%s3071_s1 + $0x48] sm:$0xff] }
   0x4   :  { %v34_v7 = vld [vmem:[%s3071_s1 + $0x60] sm:$0xff]  ;;  %v35_v12 = vld [vmem:[%s3071_s1 + $0x68] sm:$0xff] }
   0x5   :  { %v1949_v10 = vcombine.high %v30_v6, %v34_v7  ;;  %v38_v13 = vld [vmem:[%s3071_s1 + $0x80] sm:$0xff]  ;;  %1600 = vmatprep.subr.bf16.mxu0 %v1941_v3  ;;  %v1951_v14 = vcombine.high %v31_v11, %v35_v12  ;;  %v39_v16 = vld [vmem:[%s3071_s1 + $0x88] sm:$0xff]  ;;  %1682 = vmatprep.subr.bf16.mxu1 %v1943_v8  ;;  %v1948_v18 = vcombine.low %v30_v6, %v34_v7 }
   0x6   :  { %v42_v15 = vld [vmem:[%s3071_s1 + $0xa0] sm:$0xff]  ;;  %v43_v17 = vld [vmem:[%s3071_s1 + $0xa8] sm:$0xff]  ;;  %1601 = vmatpush1.bf16.msra.mxu0 %v1940_v5  ;;  %1683 = vmatpush1.bf16.msra.mxu1 %v1942_v9  ;;  %v1950_v19 = vcombine.low %v31_v11, %v35_v12 }
   0x7   :  { %1602 = vmatprep.subr.bf16.mxu0 %v1949_v10  ;;  %v1957_v20 = vcombine.high %v38_v13, %v42_v15  ;;  %1684 = vmatprep.subr.bf16.mxu1 %v1951_v14  ;;  %v1959_v21 = vcombine.high %v39_v16, %v43_v17  ;;  %v46_v22 = vld [vmem:[%s3071_s1 + $0xc0] sm:$0xff]  ;;  %v47_v24 = vld [vmem:[%s3071_s1 + $0xc8] sm:$0xff]  ;;  %v1956_v26 = vcombine.low %v38_v13, %v42_v15 }
   0x8   :  { %v50_v23 = vld [vmem:[%s3071_s1 + $0xe0] sm:$0xff]  ;;  %v51_v25 = vld [vmem:[%s3071_s1 + $0xe8] sm:$0xff]  ;;  %v1958_v27 = vcombine.low %v39_v16, %v43_v17 }
   0x9   :  { %v1965_v28 = vcombine.high %v46_v22, %v50_v23  ;;  %v1967_v29 = vcombine.high %v47_v24, %v51_v25  ;;  %v54_v30 = vld [vmem:[%s3071_s1 + $0x100] sm:$0xff]  ;;  %v55_v32 = vld [vmem:[%s3071_s1 + $0x108] sm:$0xff]  ;;  %v1964_v34 = vcombine.low %v46_v22, %v50_v23  ;;  %v1966_v35 = vcombine.low %v47_v24, %v51_v25 }
   0xa   :  { %1603 = vmatpush1.bf16.msra.mxu0 %v1948_v18  ;;  %1685 = vmatpush1.bf16.msra.mxu1 %v1950_v19  ;;  %v58_v31 = vld [vmem:[%s3071_s1 + $0x120] sm:$0xff]  ;;  %v59_v33 = vld [vmem:[%s3071_s1 + $0x128] sm:$0xff] }
   0xb   :  { %1604 = vmatprep.subr.bf16.mxu0 %v1957_v20  ;;  %1686 = vmatprep.subr.bf16.mxu1 %v1959_v21  ;;  %v1973_v36 = vcombine.high %v54_v30, %v58_v31  ;;  %v1975_v37 = vcombine.high %v55_v32, %v59_v33  ;;  %v62_v38 = vld [vmem:[%s3071_s1 + $0x140] sm:$0xff]  ;;  %v63_v40 = vld [vmem:[%s3071_s1 + $0x148] sm:$0xff]  ;;  %v1972_v42 = vcombine.low %v54_v30, %v58_v31 }
   0xc   :  { %v66_v39 = vld [vmem:[%s3071_s1 + $0x160] sm:$0xff]  ;;  %v67_v41 = vld [vmem:[%s3071_s1 + $0x168] sm:$0xff]  ;;  %v1974_v43 = vcombine.low %v55_v32, %v59_v33 }
   0xd   :  { %v1981_v44 = vcombine.high %v62_v38, %v66_v39  ;;  %v1983_v45 = vcombine.high %v63_v40, %v67_v41  ;;  %v70_v46 = vld [vmem:[%s3071_s1 + $0x180] sm:$0xff]  ;;  %v71_v48 = vld [vmem:[%s3071_s1 + $0x188] sm:$0xff]  ;;  %v1980_v50 = vcombine.low %v62_v38, %v66_v39  ;;  %v1982_v51 = vcombine.low %v63_v40, %v67_v41 }
   0xe   :  { %1605 = vmatpush1.bf16.msra.mxu0 %v1956_v26  ;;  %1687 = vmatpush1.bf16.msra.mxu1 %v1958_v27  ;;  %v74_v47 = vld [vmem:[%s3071_s1 + $0x1a0] sm:$0xff]  ;;  %v75_v49 = vld [vmem:[%s3071_s1 + $0x1a8] sm:$0xff] }
   0xf   :  { %1606 = vmatprep.subr.bf16.mxu0 %v1965_v28  ;;  %1688 = vmatprep.subr.bf16.mxu1 %v1967_v29  ;;  %v1989_v52 = vcombine.high %v70_v46, %v74_v47  ;;  %v15_v53 = vld [vmem:[%s3072_s0 + $0x8] sm:$0xff]  ;;  %v1991_v54 = vcombine.high %v71_v48, %v75_v49  ;;  %v78_v55 = vld [vmem:[%s3071_s1 + $0x1c0] sm:$0xff]  ;;  %v1988_v60 = vcombine.low %v70_v46, %v74_v47 }
  0x10   :  { %v82_v56 = vld [vmem:[%s3071_s1 + $0x1e0] sm:$0xff]  ;;  %v2333_v57 = vpack.c.bf16 %v15_v53, %v15_v53  ;;  %v79_v58 = vld [vmem:[%s3071_s1 + $0x1c8] sm:$0xff]  ;;  %v1990_v61 = vcombine.low %v71_v48, %v75_v49 }
  0x11   :  { %v83_v59 = vld [vmem:[%s3071_s1 + $0x1e8] sm:$0xff]  ;;  %v1997_v62 = vcombine.high %v78_v55, %v82_v56  ;;  %v86_v0 = vld [vmem:[%s3071_s1 + $0x200] sm:$0xff]  ;;  %v1996_v4 = vcombine.low %v78_v55, %v82_v56 }
  0x12   :  { %1607 = vmatpush1.bf16.msra.mxu0 %v1964_v34  ;;  %1689 = vmatpush1.bf16.msra.mxu1 %v1966_v35  ;;  %v1999_v63 = vcombine.high %v79_v58, %v83_v59  ;;  %v90_v1 = vld [vmem:[%s3071_s1 + $0x220] sm:$0xff]  ;;  %v87_v2 = vld [vmem:[%s3071_s1 + $0x208] sm:$0xff]  ;;  %v1998_v5 = vcombine.low %v79_v58, %v83_v59 }
  0x13   :  { %1608 = vmatprep.subr.bf16.mxu0 %v1973_v36  ;;  %1690 = vmatprep.subr.bf16.mxu1 %v1975_v37  ;;  %v91_v3 = vld [vmem:[%s3071_s1 + $0x228] sm:$0xff]  ;;  %v2005_v6 = vcombine.high %v86_v0, %v90_v1  ;;  %v94_v8 = vld [vmem:[%s3071_s1 + $0x240] sm:$0xff]  ;;  %v2004_v12 = vcombine.low %v86_v0, %v90_v1 }
  0x14   :  { %1632 = vmatprep.mubr.bf16.mxu0 %v2333_v57  ;;  %1714 = vmatprep.mubr.bf16.mxu1 %v2333_v57  ;;  %v2007_v7 = vcombine.high %v87_v2, %v91_v3  ;;  %v98_v9 = vld [vmem:[%s3071_s1 + $0x260] sm:$0xff]  ;;  %v95_v10 = vld [vmem:[%s3071_s1 + $0x248] sm:$0xff]  ;;  %v2006_v13 = vcombine.low %v87_v2, %v91_v3 }
  0x15   :  { %v99_v11 = vld [vmem:[%s3071_s1 + $0x268] sm:$0xff]  ;;  %v2013_v14 = vcombine.high %v94_v8, %v98_v9  ;;  %v102_v16 = vld [vmem:[%s3071_s1 + $0x280] sm:$0xff]  ;;  %v2012_v20 = vcombine.low %v94_v8, %v98_v9 }
  0x16   :  { %1609 = vmatpush1.bf16.msra.mxu0 %v1972_v42  ;;  %1691 = vmatpush1.bf16.msra.mxu1 %v1974_v43  ;;  %v2015_v15 = vcombine.high %v95_v10, %v99_v11  ;;  %v106_v17 = vld [vmem:[%s3071_s1 + $0x2a0] sm:$0xff]  ;;  %v103_v18 = vld [vmem:[%s3071_s1 + $0x288] sm:$0xff]  ;;  %v2014_v21 = vcombine.low %v95_v10, %v99_v11 }
  0x17   :  { %1610 = vmatprep.subr.bf16.mxu0 %v1981_v44  ;;  %1692 = vmatprep.subr.bf16.mxu1 %v1983_v45  ;;  %v107_v19 = vld [vmem:[%s3071_s1 + $0x2a8] sm:$0xff]  ;;  %v2021_v22 = vcombine.high %v102_v16, %v106_v17  ;;  %v110_v24 = vld [vmem:[%s3071_s1 + $0x2c0] sm:$0xff]  ;;  %v2020_v28 = vcombine.low %v102_v16, %v106_v17 }
  0x18   :  { %v2023_v23 = vcombine.high %v103_v18, %v107_v19  ;;  %v114_v25 = vld [vmem:[%s3071_s1 + $0x2e0] sm:$0xff]  ;;  %v111_v26 = vld [vmem:[%s3071_s1 + $0x2c8] sm:$0xff]  ;;  %v2022_v29 = vcombine.low %v103_v18, %v107_v19 }
  0x19   :  { %v115_v27 = vld [vmem:[%s3071_s1 + $0x2e8] sm:$0xff]  ;;  %v2029_v30 = vcombine.high %v110_v24, %v114_v25  ;;  %v118_v32 = vld [vmem:[%s3071_s1 + $0x300] sm:$0xff]  ;;  %v2028_v36 = vcombine.low %v110_v24, %v114_v25 }
  0x1a   :  { %1611 = vmatpush1.bf16.msra.mxu0 %v1980_v50  ;;  %1693 = vmatpush1.bf16.msra.mxu1 %v1982_v51  ;;  %v2031_v31 = vcombine.high %v111_v26, %v115_v27  ;;  %v122_v33 = vld [vmem:[%s3071_s1 + $0x320] sm:$0xff]  ;;  %v119_v34 = vld [vmem:[%s3071_s1 + $0x308] sm:$0xff]  ;;  %v2030_v37 = vcombine.low %v111_v26, %v115_v27 }
  0x1b   :  { %1612 = vmatprep.subr.bf16.mxu0 %v1989_v52  ;;  %1694 = vmatprep.subr.bf16.mxu1 %v1991_v54  ;;  %v123_v35 = vld [vmem:[%s3071_s1 + $0x328] sm:$0xff]  ;;  %v2037_v38 = vcombine.high %v118_v32, %v122_v33  ;;  %v126_v40 = vld [vmem:[%s3071_s1 + $0x340] sm:$0xff]  ;;  %v2036_v44 = vcombine.low %v118_v32, %v122_v33 }
  0x1c   :  { %v2039_v39 = vcombine.high %v119_v34, %v123_v35  ;;  %v130_v41 = vld [vmem:[%s3071_s1 + $0x360] sm:$0xff]  ;;  %v127_v42 = vld [vmem:[%s3071_s1 + $0x348] sm:$0xff]  ;;  %v2038_v45 = vcombine.low %v119_v34, %v123_v35 }
  0x1d   :  { %v131_v43 = vld [vmem:[%s3071_s1 + $0x368] sm:$0xff]  ;;  %v2045_v46 = vcombine.high %v126_v40, %v130_v41  ;;  %v134_v48 = vld [vmem:[%s3071_s1 + $0x380] sm:$0xff]  ;;  %v2044_v52 = vcombine.low %v126_v40, %v130_v41 }
  0x1e   :  { %1613 = vmatpush1.bf16.msra.mxu0 %v1988_v60  ;;  %1695 = vmatpush1.bf16.msra.mxu1 %v1990_v61  ;;  %v2047_v47 = vcombine.high %v127_v42, %v131_v43  ;;  %v138_v49 = vld [vmem:[%s3071_s1 + $0x3a0] sm:$0xff]  ;;  %v135_v50 = vld [vmem:[%s3071_s1 + $0x388] sm:$0xff]  ;;  %v2046_v53 = vcombine.low %v127_v42, %v131_v43 }
  0x1f   :  { %1614 = vmatprep.subr.bf16.mxu0 %v1997_v62  ;;  %1696 = vmatprep.subr.bf16.mxu1 %v1999_v63  ;;  %v139_v51 = vld [vmem:[%s3071_s1 + $0x3a8] sm:$0xff]  ;;  %v2053_v54 = vcombine.high %v134_v48, %v138_v49  ;;  %v142_v56 = vld [vmem:[%s3071_s1 + $0x3c0] sm:$0xff]  ;;  %v2052_v61 = vcombine.low %v134_v48, %v138_v49 }
  0x20   :  { %v2055_v55 = vcombine.high %v135_v50, %v139_v51  ;;  %v146_v58 = vld [vmem:[%s3071_s1 + $0x3e0] sm:$0xff]  ;;  %v143_v59 = vld [vmem:[%s3071_s1 + $0x3c8] sm:$0xff]  ;;  %v2054_v62 = vcombine.low %v135_v50, %v139_v51 }
  0x21   :  { %v147_v60 = vld [vmem:[%s3071_s1 + $0x3e8] sm:$0xff]  ;;  %v2061_v63 = vcombine.high %v142_v56, %v146_v58  ;;  %v150_v1 = vld [vmem:[%s3071_s1 + $0x400] sm:$0xff] }
  0x22   :  { %1615 = vmatpush1.bf16.msra.mxu0 %v1996_v4  ;;  %1697 = vmatpush1.bf16.msra.mxu1 %v1998_v5  ;;  %v2063_v0 = vcombine.high %v143_v59, %v147_v60  ;;  %v154_v2 = vld [vmem:[%s3071_s1 + $0x420] sm:$0xff]  ;;  %v151_v3 = vld [vmem:[%s3071_s1 + $0x408] sm:$0xff]  ;;  %v2060_v5 = vcombine.low %v142_v56, %v146_v58 }
  0x23   :  { %1616 = vmatprep.subr.bf16.mxu0 %v2005_v6  ;;  %1698 = vmatprep.subr.bf16.mxu1 %v2007_v7  ;;  %v155_v4 = vld [vmem:[%s3071_s1 + $0x428] sm:$0xff]  ;;  %v14_v6 = vld [vmem:[%s3072_s0] sm:$0xff]  ;;  %v2062_v7 = vcombine.low %v143_v59, %v147_v60  ;;  %v2069_v8 = vcombine.high %v150_v1, %v154_v2  ;;  %v2068_v16 = vcombine.low %v150_v1, %v154_v2 }
  0x24   :  { %v2071_v9 = vcombine.high %v151_v3, %v155_v4  ;;  %v158_v10 = vld [vmem:[%s3071_s1 + $0x440] sm:$0xff]  ;;  %v2070_v17 = vcombine.low %v151_v3, %v155_v4  ;;  %v171_v24 = vld [vmem:[%s3071_s1 + $0x4a8] sm:$0xff] }
  0x25   :  { %v162_v11 = vld [vmem:[%s3071_s1 + $0x460] sm:$0xff]  ;;  %v179_v32 = vld [vmem:[%s3071_s1 + $0x4e8] sm:$0xff] }
  0x26   :  { %1617 = vmatpush1.bf16.msra.mxu0 %v2004_v12  ;;  %1699 = vmatpush1.bf16.msra.mxu1 %v2006_v13  ;;  %v2460_v12 = vpack.c.bf16 %v14_v6, %v14_v6  ;;  %v159_v13 = vld [vmem:[%s3071_s1 + $0x448] sm:$0xff]  ;;  %v2077_v18 = vcombine.high %v158_v10, %v162_v11  ;;  %v2076_v25 = vcombine.low %v158_v10, %v162_v11  ;;  %v214_v6 = vld [vmem:[%s3071_s1 + $0x600] sm:$0xff] }
  0x27   :  { %1618 = vmatprep.subr.bf16.mxu0 %v2013_v14  ;;  %1700 = vmatprep.subr.bf16.mxu1 %v2015_v15  ;;  %v163_v14 = vld [vmem:[%s3071_s1 + $0x468] sm:$0xff]  ;;  %v17_v15 = vld [vmem:[%s3072_s0 + $0x18] sm:$0xff] }
  0x28   :  { %v2079_v19 = vcombine.high %v159_v13, %v163_v14  ;;  %v2078_v26 = vcombine.low %v159_v13, %v163_v14  ;;  %v187_v40 = vld [vmem:[%s3071_s1 + $0x528] sm:$0xff] }
  0x29   :  { %v195_v48 = vld [vmem:[%s3071_s1 + $0x568] sm:$0xff] }
  0x2a   :  { %1619 = vmatpush1.bf16.msra.mxu0 %v2012_v20  ;;  %1701 = vmatpush1.bf16.msra.mxu1 %v2014_v21  ;;  %v166_v20 = vld [vmem:[%s3071_s1 + $0x480] sm:$0xff]  ;;  %v203_v56 = vld [vmem:[%s3071_s1 + $0x5a8] sm:$0xff] }
  0x2b   :  { %1620 = vmatprep.subr.bf16.mxu0 %v2021_v22  ;;  %1702 = vmatprep.subr.bf16.mxu1 %v2023_v23  ;;  %v170_v21 = vld [vmem:[%s3071_s1 + $0x4a0] sm:$0xff]  ;;  %v2477_v22 = vpack.c.bf16 %v17_v15, %v17_v15  ;;  %v167_v23 = vld [vmem:[%s3071_s1 + $0x488] sm:$0xff] }
  0x2c   :  { %v2085_v27 = vcombine.high %v166_v20, %v170_v21  ;;  %v2084_v33 = vcombine.low %v166_v20, %v170_v21  ;;  %v2086_v34 = vcombine.low %v167_v23, %v171_v24  ;;  %v211_v1 = vld [vmem:[%s3071_s1 + $0x5e8] sm:$0xff]  ;;  %v222_v15 = vld [vmem:[%s3071_s1 + $0x640] sm:$0xff] }
  0x2e   :  { %1621 = vmatpush1.bf16.msra.mxu0 %v2020_v28  ;;  %1703 = vmatpush1.bf16.msra.mxu1 %v2022_v29  ;;  %v2087_v28 = vcombine.high %v167_v23, %v171_v24  ;;  %v174_v29 = vld [vmem:[%s3071_s1 + $0x4c0] sm:$0xff] }
  0x2f   :  { %1622 = vmatprep.subr.bf16.mxu0 %v2029_v30  ;;  %1704 = vmatprep.subr.bf16.mxu1 %v2031_v31  ;;  %v178_v30 = vld [vmem:[%s3071_s1 + $0x4e0] sm:$0xff]  ;;  %v175_v31 = vld [vmem:[%s3071_s1 + $0x4c8] sm:$0xff] }
  0x30   :  { %v2093_v35 = vcombine.high %v174_v29, %v178_v30  ;;  %v2092_v41 = vcombine.low %v174_v29, %v178_v30  ;;  %v2094_v42 = vcombine.low %v175_v31, %v179_v32  ;;  %v230_v24 = vld [vmem:[%s3071_s1 + $0x680] sm:$0xff] }
  0x32   :  { %1623 = vmatpush1.bf16.msra.mxu0 %v2028_v36  ;;  %1705 = vmatpush1.bf16.msra.mxu1 %v2030_v37  ;;  %v2095_v36 = vcombine.high %v175_v31, %v179_v32  ;;  %v182_v37 = vld [vmem:[%s3071_s1 + $0x500] sm:$0xff] }
  0x33   :  { %1624 = vmatprep.subr.bf16.mxu0 %v2037_v38  ;;  %1706 = vmatprep.subr.bf16.mxu1 %v2039_v39  ;;  %v186_v38 = vld [vmem:[%s3071_s1 + $0x520] sm:$0xff]  ;;  %v183_v39 = vld [vmem:[%s3071_s1 + $0x508] sm:$0xff] }
  0x34   :  { %v2101_v43 = vcombine.high %v182_v37, %v186_v38  ;;  %v2100_v49 = vcombine.low %v182_v37, %v186_v38  ;;  %v2102_v50 = vcombine.low %v183_v39, %v187_v40  ;;  %v238_v32 = vld [vmem:[%s3071_s1 + $0x6c0] sm:$0xff] }
  0x36   :  { %1625 = vmatpush1.bf16.msra.mxu0 %v2036_v44  ;;  %1707 = vmatpush1.bf16.msra.mxu1 %v2038_v45  ;;  %v2103_v44 = vcombine.high %v183_v39, %v187_v40  ;;  %v190_v45 = vld [vmem:[%s3071_s1 + $0x540] sm:$0xff] }
  0x37   :  { %1626 = vmatprep.subr.bf16.mxu0 %v2045_v46  ;;  %1708 = vmatprep.subr.bf16.mxu1 %v2047_v47  ;;  %v194_v46 = vld [vmem:[%s3071_s1 + $0x560] sm:$0xff]  ;;  %v191_v47 = vld [vmem:[%s3071_s1 + $0x548] sm:$0xff] }
  0x38   :  { %v2109_v51 = vcombine.high %v190_v45, %v194_v46  ;;  %v2108_v58 = vcombine.low %v190_v45, %v194_v46  ;;  %v2110_v59 = vcombine.low %v191_v47, %v195_v48  ;;  %v246_v40 = vld [vmem:[%s3071_s1 + $0x700] sm:$0xff] }
  0x3a   :  { %1627 = vmatpush1.bf16.msra.mxu0 %v2044_v52  ;;  %1709 = vmatpush1.bf16.msra.mxu1 %v2046_v53  ;;  %v2111_v52 = vcombine.high %v191_v47, %v195_v48  ;;  %v198_v53 = vld [vmem:[%s3071_s1 + $0x580] sm:$0xff] }
  0x3b   :  { %1628 = vmatprep.subr.bf16.mxu0 %v2053_v54  ;;  %1710 = vmatprep.subr.bf16.mxu1 %v2055_v55  ;;  %v202_v54 = vld [vmem:[%s3071_s1 + $0x5a0] sm:$0xff]  ;;  %v199_v55 = vld [vmem:[%s3071_s1 + $0x588] sm:$0xff] }
  0x3c   :  { %v2117_v60 = vcombine.high %v198_v53, %v202_v54  ;;  %v2116_v2 = vcombine.low %v198_v53, %v202_v54  ;;  %v2118_v3 = vcombine.low %v199_v55, %v203_v56  ;;  %v254_v48 = vld [vmem:[%s3071_s1 + $0x740] sm:$0xff] }
  0x3e   :  { %1629 = vmatpush1.bf16.msra.mxu0 %v2052_v61  ;;  %1711 = vmatpush1.bf16.msra.mxu1 %v2054_v62  ;;  %v2119_v61 = vcombine.high %v199_v55, %v203_v56  ;;  %v206_v62 = vld [vmem:[%s3071_s1 + $0x5c0] sm:$0xff] }
  0x3f   :  { %1630 = vmatprep.subr.bf16.mxu0 %v2061_v63  ;;  %1712 = vmatprep.subr.bf16.mxu1 %v2063_v0  ;;  %v210_v63 = vld [vmem:[%s3071_s1 + $0x5e0] sm:$0xff]  ;;  %v207_v0 = vld [vmem:[%s3071_s1 + $0x5c8] sm:$0xff] }
  0x40   :  { %v2125_v4 = vcombine.high %v206_v62, %v210_v63  ;;  %v2124_v10 = vcombine.low %v206_v62, %v210_v63  ;;  %v2126_v11 = vcombine.low %v207_v0, %v211_v1  ;;  %v262_v56 = vld [vmem:[%s3071_s1 + $0x780] sm:$0xff] }
  0x42   :  { %1631 = vmatpush1.bf16.msra.mxu0 %v2060_v5  ;;  %1713 = vmatpush1.bf16.msra.mxu1 %v2062_v7  ;;  %v2127_v5 = vcombine.high %v207_v0, %v211_v1  ;;  %v218_v7 = vld [vmem:[%s3071_s1 + $0x620] sm:$0xff] }
  0x43   :  { %1641 = vmatprep.subr.bf16.mxu0 %v2069_v8  ;;  %1723 = vmatprep.subr.bf16.mxu1 %v2071_v9  ;;  %v215_v8 = vld [vmem:[%s3071_s1 + $0x608] sm:$0xff]  ;;  %v2133_v13 = vcombine.high %v214_v6, %v218_v7  ;;  %v270_v1 = vld [vmem:[%s3071_s1 + $0x7c0] sm:$0xff] }
  0x44   :  { %v219_v9 = vld [vmem:[%s3071_s1 + $0x628] sm:$0xff] }
  0x45   :  { %1633 = vmatmul.mubr.bf16.vlgmr.msra.gmra.mrb[0].mxu0 %v2460_v12  ;;  %1715 = vmatmul.mubr.bf16.vlgmr.msra.gmra.mrb[0].mxu1 %v2460_v12  ;;  %v2135_v14 = vcombine.high %v215_v8, %v219_v9  ;;  %v2134_v20 = vcombine.low %v215_v8, %v219_v9  ;;  %v24_v9 = vld [vmem:[%s3071_s1 + $0x10] sm:$0xff] }
  0x46   :  { %1642 = vmatpush1.bf16.msra.mxu0 %v2068_v16  ;;  %1724 = vmatpush1.bf16.msra.mxu1 %v2070_v17  ;;  %v226_v16 = vld [vmem:[%s3071_s1 + $0x660] sm:$0xff]  ;;  %v223_v17 = vld [vmem:[%s3071_s1 + $0x648] sm:$0xff] }
  0x47   :  { %1643 = vmatprep.subr.bf16.mxu0 %v2077_v18  ;;  %1725 = vmatprep.subr.bf16.mxu1 %v2079_v19  ;;  %v227_v18 = vld [vmem:[%s3071_s1 + $0x668] sm:$0xff]  ;;  %v2132_v19 = vcombine.low %v214_v6, %v218_v7  ;;  %v2141_v21 = vcombine.high %v222_v15, %v226_v16 }
  0x48   :  { %1673 = vmatprep.mubr.bf16.mxu0 %v2477_v22  ;;  %1755 = vmatprep.mubr.bf16.mxu1 %v2477_v22  ;;  %v2143_v23 = vcombine.high %v223_v17, %v227_v18  ;;  %v2142_v29 = vcombine.low %v223_v17, %v227_v18 }
  0x4a   :  { %1644 = vmatpush1.bf16.msra.mxu0 %v2076_v25  ;;  %1726 = vmatpush1.bf16.msra.mxu1 %v2078_v26  ;;  %v234_v25 = vld [vmem:[%s3071_s1 + $0x6a0] sm:$0xff]  ;;  %v231_v26 = vld [vmem:[%s3071_s1 + $0x688] sm:$0xff] }
  0x4b   :  { %1645 = vmatprep.subr.bf16.mxu0 %v2085_v27  ;;  %1727 = vmatprep.subr.bf16.mxu1 %v2087_v28  ;;  %v235_v27 = vld [vmem:[%s3071_s1 + $0x6a8] sm:$0xff]  ;;  %v2140_v28 = vcombine.low %v222_v15, %v226_v16  ;;  %v2149_v30 = vcombine.high %v230_v24, %v234_v25  ;;  %v16_v15 = vld [vmem:[%s3072_s0 + $0x10] sm:$0xff] }
  0x4c   :  { %v2151_v31 = vcombine.high %v231_v26, %v235_v27  ;;  %v2150_v37 = vcombine.low %v231_v26, %v235_v27 }
  0x4e   :  { %1646 = vmatpush1.bf16.msra.mxu0 %v2084_v33  ;;  %1728 = vmatpush1.bf16.msra.mxu1 %v2086_v34  ;;  %v242_v33 = vld [vmem:[%s3071_s1 + $0x6e0] sm:$0xff]  ;;  %v239_v34 = vld [vmem:[%s3071_s1 + $0x6c8] sm:$0xff] }
  0x4f   :  { %1647 = vmatprep.subr.bf16.mxu0 %v2093_v35  ;;  %1729 = vmatprep.subr.bf16.mxu1 %v2095_v36  ;;  %v243_v35 = vld [vmem:[%s3071_s1 + $0x6e8] sm:$0xff]  ;;  %v2148_v36 = vcombine.low %v230_v24, %v234_v25  ;;  %v2157_v38 = vcombine.high %v238_v32, %v242_v33  ;;  %v37_v24 = vld [vmem:[%s3071_s1 + $0x78] sm:$0xff] }
  0x50   :  { %v2159_v39 = vcombine.high %v239_v34, %v243_v35  ;;  %v2158_v45 = vcombine.low %v239_v34, %v243_v35 }
  0x52   :  { %1648 = vmatpush1.bf16.msra.mxu0 %v2092_v41  ;;  %1730 = vmatpush1.bf16.msra.mxu1 %v2094_v42  ;;  %v250_v41 = vld [vmem:[%s3071_s1 + $0x720] sm:$0xff]  ;;  %v247_v42 = vld [vmem:[%s3071_s1 + $0x708] sm:$0xff] }
  0x53   :  { %1649 = vmatprep.subr.bf16.mxu0 %v2101_v43  ;;  %1731 = vmatprep.subr.bf16.mxu1 %v2103_v44  ;;  %v251_v43 = vld [vmem:[%s3071_s1 + $0x728] sm:$0xff]  ;;  %v2156_v44 = vcombine.low %v238_v32, %v242_v33  ;;  %v2165_v46 = vcombine.high %v246_v40, %v250_v41  ;;  %v45_v32 = vld [vmem:[%s3071_s1 + $0xb8] sm:$0xff] }
  0x54   :  { %v2167_v47 = vcombine.high %v247_v42, %v251_v43  ;;  %v2166_v53 = vcombine.low %v247_v42, %v251_v43 }
  0x56   :  { %1650 = vmatpush1.bf16.msra.mxu0 %v2100_v49  ;;  %1732 = vmatpush1.bf16.msra.mxu1 %v2102_v50  ;;  %v258_v49 = vld [vmem:[%s3071_s1 + $0x760] sm:$0xff]  ;;  %v255_v50 = vld [vmem:[%s3071_s1 + $0x748] sm:$0xff] }
  0x57   :  { %1651 = vmatprep.subr.bf16.mxu0 %v2109_v51  ;;  %1733 = vmatprep.subr.bf16.mxu1 %v2111_v52  ;;  %v259_v51 = vld [vmem:[%s3071_s1 + $0x768] sm:$0xff]  ;;  %v2164_v52 = vcombine.low %v246_v40, %v250_v41  ;;  %v2173_v54 = vcombine.high %v254_v48, %v258_v49  ;;  %v53_v40 = vld [vmem:[%s3071_s1 + $0xf8] sm:$0xff] }
  0x58   :  { %v2175_v55 = vcombine.high %v255_v50, %v259_v51  ;;  %v2174_v62 = vcombine.low %v255_v50, %v259_v51 }
  0x5a   :  { %1652 = vmatpush1.bf16.msra.mxu0 %v2108_v58  ;;  %1734 = vmatpush1.bf16.msra.mxu1 %v2110_v59  ;;  %v266_v58 = vld [vmem:[%s3071_s1 + $0x7a0] sm:$0xff]  ;;  %v263_v59 = vld [vmem:[%s3071_s1 + $0x788] sm:$0xff] }
  0x5b   :  { %1653 = vmatprep.subr.bf16.mxu0 %v2117_v60  ;;  %1735 = vmatprep.subr.bf16.mxu1 %v2119_v61  ;;  %v267_v60 = vld [vmem:[%s3071_s1 + $0x7a8] sm:$0xff]  ;;  %v2172_v61 = vcombine.low %v254_v48, %v258_v49  ;;  %v2181_v63 = vcombine.high %v262_v56, %v266_v58 }
  0x5c   :  { %v2183_v0 = vcombine.high %v263_v59, %v267_v60  ;;  %v2182_v6 = vcombine.low %v263_v59, %v267_v60 }
  0x5e   :  { %1654 = vmatpush1.bf16.msra.mxu0 %v2116_v2  ;;  %1736 = vmatpush1.bf16.msra.mxu1 %v2118_v3  ;;  %v274_v2 = vld [vmem:[%s3071_s1 + $0x7e0] sm:$0xff]  ;;  %v271_v3 = vld [vmem:[%s3071_s1 + $0x7c8] sm:$0xff] }
  0x5f   :  { %1655 = vmatprep.subr.bf16.mxu0 %v2125_v4  ;;  %1737 = vmatprep.subr.bf16.mxu1 %v2127_v5  ;;  %v275_v4 = vld [vmem:[%s3071_s1 + $0x7e8] sm:$0xff]  ;;  %v2180_v5 = vcombine.low %v262_v56, %v266_v58  ;;  %v2189_v7 = vcombine.high %v270_v1, %v274_v2 }
  0x60   :  { %v2191_v8 = vcombine.high %v271_v3, %v275_v4  ;;  %v2190_v16 = vcombine.low %v271_v3, %v275_v4 }
  0x62   :  { %1656 = vmatpush1.bf16.msra.mxu0 %v2124_v10  ;;  %1738 = vmatpush1.bf16.msra.mxu1 %v2126_v11  ;;  %v28_v10 = vld [vmem:[%s3071_s1 + $0x30] sm:$0xff]  ;;  %v25_v11 = vld [vmem:[%s3071_s1 + $0x18] sm:$0xff] }
  0x63   :  { %1657 = vmatprep.subr.bf16.mxu0 %v2133_v13  ;;  %1739 = vmatprep.subr.bf16.mxu1 %v2135_v14  ;;  %v29_v13 = vld [vmem:[%s3071_s1 + $0x38] sm:$0xff]  ;;  %v2188_v14 = vcombine.low %v270_v1, %v274_v2  ;;  %v1945_v17 = vcombine.high %v24_v9, %v28_v10  ;;  %v1944_v25 = vcombine.low %v24_v9, %v28_v10 }
  0x64   :  { %v1947_v18 = vcombine.high %v25_v11, %v29_v13  ;;  %v1946_v26 = vcombine.low %v25_v11, %v29_v13 }
  0x66   :  { %1658 = vmatpush1.bf16.msra.mxu0 %v2132_v19  ;;  %1740 = vmatpush1.bf16.msra.mxu1 %v2134_v20  ;;  %v32_v19 = vld [vmem:[%s3071_s1 + $0x50] sm:$0xff] }
  0x67   :  { %1659 = vmatprep.subr.bf16.mxu0 %v2141_v21  ;;  %1741 = vmatprep.subr.bf16.mxu1 %v2143_v23  ;;  %v36_v20 = vld [vmem:[%s3071_s1 + $0x70] sm:$0xff]  ;;  %v2666_v21 = vpack.c.bf16 %v16_v15, %v16_v15  ;;  %v33_v23 = vld [vmem:[%s3071_s1 + $0x58] sm:$0xff] }
  0x68   :  { %v1953_v27 = vcombine.high %v32_v19, %v36_v20  ;;  %v1952_v33 = vcombine.low %v32_v19, %v36_v20  ;;  %v1954_v34 = vcombine.low %v33_v23, %v37_v24  ;;  %v92_v15 = vld [vmem:[%s3071_s1 + $0x230] sm:$0xff] }
  0x6a   :  { %1660 = vmatpush1.bf16.msra.mxu0 %v2140_v28  ;;  %1742 = vmatpush1.bf16.msra.mxu1 %v2142_v29  ;;  %v1955_v28 = vcombine.high %v33_v23, %v37_v24  ;;  %v40_v29 = vld [vmem:[%s3071_s1 + $0x90] sm:$0xff] }
  0x6b   :  { %1661 = vmatprep.subr.bf16.mxu0 %v2149_v30  ;;  %1743 = vmatprep.subr.bf16.mxu1 %v2151_v31  ;;  %v44_v30 = vld [vmem:[%s3071_s1 + $0xb0] sm:$0xff]  ;;  %v41_v31 = vld [vmem:[%s3071_s1 + $0x98] sm:$0xff] }
  0x6c   :  { %v1961_v35 = vcombine.high %v40_v29, %v44_v30  ;;  %v1960_v41 = vcombine.low %v40_v29, %v44_v30  ;;  %v1962_v42 = vcombine.low %v41_v31, %v45_v32  ;;  %v96_v24 = vld [vmem:[%s3071_s1 + $0x250] sm:$0xff] }
  0x6e   :  { %1662 = vmatpush1.bf16.msra.mxu0 %v2148_v36  ;;  %1744 = vmatpush1.bf16.msra.mxu1 %v2150_v37  ;;  %v1963_v36 = vcombine.high %v41_v31, %v45_v32  ;;  %v48_v37 = vld [vmem:[%s3071_s1 + $0xd0] sm:$0xff] }
  0x6f   :  { %1663 = vmatprep.subr.bf16.mxu0 %v2157_v38  ;;  %1745 = vmatprep.subr.bf16.mxu1 %v2159_v39  ;;  %v52_v38 = vld [vmem:[%s3071_s1 + $0xf0] sm:$0xff]  ;;  %v49_v39 = vld [vmem:[%s3071_s1 + $0xd8] sm:$0xff] }
  0x70   :  { %v1969_v43 = vcombine.high %v48_v37, %v52_v38  ;;  %v1968_v48 = vcombine.low %v48_v37, %v52_v38  ;;  %v1970_v49 = vcombine.low %v49_v39, %v53_v40  ;;  %v104_v32 = vld [vmem:[%s3071_s1 + $0x290] sm:$0xff] }
  0x72   :  { %1664 = vmatpush1.bf16.msra.mxu0 %v2156_v44  ;;  %1746 = vmatpush1.bf16.msra.mxu1 %v2158_v45  ;;  %v1971_v44 = vcombine.high %v49_v39, %v53_v40  ;;  %v56_v45 = vld [vmem:[%s3071_s1 + $0x110] sm:$0xff] }
  0x73   :  { %1665 = vmatprep.subr.bf16.mxu0 %v2165_v46  ;;  %1747 = vmatprep.subr.bf16.mxu1 %v2167_v47  ;;  %v60_v46 = vld [vmem:[%s3071_s1 + $0x130] sm:$0xff]  ;;  %v61_v47 = vld [vmem:[%s3071_s1 + $0x138] sm:$0xff] }
  0x74   :  { %v1977_v50 = vcombine.high %v56_v45, %v60_v46  ;;  %v1976_v56 = vcombine.low %v56_v45, %v60_v46  ;;  %v112_v40 = vld [vmem:[%s3071_s1 + $0x2d0] sm:$0xff] }
  0x76   :  { %1666 = vmatpush1.bf16.msra.mxu0 %v2164_v52  ;;  %1748 = vmatpush1.bf16.msra.mxu1 %v2166_v53  ;;  %v64_v52 = vld [vmem:[%s3071_s1 + $0x150] sm:$0xff] }
  0x77   :  { %1667 = vmatprep.subr.bf16.mxu0 %v2173_v54  ;;  %1749 = vmatprep.subr.bf16.mxu1 %v2175_v55  ;;  %v68_v53 = vld [vmem:[%s3071_s1 + $0x170] sm:$0xff]  ;;  %v65_v54 = vld [vmem:[%s3071_s1 + $0x158] sm:$0xff] }
  0x78   :  { %v69_v55 = vld [vmem:[%s3071_s1 + $0x178] sm:$0xff]  ;;  %v1985_v59 = vcombine.high %v64_v52, %v68_v53  ;;  %v1984_v1 = vcombine.low %v64_v52, %v68_v53 }
  0x79   :  { %v1987_v60 = vcombine.high %v65_v54, %v69_v55  ;;  %v1986_v2 = vcombine.low %v65_v54, %v69_v55  ;;  %v128_v55 = vld [vmem:[%s3071_s1 + $0x350] sm:$0xff] }
  0x7a   :  { %1668 = vmatpush1.bf16.msra.mxu0 %v2172_v61  ;;  %1750 = vmatpush1.bf16.msra.mxu1 %v2174_v62  ;;  %v72_v61 = vld [vmem:[%s3071_s1 + $0x190] sm:$0xff] }
  0x7b   :  { %1669 = vmatprep.subr.bf16.mxu0 %v2181_v63  ;;  %1751 = vmatprep.subr.bf16.mxu1 %v2183_v0  ;;  %v76_v62 = vld [vmem:[%s3071_s1 + $0x1b0] sm:$0xff]  ;;  %v73_v63 = vld [vmem:[%s3071_s1 + $0x198] sm:$0xff] }
  0x7c   :  { %v77_v0 = vld [vmem:[%s3071_s1 + $0x1b8] sm:$0xff]  ;;  %v1993_v3 = vcombine.high %v72_v61, %v76_v62  ;;  %v1992_v9 = vcombine.low %v72_v61, %v76_v62 }
  0x7d   :  { %v1995_v4 = vcombine.high %v73_v63, %v77_v0  ;;  %v1994_v10 = vcombine.low %v73_v63, %v77_v0  ;;  %v136_v0 = vld [vmem:[%s3071_s1 + $0x390] sm:$0xff] }
  0x7e   :  { %1670 = vmatpush1.bf16.msra.mxu0 %v2180_v5  ;;  %1752 = vmatpush1.bf16.msra.mxu1 %v2182_v6  ;;  %v80_v5 = vld [vmem:[%s3071_s1 + $0x1d0] sm:$0xff] }
  0x7f   :  { %1671 = vmatprep.subr.bf16.mxu0 %v2189_v7  ;;  %1753 = vmatprep.subr.bf16.mxu1 %v2191_v8  ;;  %v84_v6 = vld [vmem:[%s3071_s1 + $0x1f0] sm:$0xff]  ;;  %v81_v7 = vld [vmem:[%s3071_s1 + $0x1d8] sm:$0xff] }
  0x80   :  { %v85_v8 = vld [vmem:[%s3071_s1 + $0x1f8] sm:$0xff]  ;;  %v2001_v11 = vcombine.high %v80_v5, %v84_v6 }
  0x81   :  { %v2003_v13 = vcombine.high %v81_v7, %v85_v8  ;;  %v2002_v19 = vcombine.low %v81_v7, %v85_v8  ;;  %v144_v8 = vld [vmem:[%s3071_s1 + $0x3d0] sm:$0xff] }
  0x82   :  { %1672 = vmatpush1.bf16.msra.mxu0 %v2188_v14  ;;  %1754 = vmatpush1.bf16.msra.mxu1 %v2190_v16  ;;  %v88_v14 = vld [vmem:[%s3071_s1 + $0x210] sm:$0xff]  ;;  %v89_v16 = vld [vmem:[%s3071_s1 + $0x218] sm:$0xff] }
  0x83   :  { %1764 = vmatprep.subr.bf16.mxu0 %v1945_v17  ;;  %1846 = vmatprep.subr.bf16.mxu1 %v1947_v18  ;;  %v93_v17 = vld [vmem:[%s3071_s1 + $0x238] sm:$0xff]  ;;  %v2000_v18 = vcombine.low %v80_v5, %v84_v6  ;;  %v2009_v20 = vcombine.high %v88_v14, %v92_v15 }
  0x84   :  { %v2011_v23 = vcombine.high %v89_v16, %v93_v17  ;;  %v2010_v29 = vcombine.low %v89_v16, %v93_v17  ;;  %v152_v17 = vld [vmem:[%s3071_s1 + $0x410] sm:$0xff] }
  0x85   :  { %1674 = vmatmul.mubr.bf16.vlgmr.msra.gmra.mrb[0].mxu0 %v2666_v21  ;;  %1756 = vmatmul.mubr.bf16.vlgmr.msra.gmra.mrb[0].mxu1 %v2666_v21 }
  0x86   :  { %1765 = vmatpush1.bf16.msra.mxu0 %v1944_v25  ;;  %1847 = vmatpush1.bf16.msra.mxu1 %v1946_v26  ;;  %v100_v25 = vld [vmem:[%s3071_s1 + $0x270] sm:$0xff]  ;;  %v97_v26 = vld [vmem:[%s3071_s1 + $0x258] sm:$0xff] }
  0x87   :  { %1766 = vmatprep.subr.bf16.mxu0 %v1953_v27  ;;  %1848 = vmatprep.subr.bf16.mxu1 %v1955_v28  ;;  %v101_v27 = vld [vmem:[%s3071_s1 + $0x278] sm:$0xff]  ;;  %v2008_v28 = vcombine.low %v88_v14, %v92_v15  ;;  %v2017_v30 = vcombine.high %v96_v24, %v100_v25 }
  0x88   :  { %1796 = vmatprep.mubr.bf16.mxu0 %v2333_v57  ;;  %1878 = vmatprep.mubr.bf16.mxu1 %v2333_v57  ;;  %v57_v57 = vld [vmem:[%s3071_s1 + $0x118] sm:$0xff]  ;;  %v2019_v31 = vcombine.high %v97_v26, %v101_v27  ;;  %v2018_v37 = vcombine.low %v97_v26, %v101_v27  ;;  %v160_v27 = vld [vmem:[%s3071_s1 + $0x450] sm:$0xff] }
  0x89   :  { %v1979_v51 = vcombine.high %v57_v57, %v61_v47  ;;  %v1978_v58 = vcombine.low %v57_v57, %v61_v47  ;;  %v120_v47 = vld [vmem:[%s3071_s1 + $0x310] sm:$0xff] }
  0x8a   :  { %1767 = vmatpush1.bf16.msra.mxu0 %v1952_v33  ;;  %1849 = vmatpush1.bf16.msra.mxu1 %v1954_v34  ;;  %v108_v33 = vld [vmem:[%s3071_s1 + $0x2b0] sm:$0xff]  ;;  %v105_v34 = vld [vmem:[%s3071_s1 + $0x298] sm:$0xff] }
  0x8b   :  { %1768 = vmatprep.subr.bf16.mxu0 %v1961_v35  ;;  %1850 = vmatprep.subr.bf16.mxu1 %v1963_v36  ;;  %v109_v35 = vld [vmem:[%s3071_s1 + $0x2b8] sm:$0xff]  ;;  %v2016_v36 = vcombine.low %v96_v24, %v100_v25  ;;  %v2025_v38 = vcombine.high %v104_v32, %v108_v33 }
  0x8c   :  { %v2027_v39 = vcombine.high %v105_v34, %v109_v35  ;;  %v2026_v45 = vcombine.low %v105_v34, %v109_v35  ;;  %v168_v35 = vld [vmem:[%s3071_s1 + $0x490] sm:$0xff] }
  0x8e   :  { %1769 = vmatpush1.bf16.msra.mxu0 %v1960_v41  ;;  %1851 = vmatpush1.bf16.msra.mxu1 %v1962_v42  ;;  %v116_v41 = vld [vmem:[%s3071_s1 + $0x2f0] sm:$0xff]  ;;  %v113_v42 = vld [vmem:[%s3071_s1 + $0x2d8] sm:$0xff] }
  0x8f   :  { %1770 = vmatprep.subr.bf16.mxu0 %v1969_v43  ;;  %1852 = vmatprep.subr.bf16.mxu1 %v1971_v44  ;;  %v117_v43 = vld [vmem:[%s3071_s1 + $0x2f8] sm:$0xff]  ;;  %v2024_v44 = vcombine.low %v104_v32, %v108_v33  ;;  %v2033_v46 = vcombine.high %v112_v40, %v116_v41 }
  0x90   :  { %v2035_v57 = vcombine.high %v113_v42, %v117_v43  ;;  %v2034_v52 = vcombine.low %v113_v42, %v117_v43  ;;  %v176_v43 = vld [vmem:[%s3071_s1 + $0x4d0] sm:$0xff] }
  0x92   :  { %1771 = vmatpush1.bf16.msra.mxu0 %v1968_v48  ;;  %1853 = vmatpush1.bf16.msra.mxu1 %v1970_v49  ;;  %v124_v48 = vld [vmem:[%s3071_s1 + $0x330] sm:$0xff]  ;;  %v121_v49 = vld [vmem:[%s3071_s1 + $0x318] sm:$0xff] }
  0x93   :  { %1772 = vmatprep.subr.bf16.mxu0 %v1977_v50  ;;  %1854 = vmatprep.subr.bf16.mxu1 %v1979_v51  ;;  %v125_v50 = vld [vmem:[%s3071_s1 + $0x338] sm:$0xff]  ;;  %v2032_v51 = vcombine.low %v112_v40, %v116_v41  ;;  %v2041_v53 = vcombine.high %v120_v47, %v124_v48 }
  0x94   :  { %v2043_v54 = vcombine.high %v121_v49, %v125_v50  ;;  %v2042_v61 = vcombine.low %v121_v49, %v125_v50  ;;  %v184_v49 = vld [vmem:[%s3071_s1 + $0x510] sm:$0xff] }
  0x95   :  { %v188_v50 = vld [vmem:[%s3071_s1 + $0x530] sm:$0xff] }
  0x96   :  { %1773 = vmatpush1.bf16.msra.mxu0 %v1976_v56  ;;  %1855 = vmatpush1.bf16.msra.mxu1 %v1978_v58  ;;  %v132_v56 = vld [vmem:[%s3071_s1 + $0x370] sm:$0xff]  ;;  %v129_v58 = vld [vmem:[%s3071_s1 + $0x358] sm:$0xff] }
  0x97   :  { %1774 = vmatprep.subr.bf16.mxu0 %v1985_v59  ;;  %1856 = vmatprep.subr.bf16.mxu1 %v1987_v60  ;;  %v133_v59 = vld [vmem:[%s3071_s1 + $0x378] sm:$0xff]  ;;  %v2040_v60 = vcombine.low %v120_v47, %v124_v48  ;;  %v2049_v62 = vcombine.high %v128_v55, %v132_v56 }
  0x98   :  { %v2051_v63 = vcombine.high %v129_v58, %v133_v59  ;;  %v2050_v5 = vcombine.low %v129_v58, %v133_v59  ;;  %v196_v58 = vld [vmem:[%s3071_s1 + $0x570] sm:$0xff]  ;;  %v193_v59 = vld [vmem:[%s3071_s1 + $0x558] sm:$0xff] }
  0x9a   :  { %1775 = vmatpush1.bf16.msra.mxu0 %v1984_v1  ;;  %1857 = vmatpush1.bf16.msra.mxu1 %v1986_v2  ;;  %v140_v1 = vld [vmem:[%s3071_s1 + $0x3b0] sm:$0xff]  ;;  %v137_v2 = vld [vmem:[%s3071_s1 + $0x398] sm:$0xff] }
  0x9b   :  { %1776 = vmatprep.subr.bf16.mxu0 %v1993_v3  ;;  %1858 = vmatprep.subr.bf16.mxu1 %v1995_v4  ;;  %v141_v3 = vld [vmem:[%s3071_s1 + $0x3b8] sm:$0xff]  ;;  %v2048_v4 = vcombine.low %v128_v55, %v132_v56  ;;  %v2057_v6 = vcombine.high %v136_v0, %v140_v1  ;;  %v192_v56 = vld [vmem:[%s3071_s1 + $0x550] sm:$0xff] }
  0x9c   :  { %v2059_v7 = vcombine.high %v137_v2, %v141_v3  ;;  %v2058_v14 = vcombine.low %v137_v2, %v141_v3  ;;  %v204_v2 = vld [vmem:[%s3071_s1 + $0x5b0] sm:$0xff]  ;;  %v201_v3 = vld [vmem:[%s3071_s1 + $0x598] sm:$0xff] }
  0x9e   :  { %1777 = vmatpush1.bf16.msra.mxu0 %v1992_v9  ;;  %1859 = vmatpush1.bf16.msra.mxu1 %v1994_v10  ;;  %v148_v9 = vld [vmem:[%s3071_s1 + $0x3f0] sm:$0xff]  ;;  %v145_v10 = vld [vmem:[%s3071_s1 + $0x3d8] sm:$0xff] }
  0x9f   :  { %1778 = vmatprep.subr.bf16.mxu0 %v2001_v11  ;;  %1860 = vmatprep.subr.bf16.mxu1 %v2003_v13  ;;  %v149_v11 = vld [vmem:[%s3071_s1 + $0x3f8] sm:$0xff]  ;;  %v2056_v13 = vcombine.low %v136_v0, %v140_v1  ;;  %v2065_v15 = vcombine.high %v144_v8, %v148_v9  ;;  %v200_v1 = vld [vmem:[%s3071_s1 + $0x590] sm:$0xff] }
  0xa0   :  { %v2067_v16 = vcombine.high %v145_v10, %v149_v11  ;;  %v2066_v24 = vcombine.low %v145_v10, %v149_v11  ;;  %v212_v10 = vld [vmem:[%s3071_s1 + $0x5f0] sm:$0xff]  ;;  %v209_v11 = vld [vmem:[%s3071_s1 + $0x5d8] sm:$0xff] }
  0xa2   :  { %1779 = vmatpush1.bf16.msra.mxu0 %v2000_v18  ;;  %1861 = vmatpush1.bf16.msra.mxu1 %v2002_v19  ;;  %v156_v18 = vld [vmem:[%s3071_s1 + $0x430] sm:$0xff]  ;;  %v153_v19 = vld [vmem:[%s3071_s1 + $0x418] sm:$0xff] }
  0xa3   :  { %1780 = vmatprep.subr.bf16.mxu0 %v2009_v20  ;;  %1862 = vmatprep.subr.bf16.mxu1 %v2011_v23  ;;  %v157_v20 = vld [vmem:[%s3071_s1 + $0x438] sm:$0xff]  ;;  %v2064_v23 = vcombine.low %v144_v8, %v148_v9  ;;  %v2073_v25 = vcombine.high %v152_v17, %v156_v18  ;;  %v208_v9 = vld [vmem:[%s3071_s1 + $0x5d0] sm:$0xff] }
  0xa4   :  { %v2075_v26 = vcombine.high %v153_v19, %v157_v20  ;;  %v2074_v32 = vcombine.low %v153_v19, %v157_v20  ;;  %v220_v19 = vld [vmem:[%s3071_s1 + $0x630] sm:$0xff]  ;;  %v217_v20 = vld [vmem:[%s3071_s1 + $0x618] sm:$0xff] }
  0xa6   :  { %1781 = vmatpush1.bf16.msra.mxu0 %v2008_v28  ;;  %1863 = vmatpush1.bf16.msra.mxu1 %v2010_v29  ;;  %v164_v28 = vld [vmem:[%s3071_s1 + $0x470] sm:$0xff]  ;;  %v161_v29 = vld [vmem:[%s3071_s1 + $0x458] sm:$0xff] }
  0xa7   :  { %1782 = vmatprep.subr.bf16.mxu0 %v2017_v30  ;;  %1864 = vmatprep.subr.bf16.mxu1 %v2019_v31  ;;  %v165_v30 = vld [vmem:[%s3071_s1 + $0x478] sm:$0xff]  ;;  %v2072_v31 = vcombine.low %v152_v17, %v156_v18  ;;  %v2081_v33 = vcombine.high %v160_v27, %v164_v28  ;;  %v216_v18 = vld [vmem:[%s3071_s1 + $0x610] sm:$0xff] }
  0xa8   :  { %v2083_v34 = vcombine.high %v161_v29, %v165_v30  ;;  %v2082_v40 = vcombine.low %v161_v29, %v165_v30  ;;  %v228_v29 = vld [vmem:[%s3071_s1 + $0x670] sm:$0xff]  ;;  %v225_v30 = vld [vmem:[%s3071_s1 + $0x658] sm:$0xff] }
  0xaa   :  { %1783 = vmatpush1.bf16.msra.mxu0 %v2016_v36  ;;  %1865 = vmatpush1.bf16.msra.mxu1 %v2018_v37  ;;  %v172_v36 = vld [vmem:[%s3071_s1 + $0x4b0] sm:$0xff]  ;;  %v169_v37 = vld [vmem:[%s3071_s1 + $0x498] sm:$0xff] }
  0xab   :  { %1784 = vmatprep.subr.bf16.mxu0 %v2025_v38  ;;  %1866 = vmatprep.subr.bf16.mxu1 %v2027_v39  ;;  %v173_v38 = vld [vmem:[%s3071_s1 + $0x4b8] sm:$0xff]  ;;  %v2080_v39 = vcombine.low %v160_v27, %v164_v28  ;;  %v2089_v41 = vcombine.high %v168_v35, %v172_v36  ;;  %v224_v28 = vld [vmem:[%s3071_s1 + $0x650] sm:$0xff] }
  0xac   :  { %v2091_v42 = vcombine.high %v169_v37, %v173_v38 }
  0xae   :  { %1785 = vmatpush1.bf16.msra.mxu0 %v2024_v44  ;;  %1867 = vmatpush1.bf16.msra.mxu1 %v2026_v45  ;;  %v180_v44 = vld [vmem:[%s3071_s1 + $0x4f0] sm:$0xff]  ;;  %v181_v45 = vld [vmem:[%s3071_s1 + $0x4f8] sm:$0xff] }
  0xaf   :  { %1786 = vmatprep.subr.bf16.mxu0 %v2033_v46  ;;  %1868 = vmatprep.subr.bf16.mxu1 %v2035_v57  ;;  %v2088_v46 = vcombine.low %v168_v35, %v172_v36  ;;  %v2090_v57 = vcombine.low %v169_v37, %v173_v38  ;;  %v2097_v47 = vcombine.high %v176_v43, %v180_v44  ;;  %v232_v36 = vld [vmem:[%s3071_s1 + $0x690] sm:$0xff]  ;;  %v233_v38 = vld [vmem:[%s3071_s1 + $0x698] sm:$0xff] }
  0xb0   :  { %v236_v37 = vld [vmem:[%s3071_s1 + $0x6b0] sm:$0xff] }
  0xb2   :  { %1787 = vmatpush1.bf16.msra.mxu0 %v2032_v51  ;;  %1869 = vmatpush1.bf16.msra.mxu1 %v2034_v52  ;;  %v189_v51 = vld [vmem:[%s3071_s1 + $0x538] sm:$0xff]  ;;  %v2096_v52 = vcombine.low %v176_v43, %v180_v44  ;;  %v240_v44 = vld [vmem:[%s3071_s1 + $0x6d0] sm:$0xff] }
  0xb3   :  { %1788 = vmatprep.subr.bf16.mxu0 %v2041_v53  ;;  %1870 = vmatprep.subr.bf16.mxu1 %v2043_v54  ;;  %v2105_v54 = vcombine.high %v184_v49, %v188_v50 }
  0xb6   :  { %1789 = vmatpush1.bf16.msra.mxu0 %v2040_v60  ;;  %1871 = vmatpush1.bf16.msra.mxu1 %v2042_v61  ;;  %v197_v60 = vld [vmem:[%s3071_s1 + $0x578] sm:$0xff]  ;;  %v2104_v61 = vcombine.low %v184_v49, %v188_v50  ;;  %v248_v50 = vld [vmem:[%s3071_s1 + $0x710] sm:$0xff] }
  0xb7   :  { %1790 = vmatprep.subr.bf16.mxu0 %v2049_v62  ;;  %1872 = vmatprep.subr.bf16.mxu1 %v2051_v63  ;;  %v2113_v63 = vcombine.high %v192_v56, %v196_v58  ;;  %v2115_v0 = vcombine.high %v193_v59, %v197_v60 }
  0xba   :  { %1791 = vmatpush1.bf16.msra.mxu0 %v2048_v4  ;;  %1873 = vmatpush1.bf16.msra.mxu1 %v2050_v5  ;;  %v205_v4 = vld [vmem:[%s3071_s1 + $0x5b8] sm:$0xff]  ;;  %v2112_v5 = vcombine.low %v192_v56, %v196_v58  ;;  %v256_v58 = vld [vmem:[%s3071_s1 + $0x750] sm:$0xff] }
  0xbb   :  { %1792 = vmatprep.subr.bf16.mxu0 %v2057_v6  ;;  %1874 = vmatprep.subr.bf16.mxu1 %v2059_v7  ;;  %v2114_v6 = vcombine.low %v193_v59, %v197_v60  ;;  %v2121_v7 = vcombine.high %v200_v1, %v204_v2  ;;  %v2123_v8 = vcombine.high %v201_v3, %v205_v4  ;;  %v260_v59 = vld [vmem:[%s3071_s1 + $0x770] sm:$0xff]  ;;  %v257_v60 = vld [vmem:[%s3071_s1 + $0x758] sm:$0xff] }
  0xbe   :  { %1793 = vmatpush1.bf16.msra.mxu0 %v2056_v13  ;;  %1875 = vmatpush1.bf16.msra.mxu1 %v2058_v14  ;;  %v213_v13 = vld [vmem:[%s3071_s1 + $0x5f8] sm:$0xff]  ;;  %v2120_v14 = vcombine.low %v200_v1, %v204_v2  ;;  %v264_v2 = vld [vmem:[%s3071_s1 + $0x790] sm:$0xff] }
  0xbf   :  { %1794 = vmatprep.subr.bf16.mxu0 %v2065_v15  ;;  %1876 = vmatprep.subr.bf16.mxu1 %v2067_v16  ;;  %v2122_v15 = vcombine.low %v201_v3, %v205_v4  ;;  %v2129_v16 = vcombine.high %v208_v9, %v212_v10  ;;  %v2131_v17 = vcombine.high %v209_v11, %v213_v13  ;;  %v268_v3 = vld [vmem:[%s3071_s1 + $0x7b0] sm:$0xff]  ;;  %v265_v4 = vld [vmem:[%s3071_s1 + $0x798] sm:$0xff] }
  0xc2   :  { %1795 = vmatpush1.bf16.msra.mxu0 %v2064_v23  ;;  %1877 = vmatpush1.bf16.msra.mxu1 %v2066_v24  ;;  %v221_v23 = vld [vmem:[%s3071_s1 + $0x638] sm:$0xff]  ;;  %v2128_v24 = vcombine.low %v208_v9, %v212_v10  ;;  %v272_v10 = vld [vmem:[%s3071_s1 + $0x7d0] sm:$0xff] }
  0xc3   :  { %1805 = vmatprep.subr.bf16.mxu0 %v2073_v25  ;;  %1887 = vmatprep.subr.bf16.mxu1 %v2075_v26  ;;  %v2130_v25 = vcombine.low %v209_v11, %v213_v13  ;;  %v2137_v26 = vcombine.high %v216_v18, %v220_v19  ;;  %v2139_v27 = vcombine.high %v217_v20, %v221_v23  ;;  %v276_v11 = vld [vmem:[%s3071_s1 + $0x7f0] sm:$0xff]  ;;  %v273_v13 = vld [vmem:[%s3071_s1 + $0x7d8] sm:$0xff] }
  0xc5   :  { %1797 = vmatmul.mubr.bf16.vlgmr.msra.gmra.mrb[4].mxu0 %v2460_v12  ;;  %1879 = vmatmul.mubr.bf16.vlgmr.msra.gmra.mrb[4].mxu1 %v2460_v12  ;;  %v177_v12 = vld [vmem:[%s3071_s1 + $0x4d8] sm:$0xff] }
  0xc6   :  { %1806 = vmatpush1.bf16.msra.mxu0 %v2072_v31  ;;  %1888 = vmatpush1.bf16.msra.mxu1 %v2074_v32  ;;  %v2099_v48 = vcombine.high %v177_v12, %v181_v45  ;;  %v2098_v53 = vcombine.low %v177_v12, %v181_v45  ;;  %v229_v31 = vld [vmem:[%s3071_s1 + $0x678] sm:$0xff]  ;;  %v2136_v32 = vcombine.low %v216_v18, %v220_v19  ;;  %v244_v12 = vld [vmem:[%s3071_s1 + $0x6f0] sm:$0xff] }
  0xc7   :  { %1807 = vmatprep.subr.bf16.mxu0 %v2081_v33  ;;  %1889 = vmatprep.subr.bf16.mxu1 %v2083_v34  ;;  %v2138_v33 = vcombine.low %v217_v20, %v221_v23  ;;  %v2145_v34 = vcombine.high %v224_v28, %v228_v29  ;;  %v2147_v35 = vcombine.high %v225_v30, %v229_v31  ;;  %v241_v45 = vld [vmem:[%s3071_s1 + $0x6d8] sm:$0xff]  ;;  %v280_v23 = vlaneseq }
  0xc8   :  { %1837 = vmatprep.mubr.bf16.mxu0 %v2477_v22  ;;  %1919 = vmatprep.mubr.bf16.mxu1 %v2477_v22  ;;  %v185_v22 = vld [vmem:[%s3071_s1 + $0x518] sm:$0xff]  ;;  %v2192_v19 = vcombine.low %v272_v10, %v276_v11 }
  0xc9   :  { %v2107_v55 = vcombine.high %v185_v22, %v189_v51  ;;  %v2106_v62 = vcombine.low %v185_v22, %v189_v51  ;;  %v252_v22 = vld [vmem:[%s3071_s1 + $0x730] sm:$0xff]  ;;  %v249_v51 = vld [vmem:[%s3071_s1 + $0x718] sm:$0xff] }
  0xca   :  { %1808 = vmatpush1.bf16.msra.mxu0 %v2080_v39  ;;  %1890 = vmatpush1.bf16.msra.mxu1 %v2082_v40  ;;  %v237_v39 = vld [vmem:[%s3071_s1 + $0x6b8] sm:$0xff]  ;;  %v2144_v40 = vcombine.low %v224_v28, %v228_v29 }
  0xcb   :  { %1809 = vmatprep.subr.bf16.mxu0 %v2089_v41  ;;  %1891 = vmatprep.subr.bf16.mxu1 %v2091_v42  ;;  %v2146_v41 = vcombine.low %v225_v30, %v229_v31  ;;  %v2153_v42 = vcombine.high %v232_v36, %v236_v37  ;;  %v2155_v43 = vcombine.high %v233_v38, %v237_v39 }
  0xce   :  { %1810 = vmatpush1.bf16.msra.mxu0 %v2088_v46  ;;  %1892 = vmatpush1.bf16.msra.mxu1 %v2090_v57  ;;  %v245_v46 = vld [vmem:[%s3071_s1 + $0x6f8] sm:$0xff]  ;;  %v2152_v57 = vcombine.low %v232_v36, %v236_v37 }
  0xcf   :  { %1811 = vmatprep.subr.bf16.mxu0 %v2097_v47  ;;  %1893 = vmatprep.subr.bf16.mxu1 %v2099_v48  ;;  %v2154_v47 = vcombine.low %v233_v38, %v237_v39  ;;  %v2161_v48 = vcombine.high %v240_v44, %v244_v12  ;;  %v2163_v49 = vcombine.high %v241_v45, %v245_v46 }
  0xd2   :  { %1812 = vmatpush1.bf16.msra.mxu0 %v2096_v52  ;;  %1894 = vmatpush1.bf16.msra.mxu1 %v2098_v53  ;;  %v253_v52 = vld [vmem:[%s3071_s1 + $0x738] sm:$0xff]  ;;  %v2160_v53 = vcombine.low %v240_v44, %v244_v12 }
  0xd3   :  { %1813 = vmatprep.subr.bf16.mxu0 %v2105_v54  ;;  %1895 = vmatprep.subr.bf16.mxu1 %v2107_v55  ;;  %v2162_v54 = vcombine.low %v241_v45, %v245_v46  ;;  %v2169_v55 = vcombine.high %v248_v50, %v252_v22  ;;  %v2171_v56 = vcombine.high %v249_v51, %v253_v52 }
  0xd6   :  { %1814 = vmatpush1.bf16.msra.mxu0 %v2104_v61  ;;  %1896 = vmatpush1.bf16.msra.mxu1 %v2106_v62  ;;  %v261_v61 = vld [vmem:[%s3071_s1 + $0x778] sm:$0xff]  ;;  %v2168_v62 = vcombine.low %v248_v50, %v252_v22 }
  0xd7   :  { %1815 = vmatprep.subr.bf16.mxu0 %v2113_v63  ;;  %1897 = vmatprep.subr.bf16.mxu1 %v2115_v0  ;;  %v2170_v63 = vcombine.low %v249_v51, %v253_v52  ;;  %v2177_v0 = vcombine.high %v256_v58, %v260_v59  ;;  %v2179_v1 = vcombine.high %v257_v60, %v261_v61 }
  0xda   :  { %1816 = vmatpush1.bf16.msra.mxu0 %v2112_v5  ;;  %1898 = vmatpush1.bf16.msra.mxu1 %v2114_v6  ;;  %v269_v5 = vld [vmem:[%s3071_s1 + $0x7b8] sm:$0xff]  ;;  %v2176_v6 = vcombine.low %v256_v58, %v260_v59 }
  0xdb   :  { %1817 = vmatprep.subr.bf16.mxu0 %v2121_v7  ;;  %1899 = vmatprep.subr.bf16.mxu1 %v2123_v8  ;;  %v2178_v7 = vcombine.low %v257_v60, %v261_v61  ;;  %v2185_v8 = vcombine.high %v264_v2, %v268_v3  ;;  %v2187_v9 = vcombine.high %v265_v4, %v269_v5 }
  0xde   :  { %1818 = vmatpush1.bf16.msra.mxu0 %v2120_v14  ;;  %1900 = vmatpush1.bf16.msra.mxu1 %v2122_v15  ;;  %v277_v14 = vld [vmem:[%s3071_s1 + $0x7f8] sm:$0xff]  ;;  %v2184_v15 = vcombine.low %v264_v2, %v268_v3 }
  0xdf   :  { %1819 = vmatprep.subr.bf16.mxu0 %v2129_v16  ;;  %1901 = vmatprep.subr.bf16.mxu1 %v2131_v17  ;;  %v2186_v16 = vcombine.low %v265_v4, %v269_v5  ;;  %v2193_v17 = vcombine.high %v272_v10, %v276_v11  ;;  %v2195_v18 = vcombine.high %v273_v13, %v277_v14 }
  0xe0   :  { %v2194_v20 = vcombine.low %v273_v13, %v277_v14 }
  0xe2   :  { %1820 = vmatpush1.bf16.msra.mxu0 %v2128_v24  ;;  %1902 = vmatpush1.bf16.msra.mxu1 %v2130_v25  ;;  %v281_v24 = vshrl.u32 %v280_v23, 7 }
  0xe3   :  { %1821 = vmatprep.subr.bf16.mxu0 %v2137_v26  ;;  %1903 = vmatprep.subr.bf16.mxu1 %v2139_v27  ;;  %v278_v26 = vld [vmem:[%s3073_s2] sm:$0xff] }
  0xe4   :  { %v282_v25 = vsub.s32 0, %v281_v24  ;;  %v290_v27 = vsub.s32 2, %v281_v24  ;;  %v286_v28 = vsub.s32 1, %v281_v24  ;;  %v294_v29 = vsub.s32 3, %v281_v24 }
  0xe5   :  { %v298_v12 = vsub.s32 4, %v281_v24  ;;  %v306_v45 = vsub.s32 6, %v281_v24  ;;  %v302_v46 = vsub.s32 5, %v281_v24 }
  0xe6   :  { %1822 = vmatpush1.bf16.msra.mxu0 %v2136_v32  ;;  %1904 = vmatpush1.bf16.msra.mxu1 %v2138_v33  ;;  %v283_v30 = vrot.slane %v278_v26, %v282_v25  ;;  %v291_v31 = vrot.slane %v278_v26, %v290_v27  ;;  %v287_v32 = vrot.slane %v278_v26, %v286_v28 }
  0xe7   :  { %1823 = vmatprep.subr.bf16.mxu0 %v2145_v34  ;;  %1905 = vmatprep.subr.bf16.mxu1 %v2147_v35  ;;  %v295_v33 = vrot.slane %v278_v26, %v294_v29 }
  0xea   :  { %1824 = vmatpush1.bf16.msra.mxu0 %v2144_v40  ;;  %1906 = vmatpush1.bf16.msra.mxu1 %v2146_v41 }
  0xeb   :  { %1825 = vmatprep.subr.bf16.mxu0 %v2153_v42  ;;  %1907 = vmatprep.subr.bf16.mxu1 %v2155_v43 }
  0xee   :  { %1826 = vmatpush1.bf16.msra.mxu0 %v2152_v57  ;;  %1908 = vmatpush1.bf16.msra.mxu1 %v2154_v47  ;;  %v310_v57 = vsub.s32 7, %v281_v24  ;;  %v299_v47 = vrot.slane %v278_v26, %v298_v12 }
  0xef   :  { %1827 = vmatprep.subr.bf16.mxu0 %v2161_v48  ;;  %1909 = vmatprep.subr.bf16.mxu1 %v2163_v49  ;;  %v307_v48 = vrot.slane %v278_v26, %v306_v45  ;;  %v303_v49 = vrot.slane %v278_v26, %v302_v46 }
  0xf0   :  { %v311_v50 = vrot.slane %v278_v26, %v310_v57 }
  0xf2   :  { %1828 = vmatpush1.bf16.msra.mxu0 %v2160_v53  ;;  %1910 = vmatpush1.bf16.msra.mxu1 %v2162_v54 }
  0xf3   :  { %1829 = vmatprep.subr.bf16.mxu0 %v2169_v55  ;;  %1911 = vmatprep.subr.bf16.mxu1 %v2171_v56 }
  0xf6   :  { %1830 = vmatpush1.bf16.msra.mxu0 %v2168_v62  ;;  %1912 = vmatpush1.bf16.msra.mxu1 %v2170_v63 }
  0xf7   :  { %1831 = vmatprep.subr.bf16.mxu0 %v2177_v0  ;;  %1913 = vmatprep.subr.bf16.mxu1 %v2179_v1 }
  0xfa   :  { %1832 = vmatpush1.bf16.msra.mxu0 %v2176_v6  ;;  %1914 = vmatpush1.bf16.msra.mxu1 %v2178_v7 }
  0xfb   :  { %1833 = vmatprep.subr.bf16.mxu0 %v2185_v8  ;;  %1915 = vmatprep.subr.bf16.mxu1 %v2187_v9 }
  0xfe   :  { %1834 = vmatpush1.bf16.msra.mxu0 %v2184_v15  ;;  %1916 = vmatpush1.bf16.msra.mxu1 %v2186_v16 }
  0xff   :  { %1835 = vmatprep.subr.bf16.mxu0 %v2193_v17  ;;  %1917 = vmatprep.subr.bf16.mxu1 %v2195_v18 }
 0x102   :  { %1836 = vmatpush1.bf16.msra.mxu0 %v2192_v19  ;;  %1918 = vmatpush1.bf16.msra.mxu1 %v2194_v20 }
 0x105   :  { %1838 = vmatmul.mubr.bf16.vlgmr.msra.gmra.mrb[4].mxu0 %v2666_v21  ;;  %1920 = vmatmul.mubr.bf16.vlgmr.msra.gmra.mrb[4].mxu1 %v2666_v21 }
 0x158   :  { %v1675_v34 = vpop.f32.mrb[0].mxu0  ;;  %v1757_v36 = vpop.f32.mrb[0].mxu1 }
 0x159   :  { %v2196_v35 = vadd.f32 %v1675_v34, %v283_v30  ;;  %v1677_v37 = vpop.f32.mrb[1].mxu0  ;;  %v2198_v38 = vadd.f32 %v1757_v36, %v291_v31  ;;  %v1759_v39 = vpop.f32.mrb[1].mxu1 }
 0x15a   :  { %v2197_v21 = vadd.f32 %v1677_v37, %v287_v32  ;;  %v1679_v40 = vpop.f32.mrb[2].mxu0  ;;  %v2199_v41 = vadd.f32 %v1759_v39, %v295_v33  ;;  %v1761_v42 = vpop.f32.mrb[2].mxu1 }
 0x15b   :  { %1928 = vst [vmem:[%s3074_s3] sm:$0xff] %v2196_v35  ;;  %v1680_v43 = vpop.f32.mrb[3].mxu0  ;;  %1930 = vst [vmem:[%s3074_s3 + $0x10] sm:$0xff] %v2198_v38  ;;  %v1762_v44 = vpop.f32.mrb[3].mxu1 }
 0x15c   :  { %1929 = vst [vmem:[%s3074_s3 + $0x8] sm:$0xff] %v2197_v21  ;;  %1931 = vst [vmem:[%s3074_s3 + $0x18] sm:$0xff] %v2199_v41 }
 0x1d8   :  { %v1839_v22 = vpop.f32.mrb[4].mxu0  ;;  %v1921_v52 = vpop.f32.mrb[4].mxu1 }
 0x1d9   :  { %v2200_v51 = vadd.f32 %v1839_v22, %v299_v47  ;;  %v1841_v53 = vpop.f32.mrb[5].mxu0  ;;  %v2202_v54 = vadd.f32 %v1921_v52, %v307_v48  ;;  %v1923_v56 = vpop.f32.mrb[5].mxu1 }
 0x1da   :  { %v2201_v55 = vadd.f32 %v1841_v53, %v303_v49  ;;  %v1843_v58 = vpop.f32.mrb[6].mxu0  ;;  %v2203_v59 = vadd.f32 %v1923_v56, %v311_v50  ;;  %v1925_v60 = vpop.f32.mrb[6].mxu1 }
 0x1db   :  { %1932 = vst [vmem:[%s3074_s3 + $0x20] sm:$0xff] %v2200_v51  ;;  %v1844_v61 = vpop.f32.mrb[7].mxu0  ;;  %1934 = vst [vmem:[%s3074_s3 + $0x30] sm:$0xff] %v2202_v54  ;;  %v1926_v62 = vpop.f32.mrb[7].mxu1 }
 0x1dc   :  { %1933 = vst [vmem:[%s3074_s3 + $0x28] sm:$0xff] %v2201_v55  ;;  %1935 = vst [vmem:[%s3074_s3 + $0x38] sm:$0xff] %v2203_v59 }

// kernel: camnet_forward.7
= control target key start
LH: loop header
LB: loop body
LE: loop exit
PB: predicated region body
PF: predicated region fallthrough
CT: control target
= control target key end

     0   :  { %s10740_s0 = inlined_call_operand.vmem [shape: f32[8,1024], index: 0, kind: input, shape index: {}]   ;;  %s10741_s1 = inlined_call_operand.vmem [shape: bf16[1024,1024], index: 1, kind: input, shape index: {}]   ;;  %s10742_s2 = inlined_call_operand.vmem [shape: f32[1,1024], index: 2, kind: input, shape index: {}]   ;;  %s10743_s3 = inlined_call_operand.vmem [shape: bf16[1024,512], index: 3, kind: input, shape index: {}]   ;;  %s10744_s4 = inlined_call_operand.vmem [shape: f32[1,512], index: 4, kind: input, shape index: {}]   ;;  %s10745_s5 = inlined_call_operand.vmem [shape: f32[512,128], index: 5, kind: input, shape index: {}]   ;;  %s10746_s6 = inlined_call_operand.vmem [shape: f32[1,128], index: 6, kind: input, shape index: {}]   ;;  %s10747_s7 = inlined_call_operand.vmem [shape: f32[2,24], index: 7, kind: input, shape index: {}]   ;;  %s10748_s8 = inlined_call_operand.vmem [shape: f32[2,12], index: 8, kind: input, shape index: {}]   ;;  %s10749_s9 = inlined_call_operand.vmem [shape: f32[2,12], index: 9, kind: output, shape index: {0}]   ;;  %s10750_s10 = inlined_call_operand.hbm [shape: f32[1,1], index: 10, kind: output, shape index: {1}]  }
   0x1   :  { %v51_v0 = vld [vmem:[%s10741_s1] sm:$0xff]  ;;  %v52_v2 = vld [vmem:[%s10741_s1 + $0x8] sm:$0xff] }
   0x2   :  { %v55_v1 = vld [vmem:[%s10741_s1 + $0x20] sm:$0xff]  ;;  %v56_v4 = vld [vmem:[%s10741_s1 + $0x28] sm:$0xff] }
   0x3   :  { %v6389_v3 = vcombine.high %v51_v0, %v55_v1  ;;  %v6388_v5 = vcombine.low %v51_v0, %v55_v1  ;;  %v59_v6 = vld [vmem:[%s10741_s1 + $0x40] sm:$0xff]  ;;  %v6391_v8 = vcombine.high %v52_v2, %v56_v4  ;;  %v6390_v9 = vcombine.low %v52_v2, %v56_v4  ;;  %v60_v11 = vld [vmem:[%s10741_s1 + $0x48] sm:$0xff] }
   0x4   :  { %v63_v7 = vld [vmem:[%s10741_s1 + $0x60] sm:$0xff]  ;;  %v64_v12 = vld [vmem:[%s10741_s1 + $0x68] sm:$0xff] }
   0x5   :  { %v6397_v10 = vcombine.high %v59_v6, %v63_v7  ;;  %v67_v13 = vld [vmem:[%s10741_s1 + $0x80] sm:$0xff]  ;;  %3165 = vmatprep.subr.bf16.mxu0 %v6389_v3  ;;  %v6399_v14 = vcombine.high %v60_v11, %v64_v12  ;;  %v68_v16 = vld [vmem:[%s10741_s1 + $0x88] sm:$0xff]  ;;  %3329 = vmatprep.subr.bf16.mxu1 %v6391_v8  ;;  %v6396_v18 = vcombine.low %v59_v6, %v63_v7 }
   0x6   :  { %v71_v15 = vld [vmem:[%s10741_s1 + $0xa0] sm:$0xff]  ;;  %v72_v17 = vld [vmem:[%s10741_s1 + $0xa8] sm:$0xff]  ;;  %3166 = vmatpush1.bf16.msra.mxu0 %v6388_v5  ;;  %3330 = vmatpush1.bf16.msra.mxu1 %v6390_v9  ;;  %v6398_v19 = vcombine.low %v60_v11, %v64_v12 }
   0x7   :  { %3167 = vmatprep.subr.bf16.mxu0 %v6397_v10  ;;  %v6405_v20 = vcombine.high %v67_v13, %v71_v15  ;;  %3331 = vmatprep.subr.bf16.mxu1 %v6399_v14  ;;  %v6407_v21 = vcombine.high %v68_v16, %v72_v17  ;;  %v75_v22 = vld [vmem:[%s10741_s1 + $0xc0] sm:$0xff]  ;;  %v76_v24 = vld [vmem:[%s10741_s1 + $0xc8] sm:$0xff]  ;;  %v6404_v26 = vcombine.low %v67_v13, %v71_v15 }
   0x8   :  { %v79_v23 = vld [vmem:[%s10741_s1 + $0xe0] sm:$0xff]  ;;  %v80_v25 = vld [vmem:[%s10741_s1 + $0xe8] sm:$0xff]  ;;  %v6406_v27 = vcombine.low %v68_v16, %v72_v17 }
   0x9   :  { %v6413_v28 = vcombine.high %v75_v22, %v79_v23  ;;  %v6415_v29 = vcombine.high %v76_v24, %v80_v25  ;;  %v83_v30 = vld [vmem:[%s10741_s1 + $0x100] sm:$0xff]  ;;  %v84_v32 = vld [vmem:[%s10741_s1 + $0x108] sm:$0xff]  ;;  %v6412_v34 = vcombine.low %v75_v22, %v79_v23  ;;  %v6414_v35 = vcombine.low %v76_v24, %v80_v25 }
   0xa   :  { %3168 = vmatpush1.bf16.msra.mxu0 %v6396_v18  ;;  %3332 = vmatpush1.bf16.msra.mxu1 %v6398_v19  ;;  %v87_v31 = vld [vmem:[%s10741_s1 + $0x120] sm:$0xff]  ;;  %v88_v33 = vld [vmem:[%s10741_s1 + $0x128] sm:$0xff] }
   0xb   :  { %3169 = vmatprep.subr.bf16.mxu0 %v6405_v20  ;;  %3333 = vmatprep.subr.bf16.mxu1 %v6407_v21  ;;  %v6421_v36 = vcombine.high %v83_v30, %v87_v31  ;;  %v6423_v37 = vcombine.high %v84_v32, %v88_v33  ;;  %v91_v38 = vld [vmem:[%s10741_s1 + $0x140] sm:$0xff]  ;;  %v92_v40 = vld [vmem:[%s10741_s1 + $0x148] sm:$0xff]  ;;  %v6420_v42 = vcombine.low %v83_v30, %v87_v31 }
   0xc   :  { %v95_v39 = vld [vmem:[%s10741_s1 + $0x160] sm:$0xff]  ;;  %v96_v41 = vld [vmem:[%s10741_s1 + $0x168] sm:$0xff]  ;;  %v6422_v43 = vcombine.low %v84_v32, %v88_v33 }
   0xd   :  { %v6429_v44 = vcombine.high %v91_v38, %v95_v39  ;;  %v6431_v45 = vcombine.high %v92_v40, %v96_v41  ;;  %v99_v46 = vld [vmem:[%s10741_s1 + $0x180] sm:$0xff]  ;;  %v100_v48 = vld [vmem:[%s10741_s1 + $0x188] sm:$0xff]  ;;  %v6428_v50 = vcombine.low %v91_v38, %v95_v39  ;;  %v6430_v51 = vcombine.low %v92_v40, %v96_v41 }
   0xe   :  { %3170 = vmatpush1.bf16.msra.mxu0 %v6404_v26  ;;  %3334 = vmatpush1.bf16.msra.mxu1 %v6406_v27  ;;  %v103_v47 = vld [vmem:[%s10741_s1 + $0x1a0] sm:$0xff]  ;;  %v104_v49 = vld [vmem:[%s10741_s1 + $0x1a8] sm:$0xff] }
   0xf   :  { %3171 = vmatprep.subr.bf16.mxu0 %v6413_v28  ;;  %3335 = vmatprep.subr.bf16.mxu1 %v6415_v29  ;;  %v6437_v52 = vcombine.high %v99_v46, %v103_v47  ;;  %v36_v53 = vld [vmem:[%s10740_s0 + $0x8] sm:$0xff]  ;;  %v6439_v54 = vcombine.high %v100_v48, %v104_v49  ;;  %v107_v55 = vld [vmem:[%s10741_s1 + $0x1c0] sm:$0xff]  ;;  %v6436_v60 = vcombine.low %v99_v46, %v103_v47 }
  0x10   :  { %v111_v56 = vld [vmem:[%s10741_s1 + $0x1e0] sm:$0xff]  ;;  %v8017_v57 = vpack.c.bf16 %v36_v53, %v36_v53  ;;  %v108_v58 = vld [vmem:[%s10741_s1 + $0x1c8] sm:$0xff]  ;;  %v6438_v61 = vcombine.low %v100_v48, %v104_v49 }
  0x11   :  { %v112_v59 = vld [vmem:[%s10741_s1 + $0x1e8] sm:$0xff]  ;;  %v6445_v62 = vcombine.high %v107_v55, %v111_v56  ;;  %v115_v0 = vld [vmem:[%s10741_s1 + $0x200] sm:$0xff]  ;;  %v6444_v4 = vcombine.low %v107_v55, %v111_v56 }
  0x12   :  { %3172 = vmatpush1.bf16.msra.mxu0 %v6412_v34  ;;  %3336 = vmatpush1.bf16.msra.mxu1 %v6414_v35  ;;  %v6447_v63 = vcombine.high %v108_v58, %v112_v59  ;;  %v119_v1 = vld [vmem:[%s10741_s1 + $0x220] sm:$0xff]  ;;  %v116_v2 = vld [vmem:[%s10741_s1 + $0x208] sm:$0xff]  ;;  %v6446_v5 = vcombine.low %v108_v58, %v112_v59 }
  0x13   :  { %3173 = vmatprep.subr.bf16.mxu0 %v6421_v36  ;;  %3337 = vmatprep.subr.bf16.mxu1 %v6423_v37  ;;  %v120_v3 = vld [vmem:[%s10741_s1 + $0x228] sm:$0xff]  ;;  %v6453_v6 = vcombine.high %v115_v0, %v119_v1  ;;  %v123_v8 = vld [vmem:[%s10741_s1 + $0x240] sm:$0xff]  ;;  %v6452_v12 = vcombine.low %v115_v0, %v119_v1 }
  0x14   :  { %3197 = vmatprep.mubr.bf16.mxu0 %v8017_v57  ;;  %3361 = vmatprep.mubr.bf16.mxu1 %v8017_v57  ;;  %v6455_v7 = vcombine.high %v116_v2, %v120_v3  ;;  %v127_v9 = vld [vmem:[%s10741_s1 + $0x260] sm:$0xff]  ;;  %v124_v10 = vld [vmem:[%s10741_s1 + $0x248] sm:$0xff]  ;;  %v6454_v13 = vcombine.low %v116_v2, %v120_v3 }
  0x15   :  { %v128_v11 = vld [vmem:[%s10741_s1 + $0x268] sm:$0xff]  ;;  %v6461_v14 = vcombine.high %v123_v8, %v127_v9  ;;  %v131_v16 = vld [vmem:[%s10741_s1 + $0x280] sm:$0xff]  ;;  %v6460_v20 = vcombine.low %v123_v8, %v127_v9 }
  0x16   :  { %3174 = vmatpush1.bf16.msra.mxu0 %v6420_v42  ;;  %3338 = vmatpush1.bf16.msra.mxu1 %v6422_v43  ;;  %v6463_v15 = vcombine.high %v124_v10, %v128_v11  ;;  %v135_v17 = vld [vmem:[%s10741_s1 + $0x2a0] sm:$0xff]  ;;  %v132_v18 = vld [vmem:[%s10741_s1 + $0x288] sm:$0xff]  ;;  %v6462_v21 = vcombine.low %v124_v10, %v128_v11 }
  0x17   :  { %3175 = vmatprep.subr.bf16.mxu0 %v6429_v44  ;;  %3339 = vmatprep.subr.bf16.mxu1 %v6431_v45  ;;  %v136_v19 = vld [vmem:[%s10741_s1 + $0x2a8] sm:$0xff]  ;;  %v6469_v22 = vcombine.high %v131_v16, %v135_v17  ;;  %v139_v24 = vld [vmem:[%s10741_s1 + $0x2c0] sm:$0xff]  ;;  %v6468_v28 = vcombine.low %v131_v16, %v135_v17 }
  0x18   :  { %v6471_v23 = vcombine.high %v132_v18, %v136_v19  ;;  %v143_v25 = vld [vmem:[%s10741_s1 + $0x2e0] sm:$0xff]  ;;  %v140_v26 = vld [vmem:[%s10741_s1 + $0x2c8] sm:$0xff]  ;;  %v6470_v29 = vcombine.low %v132_v18, %v136_v19 }
  0x19   :  { %v144_v27 = vld [vmem:[%s10741_s1 + $0x2e8] sm:$0xff]  ;;  %v6477_v30 = vcombine.high %v139_v24, %v143_v25  ;;  %v147_v32 = vld [vmem:[%s10741_s1 + $0x300] sm:$0xff]  ;;  %v6476_v36 = vcombine.low %v139_v24, %v143_v25 }
  0x1a   :  { %3176 = vmatpush1.bf16.msra.mxu0 %v6428_v50  ;;  %3340 = vmatpush1.bf16.msra.mxu1 %v6430_v51  ;;  %v6479_v31 = vcombine.high %v140_v26, %v144_v27  ;;  %v151_v33 = vld [vmem:[%s10741_s1 + $0x320] sm:$0xff]  ;;  %v148_v34 = vld [vmem:[%s10741_s1 + $0x308] sm:$0xff]  ;;  %v6478_v37 = vcombine.low %v140_v26, %v144_v27 }
  0x1b   :  { %3177 = vmatprep.subr.bf16.mxu0 %v6437_v52  ;;  %3341 = vmatprep.subr.bf16.mxu1 %v6439_v54  ;;  %v152_v35 = vld [vmem:[%s10741_s1 + $0x328] sm:$0xff]  ;;  %v6485_v38 = vcombine.high %v147_v32, %v151_v33  ;;  %v155_v40 = vld [vmem:[%s10741_s1 + $0x340] sm:$0xff]  ;;  %v6484_v44 = vcombine.low %v147_v32, %v151_v33 }
  0x1c   :  { %v6487_v39 = vcombine.high %v148_v34, %v152_v35  ;;  %v159_v41 = vld [vmem:[%s10741_s1 + $0x360] sm:$0xff]  ;;  %v156_v42 = vld [vmem:[%s10741_s1 + $0x348] sm:$0xff]  ;;  %v6486_v45 = vcombine.low %v148_v34, %v152_v35 }
  0x1d   :  { %v160_v43 = vld [vmem:[%s10741_s1 + $0x368] sm:$0xff]  ;;  %v6493_v46 = vcombine.high %v155_v40, %v159_v41  ;;  %v163_v48 = vld [vmem:[%s10741_s1 + $0x380] sm:$0xff]  ;;  %v6492_v52 = vcombine.low %v155_v40, %v159_v41 }
  0x1e   :  { %3178 = vmatpush1.bf16.msra.mxu0 %v6436_v60  ;;  %3342 = vmatpush1.bf16.msra.mxu1 %v6438_v61  ;;  %v6495_v47 = vcombine.high %v156_v42, %v160_v43  ;;  %v167_v49 = vld [vmem:[%s10741_s1 + $0x3a0] sm:$0xff]  ;;  %v164_v50 = vld [vmem:[%s10741_s1 + $0x388] sm:$0xff]  ;;  %v6494_v53 = vcombine.low %v156_v42, %v160_v43 }
  0x1f   :  { %3179 = vmatprep.subr.bf16.mxu0 %v6445_v62  ;;  %3343 = vmatprep.subr.bf16.mxu1 %v6447_v63  ;;  %v168_v51 = vld [vmem:[%s10741_s1 + $0x3a8] sm:$0xff]  ;;  %v6501_v54 = vcombine.high %v163_v48, %v167_v49  ;;  %v171_v56 = vld [vmem:[%s10741_s1 + $0x3c0] sm:$0xff]  ;;  %v6500_v61 = vcombine.low %v163_v48, %v167_v49 }
  0x20   :  { %v6503_v55 = vcombine.high %v164_v50, %v168_v51  ;;  %v175_v58 = vld [vmem:[%s10741_s1 + $0x3e0] sm:$0xff]  ;;  %v172_v59 = vld [vmem:[%s10741_s1 + $0x3c8] sm:$0xff]  ;;  %v6502_v62 = vcombine.low %v164_v50, %v168_v51 }
  0x21   :  { %v176_v60 = vld [vmem:[%s10741_s1 + $0x3e8] sm:$0xff]  ;;  %v6509_v63 = vcombine.high %v171_v56, %v175_v58  ;;  %v179_v1 = vld [vmem:[%s10741_s1 + $0x400] sm:$0xff] }
  0x22   :  { %3180 = vmatpush1.bf16.msra.mxu0 %v6444_v4  ;;  %3344 = vmatpush1.bf16.msra.mxu1 %v6446_v5  ;;  %v6511_v0 = vcombine.high %v172_v59, %v176_v60  ;;  %v183_v2 = vld [vmem:[%s10741_s1 + $0x420] sm:$0xff]  ;;  %v180_v3 = vld [vmem:[%s10741_s1 + $0x408] sm:$0xff]  ;;  %v6508_v5 = vcombine.low %v171_v56, %v175_v58 }
  0x23   :  { %3181 = vmatprep.subr.bf16.mxu0 %v6453_v6  ;;  %3345 = vmatprep.subr.bf16.mxu1 %v6455_v7  ;;  %v184_v4 = vld [vmem:[%s10741_s1 + $0x428] sm:$0xff]  ;;  %v35_v6 = vld [vmem:[%s10740_s0] sm:$0xff]  ;;  %v6510_v7 = vcombine.low %v172_v59, %v176_v60  ;;  %v6517_v8 = vcombine.high %v179_v1, %v183_v2  ;;  %v6516_v16 = vcombine.low %v179_v1, %v183_v2 }
  0x24   :  { %v6519_v9 = vcombine.high %v180_v3, %v184_v4  ;;  %v187_v10 = vld [vmem:[%s10741_s1 + $0x440] sm:$0xff]  ;;  %v6518_v17 = vcombine.low %v180_v3, %v184_v4  ;;  %v200_v24 = vld [vmem:[%s10741_s1 + $0x4a8] sm:$0xff] }
  0x25   :  { %v191_v11 = vld [vmem:[%s10741_s1 + $0x460] sm:$0xff]  ;;  %v208_v32 = vld [vmem:[%s10741_s1 + $0x4e8] sm:$0xff] }
  0x26   :  { %3182 = vmatpush1.bf16.msra.mxu0 %v6452_v12  ;;  %3346 = vmatpush1.bf16.msra.mxu1 %v6454_v13  ;;  %v8144_v12 = vpack.c.bf16 %v35_v6, %v35_v6  ;;  %v188_v13 = vld [vmem:[%s10741_s1 + $0x448] sm:$0xff]  ;;  %v6525_v18 = vcombine.high %v187_v10, %v191_v11  ;;  %v6524_v25 = vcombine.low %v187_v10, %v191_v11  ;;  %v247_v6 = vld [vmem:[%s10741_s1 + $0x620] sm:$0xff] }
  0x27   :  { %3183 = vmatprep.subr.bf16.mxu0 %v6461_v14  ;;  %3347 = vmatprep.subr.bf16.mxu1 %v6463_v15  ;;  %v192_v14 = vld [vmem:[%s10741_s1 + $0x468] sm:$0xff]  ;;  %v38_v15 = vld [vmem:[%s10740_s0 + $0x18] sm:$0xff] }
  0x28   :  { %v6527_v19 = vcombine.high %v188_v13, %v192_v14  ;;  %v6526_v26 = vcombine.low %v188_v13, %v192_v14  ;;  %v216_v40 = vld [vmem:[%s10741_s1 + $0x528] sm:$0xff]  ;;  %v251_v14 = vld [vmem:[%s10741_s1 + $0x640] sm:$0xff] }
  0x29   :  { %v224_v48 = vld [vmem:[%s10741_s1 + $0x568] sm:$0xff] }
  0x2a   :  { %3184 = vmatpush1.bf16.msra.mxu0 %v6460_v20  ;;  %3348 = vmatpush1.bf16.msra.mxu1 %v6462_v21  ;;  %v195_v20 = vld [vmem:[%s10741_s1 + $0x480] sm:$0xff]  ;;  %v232_v56 = vld [vmem:[%s10741_s1 + $0x5a8] sm:$0xff] }
  0x2b   :  { %3185 = vmatprep.subr.bf16.mxu0 %v6469_v22  ;;  %3349 = vmatprep.subr.bf16.mxu1 %v6471_v23  ;;  %v199_v21 = vld [vmem:[%s10741_s1 + $0x4a0] sm:$0xff]  ;;  %v196_v22 = vld [vmem:[%s10741_s1 + $0x488] sm:$0xff]  ;;  %v8164_v23 = vpack.c.bf16 %v38_v15, %v38_v15 }
  0x2c   :  { %v6533_v27 = vcombine.high %v195_v20, %v199_v21  ;;  %v6532_v33 = vcombine.low %v195_v20, %v199_v21  ;;  %v6534_v34 = vcombine.low %v196_v22, %v200_v24  ;;  %v240_v1 = vld [vmem:[%s10741_s1 + $0x5e8] sm:$0xff]  ;;  %v255_v15 = vld [vmem:[%s10741_s1 + $0x660] sm:$0xff] }
  0x2d   :  { %v6589_v21 = vcombine.high %v251_v14, %v255_v15 }
  0x2e   :  { %3186 = vmatpush1.bf16.msra.mxu0 %v6468_v28  ;;  %3350 = vmatpush1.bf16.msra.mxu1 %v6470_v29  ;;  %v203_v28 = vld [vmem:[%s10741_s1 + $0x4c0] sm:$0xff] }
  0x2f   :  { %3187 = vmatprep.subr.bf16.mxu0 %v6477_v30  ;;  %3351 = vmatprep.subr.bf16.mxu1 %v6479_v31  ;;  %v207_v29 = vld [vmem:[%s10741_s1 + $0x4e0] sm:$0xff]  ;;  %v204_v30 = vld [vmem:[%s10741_s1 + $0x4c8] sm:$0xff]  ;;  %v6535_v31 = vcombine.high %v196_v22, %v200_v24 }
  0x30   :  { %v6541_v35 = vcombine.high %v203_v28, %v207_v29  ;;  %v6540_v41 = vcombine.low %v203_v28, %v207_v29  ;;  %v6542_v42 = vcombine.low %v204_v30, %v208_v32  ;;  %v259_v22 = vld [vmem:[%s10741_s1 + $0x680] sm:$0xff]  ;;  %v6588_v28 = vcombine.low %v251_v14, %v255_v15  ;;  %v37_v14 = vld [vmem:[%s10740_s0 + $0x10] sm:$0xff] }
  0x31   :  { %v263_v24 = vld [vmem:[%s10741_s1 + $0x6a0] sm:$0xff] }
  0x32   :  { %3188 = vmatpush1.bf16.msra.mxu0 %v6476_v36  ;;  %3352 = vmatpush1.bf16.msra.mxu1 %v6478_v37  ;;  %v211_v36 = vld [vmem:[%s10741_s1 + $0x500] sm:$0xff] }
  0x33   :  { %3189 = vmatprep.subr.bf16.mxu0 %v6485_v38  ;;  %3353 = vmatprep.subr.bf16.mxu1 %v6487_v39  ;;  %v215_v37 = vld [vmem:[%s10741_s1 + $0x520] sm:$0xff]  ;;  %v212_v38 = vld [vmem:[%s10741_s1 + $0x508] sm:$0xff]  ;;  %v6543_v39 = vcombine.high %v204_v30, %v208_v32  ;;  %v6597_v30 = vcombine.high %v259_v22, %v263_v24 }
  0x34   :  { %v6549_v43 = vcombine.high %v211_v36, %v215_v37  ;;  %v6548_v49 = vcombine.low %v211_v36, %v215_v37  ;;  %v6550_v50 = vcombine.low %v212_v38, %v216_v40  ;;  %v271_v32 = vld [vmem:[%s10741_s1 + $0x6e0] sm:$0xff]  ;;  %v6596_v36 = vcombine.low %v259_v22, %v263_v24  ;;  %v40_v24 = vld [vmem:[%s10740_s0 + $0x28] sm:$0xff] }
  0x36   :  { %3190 = vmatpush1.bf16.msra.mxu0 %v6484_v44  ;;  %3354 = vmatpush1.bf16.msra.mxu1 %v6486_v45  ;;  %v219_v44 = vld [vmem:[%s10741_s1 + $0x540] sm:$0xff] }
  0x37   :  { %3191 = vmatprep.subr.bf16.mxu0 %v6493_v46  ;;  %3355 = vmatprep.subr.bf16.mxu1 %v6495_v47  ;;  %v223_v45 = vld [vmem:[%s10741_s1 + $0x560] sm:$0xff]  ;;  %v220_v46 = vld [vmem:[%s10741_s1 + $0x548] sm:$0xff]  ;;  %v6551_v47 = vcombine.high %v212_v38, %v216_v40 }
  0x38   :  { %v6557_v51 = vcombine.high %v219_v44, %v223_v45  ;;  %v6556_v58 = vcombine.low %v219_v44, %v223_v45  ;;  %v6558_v59 = vcombine.low %v220_v46, %v224_v48  ;;  %v279_v40 = vld [vmem:[%s10741_s1 + $0x720] sm:$0xff] }
  0x3a   :  { %3192 = vmatpush1.bf16.msra.mxu0 %v6492_v52  ;;  %3356 = vmatpush1.bf16.msra.mxu1 %v6494_v53  ;;  %v227_v52 = vld [vmem:[%s10741_s1 + $0x580] sm:$0xff] }
  0x3b   :  { %3193 = vmatprep.subr.bf16.mxu0 %v6501_v54  ;;  %3357 = vmatprep.subr.bf16.mxu1 %v6503_v55  ;;  %v231_v53 = vld [vmem:[%s10741_s1 + $0x5a0] sm:$0xff]  ;;  %v228_v54 = vld [vmem:[%s10741_s1 + $0x588] sm:$0xff]  ;;  %v6559_v55 = vcombine.high %v220_v46, %v224_v48 }
  0x3c   :  { %v6565_v60 = vcombine.high %v227_v52, %v231_v53  ;;  %v6564_v2 = vcombine.low %v227_v52, %v231_v53  ;;  %v6566_v3 = vcombine.low %v228_v54, %v232_v56  ;;  %v287_v48 = vld [vmem:[%s10741_s1 + $0x760] sm:$0xff] }
  0x3e   :  { %3194 = vmatpush1.bf16.msra.mxu0 %v6500_v61  ;;  %3358 = vmatpush1.bf16.msra.mxu1 %v6502_v62  ;;  %v235_v61 = vld [vmem:[%s10741_s1 + $0x5c0] sm:$0xff] }
  0x3f   :  { %3195 = vmatprep.subr.bf16.mxu0 %v6509_v63  ;;  %3359 = vmatprep.subr.bf16.mxu1 %v6511_v0  ;;  %v239_v62 = vld [vmem:[%s10741_s1 + $0x5e0] sm:$0xff]  ;;  %v236_v63 = vld [vmem:[%s10741_s1 + $0x5c8] sm:$0xff]  ;;  %v6567_v0 = vcombine.high %v228_v54, %v232_v56 }
  0x40   :  { %v6573_v4 = vcombine.high %v235_v61, %v239_v62  ;;  %v6572_v10 = vcombine.low %v235_v61, %v239_v62  ;;  %v6574_v11 = vcombine.low %v236_v63, %v240_v1  ;;  %v295_v56 = vld [vmem:[%s10741_s1 + $0x7a0] sm:$0xff] }
  0x42   :  { %3196 = vmatpush1.bf16.msra.mxu0 %v6508_v5  ;;  %3360 = vmatpush1.bf16.msra.mxu1 %v6510_v7  ;;  %v243_v5 = vld [vmem:[%s10741_s1 + $0x600] sm:$0xff]  ;;  %v244_v7 = vld [vmem:[%s10741_s1 + $0x608] sm:$0xff] }
  0x43   :  { %3206 = vmatprep.subr.bf16.mxu0 %v6517_v8  ;;  %3370 = vmatprep.subr.bf16.mxu1 %v6519_v9  ;;  %v6575_v8 = vcombine.high %v236_v63, %v240_v1  ;;  %v248_v9 = vld [vmem:[%s10741_s1 + $0x628] sm:$0xff]  ;;  %v6581_v13 = vcombine.high %v243_v5, %v247_v6  ;;  %v303_v1 = vld [vmem:[%s10741_s1 + $0x7e0] sm:$0xff] }
  0x44   :  { %v6582_v20 = vcombine.low %v244_v7, %v248_v9 }
  0x45   :  { %3198 = vmatmul.mubr.bf16.vlgmr.msra.gmra.mrb[0].mxu0 %v8144_v12  ;;  %3362 = vmatmul.mubr.bf16.vlgmr.msra.gmra.mrb[0].mxu1 %v8144_v12 }
  0x46   :  { %3207 = vmatpush1.bf16.msra.mxu0 %v6516_v16  ;;  %3371 = vmatpush1.bf16.msra.mxu1 %v6518_v17  ;;  %v252_v16 = vld [vmem:[%s10741_s1 + $0x648] sm:$0xff]  ;;  %v6583_v17 = vcombine.high %v244_v7, %v248_v9  ;;  %v311_v9 = vld [vmem:[%s10741_s1 + $0x820] sm:$0xff] }
  0x47   :  { %3208 = vmatprep.subr.bf16.mxu0 %v6525_v18  ;;  %3372 = vmatprep.subr.bf16.mxu1 %v6527_v19  ;;  %v256_v18 = vld [vmem:[%s10741_s1 + $0x668] sm:$0xff]  ;;  %v6580_v19 = vcombine.low %v243_v5, %v247_v6  ;;  %v307_v6 = vld [vmem:[%s10741_s1 + $0x800] sm:$0xff] }
  0x48   :  { %3238 = vmatprep.mubr.bf16.mxu0 %v8164_v23  ;;  %3402 = vmatprep.mubr.bf16.mxu1 %v8164_v23  ;;  %v6590_v29 = vcombine.low %v252_v16, %v256_v18 }
  0x4a   :  { %3209 = vmatpush1.bf16.msra.mxu0 %v6524_v25  ;;  %3373 = vmatpush1.bf16.msra.mxu1 %v6526_v26  ;;  %v260_v25 = vld [vmem:[%s10741_s1 + $0x688] sm:$0xff]  ;;  %v6591_v26 = vcombine.high %v252_v16, %v256_v18  ;;  %v315_v16 = vld [vmem:[%s10741_s1 + $0x840] sm:$0xff]  ;;  %v6645_v18 = vcombine.high %v307_v6, %v311_v9 }
  0x4b   :  { %3210 = vmatprep.subr.bf16.mxu0 %v6533_v27  ;;  %3374 = vmatprep.subr.bf16.mxu1 %v6535_v31  ;;  %v264_v27 = vld [vmem:[%s10741_s1 + $0x6a8] sm:$0xff]  ;;  %v267_v31 = vld [vmem:[%s10741_s1 + $0x6c0] sm:$0xff] }
  0x4c   :  { %v6598_v37 = vcombine.low %v260_v25, %v264_v27  ;;  %v6605_v38 = vcombine.high %v267_v31, %v271_v32  ;;  %v6604_v44 = vcombine.low %v267_v31, %v271_v32  ;;  %v324_v32 = vld [vmem:[%s10741_s1 + $0x888] sm:$0xff] }
  0x4e   :  { %3211 = vmatpush1.bf16.msra.mxu0 %v6532_v33  ;;  %3375 = vmatpush1.bf16.msra.mxu1 %v6534_v34  ;;  %v268_v33 = vld [vmem:[%s10741_s1 + $0x6c8] sm:$0xff]  ;;  %v6599_v34 = vcombine.high %v260_v25, %v264_v27  ;;  %v8359_v25 = vpack.c.bf16 %v37_v14, %v37_v14 }
  0x4f   :  { %3212 = vmatprep.subr.bf16.mxu0 %v6541_v35  ;;  %3376 = vmatprep.subr.bf16.mxu1 %v6543_v39  ;;  %v272_v35 = vld [vmem:[%s10741_s1 + $0x6e8] sm:$0xff]  ;;  %v275_v39 = vld [vmem:[%s10741_s1 + $0x700] sm:$0xff] }
  0x50   :  { %v6606_v45 = vcombine.low %v268_v33, %v272_v35  ;;  %v6613_v46 = vcombine.high %v275_v39, %v279_v40  ;;  %v6612_v52 = vcombine.low %v275_v39, %v279_v40  ;;  %v335_v39 = vld [vmem:[%s10741_s1 + $0x8e0] sm:$0xff]  ;;  %v332_v40 = vld [vmem:[%s10741_s1 + $0x8c8] sm:$0xff] }
  0x52   :  { %3213 = vmatpush1.bf16.msra.mxu0 %v6540_v41  ;;  %3377 = vmatpush1.bf16.msra.mxu1 %v6542_v42  ;;  %v276_v41 = vld [vmem:[%s10741_s1 + $0x708] sm:$0xff]  ;;  %v6607_v42 = vcombine.high %v268_v33, %v272_v35 }
  0x53   :  { %3214 = vmatprep.subr.bf16.mxu0 %v6549_v43  ;;  %3378 = vmatprep.subr.bf16.mxu1 %v6551_v47  ;;  %v280_v43 = vld [vmem:[%s10741_s1 + $0x728] sm:$0xff]  ;;  %v283_v47 = vld [vmem:[%s10741_s1 + $0x740] sm:$0xff] }
  0x54   :  { %v6614_v53 = vcombine.low %v276_v41, %v280_v43  ;;  %v6621_v54 = vcombine.high %v283_v47, %v287_v48  ;;  %v6620_v61 = vcombine.low %v283_v47, %v287_v48  ;;  %v328_v33 = vld [vmem:[%s10741_s1 + $0x8a8] sm:$0xff]  ;;  %v343_v47 = vld [vmem:[%s10741_s1 + $0x920] sm:$0xff] }
  0x55   :  { %v340_v48 = vld [vmem:[%s10741_s1 + $0x908] sm:$0xff] }
  0x56   :  { %3215 = vmatpush1.bf16.msra.mxu0 %v6548_v49  ;;  %3379 = vmatpush1.bf16.msra.mxu1 %v6550_v50  ;;  %v284_v49 = vld [vmem:[%s10741_s1 + $0x748] sm:$0xff]  ;;  %v6615_v50 = vcombine.high %v276_v41, %v280_v43  ;;  %v6663_v41 = vcombine.high %v324_v32, %v328_v33 }
  0x57   :  { %3216 = vmatprep.subr.bf16.mxu0 %v6557_v51  ;;  %3380 = vmatprep.subr.bf16.mxu1 %v6559_v55  ;;  %v288_v51 = vld [vmem:[%s10741_s1 + $0x768] sm:$0xff]  ;;  %v291_v55 = vld [vmem:[%s10741_s1 + $0x780] sm:$0xff] }
  0x58   :  { %v6622_v62 = vcombine.low %v284_v49, %v288_v51  ;;  %v6629_v63 = vcombine.high %v291_v55, %v295_v56  ;;  %v6628_v5 = vcombine.low %v291_v55, %v295_v56  ;;  %v351_v55 = vld [vmem:[%s10741_s1 + $0x960] sm:$0xff]  ;;  %v348_v56 = vld [vmem:[%s10741_s1 + $0x948] sm:$0xff] }
  0x5a   :  { %3217 = vmatpush1.bf16.msra.mxu0 %v6556_v58  ;;  %3381 = vmatpush1.bf16.msra.mxu1 %v6558_v59  ;;  %v292_v58 = vld [vmem:[%s10741_s1 + $0x788] sm:$0xff]  ;;  %v6623_v59 = vcombine.high %v284_v49, %v288_v51 }
  0x5b   :  { %3218 = vmatprep.subr.bf16.mxu0 %v6565_v60  ;;  %3382 = vmatprep.subr.bf16.mxu1 %v6567_v0  ;;  %v296_v60 = vld [vmem:[%s10741_s1 + $0x7a8] sm:$0xff]  ;;  %v299_v0 = vld [vmem:[%s10741_s1 + $0x7c0] sm:$0xff] }
  0x5c   :  { %v6630_v7 = vcombine.low %v292_v58, %v296_v60  ;;  %v6636_v15 = vcombine.low %v299_v0, %v303_v1 }
  0x5e   :  { %3219 = vmatpush1.bf16.msra.mxu0 %v6564_v2  ;;  %3383 = vmatpush1.bf16.msra.mxu1 %v6566_v3  ;;  %v300_v2 = vld [vmem:[%s10741_s1 + $0x7c8] sm:$0xff]  ;;  %v6631_v3 = vcombine.high %v292_v58, %v296_v60 }
  0x5f   :  { %3220 = vmatprep.subr.bf16.mxu0 %v6573_v4  ;;  %3384 = vmatprep.subr.bf16.mxu1 %v6575_v8  ;;  %v304_v4 = vld [vmem:[%s10741_s1 + $0x7e8] sm:$0xff]  ;;  %v6637_v8 = vcombine.high %v299_v0, %v303_v1  ;;  %v359_v0 = vld [vmem:[%s10741_s1 + $0x9a0] sm:$0xff] }
  0x60   :  { %v356_v1 = vld [vmem:[%s10741_s1 + $0x988] sm:$0xff] }
  0x62   :  { %3221 = vmatpush1.bf16.msra.mxu0 %v6572_v10  ;;  %3385 = vmatpush1.bf16.msra.mxu1 %v6574_v11  ;;  %v308_v10 = vld [vmem:[%s10741_s1 + $0x808] sm:$0xff] }
  0x63   :  { %3222 = vmatprep.subr.bf16.mxu0 %v6581_v13  ;;  %3386 = vmatprep.subr.bf16.mxu1 %v6583_v17  ;;  %v312_v11 = vld [vmem:[%s10741_s1 + $0x828] sm:$0xff]  ;;  %v6639_v13 = vcombine.high %v300_v2, %v304_v4  ;;  %v6638_v17 = vcombine.low %v300_v2, %v304_v4 }
  0x64   :  { %v6647_v22 = vcombine.high %v308_v10, %v312_v11  ;;  %v6646_v27 = vcombine.low %v308_v10, %v312_v11  ;;  %v368_v11 = vld [vmem:[%s10741_s1 + $0x9e8] sm:$0xff] }
  0x66   :  { %3223 = vmatpush1.bf16.msra.mxu0 %v6580_v19  ;;  %3387 = vmatpush1.bf16.msra.mxu1 %v6582_v20  ;;  %v319_v19 = vld [vmem:[%s10741_s1 + $0x860] sm:$0xff]  ;;  %v316_v20 = vld [vmem:[%s10741_s1 + $0x848] sm:$0xff] }
  0x67   :  { %3224 = vmatprep.subr.bf16.mxu0 %v6589_v21  ;;  %3388 = vmatprep.subr.bf16.mxu1 %v6591_v26  ;;  %v320_v21 = vld [vmem:[%s10741_s1 + $0x868] sm:$0xff]  ;;  %v6644_v26 = vcombine.low %v307_v6, %v311_v9  ;;  %v6652_v35 = vcombine.low %v315_v16, %v319_v19 }
  0x68   :  { %v6655_v31 = vcombine.high %v316_v20, %v320_v21  ;;  %v364_v9 = vld [vmem:[%s10741_s1 + $0x9c8] sm:$0xff] }
  0x6a   :  { %3225 = vmatpush1.bf16.msra.mxu0 %v6588_v28  ;;  %3389 = vmatpush1.bf16.msra.mxu1 %v6590_v29  ;;  %v6653_v28 = vcombine.high %v315_v16, %v319_v19  ;;  %v323_v29 = vld [vmem:[%s10741_s1 + $0x880] sm:$0xff]  ;;  %v6703_v19 = vcombine.high %v364_v9, %v368_v11 }
  0x6b   :  { %3226 = vmatprep.subr.bf16.mxu0 %v6597_v30  ;;  %3390 = vmatprep.subr.bf16.mxu1 %v6599_v34  ;;  %v327_v30 = vld [vmem:[%s10741_s1 + $0x8a0] sm:$0xff]  ;;  %v8373_v34 = vpack.c.bf16 %v40_v24, %v40_v24 }
  0x6c   :  { %v6660_v43 = vcombine.low %v323_v29, %v327_v30  ;;  %v371_v16 = vld [vmem:[%s10741_s1 + $0xa00] sm:$0xff] }
  0x6e   :  { %3227 = vmatpush1.bf16.msra.mxu0 %v6596_v36  ;;  %3391 = vmatpush1.bf16.msra.mxu1 %v6598_v37  ;;  %v6654_v36 = vcombine.low %v316_v20, %v320_v21  ;;  %v6661_v37 = vcombine.high %v323_v29, %v327_v30  ;;  %v376_v20 = vld [vmem:[%s10741_s1 + $0xa28] sm:$0xff] }
  0x6f   :  { %3228 = vmatprep.subr.bf16.mxu0 %v6605_v38  ;;  %3392 = vmatprep.subr.bf16.mxu1 %v6607_v42  ;;  %v331_v38 = vld [vmem:[%s10741_s1 + $0x8c0] sm:$0xff]  ;;  %v336_v42 = vld [vmem:[%s10741_s1 + $0x8e8] sm:$0xff] }
  0x70   :  { %v6671_v49 = vcombine.high %v332_v40, %v336_v42  ;;  %v6668_v51 = vcombine.low %v331_v38, %v335_v39  ;;  %v384_v30 = vld [vmem:[%s10741_s1 + $0xa68] sm:$0xff] }
  0x72   :  { %3229 = vmatpush1.bf16.msra.mxu0 %v6604_v44  ;;  %3393 = vmatpush1.bf16.msra.mxu1 %v6606_v45  ;;  %v6662_v44 = vcombine.low %v324_v32, %v328_v33  ;;  %v6669_v45 = vcombine.high %v331_v38, %v335_v39  ;;  %v392_v39 = vld [vmem:[%s10741_s1 + $0xaa8] sm:$0xff] }
  0x73   :  { %3230 = vmatprep.subr.bf16.mxu0 %v6613_v46  ;;  %3394 = vmatprep.subr.bf16.mxu1 %v6615_v50  ;;  %v339_v46 = vld [vmem:[%s10741_s1 + $0x900] sm:$0xff]  ;;  %v344_v50 = vld [vmem:[%s10741_s1 + $0x928] sm:$0xff] }
  0x74   :  { %v6679_v58 = vcombine.high %v340_v48, %v344_v50  ;;  %v6676_v60 = vcombine.low %v339_v46, %v343_v47 }
  0x76   :  { %3231 = vmatpush1.bf16.msra.mxu0 %v6612_v52  ;;  %3395 = vmatpush1.bf16.msra.mxu1 %v6614_v53  ;;  %v6670_v52 = vcombine.low %v332_v40, %v336_v42  ;;  %v6677_v53 = vcombine.high %v339_v46, %v343_v47  ;;  %v400_v47 = vld [vmem:[%s10741_s1 + $0xae8] sm:$0xff] }
  0x77   :  { %3232 = vmatprep.subr.bf16.mxu0 %v6621_v54  ;;  %3396 = vmatprep.subr.bf16.mxu1 %v6623_v59  ;;  %v347_v54 = vld [vmem:[%s10741_s1 + $0x940] sm:$0xff]  ;;  %v352_v59 = vld [vmem:[%s10741_s1 + $0x968] sm:$0xff] }
  0x78   :  { %v6687_v2 = vcombine.high %v348_v56, %v352_v59  ;;  %v6684_v4 = vcombine.low %v347_v54, %v351_v55 }
  0x7a   :  { %3233 = vmatpush1.bf16.msra.mxu0 %v6620_v61  ;;  %3397 = vmatpush1.bf16.msra.mxu1 %v6622_v62  ;;  %v6678_v61 = vcombine.low %v340_v48, %v344_v50  ;;  %v6685_v62 = vcombine.high %v347_v54, %v351_v55  ;;  %v408_v55 = vld [vmem:[%s10741_s1 + $0xb28] sm:$0xff] }
  0x7b   :  { %3234 = vmatprep.subr.bf16.mxu0 %v6629_v63  ;;  %3398 = vmatprep.subr.bf16.mxu1 %v6631_v3  ;;  %v355_v63 = vld [vmem:[%s10741_s1 + $0x980] sm:$0xff]  ;;  %v360_v3 = vld [vmem:[%s10741_s1 + $0x9a8] sm:$0xff] }
  0x7c   :  { %v6693_v6 = vcombine.high %v355_v63, %v359_v0  ;;  %v6695_v10 = vcombine.high %v356_v1, %v360_v3  ;;  %v6694_v14 = vcombine.low %v356_v1, %v360_v3 }
  0x7e   :  { %3235 = vmatpush1.bf16.msra.mxu0 %v6628_v5  ;;  %3399 = vmatpush1.bf16.msra.mxu1 %v6630_v7  ;;  %v6686_v5 = vcombine.low %v348_v56, %v352_v59  ;;  %v363_v7 = vld [vmem:[%s10741_s1 + $0x9c0] sm:$0xff] }
  0x7f   :  { %3236 = vmatprep.subr.bf16.mxu0 %v6637_v8  ;;  %3400 = vmatprep.subr.bf16.mxu1 %v6639_v13  ;;  %v367_v8 = vld [vmem:[%s10741_s1 + $0x9e0] sm:$0xff]  ;;  %v6692_v13 = vcombine.low %v355_v63, %v359_v0  ;;  %v416_v0 = vld [vmem:[%s10741_s1 + $0xb68] sm:$0xff] }
  0x80   :  { %v6700_v21 = vcombine.low %v363_v7, %v367_v8 }
  0x82   :  { %3237 = vmatpush1.bf16.msra.mxu0 %v6636_v15  ;;  %3401 = vmatpush1.bf16.msra.mxu1 %v6638_v17  ;;  %v6701_v15 = vcombine.high %v363_v7, %v367_v8  ;;  %v375_v17 = vld [vmem:[%s10741_s1 + $0xa20] sm:$0xff]  ;;  %v424_v8 = vld [vmem:[%s10741_s1 + $0xba8] sm:$0xff] }
  0x83   :  { %3247 = vmatprep.subr.bf16.mxu0 %v6645_v18  ;;  %3411 = vmatprep.subr.bf16.mxu1 %v6647_v22  ;;  %v372_v18 = vld [vmem:[%s10741_s1 + $0xa08] sm:$0xff]  ;;  %v6702_v22 = vcombine.low %v364_v9, %v368_v11  ;;  %v6709_v24 = vcombine.high %v371_v16, %v375_v17 }
  0x84   :  { %v6711_v29 = vcombine.high %v372_v18, %v376_v20  ;;  %v6710_v32 = vcombine.low %v372_v18, %v376_v20 }
  0x85   :  { %3239 = vmatmul.mubr.bf16.vlgmr.msra.gmra.mrb[0].mxu0 %v8359_v25  ;;  %3403 = vmatmul.mubr.bf16.vlgmr.msra.gmra.mrb[0].mxu1 %v8359_v25 }
  0x86   :  { %3248 = vmatpush1.bf16.msra.mxu0 %v6644_v26  ;;  %3412 = vmatpush1.bf16.msra.mxu1 %v6646_v27  ;;  %v379_v26 = vld [vmem:[%s10741_s1 + $0xa40] sm:$0xff] }
  0x87   :  { %3249 = vmatprep.subr.bf16.mxu0 %v6653_v28  ;;  %3413 = vmatprep.subr.bf16.mxu1 %v6655_v31  ;;  %v383_v27 = vld [vmem:[%s10741_s1 + $0xa60] sm:$0xff]  ;;  %v380_v28 = vld [vmem:[%s10741_s1 + $0xa48] sm:$0xff]  ;;  %v6708_v31 = vcombine.low %v371_v16, %v375_v17 }
  0x88   :  { %3279 = vmatprep.mubr.bf16.mxu0 %v8373_v34  ;;  %3443 = vmatprep.mubr.bf16.mxu1 %v8373_v34  ;;  %v6717_v33 = vcombine.high %v379_v26, %v383_v27  ;;  %v6719_v38 = vcombine.high %v380_v28, %v384_v30  ;;  %v6716_v40 = vcombine.low %v379_v26, %v383_v27  ;;  %v432_v17 = vld [vmem:[%s10741_s1 + $0xbe8] sm:$0xff] }
  0x89   :  { %v440_v26 = vld [vmem:[%s10741_s1 + $0xc28] sm:$0xff] }
  0x8a   :  { %3250 = vmatpush1.bf16.msra.mxu0 %v6652_v35  ;;  %3414 = vmatpush1.bf16.msra.mxu1 %v6654_v36  ;;  %v387_v35 = vld [vmem:[%s10741_s1 + $0xa80] sm:$0xff] }
  0x8b   :  { %3251 = vmatprep.subr.bf16.mxu0 %v6661_v37  ;;  %3415 = vmatprep.subr.bf16.mxu1 %v6663_v41  ;;  %v391_v36 = vld [vmem:[%s10741_s1 + $0xaa0] sm:$0xff]  ;;  %v388_v37 = vld [vmem:[%s10741_s1 + $0xa88] sm:$0xff]  ;;  %v6718_v41 = vcombine.low %v380_v28, %v384_v30 }
  0x8c   :  { %v6725_v42 = vcombine.high %v387_v35, %v391_v36  ;;  %v6727_v46 = vcombine.high %v388_v37, %v392_v39  ;;  %v6724_v48 = vcombine.low %v387_v35, %v391_v36  ;;  %v39_v28 = vld [vmem:[%s10740_s0 + $0x20] sm:$0xff]  ;;  %v444_v35 = vld [vmem:[%s10741_s1 + $0xc48] sm:$0xff] }
  0x8d   :  { %v443_v30 = vld [vmem:[%s10741_s1 + $0xc40] sm:$0xff]  ;;  %v448_v36 = vld [vmem:[%s10741_s1 + $0xc68] sm:$0xff] }
  0x8e   :  { %3252 = vmatpush1.bf16.msra.mxu0 %v6660_v43  ;;  %3416 = vmatpush1.bf16.msra.mxu1 %v6662_v44  ;;  %v395_v43 = vld [vmem:[%s10741_s1 + $0xac0] sm:$0xff] }
  0x8f   :  { %3253 = vmatprep.subr.bf16.mxu0 %v6669_v45  ;;  %3417 = vmatprep.subr.bf16.mxu1 %v6671_v49  ;;  %v399_v44 = vld [vmem:[%s10741_s1 + $0xae0] sm:$0xff]  ;;  %v396_v45 = vld [vmem:[%s10741_s1 + $0xac8] sm:$0xff]  ;;  %v6726_v49 = vcombine.low %v388_v37, %v392_v39  ;;  %v8565_v39 = vpack.c.bf16 %v39_v28, %v39_v28 }
  0x90   :  { %v6733_v50 = vcombine.high %v395_v43, %v399_v44  ;;  %v6735_v54 = vcombine.high %v396_v45, %v400_v47  ;;  %v6732_v56 = vcombine.low %v395_v43, %v399_v44  ;;  %v451_v43 = vld [vmem:[%s10741_s1 + $0xc80] sm:$0xff] }
  0x91   :  { %v455_v44 = vld [vmem:[%s10741_s1 + $0xca0] sm:$0xff] }
  0x92   :  { %3254 = vmatpush1.bf16.msra.mxu0 %v6668_v51  ;;  %3418 = vmatpush1.bf16.msra.mxu1 %v6670_v52  ;;  %v403_v51 = vld [vmem:[%s10741_s1 + $0xb00] sm:$0xff] }
  0x93   :  { %3255 = vmatprep.subr.bf16.mxu0 %v6677_v53  ;;  %3419 = vmatprep.subr.bf16.mxu1 %v6679_v58  ;;  %v407_v52 = vld [vmem:[%s10741_s1 + $0xb20] sm:$0xff]  ;;  %v404_v53 = vld [vmem:[%s10741_s1 + $0xb08] sm:$0xff]  ;;  %v6734_v58 = vcombine.low %v396_v45, %v400_v47 }
  0x94   :  { %v6741_v59 = vcombine.high %v403_v51, %v407_v52  ;;  %v6743_v63 = vcombine.high %v404_v53, %v408_v55  ;;  %v6740_v1 = vcombine.low %v403_v51, %v407_v52  ;;  %v452_v45 = vld [vmem:[%s10741_s1 + $0xc88] sm:$0xff] }
  0x95   :  { %v456_v47 = vld [vmem:[%s10741_s1 + $0xca8] sm:$0xff] }
  0x96   :  { %3256 = vmatpush1.bf16.msra.mxu0 %v6676_v60  ;;  %3420 = vmatpush1.bf16.msra.mxu1 %v6678_v61  ;;  %v411_v60 = vld [vmem:[%s10741_s1 + $0xb40] sm:$0xff] }
  0x97   :  { %3257 = vmatprep.subr.bf16.mxu0 %v6685_v62  ;;  %3421 = vmatprep.subr.bf16.mxu1 %v6687_v2  ;;  %v415_v61 = vld [vmem:[%s10741_s1 + $0xb60] sm:$0xff]  ;;  %v412_v62 = vld [vmem:[%s10741_s1 + $0xb48] sm:$0xff]  ;;  %v6742_v2 = vcombine.low %v404_v53, %v408_v55 }
  0x98   :  { %v6749_v3 = vcombine.high %v411_v60, %v415_v61  ;;  %v6751_v7 = vcombine.high %v412_v62, %v416_v0  ;;  %v6748_v9 = vcombine.low %v411_v60, %v415_v61 }
  0x9a   :  { %3258 = vmatpush1.bf16.msra.mxu0 %v6684_v4  ;;  %3422 = vmatpush1.bf16.msra.mxu1 %v6686_v5  ;;  %v419_v4 = vld [vmem:[%s10741_s1 + $0xb80] sm:$0xff] }
  0x9b   :  { %3259 = vmatprep.subr.bf16.mxu0 %v6693_v6  ;;  %3423 = vmatprep.subr.bf16.mxu1 %v6695_v10  ;;  %v423_v5 = vld [vmem:[%s10741_s1 + $0xba0] sm:$0xff]  ;;  %v420_v6 = vld [vmem:[%s10741_s1 + $0xb88] sm:$0xff]  ;;  %v6750_v10 = vcombine.low %v412_v62, %v416_v0 }
  0x9c   :  { %v6757_v11 = vcombine.high %v419_v4, %v423_v5  ;;  %v6759_v16 = vcombine.high %v420_v6, %v424_v8  ;;  %v6756_v18 = vcombine.low %v419_v4, %v423_v5  ;;  %v6758_v20 = vcombine.low %v420_v6, %v424_v8 }
  0x9e   :  { %3260 = vmatpush1.bf16.msra.mxu0 %v6692_v13  ;;  %3424 = vmatpush1.bf16.msra.mxu1 %v6694_v14  ;;  %v427_v13 = vld [vmem:[%s10741_s1 + $0xbc0] sm:$0xff] }
  0x9f   :  { %3261 = vmatprep.subr.bf16.mxu0 %v6701_v15  ;;  %3425 = vmatprep.subr.bf16.mxu1 %v6703_v19  ;;  %v431_v14 = vld [vmem:[%s10741_s1 + $0xbe0] sm:$0xff]  ;;  %v428_v15 = vld [vmem:[%s10741_s1 + $0xbc8] sm:$0xff] }
  0xa0   :  { %v435_v19 = vld [vmem:[%s10741_s1 + $0xc00] sm:$0xff]  ;;  %v6767_v27 = vcombine.high %v428_v15, %v432_v17 }
  0xa2   :  { %3262 = vmatpush1.bf16.msra.mxu0 %v6700_v21  ;;  %3426 = vmatpush1.bf16.msra.mxu1 %v6702_v22  ;;  %v6765_v21 = vcombine.high %v427_v13, %v431_v14  ;;  %v439_v22 = vld [vmem:[%s10741_s1 + $0xc20] sm:$0xff] }
  0xa3   :  { %3263 = vmatprep.subr.bf16.mxu0 %v6709_v24  ;;  %3427 = vmatprep.subr.bf16.mxu1 %v6711_v29  ;;  %v436_v24 = vld [vmem:[%s10741_s1 + $0xc08] sm:$0xff]  ;;  %v6764_v29 = vcombine.low %v427_v13, %v431_v14 }
  0xa4   :  { %v6775_v37 = vcombine.high %v436_v24, %v440_v26 }
  0xa6   :  { %3264 = vmatpush1.bf16.msra.mxu0 %v6708_v31  ;;  %3428 = vmatpush1.bf16.msra.mxu1 %v6710_v32  ;;  %v6766_v31 = vcombine.low %v428_v15, %v432_v17  ;;  %v6773_v32 = vcombine.high %v435_v19, %v439_v22 }
  0xa7   :  { %3265 = vmatprep.subr.bf16.mxu0 %v6717_v33  ;;  %3429 = vmatprep.subr.bf16.mxu1 %v6719_v38  ;;  %v447_v33 = vld [vmem:[%s10741_s1 + $0xc60] sm:$0xff]  ;;  %v42_v38 = vld [vmem:[%s10740_s0 + $0x38] sm:$0xff] }
  0xaa   :  { %3266 = vmatpush1.bf16.msra.mxu0 %v6716_v40  ;;  %3430 = vmatpush1.bf16.msra.mxu1 %v6718_v41  ;;  %v6772_v40 = vcombine.low %v435_v19, %v439_v22  ;;  %v6774_v41 = vcombine.low %v436_v24, %v440_v26 }
  0xab   :  { %3267 = vmatprep.subr.bf16.mxu0 %v6725_v42  ;;  %3431 = vmatprep.subr.bf16.mxu1 %v6727_v46  ;;  %v6781_v42 = vcombine.high %v443_v30, %v447_v33  ;;  %v6783_v46 = vcombine.high %v444_v35, %v448_v36 }
  0xae   :  { %3268 = vmatpush1.bf16.msra.mxu0 %v6724_v48  ;;  %3432 = vmatpush1.bf16.msra.mxu1 %v6726_v49  ;;  %v8579_v48 = vpack.c.bf16 %v42_v38, %v42_v38  ;;  %v6780_v49 = vcombine.low %v443_v30, %v447_v33 }
  0xaf   :  { %3269 = vmatprep.subr.bf16.mxu0 %v6733_v50  ;;  %3433 = vmatprep.subr.bf16.mxu1 %v6735_v54 }
  0xb2   :  { %3270 = vmatpush1.bf16.msra.mxu0 %v6732_v56  ;;  %3434 = vmatpush1.bf16.msra.mxu1 %v6734_v58 }
  0xb3   :  { %3271 = vmatprep.subr.bf16.mxu0 %v6741_v59  ;;  %3435 = vmatprep.subr.bf16.mxu1 %v6743_v63 }
  0xb6   :  { %3272 = vmatpush1.bf16.msra.mxu0 %v6740_v1  ;;  %3436 = vmatpush1.bf16.msra.mxu1 %v6742_v2 }
  0xb7   :  { %3273 = vmatprep.subr.bf16.mxu0 %v6749_v3  ;;  %3437 = vmatprep.subr.bf16.mxu1 %v6751_v7 }
  0xba   :  { %3274 = vmatpush1.bf16.msra.mxu0 %v6748_v9  ;;  %3438 = vmatpush1.bf16.msra.mxu1 %v6750_v10 }
  0xbb   :  { %3275 = vmatprep.subr.bf16.mxu0 %v6757_v11  ;;  %3439 = vmatprep.subr.bf16.mxu1 %v6759_v16 }
  0xbe   :  { %3276 = vmatpush1.bf16.msra.mxu0 %v6756_v18  ;;  %3440 = vmatpush1.bf16.msra.mxu1 %v6758_v20 }
  0xbf   :  { %3277 = vmatprep.subr.bf16.mxu0 %v6765_v21  ;;  %3441 = vmatprep.subr.bf16.mxu1 %v6767_v27 }
  0xc2   :  { %3278 = vmatpush1.bf16.msra.mxu0 %v6764_v29  ;;  %3442 = vmatpush1.bf16.msra.mxu1 %v6766_v31 }
  0xc3   :  { %3288 = vmatprep.subr.bf16.mxu0 %v6773_v32  ;;  %3452 = vmatprep.subr.bf16.mxu1 %v6775_v37 }
  0xc5   :  { %3280 = vmatmul.mubr.bf16.vlgmr.msra.gmra.mrb[0].mxu0 %v8565_v39  ;;  %3444 = vmatmul.mubr.bf16.vlgmr.msra.gmra.mrb[0].mxu1 %v8565_v39 }
  0xc6   :  { %3289 = vmatpush1.bf16.msra.mxu0 %v6772_v40 }
  0xc7   :  { %16 = vsyncpa [#allocation3], 0  ;;  %3453 = vmatpush1.bf16.msra.mxu1 %v6774_v41  ;;  %3290 = vmatprep.subr.bf16.mxu0 %v6781_v42  ;;  %v6782_v50 = vcombine.low %v444_v35, %v448_v36  ;;  %v6789_v51 = vcombine.high %v451_v43, %v455_v44  ;;  %v6791_v52 = vcombine.high %v452_v45, %v456_v47  ;;  %v459_v53 = vld [vmem:[%s10741_s1 + $0xcc0] sm:$0xff]  ;;  %v460_v55 = vld [vmem:[%s10741_s1 + $0xcc8] sm:$0xff]  ;;  %s7842_s26 = smov 127   ;;  %s7844_s27 = smov 1  }
  0xc8   :  { %3454 = vmatprep.subr.bf16.mxu1 %v6783_v46  ;;  %v463_v54 = vld [vmem:[%s10741_s1 + $0xce0] sm:$0xff]  ;;  %3320 = vmatprep.mubr.bf16.mxu0 %v8579_v48  ;;  %v464_v56 = vld [vmem:[%s10741_s1 + $0xce8] sm:$0xff]  ;;  %v6788_v58 = vcombine.low %v451_v43, %v455_v44  ;;  %v6790_v59 = vcombine.low %v452_v45, %v456_v47  ;;  %s7845_s28 = smov 123   ;;  %s7846_s29 = smov 2   ;;  %vm6207_vm4 = vcmask 58368   ;;  %vm6120_vm5 = vcmask 7168  }
  0xc9   :  { %3484 = vmatprep.mubr.bf16.mxu1 %v8579_v48  ;;  %v6797_v60 = vcombine.high %v459_v53, %v463_v54  ;;  %v6799_v61 = vcombine.high %v460_v55, %v464_v56  ;;  %v467_v62 = vld [vmem:[%s10741_s1 + $0xd00] sm:$0xff]  ;;  %v468_v0 = vld [vmem:[%s10741_s1 + $0xd08] sm:$0xff]  ;;  %v6796_v2 = vcombine.low %v459_v53, %v463_v54  ;;  %v6798_v3 = vcombine.low %v460_v55, %v464_v56  ;;  %s7847_s30 = smov 124   ;;  %s7859_s12 = smov 120  }
  0xca   :  { %3291 = vmatpush1.bf16.msra.mxu0 %v6780_v49  ;;  %v471_v63 = vld [vmem:[%s10741_s1 + $0xd20] sm:$0xff]  ;;  %v472_v1 = vld [vmem:[%s10741_s1 + $0xd28] sm:$0xff]  ;;  %s7862_s13 = smov 5   ;;  %s7863_s14 = smov 9   ;;  %vm6122_vm6 = vcmask 15360   ;;  %vm6124_vm7 = vcmask 23552  }
  0xcb   :  { %3455 = vmatpush1.bf16.msra.mxu1 %v6782_v50  ;;  %3292 = vmatprep.subr.bf16.mxu0 %v6789_v51  ;;  %v6805_v4 = vcombine.high %v467_v62, %v471_v63  ;;  %v6807_v5 = vcombine.high %v468_v0, %v472_v1  ;;  %v475_v6 = vld [vmem:[%s10741_s1 + $0xd40] sm:$0xff]  ;;  %v476_v8 = vld [vmem:[%s10741_s1 + $0xd48] sm:$0xff]  ;;  %v6804_v10 = vcombine.low %v467_v62, %v471_v63  ;;  %s7865_s15 = smov 11   ;;  %s7866_s16 = smov 7   ;;  %vm6126_vm8 = vcmask 31744  }
  0xcc   :  { %3456 = vmatprep.subr.bf16.mxu1 %v6791_v52  ;;  %v479_v7 = vld [vmem:[%s10741_s1 + $0xd60] sm:$0xff]  ;;  %v480_v9 = vld [vmem:[%s10741_s1 + $0xd68] sm:$0xff]  ;;  %v6806_v11 = vcombine.low %v468_v0, %v472_v1  ;;  %vm6128_vm9 = vcmask 39936   ;;  %vm6130_vm10 = vcmask 48128   ;;  %vm6132_vm11 = vcmask 56320  }
  0xcd   :  { %v6813_v13 = vcombine.high %v475_v6, %v479_v7  ;;  %v6815_v14 = vcombine.high %v476_v8, %v480_v9  ;;  %v483_v15 = vld [vmem:[%s10741_s1 + $0xd80] sm:$0xff]  ;;  %v484_v17 = vld [vmem:[%s10741_s1 + $0xd88] sm:$0xff]  ;;  %v6812_v19 = vcombine.low %v475_v6, %v479_v7  ;;  %v6814_v20 = vcombine.low %v476_v8, %v480_v9 }
  0xce   :  { %3293 = vmatpush1.bf16.msra.mxu0 %v6788_v58  ;;  %v487_v16 = vld [vmem:[%s10741_s1 + $0xda0] sm:$0xff]  ;;  %v488_v18 = vld [vmem:[%s10741_s1 + $0xda8] sm:$0xff]  ;;  %vm6134_vm12 = vcmask 64512   ;;  %vm6136_vm13 = vcmask 72704   ;;  %vm6138_vm14 = vcmask 80896   ;;  %vm6140_vm15 = vcmask 89088  }
  0xcf   :  { %3457 = vmatpush1.bf16.msra.mxu1 %v6790_v59  ;;  %3294 = vmatprep.subr.bf16.mxu0 %v6797_v60  ;;  %v6821_v21 = vcombine.high %v483_v15, %v487_v16  ;;  %v6823_v22 = vcombine.high %v484_v17, %v488_v18  ;;  %v491_v24 = vld [vmem:[%s10741_s1 + $0xdc0] sm:$0xff]  ;;  %v492_v27 = vld [vmem:[%s10741_s1 + $0xdc8] sm:$0xff]  ;;  %v6820_v29 = vcombine.low %v483_v15, %v487_v16 }
  0xd0   :  { %3458 = vmatprep.subr.bf16.mxu1 %v6799_v61  ;;  %v495_v26 = vld [vmem:[%s10741_s1 + $0xde0] sm:$0xff]  ;;  %v496_v28 = vld [vmem:[%s10741_s1 + $0xde8] sm:$0xff]  ;;  %v6822_v30 = vcombine.low %v484_v17, %v488_v18 }
  0xd1   :  { %v6829_v31 = vcombine.high %v491_v24, %v495_v26  ;;  %v6831_v32 = vcombine.high %v492_v27, %v496_v28  ;;  %v499_v33 = vld [vmem:[%s10741_s1 + $0xe00] sm:$0xff]  ;;  %v500_v36 = vld [vmem:[%s10741_s1 + $0xe08] sm:$0xff]  ;;  %v6828_v38 = vcombine.low %v491_v24, %v495_v26  ;;  %v6830_v40 = vcombine.low %v492_v27, %v496_v28 }
  0xd2   :  { %3295 = vmatpush1.bf16.msra.mxu0 %v6796_v2  ;;  %v503_v35 = vld [vmem:[%s10741_s1 + $0xe20] sm:$0xff]  ;;  %v504_v37 = vld [vmem:[%s10741_s1 + $0xe28] sm:$0xff] }
  0xd3   :  { %3459 = vmatpush1.bf16.msra.mxu1 %v6798_v3  ;;  %3296 = vmatprep.subr.bf16.mxu0 %v6805_v4  ;;  %v6837_v41 = vcombine.high %v499_v33, %v503_v35  ;;  %v6839_v42 = vcombine.high %v500_v36, %v504_v37  ;;  %v507_v43 = vld [vmem:[%s10741_s1 + $0xe40] sm:$0xff]  ;;  %v508_v45 = vld [vmem:[%s10741_s1 + $0xe48] sm:$0xff]  ;;  %v6836_v47 = vcombine.low %v499_v33, %v503_v35 }
  0xd4   :  { %3460 = vmatprep.subr.bf16.mxu1 %v6807_v5  ;;  %v511_v44 = vld [vmem:[%s10741_s1 + $0xe60] sm:$0xff]  ;;  %v512_v46 = vld [vmem:[%s10741_s1 + $0xe68] sm:$0xff]  ;;  %v6838_v49 = vcombine.low %v500_v36, %v504_v37 }
  0xd5   :  { %v6845_v50 = vcombine.high %v507_v43, %v511_v44  ;;  %v6847_v51 = vcombine.high %v508_v45, %v512_v46  ;;  %v515_v52 = vld [vmem:[%s10741_s1 + $0xe80] sm:$0xff]  ;;  %v516_v54 = vld [vmem:[%s10741_s1 + $0xe88] sm:$0xff]  ;;  %v6844_v56 = vcombine.low %v507_v43, %v511_v44  ;;  %v6846_v58 = vcombine.low %v508_v45, %v512_v46  ;;  %v57_v43 = vld [vmem:[%s10741_s1 + $0x30] sm:$0xff] }
  0xd6   :  { %3297 = vmatpush1.bf16.msra.mxu0 %v6804_v10  ;;  %v519_v53 = vld [vmem:[%s10741_s1 + $0xea0] sm:$0xff]  ;;  %v520_v55 = vld [vmem:[%s10741_s1 + $0xea8] sm:$0xff]  ;;  %v54_v44 = vld [vmem:[%s10741_s1 + $0x18] sm:$0xff] }
  0xd7   :  { %3461 = vmatpush1.bf16.msra.mxu1 %v6806_v11  ;;  %3298 = vmatprep.subr.bf16.mxu0 %v6813_v13  ;;  %v6853_v59 = vcombine.high %v515_v52, %v519_v53  ;;  %v6855_v60 = vcombine.high %v516_v54, %v520_v55  ;;  %v523_v61 = vld [vmem:[%s10741_s1 + $0xec0] sm:$0xff]  ;;  %v524_v63 = vld [vmem:[%s10741_s1 + $0xec8] sm:$0xff]  ;;  %v6852_v1 = vcombine.low %v515_v52, %v519_v53  ;;  %v58_v45 = vld [vmem:[%s10741_s1 + $0x38] sm:$0xff] }
  0xd8   :  { %3462 = vmatprep.subr.bf16.mxu1 %v6815_v14  ;;  %v527_v62 = vld [vmem:[%s10741_s1 + $0xee0] sm:$0xff]  ;;  %v528_v0 = vld [vmem:[%s10741_s1 + $0xee8] sm:$0xff]  ;;  %v6854_v2 = vcombine.low %v516_v54, %v520_v55  ;;  %v61_v52 = vld [vmem:[%s10741_s1 + $0x50] sm:$0xff] }
  0xd9   :  { %v6861_v3 = vcombine.high %v523_v61, %v527_v62  ;;  %v6863_v4 = vcombine.high %v524_v63, %v528_v0  ;;  %v531_v5 = vld [vmem:[%s10741_s1 + $0xf00] sm:$0xff]  ;;  %v532_v7 = vld [vmem:[%s10741_s1 + $0xf08] sm:$0xff]  ;;  %v6860_v9 = vcombine.low %v523_v61, %v527_v62  ;;  %v6862_v10 = vcombine.low %v524_v63, %v528_v0  ;;  %v65_v53 = vld [vmem:[%s10741_s1 + $0x70] sm:$0xff] }
  0xda   :  { %3299 = vmatpush1.bf16.msra.mxu0 %v6812_v19  ;;  %v535_v6 = vld [vmem:[%s10741_s1 + $0xf20] sm:$0xff]  ;;  %v536_v8 = vld [vmem:[%s10741_s1 + $0xf28] sm:$0xff]  ;;  %v62_v55 = vld [vmem:[%s10741_s1 + $0x58] sm:$0xff] }
  0xdb   :  { %3463 = vmatpush1.bf16.msra.mxu1 %v6814_v20  ;;  %3300 = vmatprep.subr.bf16.mxu0 %v6821_v21  ;;  %v6869_v11 = vcombine.high %v531_v5, %v535_v6  ;;  %v6871_v13 = vcombine.high %v532_v7, %v536_v8  ;;  %v539_v14 = vld [vmem:[%s10741_s1 + $0xf40] sm:$0xff]  ;;  %v540_v16 = vld [vmem:[%s10741_s1 + $0xf48] sm:$0xff]  ;;  %v6868_v18 = vcombine.low %v531_v5, %v535_v6  ;;  %v69_v62 = vld [vmem:[%s10741_s1 + $0x90] sm:$0xff] }
  0xdc   :  { %3464 = vmatprep.subr.bf16.mxu1 %v6823_v22  ;;  %v543_v15 = vld [vmem:[%s10741_s1 + $0xf60] sm:$0xff]  ;;  %v544_v17 = vld [vmem:[%s10741_s1 + $0xf68] sm:$0xff]  ;;  %v6870_v19 = vcombine.low %v532_v7, %v536_v8  ;;  %v73_v63 = vld [vmem:[%s10741_s1 + $0xb0] sm:$0xff] }
  0xdd   :  { %v6877_v20 = vcombine.high %v539_v14, %v543_v15  ;;  %v6879_v21 = vcombine.high %v540_v16, %v544_v17  ;;  %v547_v22 = vld [vmem:[%s10741_s1 + $0xf80] sm:$0xff]  ;;  %v548_v26 = vld [vmem:[%s10741_s1 + $0xf88] sm:$0xff]  ;;  %v6876_v28 = vcombine.low %v539_v14, %v543_v15  ;;  %v70_v0 = vld [vmem:[%s10741_s1 + $0x98] sm:$0xff] }
  0xde   :  { %3301 = vmatpush1.bf16.msra.mxu0 %v6820_v29  ;;  %v551_v24 = vld [vmem:[%s10741_s1 + $0xfa0] sm:$0xff]  ;;  %v552_v27 = vld [vmem:[%s10741_s1 + $0xfa8] sm:$0xff]  ;;  %v6878_v29 = vcombine.low %v540_v16, %v544_v17  ;;  %v77_v6 = vld [vmem:[%s10741_s1 + $0xd0] sm:$0xff] }
  0xdf   :  { %3465 = vmatpush1.bf16.msra.mxu1 %v6822_v30  ;;  %3302 = vmatprep.subr.bf16.mxu0 %v6829_v31  ;;  %v6885_v30 = vcombine.high %v547_v22, %v551_v24  ;;  %v6887_v31 = vcombine.high %v548_v26, %v552_v27  ;;  %v559_v33 = vld [vmem:[%s10741_s1 + $0xfe0] sm:$0xff]  ;;  %v556_v35 = vld [vmem:[%s10741_s1 + $0xfc8] sm:$0xff]  ;;  %v6884_v37 = vcombine.low %v547_v22, %v551_v24  ;;  %v81_v7 = vld [vmem:[%s10741_s1 + $0xf0] sm:$0xff] }
  0xe0   :  { %3466 = vmatprep.subr.bf16.mxu1 %v6831_v32  ;;  %v555_v32 = vld [vmem:[%s10741_s1 + $0xfc0] sm:$0xff]  ;;  %v560_v36 = vld [vmem:[%s10741_s1 + $0xfe8] sm:$0xff]  ;;  %v78_v8 = vld [vmem:[%s10741_s1 + $0xd8] sm:$0xff] }
  0xe1   :  { %v6892_v46 = vcombine.low %v555_v32, %v559_v33  ;;  %v85_v15 = vld [vmem:[%s10741_s1 + $0x110] sm:$0xff]  ;;  %v90_v17 = vld [vmem:[%s10741_s1 + $0x138] sm:$0xff] }
  0xe2   :  { %3303 = vmatpush1.bf16.msra.mxu0 %v6828_v38  ;;  %v6886_v38 = vcombine.low %v548_v26, %v552_v27  ;;  %v89_v16 = vld [vmem:[%s10741_s1 + $0x130] sm:$0xff]  ;;  %v94_v26 = vld [vmem:[%s10741_s1 + $0x158] sm:$0xff] }
  0xe3   :  { %3467 = vmatpush1.bf16.msra.mxu1 %v6830_v40  ;;  %3304 = vmatprep.subr.bf16.mxu0 %v6837_v41  ;;  %v6893_v40 = vcombine.high %v555_v32, %v559_v33  ;;  %v6895_v41 = vcombine.high %v556_v35, %v560_v36  ;;  %v93_v22 = vld [vmem:[%s10741_s1 + $0x150] sm:$0xff]  ;;  %v98_v27 = vld [vmem:[%s10741_s1 + $0x178] sm:$0xff] }
  0xe4   :  { %3468 = vmatprep.subr.bf16.mxu1 %v6839_v42  ;;  %v53_v42 = vld [vmem:[%s10741_s1 + $0x10] sm:$0xff] }
  0xe5   :  { %v97_v24 = vld [vmem:[%s10741_s1 + $0x170] sm:$0xff] }
  0xe6   :  { %3305 = vmatpush1.bf16.msra.mxu0 %v6836_v47  ;;  %v41_v47 = vld [vmem:[%s10740_s0 + $0x30] sm:$0xff]  ;;  %s7864_s0 = smov 3  }
  0xe7   :  { %3469 = vmatpush1.bf16.msra.mxu1 %v6838_v49  ;;  %3306 = vmatprep.subr.bf16.mxu0 %v6845_v50  ;;  %v6894_v49 = vcombine.low %v556_v35, %v560_v36  ;;  %v6393_v50 = vcombine.high %v53_v42, %v57_v43  ;;  %v8762_v54 = vpack.c.bf16 %v41_v47, %v41_v47  ;;  %v101_v32 = vld [vmem:[%s10741_s1 + $0x190] sm:$0xff]  ;;  %v102_v35 = vld [vmem:[%s10741_s1 + $0x198] sm:$0xff] }
  0xe8   :  { %3470 = vmatprep.subr.bf16.mxu1 %v6847_v51  ;;  %v6395_v51 = vcombine.high %v54_v44, %v58_v45  ;;  %v105_v33 = vld [vmem:[%s10741_s1 + $0x1b0] sm:$0xff]  ;;  %v106_v36 = vld [vmem:[%s10741_s1 + $0x1b8] sm:$0xff] }
  0xe9   :  { %v6442_v47 = vcombine.low %v102_v35, %v106_v36 }
  0xea   :  { %3307 = vmatpush1.bf16.msra.mxu0 %v6844_v56  ;;  %v66_v56 = vld [vmem:[%s10741_s1 + $0x78] sm:$0xff] }
  0xeb   :  { %3471 = vmatpush1.bf16.msra.mxu1 %v6846_v58  ;;  %3308 = vmatprep.subr.bf16.mxu0 %v6853_v59  ;;  %v6392_v58 = vcombine.low %v53_v42, %v57_v43  ;;  %v6394_v59 = vcombine.low %v54_v44, %v58_v45  ;;  %v6403_v61 = vcombine.high %v62_v55, %v66_v56  ;;  %v109_v42 = vld [vmem:[%s10741_s1 + $0x1d0] sm:$0xff]  ;;  %v110_v44 = vld [vmem:[%s10741_s1 + $0x1d8] sm:$0xff] }
  0xec   :  { %3472 = vmatprep.subr.bf16.mxu1 %v6855_v60  ;;  %v6401_v60 = vcombine.high %v61_v52, %v65_v53  ;;  %v113_v43 = vld [vmem:[%s10741_s1 + $0x1f0] sm:$0xff]  ;;  %v114_v45 = vld [vmem:[%s10741_s1 + $0x1f8] sm:$0xff] }
  0xee   :  { %3309 = vmatpush1.bf16.msra.mxu0 %v6852_v1  ;;  %v74_v1 = vld [vmem:[%s10741_s1 + $0xb8] sm:$0xff] }
  0xef   :  { %3473 = vmatpush1.bf16.msra.mxu1 %v6854_v2  ;;  %3310 = vmatprep.subr.bf16.mxu0 %v6861_v3  ;;  %v6400_v2 = vcombine.low %v61_v52, %v65_v53  ;;  %v6402_v3 = vcombine.low %v62_v55, %v66_v56  ;;  %v6411_v5 = vcombine.high %v70_v0, %v74_v1  ;;  %v121_v52 = vld [vmem:[%s10741_s1 + $0x230] sm:$0xff]  ;;  %v118_v53 = vld [vmem:[%s10741_s1 + $0x218] sm:$0xff] }
  0xf0   :  { %3474 = vmatprep.subr.bf16.mxu1 %v6863_v4  ;;  %v6409_v4 = vcombine.high %v69_v62, %v73_v63  ;;  %v122_v55 = vld [vmem:[%s10741_s1 + $0x238] sm:$0xff]  ;;  %v6448_v56 = vcombine.low %v109_v42, %v113_v43 }
  0xf2   :  { %3311 = vmatpush1.bf16.msra.mxu0 %v6860_v9  ;;  %v82_v9 = vld [vmem:[%s10741_s1 + $0xf8] sm:$0xff] }
  0xf3   :  { %3475 = vmatpush1.bf16.msra.mxu1 %v6862_v10  ;;  %3312 = vmatprep.subr.bf16.mxu0 %v6869_v11  ;;  %v6408_v10 = vcombine.low %v69_v62, %v73_v63  ;;  %v6410_v11 = vcombine.low %v70_v0, %v74_v1  ;;  %v6419_v14 = vcombine.high %v78_v8, %v82_v9  ;;  %v129_v62 = vld [vmem:[%s10741_s1 + $0x270] sm:$0xff]  ;;  %v126_v63 = vld [vmem:[%s10741_s1 + $0x258] sm:$0xff] }
  0xf4   :  { %3476 = vmatprep.subr.bf16.mxu1 %v6871_v13  ;;  %v6417_v13 = vcombine.high %v77_v6, %v81_v7  ;;  %v130_v0 = vld [vmem:[%s10741_s1 + $0x278] sm:$0xff] }
  0xf6   :  { %3313 = vmatpush1.bf16.msra.mxu0 %v6868_v18  ;;  %v6416_v18 = vcombine.low %v77_v6, %v81_v7  ;;  %v137_v6 = vld [vmem:[%s10741_s1 + $0x2b0] sm:$0xff]  ;;  %v134_v7 = vld [vmem:[%s10741_s1 + $0x298] sm:$0xff] }
  0xf7   :  { %3477 = vmatpush1.bf16.msra.mxu1 %v6870_v19  ;;  %3314 = vmatprep.subr.bf16.mxu0 %v6877_v20  ;;  %v6418_v19 = vcombine.low %v78_v8, %v82_v9  ;;  %v6425_v20 = vcombine.high %v85_v15, %v89_v16  ;;  %v138_v8 = vld [vmem:[%s10741_s1 + $0x2b8] sm:$0xff] }
  0xf8   :  { %3478 = vmatprep.subr.bf16.mxu1 %v6879_v21 }
  0xfa   :  { %3315 = vmatpush1.bf16.msra.mxu0 %v6876_v28  ;;  %v6424_v28 = vcombine.low %v85_v15, %v89_v16  ;;  %v145_v15 = vld [vmem:[%s10741_s1 + $0x2f0] sm:$0xff]  ;;  %v142_v16 = vld [vmem:[%s10741_s1 + $0x2d8] sm:$0xff] }
  0xfb   :  { %3479 = vmatpush1.bf16.msra.mxu1 %v6878_v29  ;;  %3316 = vmatprep.subr.bf16.mxu0 %v6885_v30  ;;  %v6433_v30 = vcombine.high %v93_v22, %v97_v24 }
  0xfc   :  { %3480 = vmatprep.subr.bf16.mxu1 %v6887_v31  ;;  %v6435_v31 = vcombine.high %v94_v26, %v98_v27 }
  0xfe   :  { %3317 = vmatpush1.bf16.msra.mxu0 %v6884_v37  ;;  %v6432_v37 = vcombine.low %v93_v22, %v97_v24  ;;  %v153_v22 = vld [vmem:[%s10741_s1 + $0x330] sm:$0xff]  ;;  %v150_v24 = vld [vmem:[%s10741_s1 + $0x318] sm:$0xff] }
  0xff   :  { %3481 = vmatpush1.bf16.msra.mxu1 %v6886_v38  ;;  %3318 = vmatprep.subr.bf16.mxu0 %v6893_v40  ;;  %v6434_v38 = vcombine.low %v94_v26, %v98_v27  ;;  %v6441_v40 = vcombine.high %v101_v32, %v105_v33  ;;  %v154_v26 = vld [vmem:[%s10741_s1 + $0x338] sm:$0xff] }
 0x100   :  { %3482 = vmatprep.subr.bf16.mxu1 %v6895_v41  ;;  %v6443_v41 = vcombine.high %v102_v35, %v106_v36  ;;  %v162_v35 = vld [vmem:[%s10741_s1 + $0x378] sm:$0xff] }
 0x102   :  { %3319 = vmatpush1.bf16.msra.mxu0 %v6892_v46  ;;  %v6440_v46 = vcombine.low %v101_v32, %v105_v33  ;;  %v161_v32 = vld [vmem:[%s10741_s1 + $0x370] sm:$0xff]  ;;  %v158_v33 = vld [vmem:[%s10741_s1 + $0x358] sm:$0xff] }
 0x103   :  { %3483 = vmatpush1.bf16.msra.mxu1 %v6894_v49  ;;  %3493 = vmatprep.subr.bf16.mxu0 %v6393_v50  ;;  %v6449_v49 = vcombine.high %v109_v42, %v113_v43  ;;  %v6451_v50 = vcombine.high %v110_v44, %v114_v45  ;;  %v169_v42 = vld [vmem:[%s10741_s1 + $0x3b0] sm:$0xff]  ;;  %v166_v43 = vld [vmem:[%s10741_s1 + $0x398] sm:$0xff] }
 0x104   :  { %3657 = vmatprep.subr.bf16.mxu1 %v6395_v51  ;;  %v117_v51 = vld [vmem:[%s10741_s1 + $0x210] sm:$0xff] }
 0x105   :  { %3321 = vmatmul.mubr.bf16.vlgmr.msra.gmra.mrb[0].mxu0 %v8762_v54  ;;  %v6456_v1 = vcombine.low %v117_v51, %v121_v52 }
 0x106   :  { %3485 = vmatmul.mubr.bf16.vlgmr.msra.gmra.mrb[0].mxu1 %v8762_v54  ;;  %3494 = vmatpush1.bf16.msra.mxu0 %v6392_v58  ;;  %v6450_v58 = vcombine.low %v110_v44, %v114_v45  ;;  %v170_v44 = vld [vmem:[%s10741_s1 + $0x3b8] sm:$0xff] }
 0x107   :  { %3658 = vmatpush1.bf16.msra.mxu1 %v6394_v59  ;;  %3495 = vmatprep.subr.bf16.mxu0 %v6401_v60  ;;  %v6457_v59 = vcombine.high %v117_v51, %v121_v52  ;;  %v6459_v60 = vcombine.high %v118_v53, %v122_v55  ;;  %v177_v51 = vld [vmem:[%s10741_s1 + $0x3f0] sm:$0xff]  ;;  %v174_v52 = vld [vmem:[%s10741_s1 + $0x3d8] sm:$0xff] }
 0x108   :  { %3659 = vmatprep.subr.bf16.mxu1 %v6403_v61  ;;  %3525 = vmatprep.mubr.bf16.mxu0 %v8017_v57  ;;  %v125_v61 = vld [vmem:[%s10741_s1 + $0x250] sm:$0xff] }
 0x109   :  { %3689 = vmatprep.mubr.bf16.mxu1 %v8017_v57  ;;  %v86_v57 = vld [vmem:[%s10741_s1 + $0x118] sm:$0xff]  ;;  %v6464_v9 = vcombine.low %v125_v61, %v129_v62 }
 0x10a   :  { %3496 = vmatpush1.bf16.msra.mxu0 %v6400_v2  ;;  %v6427_v21 = vcombine.high %v86_v57, %v90_v17  ;;  %v6426_v29 = vcombine.low %v86_v57, %v90_v17  ;;  %v6458_v2 = vcombine.low %v118_v53, %v122_v55  ;;  %v146_v57 = vld [vmem:[%s10741_s1 + $0x2f8] sm:$0xff] }
 0x10b   :  { %3660 = vmatpush1.bf16.msra.mxu1 %v6402_v3  ;;  %3497 = vmatprep.subr.bf16.mxu0 %v6409_v4  ;;  %v6465_v3 = vcombine.high %v125_v61, %v129_v62  ;;  %v6467_v4 = vcombine.high %v126_v63, %v130_v0  ;;  %v178_v53 = vld [vmem:[%s10741_s1 + $0x3f8] sm:$0xff]  ;;  %v185_v61 = vld [vmem:[%s10741_s1 + $0x430] sm:$0xff] }
 0x10c   :  { %3661 = vmatprep.subr.bf16.mxu1 %v6411_v5  ;;  %v133_v5 = vld [vmem:[%s10741_s1 + $0x290] sm:$0xff]  ;;  %v182_v62 = vld [vmem:[%s10741_s1 + $0x418] sm:$0xff] }
 0x10d   :  { %v6472_v17 = vcombine.low %v133_v5, %v137_v6 }
 0x10e   :  { %3498 = vmatpush1.bf16.msra.mxu0 %v6408_v10  ;;  %v6466_v10 = vcombine.low %v126_v63, %v130_v0  ;;  %v186_v63 = vld [vmem:[%s10741_s1 + $0x438] sm:$0xff] }
 0x10f   :  { %3662 = vmatpush1.bf16.msra.mxu1 %v6410_v11  ;;  %3499 = vmatprep.subr.bf16.mxu0 %v6417_v13  ;;  %v6473_v11 = vcombine.high %v133_v5, %v137_v6  ;;  %v6475_v13 = vcombine.high %v134_v7, %v138_v8  ;;  %v193_v5 = vld [vmem:[%s10741_s1 + $0x470] sm:$0xff]  ;;  %v190_v6 = vld [vmem:[%s10741_s1 + $0x458] sm:$0xff] }
 0x110   :  { %3663 = vmatprep.subr.bf16.mxu1 %v6419_v14  ;;  %v141_v14 = vld [vmem:[%s10741_s1 + $0x2d0] sm:$0xff] }
 0x111   :  { %v6480_v27 = vcombine.low %v141_v14, %v145_v15 }
 0x112   :  { %3500 = vmatpush1.bf16.msra.mxu0 %v6416_v18  ;;  %v6474_v18 = vcombine.low %v134_v7, %v138_v8  ;;  %v194_v7 = vld [vmem:[%s10741_s1 + $0x478] sm:$0xff] }
 0x113   :  { %3664 = vmatpush1.bf16.msra.mxu1 %v6418_v19  ;;  %3501 = vmatprep.subr.bf16.mxu0 %v6425_v20  ;;  %v6481_v19 = vcombine.high %v141_v14, %v145_v15  ;;  %v6483_v20 = vcombine.high %v142_v16, %v146_v57  ;;  %v201_v14 = vld [vmem:[%s10741_s1 + $0x4b0] sm:$0xff]  ;;  %v198_v15 = vld [vmem:[%s10741_s1 + $0x498] sm:$0xff] }
 0x114   :  { %3665 = vmatprep.subr.bf16.mxu1 %v6427_v21  ;;  %v149_v21 = vld [vmem:[%s10741_s1 + $0x310] sm:$0xff] }
 0x115   :  { %v6488_v36 = vcombine.low %v149_v21, %v153_v22 }
 0x116   :  { %3502 = vmatpush1.bf16.msra.mxu0 %v6424_v28  ;;  %v6482_v28 = vcombine.low %v142_v16, %v146_v57  ;;  %v202_v16 = vld [vmem:[%s10741_s1 + $0x4b8] sm:$0xff] }
 0x117   :  { %3666 = vmatpush1.bf16.msra.mxu1 %v6426_v29  ;;  %3503 = vmatprep.subr.bf16.mxu0 %v6433_v30  ;;  %v6489_v29 = vcombine.high %v149_v21, %v153_v22  ;;  %v6491_v30 = vcombine.high %v150_v24, %v154_v26  ;;  %v209_v21 = vld [vmem:[%s10741_s1 + $0x4f0] sm:$0xff]  ;;  %v210_v22 = vld [vmem:[%s10741_s1 + $0x4f8] sm:$0xff] }
 0x118   :  { %3667 = vmatprep.subr.bf16.mxu1 %v6435_v31  ;;  %v157_v31 = vld [vmem:[%s10741_s1 + $0x350] sm:$0xff] }
 0x119   :  { %v6496_v45 = vcombine.low %v157_v31, %v161_v32 }
 0x11a   :  { %3504 = vmatpush1.bf16.msra.mxu0 %v6432_v37  ;;  %v6490_v37 = vcombine.low %v150_v24, %v154_v26  ;;  %v6538_v26 = vcombine.low %v198_v15, %v202_v16 }
 0x11b   :  { %3668 = vmatpush1.bf16.msra.mxu1 %v6434_v38  ;;  %3505 = vmatprep.subr.bf16.mxu0 %v6441_v40  ;;  %v6497_v38 = vcombine.high %v157_v31, %v161_v32  ;;  %v6499_v40 = vcombine.high %v158_v33, %v162_v35  ;;  %v218_v31 = vld [vmem:[%s10741_s1 + $0x538] sm:$0xff] }
 0x11c   :  { %3669 = vmatprep.subr.bf16.mxu1 %v6443_v41  ;;  %v165_v41 = vld [vmem:[%s10741_s1 + $0x390] sm:$0xff] }
 0x11d   :  { %v6504_v55 = vcombine.low %v165_v41, %v169_v42 }
 0x11e   :  { %3506 = vmatpush1.bf16.msra.mxu0 %v6440_v46  ;;  %v6498_v46 = vcombine.low %v158_v33, %v162_v35 }
 0x11f   :  { %3670 = vmatpush1.bf16.msra.mxu1 %v6442_v47  ;;  %3507 = vmatprep.subr.bf16.mxu0 %v6449_v49  ;;  %v6505_v47 = vcombine.high %v165_v41, %v169_v42  ;;  %v6507_v49 = vcombine.high %v166_v43, %v170_v44  ;;  %v226_v41 = vld [vmem:[%s10741_s1 + $0x578] sm:$0xff] }
 0x120   :  { %3671 = vmatprep.subr.bf16.mxu1 %v6451_v50  ;;  %v173_v50 = vld [vmem:[%s10741_s1 + $0x3d0] sm:$0xff] }
 0x121   :  { %v6512_v0 = vcombine.low %v173_v50, %v177_v51 }
 0x122   :  { %3508 = vmatpush1.bf16.msra.mxu0 %v6448_v56  ;;  %v6506_v56 = vcombine.low %v166_v43, %v170_v44 }
 0x123   :  { %3672 = vmatpush1.bf16.msra.mxu1 %v6450_v58  ;;  %3509 = vmatprep.subr.bf16.mxu0 %v6457_v59  ;;  %v6513_v58 = vcombine.high %v173_v50, %v177_v51  ;;  %v6515_v59 = vcombine.high %v174_v52, %v178_v53  ;;  %v234_v50 = vld [vmem:[%s10741_s1 + $0x5b8] sm:$0xff] }
 0x124   :  { %3673 = vmatprep.subr.bf16.mxu1 %v6459_v60  ;;  %v181_v60 = vld [vmem:[%s10741_s1 + $0x410] sm:$0xff] }
 0x125   :  { %v6520_v8 = vcombine.low %v181_v60, %v185_v61 }
 0x126   :  { %3510 = vmatpush1.bf16.msra.mxu0 %v6456_v1  ;;  %v6514_v1 = vcombine.low %v174_v52, %v178_v53 }
 0x127   :  { %3674 = vmatpush1.bf16.msra.mxu1 %v6458_v2  ;;  %3511 = vmatprep.subr.bf16.mxu0 %v6465_v3  ;;  %v6521_v2 = vcombine.high %v181_v60, %v185_v61  ;;  %v6523_v3 = vcombine.high %v182_v62, %v186_v63  ;;  %v242_v60 = vld [vmem:[%s10741_s1 + $0x5f8] sm:$0xff] }
 0x128   :  { %3675 = vmatprep.subr.bf16.mxu1 %v6467_v4  ;;  %v189_v4 = vld [vmem:[%s10741_s1 + $0x450] sm:$0xff] }
 0x129   :  { %v6528_v57 = vcombine.low %v189_v4, %v193_v5 }
 0x12a   :  { %3512 = vmatpush1.bf16.msra.mxu0 %v6464_v9  ;;  %v6522_v9 = vcombine.low %v182_v62, %v186_v63 }
 0x12b   :  { %3676 = vmatpush1.bf16.msra.mxu1 %v6466_v10  ;;  %3513 = vmatprep.subr.bf16.mxu0 %v6473_v11  ;;  %v6529_v10 = vcombine.high %v189_v4, %v193_v5  ;;  %v6531_v11 = vcombine.high %v190_v6, %v194_v7  ;;  %v250_v4 = vld [vmem:[%s10741_s1 + $0x638] sm:$0xff] }
 0x12c   :  { %3677 = vmatprep.subr.bf16.mxu1 %v6475_v13  ;;  %v197_v13 = vld [vmem:[%s10741_s1 + $0x490] sm:$0xff] }
 0x12d   :  { %v6536_v24 = vcombine.low %v197_v13, %v201_v14 }
 0x12e   :  { %3514 = vmatpush1.bf16.msra.mxu0 %v6472_v17  ;;  %v6530_v17 = vcombine.low %v190_v6, %v194_v7 }
 0x12f   :  { %3678 = vmatpush1.bf16.msra.mxu1 %v6474_v18  ;;  %3515 = vmatprep.subr.bf16.mxu0 %v6481_v19  ;;  %v6537_v18 = vcombine.high %v197_v13, %v201_v14  ;;  %v6539_v19 = vcombine.high %v198_v15, %v202_v16  ;;  %v258_v13 = vld [vmem:[%s10741_s1 + $0x678] sm:$0xff] }
 0x130   :  { %3679 = vmatprep.subr.bf16.mxu1 %v6483_v20  ;;  %v205_v20 = vld [vmem:[%s10741_s1 + $0x4d0] sm:$0xff] }
 0x131   :  { %v6544_v32 = vcombine.low %v205_v20, %v209_v21 }
 0x132   :  { %3516 = vmatpush1.bf16.msra.mxu0 %v6480_v27  ;;  %v6545_v27 = vcombine.high %v205_v20, %v209_v21  ;;  %v266_v20 = vld [vmem:[%s10741_s1 + $0x6b8] sm:$0xff] }
 0x133   :  { %3680 = vmatpush1.bf16.msra.mxu1 %v6482_v28  ;;  %3517 = vmatprep.subr.bf16.mxu0 %v6489_v29  ;;  %v213_v29 = vld [vmem:[%s10741_s1 + $0x510] sm:$0xff] }
 0x134   :  { %3681 = vmatprep.subr.bf16.mxu1 %v6491_v30  ;;  %v217_v30 = vld [vmem:[%s10741_s1 + $0x530] sm:$0xff] }
 0x135   :  { %v6553_v35 = vcombine.high %v213_v29, %v217_v30  ;;  %v6552_v42 = vcombine.low %v213_v29, %v217_v30  ;;  %v274_v29 = vld [vmem:[%s10741_s1 + $0x6f8] sm:$0xff] }
 0x136   :  { %3518 = vmatpush1.bf16.msra.mxu0 %v6488_v36 }
 0x137   :  { %3682 = vmatpush1.bf16.msra.mxu1 %v6490_v37  ;;  %3519 = vmatprep.subr.bf16.mxu0 %v6497_v38  ;;  %v221_v37 = vld [vmem:[%s10741_s1 + $0x550] sm:$0xff] }
 0x138   :  { %3683 = vmatprep.subr.bf16.mxu1 %v6499_v40  ;;  %v225_v38 = vld [vmem:[%s10741_s1 + $0x570] sm:$0xff]  ;;  %v222_v40 = vld [vmem:[%s10741_s1 + $0x558] sm:$0xff] }
 0x139   :  { %v6561_v44 = vcombine.high %v221_v37, %v225_v38  ;;  %v6560_v51 = vcombine.low %v221_v37, %v225_v38  ;;  %v6562_v52 = vcombine.low %v222_v40, %v226_v41  ;;  %v282_v37 = vld [vmem:[%s10741_s1 + $0x738] sm:$0xff] }
 0x13a   :  { %3520 = vmatpush1.bf16.msra.mxu0 %v6496_v45  ;;  %v6563_v45 = vcombine.high %v222_v40, %v226_v41 }
 0x13b   :  { %3684 = vmatpush1.bf16.msra.mxu1 %v6498_v46  ;;  %3521 = vmatprep.subr.bf16.mxu0 %v6505_v47  ;;  %v229_v46 = vld [vmem:[%s10741_s1 + $0x590] sm:$0xff] }
 0x13c   :  { %3685 = vmatprep.subr.bf16.mxu1 %v6507_v49  ;;  %v233_v47 = vld [vmem:[%s10741_s1 + $0x5b0] sm:$0xff]  ;;  %v230_v49 = vld [vmem:[%s10741_s1 + $0x598] sm:$0xff] }
 0x13d   :  { %v6569_v53 = vcombine.high %v229_v46, %v233_v47  ;;  %v6568_v61 = vcombine.low %v229_v46, %v233_v47  ;;  %v6570_v62 = vcombine.low %v230_v49, %v234_v50  ;;  %v290_v46 = vld [vmem:[%s10741_s1 + $0x778] sm:$0xff] }
 0x13e   :  { %3522 = vmatpush1.bf16.msra.mxu0 %v6504_v55  ;;  %v6571_v55 = vcombine.high %v230_v49, %v234_v50 }
 0x13f   :  { %3686 = vmatpush1.bf16.msra.mxu1 %v6506_v56  ;;  %3523 = vmatprep.subr.bf16.mxu0 %v6513_v58  ;;  %v237_v56 = vld [vmem:[%s10741_s1 + $0x5d0] sm:$0xff] }
 0x140   :  { %3687 = vmatprep.subr.bf16.mxu1 %v6515_v59  ;;  %v241_v58 = vld [vmem:[%s10741_s1 + $0x5f0] sm:$0xff]  ;;  %v238_v59 = vld [vmem:[%s10741_s1 + $0x5d8] sm:$0xff] }
 0x141   :  { %v6577_v63 = vcombine.high %v237_v56, %v241_v58  ;;  %v6576_v5 = vcombine.low %v237_v56, %v241_v58  ;;  %v6578_v6 = vcombine.low %v238_v59, %v242_v60  ;;  %v298_v56 = vld [vmem:[%s10741_s1 + $0x7b8] sm:$0xff] }
 0x142   :  { %3524 = vmatpush1.bf16.msra.mxu0 %v6512_v0  ;;  %v6579_v0 = vcombine.high %v238_v59, %v242_v60 }
 0x143   :  { %3688 = vmatpush1.bf16.msra.mxu1 %v6514_v1  ;;  %3534 = vmatprep.subr.bf16.mxu0 %v6521_v2  ;;  %v245_v1 = vld [vmem:[%s10741_s1 + $0x610] sm:$0xff] }
 0x144   :  { %3698 = vmatprep.subr.bf16.mxu1 %v6523_v3  ;;  %v249_v2 = vld [vmem:[%s10741_s1 + $0x630] sm:$0xff]  ;;  %v246_v3 = vld [vmem:[%s10741_s1 + $0x618] sm:$0xff] }
 0x145   :  { %3526 = vmatmul.mubr.bf16.vlgmr.msra.gmra.mrb[4].mxu0 %v8144_v12  ;;  %v6585_v7 = vcombine.high %v245_v1, %v249_v2  ;;  %v6584_v14 = vcombine.low %v245_v1, %v249_v2  ;;  %v6586_v15 = vcombine.low %v246_v3, %v250_v4  ;;  %v306_v1 = vld [vmem:[%s10741_s1 + $0x7f8] sm:$0xff] }
 0x146   :  { %3535 = vmatpush1.bf16.msra.mxu0 %v6520_v8  ;;  %3690 = vmatmul.mubr.bf16.vlgmr.msra.gmra.mrb[4].mxu1 %v8144_v12  ;;  %v206_v12 = vld [vmem:[%s10741_s1 + $0x4d8] sm:$0xff]  ;;  %v6587_v8 = vcombine.high %v246_v3, %v250_v4 }
 0x147   :  { %3699 = vmatpush1.bf16.msra.mxu1 %v6522_v9  ;;  %3536 = vmatprep.subr.bf16.mxu0 %v6529_v10  ;;  %v6547_v28 = vcombine.high %v206_v12, %v210_v22  ;;  %v6546_v33 = vcombine.low %v206_v12, %v210_v22  ;;  %v253_v9 = vld [vmem:[%s10741_s1 + $0x650] sm:$0xff] }
 0x148   :  { %3700 = vmatprep.subr.bf16.mxu1 %v6531_v11  ;;  %3566 = vmatprep.mubr.bf16.mxu0 %v8164_v23  ;;  %v257_v10 = vld [vmem:[%s10741_s1 + $0x670] sm:$0xff]  ;;  %v254_v11 = vld [vmem:[%s10741_s1 + $0x658] sm:$0xff] }
 0x149   :  { %3730 = vmatprep.mubr.bf16.mxu1 %v8164_v23  ;;  %v214_v23 = vld [vmem:[%s10741_s1 + $0x518] sm:$0xff]  ;;  %v6593_v16 = vcombine.high %v253_v9, %v257_v10  ;;  %v6592_v21 = vcombine.low %v253_v9, %v257_v10  ;;  %v6594_v12 = vcombine.low %v254_v11, %v258_v13 }
 0x14a   :  { %3537 = vmatpush1.bf16.msra.mxu0 %v6528_v57  ;;  %v6555_v36 = vcombine.high %v214_v23, %v218_v31  ;;  %v6554_v43 = vcombine.low %v214_v23, %v218_v31  ;;  %v6595_v57 = vcombine.high %v254_v11, %v258_v13  ;;  %v314_v9 = vld [vmem:[%s10741_s1 + $0x838] sm:$0xff] }
 0x14b   :  { %3701 = vmatpush1.bf16.msra.mxu1 %v6530_v17  ;;  %3538 = vmatprep.subr.bf16.mxu0 %v6537_v18  ;;  %v261_v17 = vld [vmem:[%s10741_s1 + $0x690] sm:$0xff] }
 0x14c   :  { %3702 = vmatprep.subr.bf16.mxu1 %v6539_v19  ;;  %v265_v18 = vld [vmem:[%s10741_s1 + $0x6b0] sm:$0xff]  ;;  %v262_v19 = vld [vmem:[%s10741_s1 + $0x698] sm:$0xff] }
 0x14d   :  { %v6601_v22 = vcombine.high %v261_v17, %v265_v18  ;;  %v6600_v30 = vcombine.low %v261_v17, %v265_v18  ;;  %v6602_v23 = vcombine.low %v262_v19, %v266_v20  ;;  %v322_v17 = vld [vmem:[%s10741_s1 + $0x878] sm:$0xff] }
 0x14e   :  { %3539 = vmatpush1.bf16.msra.mxu0 %v6536_v24  ;;  %v6603_v24 = vcombine.high %v262_v19, %v266_v20 }
 0x14f   :  { %3703 = vmatpush1.bf16.msra.mxu1 %v6538_v26  ;;  %3540 = vmatprep.subr.bf16.mxu0 %v6545_v27  ;;  %v269_v26 = vld [vmem:[%s10741_s1 + $0x6d0] sm:$0xff] }
 0x150   :  { %3704 = vmatprep.subr.bf16.mxu1 %v6547_v28  ;;  %v273_v27 = vld [vmem:[%s10741_s1 + $0x6f0] sm:$0xff]  ;;  %v270_v28 = vld [vmem:[%s10741_s1 + $0x6d8] sm:$0xff] }
 0x151   :  { %v6609_v31 = vcombine.high %v269_v26, %v273_v27  ;;  %v6608_v38 = vcombine.low %v269_v26, %v273_v27  ;;  %v6610_v40 = vcombine.low %v270_v28, %v274_v29  ;;  %v330_v26 = vld [vmem:[%s10741_s1 + $0x8b8] sm:$0xff] }
 0x152   :  { %3541 = vmatpush1.bf16.msra.mxu0 %v6544_v32  ;;  %v6611_v32 = vcombine.high %v270_v28, %v274_v29 }
 0x153   :  { %3705 = vmatpush1.bf16.msra.mxu1 %v6546_v33  ;;  %3542 = vmatprep.subr.bf16.mxu0 %v6553_v35  ;;  %v277_v33 = vld [vmem:[%s10741_s1 + $0x710] sm:$0xff] }
 0x154   :  { %3706 = vmatprep.subr.bf16.mxu1 %v6555_v36  ;;  %v281_v35 = vld [vmem:[%s10741_s1 + $0x730] sm:$0xff]  ;;  %v278_v36 = vld [vmem:[%s10741_s1 + $0x718] sm:$0xff] }
 0x155   :  { %v6617_v41 = vcombine.high %v277_v33, %v281_v35  ;;  %v6616_v47 = vcombine.low %v277_v33, %v281_v35  ;;  %v6618_v49 = vcombine.low %v278_v36, %v282_v37 }
 0x156   :  { %3543 = vmatpush1.bf16.msra.mxu0 %v6552_v42  ;;  %v6619_v42 = vcombine.high %v278_v36, %v282_v37 }
 0x157   :  { %3707 = vmatpush1.bf16.msra.mxu1 %v6554_v43  ;;  %3544 = vmatprep.subr.bf16.mxu0 %v6561_v44  ;;  %v285_v43 = vld [vmem:[%s10741_s1 + $0x750] sm:$0xff] }
 0x158   :  { %3708 = vmatprep.subr.bf16.mxu1 %v6563_v45  ;;  %v289_v44 = vld [vmem:[%s10741_s1 + $0x770] sm:$0xff]  ;;  %v286_v45 = vld [vmem:[%s10741_s1 + $0x758] sm:$0xff] }
 0x159   :  { %v6625_v50 = vcombine.high %v285_v43, %v289_v44  ;;  %v6624_v58 = vcombine.low %v285_v43, %v289_v44  ;;  %v6626_v59 = vcombine.low %v286_v45, %v290_v46 }
 0x15a   :  { %3545 = vmatpush1.bf16.msra.mxu0 %v6560_v51  ;;  %v6627_v51 = vcombine.high %v286_v45, %v290_v46  ;;  %v349_v46 = vld [vmem:[%s10741_s1 + $0x950] sm:$0xff] }
 0x15b   :  { %3709 = vmatpush1.bf16.msra.mxu1 %v6562_v52  ;;  %3546 = vmatprep.subr.bf16.mxu0 %v6569_v53  ;;  %v293_v52 = vld [vmem:[%s10741_s1 + $0x790] sm:$0xff] }
 0x15c   :  { %3710 = vmatprep.subr.bf16.mxu1 %v6571_v55  ;;  %v297_v53 = vld [vmem:[%s10741_s1 + $0x7b0] sm:$0xff]  ;;  %v294_v55 = vld [vmem:[%s10741_s1 + $0x798] sm:$0xff] }
 0x15d   :  { %v6633_v60 = vcombine.high %v293_v52, %v297_v53  ;;  %v6632_v2 = vcombine.low %v293_v52, %v297_v53  ;;  %v6634_v3 = vcombine.low %v294_v55, %v298_v56 }
 0x15e   :  { %3547 = vmatpush1.bf16.msra.mxu0 %v6568_v61  ;;  %v6635_v61 = vcombine.high %v294_v55, %v298_v56  ;;  %v357_v56 = vld [vmem:[%s10741_s1 + $0x990] sm:$0xff] }
 0x15f   :  { %3711 = vmatpush1.bf16.msra.mxu1 %v6570_v62  ;;  %3548 = vmatprep.subr.bf16.mxu0 %v6577_v63  ;;  %v301_v62 = vld [vmem:[%s10741_s1 + $0x7d0] sm:$0xff] }
 0x160   :  { %3712 = vmatprep.subr.bf16.mxu1 %v6579_v0  ;;  %v305_v63 = vld [vmem:[%s10741_s1 + $0x7f0] sm:$0xff]  ;;  %v302_v0 = vld [vmem:[%s10741_s1 + $0x7d8] sm:$0xff] }
 0x161   :  { %v6641_v4 = vcombine.high %v301_v62, %v305_v63  ;;  %v6640_v10 = vcombine.low %v301_v62, %v305_v63  ;;  %v6642_v11 = vcombine.low %v302_v0, %v306_v1 }
 0x162   :  { %3549 = vmatpush1.bf16.msra.mxu0 %v6576_v5  ;;  %v6643_v5 = vcombine.high %v302_v0, %v306_v1  ;;  %v365_v1 = vld [vmem:[%s10741_s1 + $0x9d0] sm:$0xff] }
 0x163   :  { %3713 = vmatpush1.bf16.msra.mxu1 %v6578_v6  ;;  %3550 = vmatprep.subr.bf16.mxu0 %v6585_v7  ;;  %v309_v6 = vld [vmem:[%s10741_s1 + $0x810] sm:$0xff] }
 0x164   :  { %3714 = vmatprep.subr.bf16.mxu1 %v6587_v8  ;;  %v313_v7 = vld [vmem:[%s10741_s1 + $0x830] sm:$0xff]  ;;  %v310_v8 = vld [vmem:[%s10741_s1 + $0x818] sm:$0xff] }
 0x165   :  { %v6649_v13 = vcombine.high %v309_v6, %v313_v7  ;;  %v6648_v18 = vcombine.low %v309_v6, %v313_v7  ;;  %v6650_v19 = vcombine.low %v310_v8, %v314_v9 }
 0x166   :  { %3551 = vmatpush1.bf16.msra.mxu0 %v6584_v14  ;;  %v6651_v14 = vcombine.high %v310_v8, %v314_v9  ;;  %v373_v9 = vld [vmem:[%s10741_s1 + $0xa10] sm:$0xff] }
 0x167   :  { %3715 = vmatpush1.bf16.msra.mxu1 %v6586_v15  ;;  %3552 = vmatprep.subr.bf16.mxu0 %v6593_v16  ;;  %v317_v15 = vld [vmem:[%s10741_s1 + $0x850] sm:$0xff] }
 0x168   :  { %3716 = vmatprep.subr.bf16.mxu1 %v6595_v57  ;;  %v321_v16 = vld [vmem:[%s10741_s1 + $0x870] sm:$0xff]  ;;  %v318_v57 = vld [vmem:[%s10741_s1 + $0x858] sm:$0xff] }
 0x169   :  { %v6657_v20 = vcombine.high %v317_v15, %v321_v16  ;;  %v6656_v27 = vcombine.low %v317_v15, %v321_v16  ;;  %v6658_v28 = vcombine.low %v318_v57, %v322_v17 }
 0x16a   :  { %3553 = vmatpush1.bf16.msra.mxu0 %v6592_v21  ;;  %v6659_v21 = vcombine.high %v318_v57, %v322_v17  ;;  %v381_v17 = vld [vmem:[%s10741_s1 + $0xa50] sm:$0xff] }
 0x16b   :  { %3717 = vmatpush1.bf16.msra.mxu1 %v6594_v12  ;;  %3554 = vmatprep.subr.bf16.mxu0 %v6601_v22  ;;  %v325_v12 = vld [vmem:[%s10741_s1 + $0x890] sm:$0xff] }
 0x16c   :  { %3718 = vmatprep.subr.bf16.mxu1 %v6603_v24  ;;  %v329_v22 = vld [vmem:[%s10741_s1 + $0x8b0] sm:$0xff]  ;;  %v326_v24 = vld [vmem:[%s10741_s1 + $0x898] sm:$0xff] }
 0x16d   :  { %v6665_v29 = vcombine.high %v325_v12, %v329_v22  ;;  %v6664_v33 = vcombine.low %v325_v12, %v329_v22  ;;  %v6666_v35 = vcombine.low %v326_v24, %v330_v26 }
 0x16e   :  { %3555 = vmatpush1.bf16.msra.mxu0 %v6600_v30  ;;  %v6667_v30 = vcombine.high %v326_v24, %v330_v26  ;;  %v389_v26 = vld [vmem:[%s10741_s1 + $0xa90] sm:$0xff] }
 0x16f   :  { %3719 = vmatpush1.bf16.msra.mxu1 %v6602_v23  ;;  %3556 = vmatprep.subr.bf16.mxu0 %v6609_v31  ;;  %v333_v23 = vld [vmem:[%s10741_s1 + $0x8d0] sm:$0xff] }
 0x170   :  { %3720 = vmatprep.subr.bf16.mxu1 %v6611_v32  ;;  %v337_v31 = vld [vmem:[%s10741_s1 + $0x8f0] sm:$0xff]  ;;  %v338_v32 = vld [vmem:[%s10741_s1 + $0x8f8] sm:$0xff] }
 0x171   :  { %v6673_v36 = vcombine.high %v333_v23, %v337_v31 }
 0x172   :  { %3557 = vmatpush1.bf16.msra.mxu0 %v6608_v38  ;;  %v341_v38 = vld [vmem:[%s10741_s1 + $0x910] sm:$0xff] }
 0x173   :  { %3721 = vmatpush1.bf16.msra.mxu1 %v6610_v40  ;;  %3558 = vmatprep.subr.bf16.mxu0 %v6617_v41  ;;  %v345_v40 = vld [vmem:[%s10741_s1 + $0x930] sm:$0xff]  ;;  %v346_v41 = vld [vmem:[%s10741_s1 + $0x938] sm:$0xff] }
 0x174   :  { %3722 = vmatprep.subr.bf16.mxu1 %v6619_v42  ;;  %v6672_v42 = vcombine.low %v333_v23, %v337_v31  ;;  %v6681_v44 = vcombine.high %v341_v38, %v345_v40 }
 0x176   :  { %3559 = vmatpush1.bf16.msra.mxu0 %v6616_v47  ;;  %v353_v47 = vld [vmem:[%s10741_s1 + $0x970] sm:$0xff] }
 0x177   :  { %3723 = vmatpush1.bf16.msra.mxu1 %v6618_v49  ;;  %3560 = vmatprep.subr.bf16.mxu0 %v6625_v50  ;;  %v350_v49 = vld [vmem:[%s10741_s1 + $0x958] sm:$0xff]  ;;  %v6689_v53 = vcombine.high %v349_v46, %v353_v47 }
 0x178   :  { %3724 = vmatprep.subr.bf16.mxu1 %v6627_v51  ;;  %v354_v50 = vld [vmem:[%s10741_s1 + $0x978] sm:$0xff]  ;;  %v6680_v51 = vcombine.low %v341_v38, %v345_v40 }
 0x179   :  { %v6691_v55 = vcombine.high %v350_v49, %v354_v50  ;;  %v6690_v62 = vcombine.low %v350_v49, %v354_v50  ;;  %v413_v50 = vld [vmem:[%s10741_s1 + $0xb50] sm:$0xff] }
 0x17a   :  { %3561 = vmatpush1.bf16.msra.mxu0 %v6624_v58  ;;  %v361_v58 = vld [vmem:[%s10741_s1 + $0x9b0] sm:$0xff] }
 0x17b   :  { %3725 = vmatpush1.bf16.msra.mxu1 %v6626_v59  ;;  %3562 = vmatprep.subr.bf16.mxu0 %v6633_v60  ;;  %v358_v59 = vld [vmem:[%s10741_s1 + $0x998] sm:$0xff]  ;;  %v6697_v63 = vcombine.high %v357_v56, %v361_v58 }
 0x17c   :  { %3726 = vmatprep.subr.bf16.mxu1 %v6635_v61  ;;  %v362_v60 = vld [vmem:[%s10741_s1 + $0x9b8] sm:$0xff]  ;;  %v6688_v61 = vcombine.low %v349_v46, %v353_v47 }
 0x17d   :  { %v6699_v0 = vcombine.high %v358_v59, %v362_v60  ;;  %v6698_v6 = vcombine.low %v358_v59, %v362_v60  ;;  %v421_v60 = vld [vmem:[%s10741_s1 + $0xb90] sm:$0xff] }
 0x17e   :  { %3563 = vmatpush1.bf16.msra.mxu0 %v6632_v2  ;;  %v369_v2 = vld [vmem:[%s10741_s1 + $0x9f0] sm:$0xff] }
 0x17f   :  { %3727 = vmatpush1.bf16.msra.mxu1 %v6634_v3  ;;  %3564 = vmatprep.subr.bf16.mxu0 %v6641_v4  ;;  %v366_v3 = vld [vmem:[%s10741_s1 + $0x9d8] sm:$0xff]  ;;  %v6705_v7 = vcombine.high %v365_v1, %v369_v2 }
 0x180   :  { %3728 = vmatprep.subr.bf16.mxu1 %v6643_v5  ;;  %v370_v4 = vld [vmem:[%s10741_s1 + $0x9f8] sm:$0xff]  ;;  %v6696_v5 = vcombine.low %v357_v56, %v361_v58 }
 0x181   :  { %v6707_v8 = vcombine.high %v366_v3, %v370_v4  ;;  %v6706_v15 = vcombine.low %v366_v3, %v370_v4  ;;  %v429_v4 = vld [vmem:[%s10741_s1 + $0xbd0] sm:$0xff] }
 0x182   :  { %3565 = vmatpush1.bf16.msra.mxu0 %v6640_v10  ;;  %v377_v10 = vld [vmem:[%s10741_s1 + $0xa30] sm:$0xff] }
 0x183   :  { %3729 = vmatpush1.bf16.msra.mxu1 %v6642_v11  ;;  %3575 = vmatprep.subr.bf16.mxu0 %v6649_v13  ;;  %v374_v11 = vld [vmem:[%s10741_s1 + $0xa18] sm:$0xff]  ;;  %v6713_v16 = vcombine.high %v373_v9, %v377_v10 }
 0x184   :  { %3739 = vmatprep.subr.bf16.mxu1 %v6651_v14  ;;  %v378_v13 = vld [vmem:[%s10741_s1 + $0xa38] sm:$0xff]  ;;  %v6704_v14 = vcombine.low %v365_v1, %v369_v2 }
 0x185   :  { %3567 = vmatmul.mubr.bf16.vlgmr.msra.gmra.mrb[4].mxu0 %v8359_v25  ;;  %v6715_v57 = vcombine.high %v374_v11, %v378_v13  ;;  %v6714_v12 = vcombine.low %v374_v11, %v378_v13  ;;  %v437_v13 = vld [vmem:[%s10741_s1 + $0xc10] sm:$0xff] }
 0x186   :  { %3576 = vmatpush1.bf16.msra.mxu0 %v6648_v18  ;;  %3731 = vmatmul.mubr.bf16.vlgmr.msra.gmra.mrb[4].mxu1 %v8359_v25  ;;  %v334_v25 = vld [vmem:[%s10741_s1 + $0x8d8] sm:$0xff]  ;;  %v385_v18 = vld [vmem:[%s10741_s1 + $0xa70] sm:$0xff] }
 0x187   :  { %3740 = vmatpush1.bf16.msra.mxu1 %v6650_v19  ;;  %3577 = vmatprep.subr.bf16.mxu0 %v6657_v20  ;;  %v6675_v37 = vcombine.high %v334_v25, %v338_v32  ;;  %v6674_v43 = vcombine.low %v334_v25, %v338_v32  ;;  %v382_v19 = vld [vmem:[%s10741_s1 + $0xa58] sm:$0xff]  ;;  %v6721_v22 = vcombine.high %v381_v17, %v385_v18  ;;  %v397_v32 = vld [vmem:[%s10741_s1 + $0xad0] sm:$0xff] }
 0x188   :  { %3741 = vmatprep.subr.bf16.mxu1 %v6659_v21  ;;  %3607 = vmatprep.mubr.bf16.mxu0 %v8373_v34  ;;  %v386_v20 = vld [vmem:[%s10741_s1 + $0xa78] sm:$0xff]  ;;  %v6712_v21 = vcombine.low %v373_v9, %v377_v10 }
 0x189   :  { %3771 = vmatprep.mubr.bf16.mxu1 %v8373_v34  ;;  %v342_v34 = vld [vmem:[%s10741_s1 + $0x918] sm:$0xff]  ;;  %v6723_v24 = vcombine.high %v382_v19, %v386_v20  ;;  %v6722_v23 = vcombine.low %v382_v19, %v386_v20  ;;  %v445_v20 = vld [vmem:[%s10741_s1 + $0xc50] sm:$0xff] }
 0x18a   :  { %3578 = vmatpush1.bf16.msra.mxu0 %v6656_v27  ;;  %v6683_v45 = vcombine.high %v342_v34, %v346_v41  ;;  %v6682_v52 = vcombine.low %v342_v34, %v346_v41  ;;  %v393_v27 = vld [vmem:[%s10741_s1 + $0xab0] sm:$0xff] }
 0x18b   :  { %3742 = vmatpush1.bf16.msra.mxu1 %v6658_v28  ;;  %3579 = vmatprep.subr.bf16.mxu0 %v6665_v29  ;;  %v390_v28 = vld [vmem:[%s10741_s1 + $0xa98] sm:$0xff]  ;;  %v6729_v31 = vcombine.high %v389_v26, %v393_v27  ;;  %v405_v41 = vld [vmem:[%s10741_s1 + $0xb10] sm:$0xff] }
 0x18c   :  { %3743 = vmatprep.subr.bf16.mxu1 %v6667_v30  ;;  %v394_v29 = vld [vmem:[%s10741_s1 + $0xab8] sm:$0xff]  ;;  %v6720_v30 = vcombine.low %v381_v17, %v385_v18 }
 0x18d   :  { %v6731_v25 = vcombine.high %v390_v28, %v394_v29  ;;  %v6730_v38 = vcombine.low %v390_v28, %v394_v29  ;;  %v453_v29 = vld [vmem:[%s10741_s1 + $0xc90] sm:$0xff] }
 0x18e   :  { %3580 = vmatpush1.bf16.msra.mxu0 %v6664_v33  ;;  %v401_v33 = vld [vmem:[%s10741_s1 + $0xaf0] sm:$0xff] }
 0x18f   :  { %3744 = vmatpush1.bf16.msra.mxu1 %v6666_v35  ;;  %3581 = vmatprep.subr.bf16.mxu0 %v6673_v36  ;;  %v398_v35 = vld [vmem:[%s10741_s1 + $0xad8] sm:$0xff]  ;;  %v6737_v40 = vcombine.high %v397_v32, %v401_v33 }
 0x190   :  { %3745 = vmatprep.subr.bf16.mxu1 %v6675_v37  ;;  %v402_v36 = vld [vmem:[%s10741_s1 + $0xaf8] sm:$0xff]  ;;  %v6728_v37 = vcombine.low %v389_v26, %v393_v27 }
 0x191   :  { %v6739_v34 = vcombine.high %v398_v35, %v402_v36  ;;  %v6738_v46 = vcombine.low %v398_v35, %v402_v36  ;;  %v461_v36 = vld [vmem:[%s10741_s1 + $0xcd0] sm:$0xff] }
 0x192   :  { %3582 = vmatpush1.bf16.msra.mxu0 %v6672_v42  ;;  %v409_v42 = vld [vmem:[%s10741_s1 + $0xb30] sm:$0xff] }
 0x193   :  { %3746 = vmatpush1.bf16.msra.mxu1 %v6674_v43  ;;  %3583 = vmatprep.subr.bf16.mxu0 %v6681_v44  ;;  %v406_v43 = vld [vmem:[%s10741_s1 + $0xb18] sm:$0xff]  ;;  %v6745_v47 = vcombine.high %v405_v41, %v409_v42 }
 0x194   :  { %3747 = vmatprep.subr.bf16.mxu1 %v6683_v45  ;;  %v410_v44 = vld [vmem:[%s10741_s1 + $0xb38] sm:$0xff]  ;;  %v6736_v45 = vcombine.low %v397_v32, %v401_v33 }
 0x195   :  { %v6747_v49 = vcombine.high %v406_v43, %v410_v44  ;;  %v6746_v56 = vcombine.low %v406_v43, %v410_v44  ;;  %v469_v43 = vld [vmem:[%s10741_s1 + $0xd10] sm:$0xff] }
 0x196   :  { %3584 = vmatpush1.bf16.msra.mxu0 %v6680_v51  ;;  %v417_v51 = vld [vmem:[%s10741_s1 + $0xb70] sm:$0xff] }
 0x197   :  { %3748 = vmatpush1.bf16.msra.mxu1 %v6682_v52  ;;  %3585 = vmatprep.subr.bf16.mxu0 %v6689_v53  ;;  %v414_v52 = vld [vmem:[%s10741_s1 + $0xb58] sm:$0xff]  ;;  %v6753_v58 = vcombine.high %v413_v50, %v417_v51  ;;  %v473_v44 = vld [vmem:[%s10741_s1 + $0xd30] sm:$0xff] }
 0x198   :  { %3749 = vmatprep.subr.bf16.mxu1 %v6691_v55  ;;  %v418_v53 = vld [vmem:[%s10741_s1 + $0xb78] sm:$0xff]  ;;  %v6744_v55 = vcombine.low %v405_v41, %v409_v42 }
 0x199   :  { %v6755_v59 = vcombine.high %v414_v52, %v418_v53  ;;  %v6754_v1 = vcombine.low %v414_v52, %v418_v53  ;;  %v481_v52 = vld [vmem:[%s10741_s1 + $0xd70] sm:$0xff]  ;;  %v478_v53 = vld [vmem:[%s10741_s1 + $0xd58] sm:$0xff] }
 0x19a   :  { %3586 = vmatpush1.bf16.msra.mxu0 %v6688_v61  ;;  %v425_v61 = vld [vmem:[%s10741_s1 + $0xbb0] sm:$0xff] }
 0x19b   :  { %3750 = vmatpush1.bf16.msra.mxu1 %v6690_v62  ;;  %3587 = vmatprep.subr.bf16.mxu0 %v6697_v63  ;;  %v422_v62 = vld [vmem:[%s10741_s1 + $0xb98] sm:$0xff]  ;;  %v6761_v2 = vcombine.high %v421_v60, %v425_v61 }
 0x19c   :  { %3751 = vmatprep.subr.bf16.mxu1 %v6699_v0  ;;  %v426_v63 = vld [vmem:[%s10741_s1 + $0xbb8] sm:$0xff]  ;;  %v6752_v0 = vcombine.low %v413_v50, %v417_v51  ;;  %v477_v51 = vld [vmem:[%s10741_s1 + $0xd50] sm:$0xff] }
 0x19d   :  { %v6763_v3 = vcombine.high %v422_v62, %v426_v63  ;;  %v6762_v9 = vcombine.low %v422_v62, %v426_v63  ;;  %v489_v62 = vld [vmem:[%s10741_s1 + $0xdb0] sm:$0xff]  ;;  %v486_v63 = vld [vmem:[%s10741_s1 + $0xd98] sm:$0xff] }
 0x19e   :  { %3588 = vmatpush1.bf16.msra.mxu0 %v6696_v5  ;;  %v433_v5 = vld [vmem:[%s10741_s1 + $0xbf0] sm:$0xff] }
 0x19f   :  { %3752 = vmatpush1.bf16.msra.mxu1 %v6698_v6  ;;  %3589 = vmatprep.subr.bf16.mxu0 %v6705_v7  ;;  %v430_v6 = vld [vmem:[%s10741_s1 + $0xbd8] sm:$0xff]  ;;  %v6769_v10 = vcombine.high %v429_v4, %v433_v5 }
 0x1a0   :  { %3753 = vmatprep.subr.bf16.mxu1 %v6707_v8  ;;  %v434_v7 = vld [vmem:[%s10741_s1 + $0xbf8] sm:$0xff]  ;;  %v6760_v8 = vcombine.low %v421_v60, %v425_v61  ;;  %v485_v61 = vld [vmem:[%s10741_s1 + $0xd90] sm:$0xff] }
 0x1a1   :  { %v6771_v11 = vcombine.high %v430_v6, %v434_v7  ;;  %v6770_v17 = vcombine.low %v430_v6, %v434_v7  ;;  %v493_v6 = vld [vmem:[%s10741_s1 + $0xdd0] sm:$0xff] }
 0x1a2   :  { %3590 = vmatpush1.bf16.msra.mxu0 %v6704_v14  ;;  %v441_v14 = vld [vmem:[%s10741_s1 + $0xc30] sm:$0xff] }
 0x1a3   :  { %3754 = vmatpush1.bf16.msra.mxu1 %v6706_v15  ;;  %3591 = vmatprep.subr.bf16.mxu0 %v6713_v16  ;;  %v438_v15 = vld [vmem:[%s10741_s1 + $0xc18] sm:$0xff]  ;;  %v6777_v18 = vcombine.high %v437_v13, %v441_v14  ;;  %v497_v7 = vld [vmem:[%s10741_s1 + $0xdf0] sm:$0xff] }
 0x1a4   :  { %3755 = vmatprep.subr.bf16.mxu1 %v6715_v57  ;;  %v442_v16 = vld [vmem:[%s10741_s1 + $0xc38] sm:$0xff]  ;;  %v6768_v57 = vcombine.low %v429_v4, %v433_v5 }
 0x1a5   :  { %v6779_v19 = vcombine.high %v438_v15, %v442_v16  ;;  %v6778_v26 = vcombine.low %v438_v15, %v442_v16  ;;  %v6824_v15 = vcombine.low %v485_v61, %v489_v62 }
 0x1a6   :  { %3592 = vmatpush1.bf16.msra.mxu0 %v6712_v21  ;;  %v449_v21 = vld [vmem:[%s10741_s1 + $0xc70] sm:$0xff] }
 0x1a7   :  { %3756 = vmatpush1.bf16.msra.mxu1 %v6714_v12  ;;  %3593 = vmatprep.subr.bf16.mxu0 %v6721_v22  ;;  %v446_v12 = vld [vmem:[%s10741_s1 + $0xc58] sm:$0xff]  ;;  %v6785_v27 = vcombine.high %v445_v20, %v449_v21 }
 0x1a8   :  { %3757 = vmatprep.subr.bf16.mxu1 %v6723_v24  ;;  %v450_v22 = vld [vmem:[%s10741_s1 + $0xc78] sm:$0xff]  ;;  %v6776_v24 = vcombine.low %v437_v13, %v441_v14 }
 0x1a9   :  { %v6787_v28 = vcombine.high %v446_v12, %v450_v22  ;;  %v6786_v32 = vcombine.low %v446_v12, %v450_v22  ;;  %v505_v12 = vld [vmem:[%s10741_s1 + $0xe30] sm:$0xff]  ;;  %v502_v22 = vld [vmem:[%s10741_s1 + $0xe18] sm:$0xff] }
 0x1aa   :  { %3594 = vmatpush1.bf16.msra.mxu0 %v6720_v30  ;;  %v457_v30 = vld [vmem:[%s10741_s1 + $0xcb0] sm:$0xff] }
 0x1ab   :  { %3758 = vmatpush1.bf16.msra.mxu1 %v6722_v23  ;;  %3595 = vmatprep.subr.bf16.mxu0 %v6729_v31  ;;  %v454_v23 = vld [vmem:[%s10741_s1 + $0xc98] sm:$0xff]  ;;  %v6793_v33 = vcombine.high %v453_v29, %v457_v30 }
 0x1ac   :  { %3759 = vmatprep.subr.bf16.mxu1 %v6731_v25  ;;  %v458_v31 = vld [vmem:[%s10741_s1 + $0xcb8] sm:$0xff]  ;;  %v6784_v25 = vcombine.low %v445_v20, %v449_v21  ;;  %v501_v21 = vld [vmem:[%s10741_s1 + $0xe10] sm:$0xff] }
 0x1ad   :  { %v6795_v35 = vcombine.high %v454_v23, %v458_v31 }
 0x1ae   :  { %3596 = vmatpush1.bf16.msra.mxu0 %v6728_v37  ;;  %v465_v37 = vld [vmem:[%s10741_s1 + $0xcf0] sm:$0xff] }
 0x1af   :  { %3760 = vmatpush1.bf16.msra.mxu1 %v6730_v38  ;;  %3597 = vmatprep.subr.bf16.mxu0 %v6737_v40  ;;  %v466_v38 = vld [vmem:[%s10741_s1 + $0xcf8] sm:$0xff]  ;;  %v6792_v40 = vcombine.low %v453_v29, %v457_v30  ;;  %v6801_v41 = vcombine.high %v461_v36, %v465_v37  ;;  %v509_v30 = vld [vmem:[%s10741_s1 + $0xe50] sm:$0xff] }
 0x1b0   :  { %3761 = vmatprep.subr.bf16.mxu1 %v6739_v34  ;;  %v6794_v34 = vcombine.low %v454_v23, %v458_v31  ;;  %v513_v23 = vld [vmem:[%s10741_s1 + $0xe70] sm:$0xff]  ;;  %v510_v31 = vld [vmem:[%s10741_s1 + $0xe58] sm:$0xff] }
 0x1b2   :  { %3598 = vmatpush1.bf16.msra.mxu0 %v6736_v45  ;;  %v474_v45 = vld [vmem:[%s10741_s1 + $0xd38] sm:$0xff] }
 0x1b3   :  { %3762 = vmatpush1.bf16.msra.mxu1 %v6738_v46  ;;  %3599 = vmatprep.subr.bf16.mxu0 %v6745_v47  ;;  %v6800_v46 = vcombine.low %v461_v36, %v465_v37  ;;  %v517_v37 = vld [vmem:[%s10741_s1 + $0xe90] sm:$0xff] }
 0x1b4   :  { %3763 = vmatprep.subr.bf16.mxu1 %v6747_v49  ;;  %v6809_v49 = vcombine.high %v469_v43, %v473_v44 }
 0x1b6   :  { %3600 = vmatpush1.bf16.msra.mxu0 %v6744_v55  ;;  %v482_v55 = vld [vmem:[%s10741_s1 + $0xd78] sm:$0xff] }
 0x1b7   :  { %3764 = vmatpush1.bf16.msra.mxu1 %v6746_v56  ;;  %3601 = vmatprep.subr.bf16.mxu0 %v6753_v58  ;;  %v6808_v56 = vcombine.low %v469_v43, %v473_v44  ;;  %v6819_v60 = vcombine.high %v478_v53, %v482_v55  ;;  %v525_v44 = vld [vmem:[%s10741_s1 + $0xed0] sm:$0xff] }
 0x1b8   :  { %3765 = vmatprep.subr.bf16.mxu1 %v6755_v59  ;;  %v6817_v59 = vcombine.high %v477_v51, %v481_v52 }
 0x1ba   :  { %3602 = vmatpush1.bf16.msra.mxu0 %v6752_v0  ;;  %v490_v0 = vld [vmem:[%s10741_s1 + $0xdb8] sm:$0xff] }
 0x1bb   :  { %3766 = vmatpush1.bf16.msra.mxu1 %v6754_v1  ;;  %3603 = vmatprep.subr.bf16.mxu0 %v6761_v2  ;;  %v6816_v1 = vcombine.low %v477_v51, %v481_v52  ;;  %v6818_v2 = vcombine.low %v478_v53, %v482_v55  ;;  %v6827_v5 = vcombine.high %v486_v63, %v490_v0  ;;  %v533_v52 = vld [vmem:[%s10741_s1 + $0xf10] sm:$0xff]  ;;  %v534_v55 = vld [vmem:[%s10741_s1 + $0xf18] sm:$0xff] }
 0x1bc   :  { %3767 = vmatprep.subr.bf16.mxu1 %v6763_v3  ;;  %v6825_v3 = vcombine.high %v485_v61, %v489_v62  ;;  %v537_v53 = vld [vmem:[%s10741_s1 + $0xf30] sm:$0xff] }
 0x1bd   :  { %v541_v62 = vld [vmem:[%s10741_s1 + $0xf50] sm:$0xff] }
 0x1be   :  { %3604 = vmatpush1.bf16.msra.mxu0 %v6760_v8 }
 0x1bf   :  { %3768 = vmatpush1.bf16.msra.mxu1 %v6762_v9  ;;  %3605 = vmatprep.subr.bf16.mxu0 %v6769_v10  ;;  %v494_v10 = vld [vmem:[%s10741_s1 + $0xdd8] sm:$0xff] }
 0x1c0   :  { %3769 = vmatprep.subr.bf16.mxu1 %v6771_v11  ;;  %v498_v11 = vld [vmem:[%s10741_s1 + $0xdf8] sm:$0xff] }
 0x1c1   :  { %v6835_v20 = vcombine.high %v494_v10, %v498_v11 }
 0x1c2   :  { %3606 = vmatpush1.bf16.msra.mxu0 %v6768_v57 }
 0x1c3   :  { %3770 = vmatpush1.bf16.msra.mxu1 %v6770_v17  ;;  %3616 = vmatprep.subr.bf16.mxu0 %v6777_v18  ;;  %v6826_v17 = vcombine.low %v486_v63, %v490_v0  ;;  %v6833_v18 = vcombine.high %v493_v6, %v497_v7  ;;  %v545_v63 = vld [vmem:[%s10741_s1 + $0xf70] sm:$0xff]  ;;  %v565_v0 = vlaneseq }
 0x1c4   :  { %3780 = vmatprep.subr.bf16.mxu1 %v6779_v19 }
 0x1c5   :  { %3608 = vmatmul.mubr.bf16.vlgmr.msra.gmra.mrb[4].mxu0 %v8565_v39 }
 0x1c6   :  { %3617 = vmatpush1.bf16.msra.mxu0 %v6776_v24  ;;  %3772 = vmatmul.mubr.bf16.vlgmr.msra.gmra.mrb[4].mxu1 %v8565_v39  ;;  %v462_v39 = vld [vmem:[%s10741_s1 + $0xcd8] sm:$0xff] }
 0x1c7   :  { %3781 = vmatpush1.bf16.msra.mxu1 %v6778_v26  ;;  %3618 = vmatprep.subr.bf16.mxu0 %v6785_v27  ;;  %v6803_v42 = vcombine.high %v462_v39, %v466_v38  ;;  %v6802_v47 = vcombine.low %v462_v39, %v466_v38  ;;  %v506_v24 = vld [vmem:[%s10741_s1 + $0xe38] sm:$0xff]  ;;  %v6832_v26 = vcombine.low %v493_v6, %v497_v7  ;;  %v521_v39 = vld [vmem:[%s10741_s1 + $0xeb0] sm:$0xff] }
 0x1c8   :  { %3782 = vmatprep.subr.bf16.mxu1 %v6787_v28  ;;  %3648 = vmatprep.mubr.bf16.mxu0 %v8579_v48  ;;  %v6834_v27 = vcombine.low %v494_v10, %v498_v11  ;;  %v6841_v28 = vcombine.high %v501_v21, %v505_v12  ;;  %v6843_v29 = vcombine.high %v502_v22, %v506_v24  ;;  %v518_v38 = vld [vmem:[%s10741_s1 + $0xe98] sm:$0xff]  ;;  %v549_v10 = vld [vmem:[%s10741_s1 + $0xf90] sm:$0xff] }
 0x1c9   :  { %3812 = vmatprep.mubr.bf16.mxu1 %v8579_v48  ;;  %v470_v48 = vld [vmem:[%s10741_s1 + $0xd18] sm:$0xff]  ;;  %v6881_v6 = vcombine.high %v541_v62, %v545_v63  ;;  %v553_v11 = vld [vmem:[%s10741_s1 + $0xfb0] sm:$0xff] }
 0x1ca   :  { %3619 = vmatpush1.bf16.msra.mxu0 %v6784_v25  ;;  %v6811_v50 = vcombine.high %v470_v48, %v474_v45  ;;  %v6810_v58 = vcombine.low %v470_v48, %v474_v45  ;;  %v514_v25 = vld [vmem:[%s10741_s1 + $0xe78] sm:$0xff]  ;;  %v529_v48 = vld [vmem:[%s10741_s1 + $0xef0] sm:$0xff] }
 0x1cb   :  { %3783 = vmatpush1.bf16.msra.mxu1 %v6786_v32  ;;  %3620 = vmatprep.subr.bf16.mxu0 %v6793_v33  ;;  %v6840_v32 = vcombine.low %v501_v21, %v505_v12  ;;  %v6842_v33 = vcombine.low %v502_v22, %v506_v24  ;;  %v6851_v36 = vcombine.high %v510_v31, %v514_v25  ;;  %v526_v45 = vld [vmem:[%s10741_s1 + $0xed8] sm:$0xff]  ;;  %v561_v21 = vld [vmem:[%s10741_s1 + $0xff0] sm:$0xff] }
 0x1cc   :  { %3784 = vmatprep.subr.bf16.mxu1 %v6795_v35  ;;  %v6849_v35 = vcombine.high %v509_v30, %v513_v23  ;;  %v558_v22 = vld [vmem:[%s10741_s1 + $0xfd8] sm:$0xff] }
 0x1cd   :  { %v562_v24 = vld [vmem:[%s10741_s1 + $0xff8] sm:$0xff] }
 0x1ce   :  { %3621 = vmatpush1.bf16.msra.mxu0 %v6792_v40  ;;  %v522_v40 = vld [vmem:[%s10741_s1 + $0xeb8] sm:$0xff] }
 0x1cf   :  { %3785 = vmatpush1.bf16.msra.mxu1 %v6794_v34  ;;  %3622 = vmatprep.subr.bf16.mxu0 %v6801_v41  ;;  %v6848_v34 = vcombine.low %v509_v30, %v513_v23  ;;  %v6850_v41 = vcombine.low %v510_v31, %v514_v25  ;;  %v6859_v43 = vcombine.high %v518_v38, %v522_v40 }
 0x1d0   :  { %3786 = vmatprep.subr.bf16.mxu1 %v6803_v42  ;;  %v6857_v42 = vcombine.high %v517_v37, %v521_v39  ;;  %v6899_v30 = vcombine.high %v558_v22, %v562_v24  ;;  %v6898_v25 = vcombine.low %v558_v22, %v562_v24  ;;  %v7498_v22 = vld [vmem:[%s10743_s3 + $0x168] ss:$16 sps:$4 sm:$0xff]   ;;  %v7503_v24 = vld [vmem:[%s10743_s3 + $0x184] ss:$16 sps:$4 sm:$0xff]  }
 0x1d2   :  { %3623 = vmatpush1.bf16.msra.mxu0 %v6800_v46  ;;  %v530_v46 = vld [vmem:[%s10741_s1 + $0xef8] sm:$0xff] }
 0x1d3   :  { %3787 = vmatpush1.bf16.msra.mxu1 %v6802_v47  ;;  %3624 = vmatprep.subr.bf16.mxu0 %v6809_v49  ;;  %v6856_v47 = vcombine.low %v517_v37, %v521_v39  ;;  %v6858_v49 = vcombine.low %v518_v38, %v522_v40  ;;  %v6867_v51 = vcombine.high %v526_v45, %v530_v46  ;;  %v7432_v37 = vld [vmem:[%s10743_s3 + $0x8] ss:$16 sps:$4 sm:$0xff]   ;;  %v7437_v39 = vld [vmem:[%s10743_s3 + $0x24] ss:$16 sps:$4 sm:$0xff]   ;;  %v7435_v40 = vld [vmem:[%s10743_s3 + $0x20] ss:$16 sps:$4 sm:$0xff]  }
 0x1d4   :  { %3788 = vmatprep.subr.bf16.mxu1 %v6811_v50  ;;  %v6865_v50 = vcombine.high %v525_v44, %v529_v48 }
 0x1d6   :  { %3625 = vmatpush1.bf16.msra.mxu0 %v6808_v56  ;;  %v538_v56 = vld [vmem:[%s10741_s1 + $0xf38] sm:$0xff] }
 0x1d7   :  { %3789 = vmatpush1.bf16.msra.mxu1 %v6810_v58  ;;  %3626 = vmatprep.subr.bf16.mxu0 %v6817_v59  ;;  %v6864_v58 = vcombine.low %v525_v44, %v529_v48  ;;  %v6866_v59 = vcombine.low %v526_v45, %v530_v46  ;;  %v6875_v61 = vcombine.high %v534_v55, %v538_v56  ;;  %v7449_v44 = vld [vmem:[%s10743_s3 + $0x64] ss:$16 sps:$4 sm:$0xff]   ;;  %v7452_v48 = vld [vmem:[%s10743_s3 + $0x6c] ss:$16 sps:$4 sm:$0xff]   ;;  %v7447_v45 = vld [vmem:[%s10743_s3 + $0x60] ss:$16 sps:$4 sm:$0xff]  }
 0x1d8   :  { %v9422_v4 = vpop.f32.mrb[0].mxu0  ;;  %3790 = vmatprep.subr.bf16.mxu1 %v6819_v60  ;;  %v6873_v60 = vcombine.high %v533_v52, %v537_v53  ;;  %v7450_v46 = vld [vmem:[%s10743_s3 + $0x68] ss:$16 sps:$4 sm:$0xff]  }
 0x1d9   :  { %v9430_v8 = vpop.f32.mrb[0].mxu1  ;;  %v9432_v9 = vpop.f32.mrb[1].mxu0 }
 0x1da   :  { %v9440_v13 = vpop.f32.mrb[1].mxu1  ;;  %v3326_v14 = vpop.f32.mrb[2].mxu0  ;;  %3627 = vmatpush1.bf16.msra.mxu0 %v6816_v1  ;;  %v542_v1 = vld [vmem:[%s10741_s1 + $0xf58] sm:$0xff] }
 0x1db   :  { %v3490_v16 = vpop.f32.mrb[2].mxu1  ;;  %3791 = vmatpush1.bf16.msra.mxu1 %v6818_v2  ;;  %v3327_v57 = vpop.f32.mrb[3].mxu0  ;;  %3628 = vmatprep.subr.bf16.mxu0 %v6825_v3  ;;  %v546_v2 = vld [vmem:[%s10741_s1 + $0xf78] sm:$0xff]  ;;  %v6872_v3 = vcombine.low %v533_v52, %v537_v53  ;;  %v9520_v14 = vshrl.u32 %v565_v0, 7  ;;  %v7461_v52 = vld [vmem:[%s10743_s3 + $0xa4] ss:$16 sps:$4 sm:$0xff]  }
 0x1dc   :  { %v3491_v19 = vpop.f32.mrb[3].mxu1  ;;  %3792 = vmatprep.subr.bf16.mxu1 %v6827_v5  ;;  %v6874_v5 = vcombine.low %v534_v55, %v538_v56  ;;  %v6883_v7 = vcombine.high %v542_v1, %v546_v2  ;;  %v554_v16 = vld [vmem:[%s10741_s1 + $0xfb8] sm:$0xff]  ;;  %v6880_v57 = vcombine.low %v541_v62, %v545_v63  ;;  %v7459_v55 = vld [vmem:[%s10743_s3 + $0xa0] ss:$16 sps:$4 sm:$0xff]   ;;  %v7473_v62 = vld [vmem:[%s10743_s3 + $0xe4] ss:$16 sps:$4 sm:$0xff]  }
 0x1dd   :  { %v571_v12 = vsub.s32 1, %v9520_v14  ;;  %v7464_v53 = vld [vmem:[%s10743_s3 + $0xac] ss:$16 sps:$4 sm:$0xff]   ;;  %v7462_v56 = vld [vmem:[%s10743_s3 + $0xa8] ss:$16 sps:$4 sm:$0xff]  }
 0x1de   :  { %3629 = vmatpush1.bf16.msra.mxu0 %v6824_v15  ;;  %v550_v15 = vld [vmem:[%s10741_s1 + $0xf98] sm:$0xff]  ;;  %v7471_v0 = vld [vmem:[%s10743_s3 + $0xe0] ss:$16 sps:$4 sm:$0xff]  }
 0x1df   :  { %3793 = vmatpush1.bf16.msra.mxu1 %v6826_v17  ;;  %3630 = vmatprep.subr.bf16.mxu0 %v6833_v18  ;;  %v6882_v17 = vcombine.low %v542_v1, %v546_v2  ;;  %v6889_v18 = vcombine.high %v549_v10, %v553_v11  ;;  %v6891_v19 = vcombine.high %v550_v15, %v554_v16  ;;  %v7476_v63 = vld [vmem:[%s10743_s3 + $0xec] ss:$16 sps:$4 sm:$0xff]   ;;  %v7474_v1 = vld [vmem:[%s10743_s3 + $0xe8] ss:$16 sps:$4 sm:$0xff]   ;;  %v7479_v2 = vld [vmem:[%s10743_s3 + $0x104] ss:$16 sps:$4 sm:$0xff]  }
 0x1e0   :  { %3794 = vmatprep.subr.bf16.mxu1 %v6835_v20  ;;  %v557_v20 = vld [vmem:[%s10741_s1 + $0xfd0] sm:$0xff] }
 0x1e1   :  { %v6896_v31 = vcombine.low %v557_v20, %v561_v21 }
 0x1e2   :  { %3631 = vmatpush1.bf16.msra.mxu0 %v6832_v26  ;;  %v9544_v26 = vld [vmem:[%s10742_s2] sm:$0xff] }
 0x1e3   :  { %3795 = vmatpush1.bf16.msra.mxu1 %v6834_v27  ;;  %3632 = vmatprep.subr.bf16.mxu0 %v6841_v28  ;;  %v6888_v27 = vcombine.low %v549_v10, %v553_v11  ;;  %v6890_v28 = vcombine.low %v550_v15, %v554_v16  ;;  %v572_v23 = vrot.slane %v9544_v26, %v571_v12  ;;  %v7488_v10 = vld [vmem:[%s10743_s3 + $0x12c] ss:$16 sps:$4 sm:$0xff]   ;;  %v7483_v11 = vld [vmem:[%s10743_s3 + $0x120] ss:$16 sps:$4 sm:$0xff]   ;;  %v7486_v15 = vld [vmem:[%s10743_s3 + $0x128] ss:$16 sps:$4 sm:$0xff]  }
 0x1e4   :  { %3796 = vmatprep.subr.bf16.mxu1 %v6843_v29  ;;  %v6897_v29 = vcombine.high %v557_v20, %v561_v21  ;;  %v7491_v16 = vld [vmem:[%s10743_s3 + $0x144] ss:$16 sps:$4 sm:$0xff]   ;;  %v7500_v20 = vld [vmem:[%s10743_s3 + $0x16c] ss:$16 sps:$4 sm:$0xff]   ;;  %v7495_v21 = vld [vmem:[%s10743_s3 + $0x160] ss:$16 sps:$4 sm:$0xff]  }
 0x1e6   :  { %3633 = vmatpush1.bf16.msra.mxu0 %v6840_v32  ;;  %v7431_v32 = vld [vmem:[%s10743_s3 + $0x4] ss:$16 sps:$4 sm:$0xff]  }
 0x1e7   :  { %3797 = vmatpush1.bf16.msra.mxu1 %v6842_v33  ;;  %3634 = vmatprep.subr.bf16.mxu0 %v6849_v35  ;;  %v7434_v33 = vld [vmem:[%s10743_s3 + $0xc] ss:$16 sps:$4 sm:$0xff]   ;;  %v7292_v35 = vadd.f32 %v9432_v9, %v572_v23 }
 0x1e8   :  { %3798 = vmatprep.subr.bf16.mxu1 %v6851_v36  ;;  %v7429_v36 = vld [vmem:[%s10743_s3] ss:$16 sps:$4 sm:$0xff]   ;;  %v7440_v9 = vld [vmem:[%s10743_s3 + $0x2c] ss:$16 sps:$4 sm:$0xff]  }
 0x1e9   :  { %v3822_v38 = vpack.c.bf16 %v7292_v35, %v7292_v35  ;;  %v7512_v23 = vld [vmem:[%s10743_s3 + $0x1ac] ss:$16 sps:$4 sm:$0xff]  }
 0x1ea   :  { %3635 = vmatpush1.bf16.msra.mxu0 %v6848_v34  ;;  %v7438_v34 = vld [vmem:[%s10743_s3 + $0x28] ss:$16 sps:$4 sm:$0xff]   ;;  %v7518_v35 = vld [vmem:[%s10743_s3 + $0x1cc] ss:$16 sps:$4 sm:$0xff]  }
 0x1eb   :  { %3799 = vmatpush1.bf16.msra.mxu1 %v6850_v41  ;;  %3636 = vmatprep.subr.bf16.mxu0 %v6857_v42  ;;  %v7443_v41 = vld [vmem:[%s10743_s3 + $0x44] ss:$16 sps:$4 sm:$0xff]   ;;  %v7441_v42 = vld [vmem:[%s10743_s3 + $0x40] ss:$16 sps:$4 sm:$0xff]  }
 0x1ec   :  { %3800 = vmatprep.subr.bf16.mxu1 %v6859_v43  ;;  %v7444_v43 = vld [vmem:[%s10743_s3 + $0x48] ss:$16 sps:$4 sm:$0xff]  }
 0x1ee   :  { %3637 = vmatpush1.bf16.msra.mxu0 %v6856_v47  ;;  %v7455_v47 = vld [vmem:[%s10743_s3 + $0x84] ss:$16 sps:$4 sm:$0xff]  }
 0x1ef   :  { %3801 = vmatpush1.bf16.msra.mxu1 %v6858_v49  ;;  %3638 = vmatprep.subr.bf16.mxu0 %v6865_v50  ;;  %v7458_v49 = vld [vmem:[%s10743_s3 + $0x8c] ss:$16 sps:$4 sm:$0xff]   ;;  %v7453_v50 = vld [vmem:[%s10743_s3 + $0x80] ss:$16 sps:$4 sm:$0xff]  }
 0x1f0   :  { %3802 = vmatprep.subr.bf16.mxu1 %v6867_v51  ;;  %v7456_v51 = vld [vmem:[%s10743_s3 + $0x88] ss:$16 sps:$4 sm:$0xff]  }
 0x1f2   :  { %3639 = vmatpush1.bf16.msra.mxu0 %v6864_v58  ;;  %v7467_v58 = vld [vmem:[%s10743_s3 + $0xc4] ss:$16 sps:$4 sm:$0xff]  }
 0x1f3   :  { %3803 = vmatpush1.bf16.msra.mxu1 %v6866_v59  ;;  %3640 = vmatprep.subr.bf16.mxu0 %v6873_v60  ;;  %v7470_v59 = vld [vmem:[%s10743_s3 + $0xcc] ss:$16 sps:$4 sm:$0xff]   ;;  %v7465_v60 = vld [vmem:[%s10743_s3 + $0xc0] ss:$16 sps:$4 sm:$0xff]  }
 0x1f4   :  { %3804 = vmatprep.subr.bf16.mxu1 %v6875_v61  ;;  %v7468_v61 = vld [vmem:[%s10743_s3 + $0xc8] ss:$16 sps:$4 sm:$0xff]  }
 0x1f6   :  { %3641 = vmatpush1.bf16.msra.mxu0 %v6872_v3  ;;  %v7482_v3 = vld [vmem:[%s10743_s3 + $0x10c] ss:$16 sps:$4 sm:$0xff]  }
 0x1f7   :  { %3805 = vmatpush1.bf16.msra.mxu1 %v6874_v5  ;;  %3642 = vmatprep.subr.bf16.mxu0 %v6881_v6  ;;  %v7477_v5 = vld [vmem:[%s10743_s3 + $0x100] ss:$16 sps:$4 sm:$0xff]   ;;  %v7480_v6 = vld [vmem:[%s10743_s3 + $0x108] ss:$16 sps:$4 sm:$0xff]  }
 0x1f8   :  { %3806 = vmatprep.subr.bf16.mxu1 %v6883_v7  ;;  %v7485_v7 = vld [vmem:[%s10743_s3 + $0x124] ss:$16 sps:$4 sm:$0xff]  }
 0x1fa   :  { %3643 = vmatpush1.bf16.msra.mxu0 %v6880_v57  ;;  %v7494_v57 = vld [vmem:[%s10743_s3 + $0x14c] ss:$16 sps:$4 sm:$0xff]  }
 0x1fb   :  { %3807 = vmatpush1.bf16.msra.mxu1 %v6882_v17  ;;  %3644 = vmatprep.subr.bf16.mxu0 %v6889_v18  ;;  %v7489_v17 = vld [vmem:[%s10743_s3 + $0x140] ss:$16 sps:$4 sm:$0xff]   ;;  %v7492_v18 = vld [vmem:[%s10743_s3 + $0x148] ss:$16 sps:$4 sm:$0xff]  }
 0x1fc   :  { %3808 = vmatprep.subr.bf16.mxu1 %v6891_v19  ;;  %v7497_v19 = vld [vmem:[%s10743_s3 + $0x164] ss:$16 sps:$4 sm:$0xff]  }
 0x1fe   :  { %3645 = vmatpush1.bf16.msra.mxu0 %v6888_v27  ;;  %v7506_v27 = vld [vmem:[%s10743_s3 + $0x18c] ss:$16 sps:$4 sm:$0xff]  }
 0x1ff   :  { %3809 = vmatpush1.bf16.msra.mxu1 %v6890_v28  ;;  %3646 = vmatprep.subr.bf16.mxu0 %v6897_v29  ;;  %v7501_v28 = vld [vmem:[%s10743_s3 + $0x180] ss:$16 sps:$4 sm:$0xff]   ;;  %v7504_v29 = vld [vmem:[%s10743_s3 + $0x188] ss:$16 sps:$4 sm:$0xff]  }
 0x200   :  { %3810 = vmatprep.subr.bf16.mxu1 %v6899_v30  ;;  %v7509_v30 = vld [vmem:[%s10743_s3 + $0x1a4] ss:$16 sps:$4 sm:$0xff]  }
 0x202   :  { %3647 = vmatpush1.bf16.msra.mxu0 %v6896_v31  ;;  %v7507_v31 = vld [vmem:[%s10743_s3 + $0x1a0] ss:$16 sps:$4 sm:$0xff]  }
 0x203   :  { %3811 = vmatpush1.bf16.msra.mxu1 %v6898_v25  ;;  %5387 = vmatprep.subr.bf16.mxu0 %v7431_v32  ;;  %v567_v25 = vsub.s32 0, %v9520_v14  ;;  %v7510_v32 = vld [vmem:[%s10743_s3 + $0x1a8] ss:$16 sps:$4 sm:$0xff]  }
 0x204   :  { %5551 = vmatprep.subr.bf16.mxu1 %v7434_v33  ;;  %v7515_v33 = vld [vmem:[%s10743_s3 + $0x1c4] ss:$16 sps:$4 sm:$0xff]  }
 0x205   :  { %3649 = vmatmul.mubr.bf16.vlgmr.msra.gmra.mrb[4].mxu0 %v8762_v54 }
 0x206   :  { %3813 = vmatmul.mubr.bf16.vlgmr.msra.gmra.mrb[4].mxu1 %v8762_v54  ;;  %5388 = vmatpush1.bf16.msra.mxu0 %v7429_v36  ;;  %v7446_v54 = vld [vmem:[%s10743_s3 + $0x4c] ss:$16 sps:$4 sm:$0xff]   ;;  %v579_v36 = vsub.s32 3, %v9520_v14 }
 0x207   :  { %5419 = vmatprep.mubr.bf16.mxu0 %v3822_v38  ;;  %5552 = vmatpush1.bf16.msra.mxu1 %v7432_v37  ;;  %v7513_v37 = vld [vmem:[%s10743_s3 + $0x1c0] ss:$16 sps:$4 sm:$0xff]  }
 0x208   :  { %5583 = vmatprep.mubr.bf16.mxu1 %v3822_v38  ;;  %5389 = vmatprep.subr.bf16.mxu0 %v7437_v39  ;;  %v568_v39 = vrot.slane %v9544_v26, %v567_v25  ;;  %v7516_v38 = vld [vmem:[%s10743_s3 + $0x1c8] ss:$16 sps:$4 sm:$0xff]  }
 0x209   :  { %5553 = vmatprep.subr.bf16.mxu1 %v7440_v9  ;;  %v7521_v9 = vld [vmem:[%s10743_s3 + $0x1e4] ss:$16 sps:$4 sm:$0xff]  }
 0x20a   :  { %5390 = vmatpush1.bf16.msra.mxu0 %v7435_v40  ;;  %v7524_v40 = vld [vmem:[%s10743_s3 + $0x1ec] ss:$16 sps:$4 sm:$0xff]  }
 0x20b   :  { %5554 = vmatpush1.bf16.msra.mxu1 %v7438_v34  ;;  %5391 = vmatprep.subr.bf16.mxu0 %v7443_v41  ;;  %v580_v34 = vrot.slane %v9544_v26, %v579_v36  ;;  %v7519_v41 = vld [vmem:[%s10743_s3 + $0x1e0] ss:$16 sps:$4 sm:$0xff]  }
 0x20c   :  { %5555 = vmatprep.subr.bf16.mxu1 %v7446_v54  ;;  %v7291_v54 = vadd.f32 %v9422_v4, %v568_v39  ;;  %v7525_v4 = vld [vmem:[%s10743_s3 + $0x200] ss:$16 sps:$4 sm:$0xff]   ;;  %v7594_v39 = vld [vmem:[%s10743_s3 + $0x368] ss:$16 sps:$4 sm:$0xff]  }
 0x20e   :  { %5392 = vmatpush1.bf16.msra.mxu0 %v7441_v42  ;;  %v7522_v42 = vld [vmem:[%s10743_s3 + $0x1e8] ss:$16 sps:$4 sm:$0xff]  }
 0x20f   :  { %5556 = vmatpush1.bf16.msra.mxu1 %v7444_v43  ;;  %5393 = vmatprep.subr.bf16.mxu0 %v7449_v44  ;;  %v7527_v43 = vld [vmem:[%s10743_s3 + $0x204] ss:$16 sps:$4 sm:$0xff]   ;;  %v7530_v44 = vld [vmem:[%s10743_s3 + $0x20c] ss:$16 sps:$4 sm:$0xff]  }
 0x210   :  { %5557 = vmatprep.subr.bf16.mxu1 %v7452_v48  ;;  %v7294_v48 = vadd.f32 %v9440_v13, %v580_v34  ;;  %v7536_v13 = vld [vmem:[%s10743_s3 + $0x22c] ss:$16 sps:$4 sm:$0xff]   ;;  %v7600_v34 = vld [vmem:[%s10743_s3 + $0x388] ss:$16 sps:$4 sm:$0xff]  }
 0x212   :  { %5394 = vmatpush1.bf16.msra.mxu0 %v7447_v45  ;;  %v3821_v45 = vpack.c.bf16 %v7291_v54, %v7291_v54  ;;  %v7608_v54 = vld [vmem:[%s10743_s3 + $0x3ac] ss:$16 sps:$4 sm:$0xff]  }
 0x213   :  { %5558 = vmatpush1.bf16.msra.mxu1 %v7450_v46  ;;  %5395 = vmatprep.subr.bf16.mxu0 %v7455_v47  ;;  %v7528_v46 = vld [vmem:[%s10743_s3 + $0x208] ss:$16 sps:$4 sm:$0xff]   ;;  %v7533_v47 = vld [vmem:[%s10743_s3 + $0x224] ss:$16 sps:$4 sm:$0xff]  }
 0x214   :  { %5559 = vmatprep.subr.bf16.mxu1 %v7458_v49  ;;  %v3824_v49 = vpack.c.bf16 %v7294_v48, %v7294_v48  ;;  %v7611_v48 = vld [vmem:[%s10743_s3 + $0x3c4] ss:$16 sps:$4 sm:$0xff]  }
 0x216   :  { %5396 = vmatpush1.bf16.msra.mxu0 %v7453_v50  ;;  %v7531_v50 = vld [vmem:[%s10743_s3 + $0x220] ss:$16 sps:$4 sm:$0xff]  }
 0x217   :  { %5560 = vmatpush1.bf16.msra.mxu1 %v7456_v51  ;;  %5397 = vmatprep.subr.bf16.mxu0 %v7461_v52  ;;  %v7534_v51 = vld [vmem:[%s10743_s3 + $0x228] ss:$16 sps:$4 sm:$0xff]   ;;  %v7539_v52 = vld [vmem:[%s10743_s3 + $0x244] ss:$16 sps:$4 sm:$0xff]  }
 0x218   :  { %5561 = vmatprep.subr.bf16.mxu1 %v7464_v53  ;;  %v7542_v53 = vld [vmem:[%s10743_s3 + $0x24c] ss:$16 sps:$4 sm:$0xff]  }
 0x21a   :  { %5398 = vmatpush1.bf16.msra.mxu0 %v7459_v55  ;;  %v7537_v55 = vld [vmem:[%s10743_s3 + $0x240] ss:$16 sps:$4 sm:$0xff]  }
 0x21b   :  { %5562 = vmatpush1.bf16.msra.mxu1 %v7462_v56  ;;  %5399 = vmatprep.subr.bf16.mxu0 %v7467_v58  ;;  %v7540_v56 = vld [vmem:[%s10743_s3 + $0x248] ss:$16 sps:$4 sm:$0xff]   ;;  %v7545_v58 = vld [vmem:[%s10743_s3 + $0x264] ss:$16 sps:$4 sm:$0xff]  }
 0x21c   :  { %5563 = vmatprep.subr.bf16.mxu1 %v7470_v59  ;;  %v7548_v59 = vld [vmem:[%s10743_s3 + $0x26c] ss:$16 sps:$4 sm:$0xff]  }
 0x21e   :  { %5400 = vmatpush1.bf16.msra.mxu0 %v7465_v60  ;;  %v7543_v60 = vld [vmem:[%s10743_s3 + $0x260] ss:$16 sps:$4 sm:$0xff]  }
 0x21f   :  { %5564 = vmatpush1.bf16.msra.mxu1 %v7468_v61  ;;  %5401 = vmatprep.subr.bf16.mxu0 %v7473_v62  ;;  %v7546_v61 = vld [vmem:[%s10743_s3 + $0x268] ss:$16 sps:$4 sm:$0xff]   ;;  %v7551_v62 = vld [vmem:[%s10743_s3 + $0x284] ss:$16 sps:$4 sm:$0xff]  }
 0x220   :  { %5565 = vmatprep.subr.bf16.mxu1 %v7476_v63  ;;  %v7554_v63 = vld [vmem:[%s10743_s3 + $0x28c] ss:$16 sps:$4 sm:$0xff]  }
 0x222   :  { %5402 = vmatpush1.bf16.msra.mxu0 %v7471_v0  ;;  %v7549_v0 = vld [vmem:[%s10743_s3 + $0x280] ss:$16 sps:$4 sm:$0xff]  }
 0x223   :  { %5566 = vmatpush1.bf16.msra.mxu1 %v7474_v1  ;;  %5403 = vmatprep.subr.bf16.mxu0 %v7479_v2  ;;  %v7552_v1 = vld [vmem:[%s10743_s3 + $0x288] ss:$16 sps:$4 sm:$0xff]   ;;  %v7557_v2 = vld [vmem:[%s10743_s3 + $0x2a4] ss:$16 sps:$4 sm:$0xff]  }
 0x224   :  { %5567 = vmatprep.subr.bf16.mxu1 %v7482_v3  ;;  %v7560_v3 = vld [vmem:[%s10743_s3 + $0x2ac] ss:$16 sps:$4 sm:$0xff]  }
 0x226   :  { %5404 = vmatpush1.bf16.msra.mxu0 %v7477_v5  ;;  %v7555_v5 = vld [vmem:[%s10743_s3 + $0x2a0] ss:$16 sps:$4 sm:$0xff]  }
 0x227   :  { %5568 = vmatpush1.bf16.msra.mxu1 %v7480_v6  ;;  %5405 = vmatprep.subr.bf16.mxu0 %v7485_v7  ;;  %v7558_v6 = vld [vmem:[%s10743_s3 + $0x2a8] ss:$16 sps:$4 sm:$0xff]   ;;  %v7563_v7 = vld [vmem:[%s10743_s3 + $0x2c4] ss:$16 sps:$4 sm:$0xff]  }
 0x228   :  { %5569 = vmatprep.subr.bf16.mxu1 %v7488_v10  ;;  %v7566_v10 = vld [vmem:[%s10743_s3 + $0x2cc] ss:$16 sps:$4 sm:$0xff]  }
 0x22a   :  { %5406 = vmatpush1.bf16.msra.mxu0 %v7483_v11  ;;  %v7561_v11 = vld [vmem:[%s10743_s3 + $0x2c0] ss:$16 sps:$4 sm:$0xff]  }
 0x22b   :  { %5570 = vmatpush1.bf16.msra.mxu1 %v7486_v15  ;;  %5407 = vmatprep.subr.bf16.mxu0 %v7491_v16  ;;  %v7564_v15 = vld [vmem:[%s10743_s3 + $0x2c8] ss:$16 sps:$4 sm:$0xff]   ;;  %v7569_v16 = vld [vmem:[%s10743_s3 + $0x2e4] ss:$16 sps:$4 sm:$0xff]  }
 0x22c   :  { %5571 = vmatprep.subr.bf16.mxu1 %v7494_v57  ;;  %v7572_v57 = vld [vmem:[%s10743_s3 + $0x2ec] ss:$16 sps:$4 sm:$0xff]  }
 0x22e   :  { %5408 = vmatpush1.bf16.msra.mxu0 %v7489_v17  ;;  %v7567_v17 = vld [vmem:[%s10743_s3 + $0x2e0] ss:$16 sps:$4 sm:$0xff]  }
 0x22f   :  { %5572 = vmatpush1.bf16.msra.mxu1 %v7492_v18  ;;  %5409 = vmatprep.subr.bf16.mxu0 %v7497_v19  ;;  %v7570_v18 = vld [vmem:[%s10743_s3 + $0x2e8] ss:$16 sps:$4 sm:$0xff]   ;;  %v7575_v19 = vld [vmem:[%s10743_s3 + $0x304] ss:$16 sps:$4 sm:$0xff]  }
 0x230   :  { %5573 = vmatprep.subr.bf16.mxu1 %v7500_v20  ;;  %v7578_v20 = vld [vmem:[%s10743_s3 + $0x30c] ss:$16 sps:$4 sm:$0xff]  }
 0x232   :  { %5410 = vmatpush1.bf16.msra.mxu0 %v7495_v21  ;;  %v7573_v21 = vld [vmem:[%s10743_s3 + $0x300] ss:$16 sps:$4 sm:$0xff]  }
 0x233   :  { %5574 = vmatpush1.bf16.msra.mxu1 %v7498_v22  ;;  %5411 = vmatprep.subr.bf16.mxu0 %v7503_v24  ;;  %v7576_v22 = vld [vmem:[%s10743_s3 + $0x308] ss:$16 sps:$4 sm:$0xff]   ;;  %v7581_v24 = vld [vmem:[%s10743_s3 + $0x324] ss:$16 sps:$4 sm:$0xff]  }
 0x234   :  { %5575 = vmatprep.subr.bf16.mxu1 %v7506_v27  ;;  %v7584_v27 = vld [vmem:[%s10743_s3 + $0x32c] ss:$16 sps:$4 sm:$0xff]  }
 0x236   :  { %5412 = vmatpush1.bf16.msra.mxu0 %v7501_v28  ;;  %v7579_v28 = vld [vmem:[%s10743_s3 + $0x320] ss:$16 sps:$4 sm:$0xff]  }
 0x237   :  { %5576 = vmatpush1.bf16.msra.mxu1 %v7504_v29  ;;  %5413 = vmatprep.subr.bf16.mxu0 %v7509_v30  ;;  %v7582_v29 = vld [vmem:[%s10743_s3 + $0x328] ss:$16 sps:$4 sm:$0xff]   ;;  %v7587_v30 = vld [vmem:[%s10743_s3 + $0x344] ss:$16 sps:$4 sm:$0xff]  }
 0x238   :  { %5577 = vmatprep.subr.bf16.mxu1 %v7512_v23  ;;  %v7590_v23 = vld [vmem:[%s10743_s3 + $0x34c] ss:$16 sps:$4 sm:$0xff]  }
 0x23a   :  { %5414 = vmatpush1.bf16.msra.mxu0 %v7507_v31  ;;  %v7585_v31 = vld [vmem:[%s10743_s3 + $0x340] ss:$16 sps:$4 sm:$0xff]  }
 0x23b   :  { %5578 = vmatpush1.bf16.msra.mxu1 %v7510_v32  ;;  %5415 = vmatprep.subr.bf16.mxu0 %v7515_v33  ;;  %v7588_v32 = vld [vmem:[%s10743_s3 + $0x348] ss:$16 sps:$4 sm:$0xff]   ;;  %v7593_v33 = vld [vmem:[%s10743_s3 + $0x364] ss:$16 sps:$4 sm:$0xff]  }
 0x23c   :  { %5579 = vmatprep.subr.bf16.mxu1 %v7518_v35  ;;  %v7596_v35 = vld [vmem:[%s10743_s3 + $0x36c] ss:$16 sps:$4 sm:$0xff]  }
 0x23e   :  { %5416 = vmatpush1.bf16.msra.mxu0 %v7513_v37  ;;  %v7591_v37 = vld [vmem:[%s10743_s3 + $0x360] ss:$16 sps:$4 sm:$0xff]  }
 0x23f   :  { %5580 = vmatpush1.bf16.msra.mxu1 %v7516_v38  ;;  %5417 = vmatprep.subr.bf16.mxu0 %v7521_v9  ;;  %v7599_v38 = vld [vmem:[%s10743_s3 + $0x384] ss:$16 sps:$4 sm:$0xff]   ;;  %v7602_v9 = vld [vmem:[%s10743_s3 + $0x38c] ss:$16 sps:$4 sm:$0xff]  }
 0x240   :  { %5581 = vmatprep.subr.bf16.mxu1 %v7524_v40  ;;  %v7597_v40 = vld [vmem:[%s10743_s3 + $0x380] ss:$16 sps:$4 sm:$0xff]  }
 0x242   :  { %5418 = vmatpush1.bf16.msra.mxu0 %v7519_v41  ;;  %v7605_v41 = vld [vmem:[%s10743_s3 + $0x3a4] ss:$16 sps:$4 sm:$0xff]  }
 0x243   :  { %5582 = vmatpush1.bf16.msra.mxu1 %v7522_v42  ;;  %5428 = vmatprep.subr.bf16.mxu0 %v7527_v43  ;;  %v7603_v42 = vld [vmem:[%s10743_s3 + $0x3a0] ss:$16 sps:$4 sm:$0xff]   ;;  %v575_v43 = vsub.s32 2, %v9520_v14 }
 0x244   :  { %5592 = vmatprep.subr.bf16.mxu1 %v7530_v44  ;;  %v7606_v44 = vld [vmem:[%s10743_s3 + $0x3a8] ss:$16 sps:$4 sm:$0xff]  }
 0x245   :  { %5420 = vmatmul.mubr.bf16.vlgmr.msra.gmra.mrb[8].mxu0 %v3821_v45 }
 0x246   :  { %5584 = vmatmul.mubr.bf16.vlgmr.msra.gmra.mrb[8].mxu1 %v3821_v45  ;;  %5429 = vmatpush1.bf16.msra.mxu0 %v7525_v4  ;;  %v7614_v4 = vld [vmem:[%s10743_s3 + $0x3cc] ss:$16 sps:$4 sm:$0xff]   ;;  %v7609_v45 = vld [vmem:[%s10743_s3 + $0x3c0] ss:$16 sps:$4 sm:$0xff]  }
 0x247   :  { %5460 = vmatprep.mubr.bf16.mxu0 %v3824_v49  ;;  %5593 = vmatpush1.bf16.msra.mxu1 %v7528_v46  ;;  %v576_v46 = vrot.slane %v9544_v26, %v575_v43 }
 0x248   :  { %5624 = vmatprep.mubr.bf16.mxu1 %v3824_v49  ;;  %5430 = vmatprep.subr.bf16.mxu0 %v7533_v47  ;;  %v7612_v47 = vld [vmem:[%s10743_s3 + $0x3c8] ss:$16 sps:$4 sm:$0xff]   ;;  %v7617_v49 = vld [vmem:[%s10743_s3 + $0x3e4] ss:$16 sps:$4 sm:$0xff]  }
 0x249   :  { %5594 = vmatprep.subr.bf16.mxu1 %v7536_v13  ;;  %v7620_v13 = vld [vmem:[%s10743_s3 + $0x3ec] ss:$16 sps:$4 sm:$0xff]  }
 0x24a   :  { %5431 = vmatpush1.bf16.msra.mxu0 %v7531_v50  ;;  %v7615_v50 = vld [vmem:[%s10743_s3 + $0x3e0] ss:$16 sps:$4 sm:$0xff]  }
 0x24b   :  { %5595 = vmatpush1.bf16.msra.mxu1 %v7534_v51  ;;  %5432 = vmatprep.subr.bf16.mxu0 %v7539_v52  ;;  %v7293_v51 = vadd.f32 %v9430_v8, %v576_v46  ;;  %v7618_v52 = vld [vmem:[%s10743_s3 + $0x3e8] ss:$16 sps:$4 sm:$0xff]   ;;  %v7621_v8 = vld [vmem:[%s10743_s3 + $0x400] ss:$16 sps:$4 sm:$0xff]  }
 0x24c   :  { %5596 = vmatprep.subr.bf16.mxu1 %v7542_v53  ;;  %v7623_v53 = vld [vmem:[%s10743_s3 + $0x404] ss:$16 sps:$4 sm:$0xff]   ;;  %v7693_v46 = vld [vmem:[%s10743_s3 + $0x580] ss:$16 sps:$4 sm:$0xff]  }
 0x24e   :  { %5433 = vmatpush1.bf16.msra.mxu0 %v7537_v55  ;;  %v7626_v55 = vld [vmem:[%s10743_s3 + $0x40c] ss:$16 sps:$4 sm:$0xff]  }
 0x24f   :  { %5597 = vmatpush1.bf16.msra.mxu1 %v7540_v56  ;;  %5434 = vmatprep.subr.bf16.mxu0 %v7545_v58  ;;  %v3823_v56 = vpack.c.bf16 %v7293_v51, %v7293_v51  ;;  %v7624_v58 = vld [vmem:[%s10743_s3 + $0x408] ss:$16 sps:$4 sm:$0xff]  }
 0x250   :  { %5598 = vmatprep.subr.bf16.mxu1 %v7548_v59  ;;  %v7629_v59 = vld [vmem:[%s10743_s3 + $0x424] ss:$16 sps:$4 sm:$0xff]   ;;  %v7702_v51 = vld [vmem:[%s10743_s3 + $0x5a8] ss:$16 sps:$4 sm:$0xff]  }
 0x252   :  { %5435 = vmatpush1.bf16.msra.mxu0 %v7543_v60  ;;  %v7632_v60 = vld [vmem:[%s10743_s3 + $0x42c] ss:$16 sps:$4 sm:$0xff]  }
 0x253   :  { %5599 = vmatpush1.bf16.msra.mxu1 %v7546_v61  ;;  %5436 = vmatprep.subr.bf16.mxu0 %v7551_v62  ;;  %v7627_v61 = vld [vmem:[%s10743_s3 + $0x420] ss:$16 sps:$4 sm:$0xff]   ;;  %v7630_v62 = vld [vmem:[%s10743_s3 + $0x428] ss:$16 sps:$4 sm:$0xff]  }
 0x254   :  { %5600 = vmatprep.subr.bf16.mxu1 %v7554_v63  ;;  %v7635_v63 = vld [vmem:[%s10743_s3 + $0x444] ss:$16 sps:$4 sm:$0xff]  }
 0x256   :  { %5437 = vmatpush1.bf16.msra.mxu0 %v7549_v0  ;;  %v7638_v0 = vld [vmem:[%s10743_s3 + $0x44c] ss:$16 sps:$4 sm:$0xff]  }
 0x257   :  { %5601 = vmatpush1.bf16.msra.mxu1 %v7552_v1  ;;  %5438 = vmatprep.subr.bf16.mxu0 %v7557_v2  ;;  %v7633_v1 = vld [vmem:[%s10743_s3 + $0x440] ss:$16 sps:$4 sm:$0xff]   ;;  %v7636_v2 = vld [vmem:[%s10743_s3 + $0x448] ss:$16 sps:$4 sm:$0xff]  }
 0x258   :  { %5602 = vmatprep.subr.bf16.mxu1 %v7560_v3  ;;  %v7641_v3 = vld [vmem:[%s10743_s3 + $0x464] ss:$16 sps:$4 sm:$0xff]  }
 0x25a   :  { %5439 = vmatpush1.bf16.msra.mxu0 %v7555_v5  ;;  %v7644_v5 = vld [vmem:[%s10743_s3 + $0x46c] ss:$16 sps:$4 sm:$0xff]  }
 0x25b   :  { %5603 = vmatpush1.bf16.msra.mxu1 %v7558_v6  ;;  %5440 = vmatprep.subr.bf16.mxu0 %v7563_v7  ;;  %v7639_v6 = vld [vmem:[%s10743_s3 + $0x460] ss:$16 sps:$4 sm:$0xff]   ;;  %v7642_v7 = vld [vmem:[%s10743_s3 + $0x468] ss:$16 sps:$4 sm:$0xff]  }
 0x25c   :  { %5604 = vmatprep.subr.bf16.mxu1 %v7566_v10  ;;  %v7647_v10 = vld [vmem:[%s10743_s3 + $0x484] ss:$16 sps:$4 sm:$0xff]  }
 0x25e   :  { %5441 = vmatpush1.bf16.msra.mxu0 %v7561_v11  ;;  %v7650_v11 = vld [vmem:[%s10743_s3 + $0x48c] ss:$16 sps:$4 sm:$0xff]  }
 0x25f   :  { %5605 = vmatpush1.bf16.msra.mxu1 %v7564_v15  ;;  %5442 = vmatprep.subr.bf16.mxu0 %v7569_v16  ;;  %v7645_v15 = vld [vmem:[%s10743_s3 + $0x480] ss:$16 sps:$4 sm:$0xff]   ;;  %v7648_v16 = vld [vmem:[%s10743_s3 + $0x488] ss:$16 sps:$4 sm:$0xff]  }
 0x260   :  { %5606 = vmatprep.subr.bf16.mxu1 %v7572_v57  ;;  %v7653_v57 = vld [vmem:[%s10743_s3 + $0x4a4] ss:$16 sps:$4 sm:$0xff]  }
 0x262   :  { %5443 = vmatpush1.bf16.msra.mxu0 %v7567_v17  ;;  %v7656_v17 = vld [vmem:[%s10743_s3 + $0x4ac] ss:$16 sps:$4 sm:$0xff]  }
 0x263   :  { %5607 = vmatpush1.bf16.msra.mxu1 %v7570_v18  ;;  %5444 = vmatprep.subr.bf16.mxu0 %v7575_v19  ;;  %v7651_v18 = vld [vmem:[%s10743_s3 + $0x4a0] ss:$16 sps:$4 sm:$0xff]   ;;  %v7654_v19 = vld [vmem:[%s10743_s3 + $0x4a8] ss:$16 sps:$4 sm:$0xff]  }
 0x264   :  { %5608 = vmatprep.subr.bf16.mxu1 %v7578_v20  ;;  %v7659_v20 = vld [vmem:[%s10743_s3 + $0x4c4] ss:$16 sps:$4 sm:$0xff]  }
 0x266   :  { %5445 = vmatpush1.bf16.msra.mxu0 %v7573_v21  ;;  %v7662_v21 = vld [vmem:[%s10743_s3 + $0x4cc] ss:$16 sps:$4 sm:$0xff]  }
 0x267   :  { %5609 = vmatpush1.bf16.msra.mxu1 %v7576_v22  ;;  %5446 = vmatprep.subr.bf16.mxu0 %v7581_v24  ;;  %v7657_v22 = vld [vmem:[%s10743_s3 + $0x4c0] ss:$16 sps:$4 sm:$0xff]   ;;  %v7660_v24 = vld [vmem:[%s10743_s3 + $0x4c8] ss:$16 sps:$4 sm:$0xff]  }
 0x268   :  { %5610 = vmatprep.subr.bf16.mxu1 %v7584_v27  ;;  %v7665_v27 = vld [vmem:[%s10743_s3 + $0x4e4] ss:$16 sps:$4 sm:$0xff]  }
 0x26a   :  { %5447 = vmatpush1.bf16.msra.mxu0 %v7579_v28  ;;  %v7668_v28 = vld [vmem:[%s10743_s3 + $0x4ec] ss:$16 sps:$4 sm:$0xff]  }
 0x26b   :  { %5611 = vmatpush1.bf16.msra.mxu1 %v7582_v29  ;;  %5448 = vmatprep.subr.bf16.mxu0 %v7587_v30  ;;  %v7663_v29 = vld [vmem:[%s10743_s3 + $0x4e0] ss:$16 sps:$4 sm:$0xff]   ;;  %v7666_v30 = vld [vmem:[%s10743_s3 + $0x4e8] ss:$16 sps:$4 sm:$0xff]  }
 0x26c   :  { %5612 = vmatprep.subr.bf16.mxu1 %v7590_v23  ;;  %v7671_v23 = vld [vmem:[%s10743_s3 + $0x504] ss:$16 sps:$4 sm:$0xff]  }
 0x26e   :  { %5449 = vmatpush1.bf16.msra.mxu0 %v7585_v31  ;;  %v7674_v31 = vld [vmem:[%s10743_s3 + $0x50c] ss:$16 sps:$4 sm:$0xff]  }
 0x26f   :  { %5613 = vmatpush1.bf16.msra.mxu1 %v7588_v32  ;;  %5450 = vmatprep.subr.bf16.mxu0 %v7593_v33  ;;  %v7669_v32 = vld [vmem:[%s10743_s3 + $0x500] ss:$16 sps:$4 sm:$0xff]   ;;  %v7672_v33 = vld [vmem:[%s10743_s3 + $0x508] ss:$16 sps:$4 sm:$0xff]  }
 0x270   :  { %5614 = vmatprep.subr.bf16.mxu1 %v7596_v35  ;;  %v7677_v35 = vld [vmem:[%s10743_s3 + $0x524] ss:$16 sps:$4 sm:$0xff]  }
 0x272   :  { %5451 = vmatpush1.bf16.msra.mxu0 %v7591_v37  ;;  %v7680_v37 = vld [vmem:[%s10743_s3 + $0x52c] ss:$16 sps:$4 sm:$0xff]  }
 0x273   :  { %5615 = vmatpush1.bf16.msra.mxu1 %v7594_v39  ;;  %5452 = vmatprep.subr.bf16.mxu0 %v7599_v38  ;;  %v7675_v39 = vld [vmem:[%s10743_s3 + $0x520] ss:$16 sps:$4 sm:$0xff]   ;;  %v7678_v38 = vld [vmem:[%s10743_s3 + $0x528] ss:$16 sps:$4 sm:$0xff]  }
 0x274   :  { %5616 = vmatprep.subr.bf16.mxu1 %v7602_v9  ;;  %v7683_v9 = vld [vmem:[%s10743_s3 + $0x544] ss:$16 sps:$4 sm:$0xff]  }
 0x276   :  { %5453 = vmatpush1.bf16.msra.mxu0 %v7597_v40  ;;  %v7686_v40 = vld [vmem:[%s10743_s3 + $0x54c] ss:$16 sps:$4 sm:$0xff]  }
 0x277   :  { %5617 = vmatpush1.bf16.msra.mxu1 %v7600_v34  ;;  %5454 = vmatprep.subr.bf16.mxu0 %v7605_v41  ;;  %v7681_v34 = vld [vmem:[%s10743_s3 + $0x540] ss:$16 sps:$4 sm:$0xff]   ;;  %v7684_v41 = vld [vmem:[%s10743_s3 + $0x548] ss:$16 sps:$4 sm:$0xff]  }
 0x278   :  { %5618 = vmatprep.subr.bf16.mxu1 %v7608_v54  ;;  %v7689_v54 = vld [vmem:[%s10743_s3 + $0x564] ss:$16 sps:$4 sm:$0xff]  }
 0x27a   :  { %5455 = vmatpush1.bf16.msra.mxu0 %v7603_v42  ;;  %v7692_v42 = vld [vmem:[%s10743_s3 + $0x56c] ss:$16 sps:$4 sm:$0xff]  }
 0x27b   :  { %5619 = vmatpush1.bf16.msra.mxu1 %v7606_v44  ;;  %5456 = vmatprep.subr.bf16.mxu0 %v7611_v48  ;;  %v7687_v44 = vld [vmem:[%s10743_s3 + $0x560] ss:$16 sps:$4 sm:$0xff]   ;;  %v7690_v48 = vld [vmem:[%s10743_s3 + $0x568] ss:$16 sps:$4 sm:$0xff]  }
 0x27c   :  { %5620 = vmatprep.subr.bf16.mxu1 %v7614_v4  ;;  %v7695_v4 = vld [vmem:[%s10743_s3 + $0x584] ss:$16 sps:$4 sm:$0xff]  }
 0x27e   :  { %5457 = vmatpush1.bf16.msra.mxu0 %v7609_v45  ;;  %v7698_v45 = vld [vmem:[%s10743_s3 + $0x58c] ss:$16 sps:$4 sm:$0xff]  }
 0x27f   :  { %5621 = vmatpush1.bf16.msra.mxu1 %v7612_v47  ;;  %5458 = vmatprep.subr.bf16.mxu0 %v7617_v49  ;;  %v7696_v47 = vld [vmem:[%s10743_s3 + $0x588] ss:$16 sps:$4 sm:$0xff]   ;;  %v7701_v49 = vld [vmem:[%s10743_s3 + $0x5a4] ss:$16 sps:$4 sm:$0xff]  }
 0x280   :  { %5622 = vmatprep.subr.bf16.mxu1 %v7620_v13  ;;  %v7704_v13 = vld [vmem:[%s10743_s3 + $0x5ac] ss:$16 sps:$4 sm:$0xff]  }
 0x282   :  { %5459 = vmatpush1.bf16.msra.mxu0 %v7615_v50  ;;  %v7699_v50 = vld [vmem:[%s10743_s3 + $0x5a0] ss:$16 sps:$4 sm:$0xff]  }
 0x283   :  { %5623 = vmatpush1.bf16.msra.mxu1 %v7618_v52  ;;  %5469 = vmatprep.subr.bf16.mxu0 %v7623_v53  ;;  %v7707_v52 = vld [vmem:[%s10743_s3 + $0x5c4] ss:$16 sps:$4 sm:$0xff]   ;;  %v7710_v53 = vld [vmem:[%s10743_s3 + $0x5cc] ss:$16 sps:$4 sm:$0xff]  }
 0x284   :  { %5633 = vmatprep.subr.bf16.mxu1 %v7626_v55  ;;  %v7705_v55 = vld [vmem:[%s10743_s3 + $0x5c0] ss:$16 sps:$4 sm:$0xff]  }
 0x285   :  { %5461 = vmatmul.mubr.bf16.vlgmr.msra.gmra.mrb[8].mxu0 %v3823_v56 }
 0x286   :  { %5625 = vmatmul.mubr.bf16.vlgmr.msra.gmra.mrb[8].mxu1 %v3823_v56  ;;  %5470 = vmatpush1.bf16.msra.mxu0 %v7621_v8  ;;  %v7708_v8 = vld [vmem:[%s10743_s3 + $0x5c8] ss:$16 sps:$4 sm:$0xff]   ;;  %v7713_v56 = vld [vmem:[%s10743_s3 + $0x5e4] ss:$16 sps:$4 sm:$0xff]  }
 0x287   :  { %5634 = vmatpush1.bf16.msra.mxu1 %v7624_v58  ;;  %5471 = vmatprep.subr.bf16.mxu0 %v7629_v59  ;;  %v7716_v58 = vld [vmem:[%s10743_s3 + $0x5ec] ss:$16 sps:$4 sm:$0xff]   ;;  %v7711_v59 = vld [vmem:[%s10743_s3 + $0x5e0] ss:$16 sps:$4 sm:$0xff]  }
 0x288   :  { %5635 = vmatprep.subr.bf16.mxu1 %v7632_v60  ;;  %v7714_v60 = vld [vmem:[%s10743_s3 + $0x5e8] ss:$16 sps:$4 sm:$0xff]  }
 0x28a   :  { %5472 = vmatpush1.bf16.msra.mxu0 %v7627_v61  ;;  %v7719_v61 = vld [vmem:[%s10743_s3 + $0x604] ss:$16 sps:$4 sm:$0xff]  }
 0x28b   :  { %5636 = vmatpush1.bf16.msra.mxu1 %v7630_v62  ;;  %5473 = vmatprep.subr.bf16.mxu0 %v7635_v63  ;;  %v7722_v62 = vld [vmem:[%s10743_s3 + $0x60c] ss:$16 sps:$4 sm:$0xff]   ;;  %v583_v63 = vsub.s32 4, %v9520_v14 }
 0x28c   :  { %5637 = vmatprep.subr.bf16.mxu1 %v7638_v0  ;;  %v587_v0 = vsub.s32 5, %v9520_v14 }
 0x28e   :  { %5474 = vmatpush1.bf16.msra.mxu0 %v7633_v1  ;;  %v595_v1 = vsub.s32 7, %v9520_v14 }
 0x28f   :  { %5638 = vmatpush1.bf16.msra.mxu1 %v7636_v2  ;;  %5475 = vmatprep.subr.bf16.mxu0 %v7641_v3  ;;  %v584_v2 = vrot.slane %v9544_v26, %v583_v63  ;;  %v588_v3 = vrot.slane %v9544_v26, %v587_v0  ;;  %v7782_v63 = vld [vmem:[%s10743_s3 + $0x74c] ss:$16 sps:$4 sm:$0xff]   ;;  %v7777_v0 = vld [vmem:[%s10743_s3 + $0x740] ss:$16 sps:$4 sm:$0xff]  }
 0x290   :  { %5639 = vmatprep.subr.bf16.mxu1 %v7644_v5  ;;  %v596_v5 = vrot.slane %v9544_v26, %v595_v1  ;;  %v7720_v26 = vld [vmem:[%s10743_s3 + $0x608] ss:$16 sps:$4 sm:$0xff]  }
 0x291   :  { %v7780_v1 = vld [vmem:[%s10743_s3 + $0x748] ss:$16 sps:$4 sm:$0xff]  }
 0x292   :  { %5476 = vmatpush1.bf16.msra.mxu0 %v7639_v6 }
 0x293   :  { %5640 = vmatpush1.bf16.msra.mxu1 %v7642_v7  ;;  %5477 = vmatprep.subr.bf16.mxu0 %v7647_v10 }
 0x294   :  { %5641 = vmatprep.subr.bf16.mxu1 %v7650_v11 }
 0x296   :  { %5478 = vmatpush1.bf16.msra.mxu0 %v7645_v15 }
 0x297   :  { %5642 = vmatpush1.bf16.msra.mxu1 %v7648_v16  ;;  %5479 = vmatprep.subr.bf16.mxu0 %v7653_v57 }
 0x298   :  { %5643 = vmatprep.subr.bf16.mxu1 %v7656_v17 }
 0x29a   :  { %5480 = vmatpush1.bf16.msra.mxu0 %v7651_v18 }
 0x29b   :  { %5644 = vmatpush1.bf16.msra.mxu1 %v7654_v19  ;;  %5481 = vmatprep.subr.bf16.mxu0 %v7659_v20 }
 0x29c   :  { %5645 = vmatprep.subr.bf16.mxu1 %v7662_v21 }
 0x29e   :  { %5482 = vmatpush1.bf16.msra.mxu0 %v7657_v22  ;;  %v7717_v22 = vld [vmem:[%s10743_s3 + $0x600] ss:$16 sps:$4 sm:$0xff]  }
 0x29f   :  { %5646 = vmatpush1.bf16.msra.mxu1 %v7660_v24  ;;  %5483 = vmatprep.subr.bf16.mxu0 %v7665_v27  ;;  %v7725_v27 = vld [vmem:[%s10743_s3 + $0x624] ss:$16 sps:$4 sm:$0xff]  }
 0x2a0   :  { %5647 = vmatprep.subr.bf16.mxu1 %v7668_v28  ;;  %v7728_v28 = vld [vmem:[%s10743_s3 + $0x62c] ss:$16 sps:$4 sm:$0xff]  }
 0x2a2   :  { %5484 = vmatpush1.bf16.msra.mxu0 %v7663_v29 }
 0x2a3   :  { %5648 = vmatpush1.bf16.msra.mxu1 %v7666_v30  ;;  %5485 = vmatprep.subr.bf16.mxu0 %v7671_v23  ;;  %v7723_v30 = vld [vmem:[%s10743_s3 + $0x620] ss:$16 sps:$4 sm:$0xff]   ;;  %v7726_v23 = vld [vmem:[%s10743_s3 + $0x628] ss:$16 sps:$4 sm:$0xff]  }
 0x2a4   :  { %5649 = vmatprep.subr.bf16.mxu1 %v7674_v31  ;;  %v7731_v31 = vld [vmem:[%s10743_s3 + $0x644] ss:$16 sps:$4 sm:$0xff]  }
 0x2a6   :  { %5486 = vmatpush1.bf16.msra.mxu0 %v7669_v32  ;;  %v7734_v32 = vld [vmem:[%s10743_s3 + $0x64c] ss:$16 sps:$4 sm:$0xff]  }
 0x2a7   :  { %5650 = vmatpush1.bf16.msra.mxu1 %v7672_v33  ;;  %5487 = vmatprep.subr.bf16.mxu0 %v7677_v35  ;;  %v7729_v33 = vld [vmem:[%s10743_s3 + $0x640] ss:$16 sps:$4 sm:$0xff]   ;;  %v7732_v35 = vld [vmem:[%s10743_s3 + $0x648] ss:$16 sps:$4 sm:$0xff]  }
 0x2a8   :  { %5651 = vmatprep.subr.bf16.mxu1 %v7680_v37  ;;  %v7737_v37 = vld [vmem:[%s10743_s3 + $0x664] ss:$16 sps:$4 sm:$0xff]  }
 0x2aa   :  { %5488 = vmatpush1.bf16.msra.mxu0 %v7675_v39  ;;  %v7740_v39 = vld [vmem:[%s10743_s3 + $0x66c] ss:$16 sps:$4 sm:$0xff]  }
 0x2ab   :  { %5652 = vmatpush1.bf16.msra.mxu1 %v7678_v38  ;;  %5489 = vmatprep.subr.bf16.mxu0 %v7683_v9  ;;  %v7735_v38 = vld [vmem:[%s10743_s3 + $0x660] ss:$16 sps:$4 sm:$0xff]   ;;  %v7738_v9 = vld [vmem:[%s10743_s3 + $0x668] ss:$16 sps:$4 sm:$0xff]  }
 0x2ac   :  { %5653 = vmatprep.subr.bf16.mxu1 %v7686_v40  ;;  %v7743_v40 = vld [vmem:[%s10743_s3 + $0x684] ss:$16 sps:$4 sm:$0xff]  }
 0x2ae   :  { %5490 = vmatpush1.bf16.msra.mxu0 %v7681_v34  ;;  %v7746_v34 = vld [vmem:[%s10743_s3 + $0x68c] ss:$16 sps:$4 sm:$0xff]  }
 0x2af   :  { %5654 = vmatpush1.bf16.msra.mxu1 %v7684_v41  ;;  %5491 = vmatprep.subr.bf16.mxu0 %v7689_v54  ;;  %v7741_v41 = vld [vmem:[%s10743_s3 + $0x680] ss:$16 sps:$4 sm:$0xff]   ;;  %v7744_v54 = vld [vmem:[%s10743_s3 + $0x688] ss:$16 sps:$4 sm:$0xff]  }
 0x2b0   :  { %5655 = vmatprep.subr.bf16.mxu1 %v7692_v42  ;;  %v7749_v42 = vld [vmem:[%s10743_s3 + $0x6a4] ss:$16 sps:$4 sm:$0xff]  }
 0x2b2   :  { %5492 = vmatpush1.bf16.msra.mxu0 %v7687_v44  ;;  %v7752_v44 = vld [vmem:[%s10743_s3 + $0x6ac] ss:$16 sps:$4 sm:$0xff]  }
 0x2b3   :  { %5656 = vmatpush1.bf16.msra.mxu1 %v7690_v48  ;;  %5493 = vmatprep.subr.bf16.mxu0 %v7695_v4  ;;  %v7747_v48 = vld [vmem:[%s10743_s3 + $0x6a0] ss:$16 sps:$4 sm:$0xff]   ;;  %v7750_v4 = vld [vmem:[%s10743_s3 + $0x6a8] ss:$16 sps:$4 sm:$0xff]  }
 0x2b4   :  { %5657 = vmatprep.subr.bf16.mxu1 %v7698_v45  ;;  %v7755_v45 = vld [vmem:[%s10743_s3 + $0x6c4] ss:$16 sps:$4 sm:$0xff]  }
 0x2b6   :  { %5494 = vmatpush1.bf16.msra.mxu0 %v7693_v46  ;;  %v7758_v46 = vld [vmem:[%s10743_s3 + $0x6cc] ss:$16 sps:$4 sm:$0xff]  }
 0x2b7   :  { %5658 = vmatpush1.bf16.msra.mxu1 %v7696_v47  ;;  %5495 = vmatprep.subr.bf16.mxu0 %v7701_v49  ;;  %v7753_v47 = vld [vmem:[%s10743_s3 + $0x6c0] ss:$16 sps:$4 sm:$0xff]   ;;  %v7756_v49 = vld [vmem:[%s10743_s3 + $0x6c8] ss:$16 sps:$4 sm:$0xff]  }
 0x2b8   :  { %5659 = vmatprep.subr.bf16.mxu1 %v7704_v13  ;;  %v7761_v13 = vld [vmem:[%s10743_s3 + $0x6e4] ss:$16 sps:$4 sm:$0xff]  }
 0x2ba   :  { %5496 = vmatpush1.bf16.msra.mxu0 %v7699_v50  ;;  %v7764_v50 = vld [vmem:[%s10743_s3 + $0x6ec] ss:$16 sps:$4 sm:$0xff]  }
 0x2bb   :  { %5660 = vmatpush1.bf16.msra.mxu1 %v7702_v51  ;;  %5497 = vmatprep.subr.bf16.mxu0 %v7707_v52  ;;  %v7759_v51 = vld [vmem:[%s10743_s3 + $0x6e0] ss:$16 sps:$4 sm:$0xff]   ;;  %v7762_v52 = vld [vmem:[%s10743_s3 + $0x6e8] ss:$16 sps:$4 sm:$0xff]  }
 0x2bc   :  { %5661 = vmatprep.subr.bf16.mxu1 %v7710_v53  ;;  %v7767_v53 = vld [vmem:[%s10743_s3 + $0x704] ss:$16 sps:$4 sm:$0xff]  }
 0x2be   :  { %5498 = vmatpush1.bf16.msra.mxu0 %v7705_v55  ;;  %v7770_v55 = vld [vmem:[%s10743_s3 + $0x70c] ss:$16 sps:$4 sm:$0xff]  }
 0x2bf   :  { %5662 = vmatpush1.bf16.msra.mxu1 %v7708_v8  ;;  %5499 = vmatprep.subr.bf16.mxu0 %v7713_v56  ;;  %v7765_v8 = vld [vmem:[%s10743_s3 + $0x700] ss:$16 sps:$4 sm:$0xff]   ;;  %v7768_v56 = vld [vmem:[%s10743_s3 + $0x708] ss:$16 sps:$4 sm:$0xff]  }
 0x2c0   :  { %5663 = vmatprep.subr.bf16.mxu1 %v7716_v58  ;;  %v7773_v58 = vld [vmem:[%s10743_s3 + $0x724] ss:$16 sps:$4 sm:$0xff]  }
 0x2c2   :  { %5500 = vmatpush1.bf16.msra.mxu0 %v7711_v59  ;;  %v7776_v59 = vld [vmem:[%s10743_s3 + $0x72c] ss:$16 sps:$4 sm:$0xff]  }
 0x2c3   :  { %5664 = vmatpush1.bf16.msra.mxu1 %v7714_v60  ;;  %5510 = vmatprep.subr.bf16.mxu0 %v7719_v61  ;;  %v7771_v60 = vld [vmem:[%s10743_s3 + $0x720] ss:$16 sps:$4 sm:$0xff]   ;;  %v7774_v61 = vld [vmem:[%s10743_s3 + $0x728] ss:$16 sps:$4 sm:$0xff]  }
 0x2c4   :  { %5674 = vmatprep.subr.bf16.mxu1 %v7722_v62  ;;  %v7779_v62 = vld [vmem:[%s10743_s3 + $0x744] ss:$16 sps:$4 sm:$0xff]  }
 0x2d8   :  { %v3650_v6 = vpop.f32.mrb[4].mxu0 }
 0x2d9   :  { %v7295_v7 = vadd.f32 %v3650_v6, %v584_v2  ;;  %v10155_v10 = vpop.f32.mrb[4].mxu1  ;;  %v3652_v11 = vpop.f32.mrb[5].mxu0  ;;  %v7785_v2 = vld [vmem:[%s10743_s3 + $0x764] ss:$16 sps:$4 sm:$0xff]   ;;  %v7786_v6 = vld [vmem:[%s10743_s3 + $0x768] ss:$16 sps:$4 sm:$0xff]  }
 0x2da   :  { %v7296_v15 = vadd.f32 %v3652_v11, %v588_v3  ;;  %v3816_v16 = vpop.f32.mrb[5].mxu1  ;;  %v3654_v57 = vpop.f32.mrb[6].mxu0  ;;  %v7788_v3 = vld [vmem:[%s10743_s3 + $0x76c] ss:$16 sps:$4 sm:$0xff]  }
 0x2db   :  { %v7298_v17 = vadd.f32 %v3816_v16, %v596_v5  ;;  %v3818_v18 = vpop.f32.mrb[6].mxu1  ;;  %v3655_v19 = vpop.f32.mrb[7].mxu0  ;;  %v3825_v24 = vpack.c.bf16 %v7295_v7, %v7295_v7  ;;  %v7783_v5 = vld [vmem:[%s10743_s3 + $0x760] ss:$16 sps:$4 sm:$0xff]   ;;  %v7791_v7 = vld [vmem:[%s10743_s3 + $0x784] ss:$16 sps:$4 sm:$0xff]  }
 0x2dc   :  { %v3826_v20 = vpack.c.bf16 %v7296_v15, %v7296_v15  ;;  %v3819_v21 = vpop.f32.mrb[7].mxu1  ;;  %v7794_v11 = vld [vmem:[%s10743_s3 + $0x78c] ss:$16 sps:$4 sm:$0xff]   ;;  %v7789_v15 = vld [vmem:[%s10743_s3 + $0x780] ss:$16 sps:$4 sm:$0xff]  }
 0x2dd   :  { %v3828_v29 = vpack.c.bf16 %v7298_v17, %v7298_v17  ;;  %v7792_v16 = vld [vmem:[%s10743_s3 + $0x788] ss:$16 sps:$4 sm:$0xff]   ;;  %v7797_v57 = vld [vmem:[%s10743_s3 + $0x7a4] ss:$16 sps:$4 sm:$0xff]   ;;  %v7800_v17 = vld [vmem:[%s10743_s3 + $0x7ac] ss:$16 sps:$4 sm:$0xff]  }
 0x2de   :  { %5501 = vmatprep.mubr.bf16.mxu0 %v3826_v20  ;;  %5665 = vmatprep.mubr.bf16.mxu1 %v3826_v20  ;;  %v7795_v18 = vld [vmem:[%s10743_s3 + $0x7a0] ss:$16 sps:$4 sm:$0xff]   ;;  %v7798_v19 = vld [vmem:[%s10743_s3 + $0x7a8] ss:$16 sps:$4 sm:$0xff]   ;;  %v591_v20 = vsub.s32 6, %v9520_v14 }
 0x2df   :  { %5502 = vmatmul.mubr.bf16.vlgmr.msra.gmra.mrb[8].mxu0 %v3825_v24  ;;  %5666 = vmatmul.mubr.bf16.vlgmr.msra.gmra.mrb[8].mxu1 %v3825_v24  ;;  %v7803_v21 = vld [vmem:[%s10743_s3 + $0x7c4] ss:$16 sps:$4 sm:$0xff]   ;;  %v7804_v24 = vld [vmem:[%s10743_s3 + $0x7c8] ss:$16 sps:$4 sm:$0xff]   ;;  %v7156_v14 = vld [vmem:[%s10746_s6] ss:$0 sm:$0xff] }
 0x2e0   :  { %5511 = vmatpush1.bf16.msra.mxu0 %v7717_v22  ;;  %5675 = vmatpush1.bf16.msra.mxu1 %v7720_v26  ;;  %v7806_v22 = vld [vmem:[%s10743_s3 + $0x7cc] ss:$16 sps:$4 sm:$0xff]   ;;  %v7801_v26 = vld [vmem:[%s10743_s3 + $0x7c0] ss:$16 sps:$4 sm:$0xff]   ;;  %s7843_s6 = smov 126  }
 0x2e1   :  { %5542 = vmatprep.mubr.bf16.mxu0 %v3828_v29  ;;  %5706 = vmatprep.mubr.bf16.mxu1 %v3828_v29  ;;  %v7809_v29 = vld [vmem:[%s10743_s3 + $0x7e4] ss:$16 sps:$4 sm:$0xff]  }
 0x2e2   :  { %5512 = vmatprep.subr.bf16.mxu0 %v7725_v27  ;;  %5676 = vmatprep.subr.bf16.mxu1 %v7728_v28  ;;  %v7829_v27 = vld [vmem:[%s10742_s2] sm:$0xff]  ;;  %s7867_s2 = smov 10  }
 0x2e3   :  { %v592_v28 = vrot.slane %v7829_v27, %v591_v20  ;;  %v5739_v20 = vld [vmem:[%s10745_s5 + $0xc0] sm:$0xff] }
 0x2e4   :  { %5513 = vmatpush1.bf16.msra.mxu0 %v7723_v30  ;;  %5677 = vmatpush1.bf16.msra.mxu1 %v7726_v23  ;;  %v7812_v30 = vld [vmem:[%s10743_s3 + $0x7ec] ss:$16 sps:$4 sm:$0xff]   ;;  %v5731_v23 = vld [vmem:[%s10745_s5 + $0x80] sm:$0xff] }
 0x2e5   :  { %5514 = vmatprep.subr.bf16.mxu0 %v7731_v31  ;;  %5678 = vmatprep.subr.bf16.mxu1 %v7734_v32  ;;  %v5732_v31 = vld [vmem:[%s10745_s5 + $0x88] sm:$0xff]  ;;  %v5763_v32 = vld [vmem:[%s10745_s5 + $0x180] sm:$0xff] }
 0x2e8   :  { %5515 = vmatpush1.bf16.msra.mxu0 %v7729_v33  ;;  %5679 = vmatpush1.bf16.msra.mxu1 %v7732_v35  ;;  %v5764_v33 = vld [vmem:[%s10745_s5 + $0x188] sm:$0xff]  ;;  %v7807_v35 = vld [vmem:[%s10743_s3 + $0x7e0] ss:$16 sps:$4 sm:$0xff]  }
 0x2e9   :  { %5516 = vmatprep.subr.bf16.mxu0 %v7737_v37  ;;  %5680 = vmatprep.subr.bf16.mxu1 %v7740_v39  ;;  %v7810_v37 = vld [vmem:[%s10743_s3 + $0x7e8] ss:$16 sps:$4 sm:$0xff]   ;;  %v5715_v39 = vld [vmem:[%s10745_s5] sm:$0xff] }
 0x2ec   :  { %5517 = vmatpush1.bf16.msra.mxu0 %v7735_v38  ;;  %5681 = vmatpush1.bf16.msra.mxu1 %v7738_v9  ;;  %v5716_v38 = vld [vmem:[%s10745_s5 + $0x8] sm:$0xff]  ;;  %v7297_v9 = vadd.f32 %v10155_v10, %v592_v28  ;;  %v5734_v10 = vld [vmem:[%s10745_s5 + $0x98] sm:$0xff]  ;;  %v5723_v28 = vld [vmem:[%s10745_s5 + $0x40] sm:$0xff] }
 0x2ed   :  { %5518 = vmatprep.subr.bf16.mxu0 %v7743_v40  ;;  %5682 = vmatprep.subr.bf16.mxu1 %v7746_v34  ;;  %v7227_v40 = vpack.c.bf16 %v5732_v31, %v5731_v23  ;;  %v7259_v34 = vpack.c.bf16 %v5764_v33, %v5763_v32  ;;  %v5755_v31 = vld [vmem:[%s10745_s5 + $0x140] sm:$0xff]  ;;  %v5756_v32 = vld [vmem:[%s10745_s5 + $0x148] sm:$0xff]  ;;  %v5741_v33 = vld [vmem:[%s10745_s5 + $0xd0] sm:$0xff] }
 0x2f0   :  { %5519 = vmatpush1.bf16.msra.mxu0 %v7741_v41  ;;  %5683 = vmatpush1.bf16.msra.mxu1 %v7744_v54  ;;  %v5747_v41 = vld [vmem:[%s10745_s5 + $0x100] sm:$0xff]  ;;  %v5748_v54 = vld [vmem:[%s10745_s5 + $0x108] sm:$0xff] }
 0x2f1   :  { %5520 = vmatprep.subr.bf16.mxu0 %v7749_v42  ;;  %5684 = vmatprep.subr.bf16.mxu1 %v7752_v44  ;;  %v5733_v42 = vld [vmem:[%s10745_s5 + $0x90] sm:$0xff] }
 0x2f2   :  { %v5765_v44 = vld [vmem:[%s10745_s5 + $0x190] sm:$0xff] }
 0x2f4   :  { %5521 = vmatpush1.bf16.msra.mxu0 %v7747_v48  ;;  %5685 = vmatpush1.bf16.msra.mxu1 %v7750_v4  ;;  %v5766_v48 = vld [vmem:[%s10745_s5 + $0x198] sm:$0xff]  ;;  %v7229_v4 = vpack.c.bf16 %v5716_v38, %v5715_v39 }
 0x2f5   :  { %5522 = vmatprep.subr.bf16.mxu0 %v7755_v45  ;;  %5686 = vmatprep.subr.bf16.mxu1 %v7758_v46  ;;  %v7261_v45 = vpack.c.bf16 %v5748_v54, %v5747_v41  ;;  %v5717_v46 = vld [vmem:[%s10745_s5 + $0x10] sm:$0xff]  ;;  %v5774_v39 = vld [vmem:[%s10745_s5 + $0x1d8] sm:$0xff] }
 0x2f8   :  { %5523 = vmatpush1.bf16.msra.mxu0 %v7753_v47  ;;  %5687 = vmatpush1.bf16.msra.mxu1 %v7756_v49  ;;  %v5718_v47 = vld [vmem:[%s10745_s5 + $0x18] sm:$0xff]  ;;  %v3827_v49 = vpack.c.bf16 %v7297_v9, %v7297_v9  ;;  %v7277_v9 = vpack.c.bf16 %v5756_v32, %v5755_v31 }
 0x2f9   :  { %5524 = vmatprep.subr.bf16.mxu0 %v7761_v13  ;;  %5688 = vmatprep.subr.bf16.mxu1 %v7764_v50  ;;  %v7231_v13 = vpack.c.bf16 %v5734_v10, %v5733_v42  ;;  %v7263_v50 = vpack.c.bf16 %v5766_v48, %v5765_v44  ;;  %v5757_v42 = vld [vmem:[%s10745_s5 + $0x150] sm:$0xff]  ;;  %v5758_v10 = vld [vmem:[%s10745_s5 + $0x158] sm:$0xff]  ;;  %v5743_v44 = vld [vmem:[%s10745_s5 + $0xe0] sm:$0xff] }
 0x2fa   :  { %v5744_v48 = vld [vmem:[%s10745_s5 + $0xe8] sm:$0xff] }
 0x2fc   :  { %5525 = vmatpush1.bf16.msra.mxu0 %v7759_v51  ;;  %5689 = vmatpush1.bf16.msra.mxu1 %v7762_v52  ;;  %v5749_v51 = vld [vmem:[%s10745_s5 + $0x110] sm:$0xff]  ;;  %v5750_v52 = vld [vmem:[%s10745_s5 + $0x118] sm:$0xff] }
 0x2fd   :  { %5526 = vmatprep.subr.bf16.mxu0 %v7767_v53  ;;  %5690 = vmatprep.subr.bf16.mxu1 %v7770_v55  ;;  %v5735_v53 = vld [vmem:[%s10745_s5 + $0xa0] sm:$0xff]  ;;  %v5736_v55 = vld [vmem:[%s10745_s5 + $0xa8] sm:$0xff] }
 0x300   :  { %5527 = vmatpush1.bf16.msra.mxu0 %v7765_v8  ;;  %5691 = vmatpush1.bf16.msra.mxu1 %v7768_v56  ;;  %v5767_v8 = vld [vmem:[%s10745_s5 + $0x1a0] sm:$0xff]  ;;  %v5768_v56 = vld [vmem:[%s10745_s5 + $0x1a8] sm:$0xff] }
 0x301   :  { %5528 = vmatprep.subr.bf16.mxu0 %v7773_v58  ;;  %5692 = vmatprep.subr.bf16.mxu1 %v7776_v59  ;;  %v7233_v58 = vpack.c.bf16 %v5718_v47, %v5717_v46  ;;  %v7265_v59 = vpack.c.bf16 %v5750_v52, %v5749_v51  ;;  %v7281_v47 = vpack.c.bf16 %v5758_v10, %v5757_v42  ;;  %v5728_v51 = vld [vmem:[%s10745_s5 + $0x68] sm:$0xff]  ;;  %v5759_v52 = vld [vmem:[%s10745_s5 + $0x160] sm:$0xff] }
 0x304   :  { %5529 = vmatpush1.bf16.msra.mxu0 %v7771_v60  ;;  %5693 = vmatpush1.bf16.msra.mxu1 %v7774_v61  ;;  %v5719_v60 = vld [vmem:[%s10745_s5 + $0x20] sm:$0xff]  ;;  %v5720_v61 = vld [vmem:[%s10745_s5 + $0x28] sm:$0xff] }
 0x305   :  { %5530 = vmatprep.subr.bf16.mxu0 %v7779_v62  ;;  %5694 = vmatprep.subr.bf16.mxu1 %v7782_v63  ;;  %v7235_v62 = vpack.c.bf16 %v5736_v55, %v5735_v53  ;;  %v7267_v63 = vpack.c.bf16 %v5768_v56, %v5767_v8  ;;  %v5760_v53 = vld [vmem:[%s10745_s5 + $0x168] sm:$0xff]  ;;  %v5745_v56 = vld [vmem:[%s10745_s5 + $0xf0] sm:$0xff] }
 0x306   :  { %v7285_v8 = vpack.c.bf16 %v5760_v53, %v5759_v52 }
 0x308   :  { %5531 = vmatpush1.bf16.msra.mxu0 %v7777_v0  ;;  %5695 = vmatpush1.bf16.msra.mxu1 %v7780_v1  ;;  %v5751_v0 = vld [vmem:[%s10745_s5 + $0x120] sm:$0xff]  ;;  %v5752_v1 = vld [vmem:[%s10745_s5 + $0x128] sm:$0xff] }
 0x309   :  { %5532 = vmatprep.subr.bf16.mxu0 %v7785_v2  ;;  %5696 = vmatprep.subr.bf16.mxu1 %v7788_v3  ;;  %v5737_v2 = vld [vmem:[%s10745_s5 + $0xb0] sm:$0xff]  ;;  %v5738_v3 = vld [vmem:[%s10745_s5 + $0xb8] sm:$0xff] }
 0x30c   :  { %5533 = vmatpush1.bf16.msra.mxu0 %v7783_v5  ;;  %5697 = vmatpush1.bf16.msra.mxu1 %v7786_v6  ;;  %v5769_v5 = vld [vmem:[%s10745_s5 + $0x1b0] sm:$0xff]  ;;  %v5770_v6 = vld [vmem:[%s10745_s5 + $0x1b8] sm:$0xff] }
 0x30d   :  { %5534 = vmatprep.subr.bf16.mxu0 %v7791_v7  ;;  %5698 = vmatprep.subr.bf16.mxu1 %v7794_v11  ;;  %v7237_v7 = vpack.c.bf16 %v5720_v61, %v5719_v60  ;;  %v7269_v11 = vpack.c.bf16 %v5752_v1, %v5751_v0  ;;  %v5778_v61 = vld [vmem:[%s10745_s5 + $0x1f8] sm:$0xff] }
 0x310   :  { %5535 = vmatpush1.bf16.msra.mxu0 %v7789_v15  ;;  %5699 = vmatpush1.bf16.msra.mxu1 %v7792_v16  ;;  %v5721_v15 = vld [vmem:[%s10745_s5 + $0x30] sm:$0xff]  ;;  %v5722_v16 = vld [vmem:[%s10745_s5 + $0x38] sm:$0xff] }
 0x311   :  { %5536 = vmatprep.subr.bf16.mxu0 %v7797_v57  ;;  %5700 = vmatprep.subr.bf16.mxu1 %v7800_v17  ;;  %v7239_v57 = vpack.c.bf16 %v5738_v3, %v5737_v2  ;;  %v7271_v17 = vpack.c.bf16 %v5770_v6, %v5769_v5  ;;  %v5761_v2 = vld [vmem:[%s10745_s5 + $0x170] sm:$0xff]  ;;  %v5762_v3 = vld [vmem:[%s10745_s5 + $0x178] sm:$0xff]  ;;  %v4085_v6 = vld [vmem:[%s10744_s4] sm:$0xf] }
 0x312   :  { %v7289_v5 = vpack.c.bf16 %v5762_v3, %v5761_v2 }
 0x314   :  { %5537 = vmatpush1.bf16.msra.mxu0 %v7795_v18  ;;  %5701 = vmatpush1.bf16.msra.mxu1 %v7798_v19  ;;  %v5753_v18 = vld [vmem:[%s10745_s5 + $0x130] sm:$0xff]  ;;  %v5754_v19 = vld [vmem:[%s10745_s5 + $0x138] sm:$0xff] }
 0x315   :  { %5538 = vmatprep.subr.bf16.mxu0 %v7803_v21  ;;  %5702 = vmatprep.subr.bf16.mxu1 %v7806_v22  ;;  %v5740_v21 = vld [vmem:[%s10745_s5 + $0xc8] sm:$0xff]  ;;  %v5771_v22 = vld [vmem:[%s10745_s5 + $0x1c0] sm:$0xff]  ;;  %v7273_v27 = vpack.c.bf16 %v5754_v19, %v5753_v18 }
 0x318   :  { %5539 = vmatpush1.bf16.msra.mxu0 %v7801_v26  ;;  %5703 = vmatpush1.bf16.msra.mxu1 %v7804_v24  ;;  %v5772_v26 = vld [vmem:[%s10745_s5 + $0x1c8] sm:$0xff]  ;;  %v7241_v24 = vpack.c.bf16 %v5722_v16, %v5721_v15  ;;  %v4090_v15 = vrot.slane %v4085_v6, %v567_v25  ;;  %v4098_v16 = vrot.slane %v4085_v6, %v575_v43 }
 0x319   :  { %5540 = vmatprep.subr.bf16.mxu0 %v7809_v29  ;;  %5704 = vmatprep.subr.bf16.mxu1 %v7812_v30  ;;  %v5724_v29 = vld [vmem:[%s10745_s5 + $0x48] sm:$0xff]  ;;  %v7243_v30 = vpack.c.bf16 %v5740_v21, %v5739_v20  ;;  %v7275_v23 = vpack.c.bf16 %v5772_v26, %v5771_v22 }
 0x31a   :  { %v7245_v38 = vpack.c.bf16 %v5724_v29, %v5723_v28 }
 0x31c   :  { %5541 = vmatpush1.bf16.msra.mxu0 %v7807_v35  ;;  %5705 = vmatpush1.bf16.msra.mxu1 %v7810_v37  ;;  %v5742_v35 = vld [vmem:[%s10745_s5 + $0xd8] sm:$0xff]  ;;  %v5773_v37 = vld [vmem:[%s10745_s5 + $0x1d0] sm:$0xff] }
 0x31d   :  { %7228 = vmatprep.subr.bf16.mxu0 %v7227_v40  ;;  %7260 = vmatprep.subr.bf16.mxu1 %v7259_v34  ;;  %v5725_v40 = vld [vmem:[%s10745_s5 + $0x50] sm:$0xff]  ;;  %v5726_v34 = vld [vmem:[%s10745_s5 + $0x58] sm:$0xff]  ;;  %v7247_v41 = vpack.c.bf16 %v5742_v35, %v5741_v33  ;;  %v7279_v54 = vpack.c.bf16 %v5774_v39, %v5773_v37 }
 0x31e   :  { %v7249_v46 = vpack.c.bf16 %v5726_v34, %v5725_v40 }
 0x31f   :  { %5543 = vmatmul.mubr.bf16.vlgmr.msra.gmra.mrb[8].mxu0 %v3827_v49  ;;  %5707 = vmatmul.mubr.bf16.vlgmr.msra.gmra.mrb[8].mxu1 %v3827_v49  ;;  %v5727_v49 = vld [vmem:[%s10745_s5 + $0x60] sm:$0xff] }
 0x320   :  { %7230 = vmatpush3.bf16.msra.mxu0 %v7229_v4  ;;  %7262 = vmatpush3.bf16.msra.mxu1 %v7261_v45  ;;  %v5775_v4 = vld [vmem:[%s10745_s5 + $0x1e0] sm:$0xff]  ;;  %v5776_v45 = vld [vmem:[%s10745_s5 + $0x1e8] sm:$0xff]  ;;  %v7253_v55 = vpack.c.bf16 %v5728_v51, %v5727_v49 }
 0x321   :  { %7232 = vmatprep.subr.bf16.mxu0 %v7231_v13  ;;  %7264 = vmatprep.subr.bf16.mxu1 %v7263_v50  ;;  %v7251_v13 = vpack.c.bf16 %v5744_v48, %v5743_v44  ;;  %v7283_v50 = vpack.c.bf16 %v5776_v45, %v5775_v4 }
 0x324   :  { %7234 = vmatpush3.bf16.msra.mxu0 %v7233_v58  ;;  %7266 = vmatpush3.bf16.msra.mxu1 %v7265_v59  ;;  %v5746_v58 = vld [vmem:[%s10745_s5 + $0xf8] sm:$0xff]  ;;  %v5777_v59 = vld [vmem:[%s10745_s5 + $0x1f0] sm:$0xff] }
 0x325   :  { %7236 = vmatprep.subr.bf16.mxu0 %v7235_v62  ;;  %7268 = vmatprep.subr.bf16.mxu1 %v7267_v63  ;;  %v7255_v60 = vpack.c.bf16 %v5746_v58, %v5745_v56  ;;  %v5729_v62 = vld [vmem:[%s10745_s5 + $0x70] sm:$0xff]  ;;  %v5730_v63 = vld [vmem:[%s10745_s5 + $0x78] sm:$0xff]  ;;  %v7287_v0 = vpack.c.bf16 %v5778_v61, %v5777_v59  ;;  %s7830_s5 = scalar_lea.hbm %s10750_s10, 16 }
 0x326   :  { %v7257_v1 = vpack.c.bf16 %v5730_v63, %v5729_v62  ;;  %p7831_p0 = scmp.ne.s32.totalorder %s10750_s10, %s7830_s5  ;;  %p7834_p1 = scmp.lt.u32.totalorder %s7830_s5, %s10750_s10 }
 0x328   :  { %7238 = vmatpush3.bf16.msra.mxu0 %v7237_v7  ;;  %7270 = vmatpush3.bf16.msra.mxu1 %v7269_v11  ;;  %v4094_v7 = vrot.slane %v4085_v6, %v571_v12  ;;  %v4102_v11 = vrot.slane %v4085_v6, %v579_v36  ;;  %p7836_p2 = pnand %p7834_p1, %p7831_p0 }
 0x329   :  { %7240 = vmatprep.subr.bf16.mxu0 %v7239_v57  ;;  %7272 = vmatprep.subr.bf16.mxu1 %v7271_v17 }
 0x32c   :  { %7242 = vmatpush3.bf16.msra.mxu0 %v7241_v24  ;;  %7274 = vmatpush3.bf16.msra.mxu1 %v7273_v27 }
 0x32d   :  { %7244 = vmatprep.subr.bf16.mxu0 %v7243_v30  ;;  %7276 = vmatprep.subr.bf16.mxu1 %v7275_v23 }
 0x330   :  { %7246 = vmatpush3.bf16.msra.mxu0 %v7245_v38  ;;  %7278 = vmatpush3.bf16.msra.mxu1 %v7277_v9 }
 0x331   :  { %7248 = vmatprep.subr.bf16.mxu0 %v7247_v41  ;;  %7280 = vmatprep.subr.bf16.mxu1 %v7279_v54 }
 0x334   :  { %7250 = vmatpush3.bf16.msra.mxu0 %v7249_v46  ;;  %7282 = vmatpush3.bf16.msra.mxu1 %v7281_v47 }
 0x335   :  { %7252 = vmatprep.subr.bf16.mxu0 %v7251_v13  ;;  %7284 = vmatprep.subr.bf16.mxu1 %v7283_v50 }
 0x338   :  { %7254 = vmatpush3.bf16.msra.mxu0 %v7253_v55  ;;  %7286 = vmatpush3.bf16.msra.mxu1 %v7285_v8 }
 0x339   :  { %7256 = vmatprep.subr.bf16.mxu0 %v7255_v60  ;;  %7288 = vmatprep.subr.bf16.mxu1 %v7287_v0 }
 0x33c   :  { %7258 = vmatpush3.bf16.msra.mxu0 %v7257_v1  ;;  %7290 = vmatpush3.bf16.msra.mxu1 %v7289_v5 }
 0x3f2   :  { %v5544_v57 = vpop.f32.mrb[8].mxu0  ;;  %v5708_v17 = vpop.f32.mrb[8].mxu1 }
 0x3f3   :  { %v5546_v18 = vpop.f32.mrb[9].mxu0  ;;  %v5710_v19 = vpop.f32.mrb[9].mxu1  ;;  %v7299_v24 = vadd.f32 %v5544_v57, %v4090_v15  ;;  %v7301_v27 = vadd.f32 %v5708_v17, %v4098_v16 }
 0x3f4   :  { %v7300_v20 = vadd.f32 %v5546_v18, %v4094_v7  ;;  %v7302_v21 = vadd.f32 %v5710_v19, %v4102_v11  ;;  %v5548_v22 = vpop.f32.mrb[10].mxu0  ;;  %v5712_v26 = vpop.f32.mrb[10].mxu1  ;;  %v7848_v11 = vmov 3  }
 0x3f5   :  { %v5549_v12 = vpop.f32.mrb[11].mxu0  ;;  %v5713_v28 = vpop.f32.mrb[11].mxu1  ;;  %7409 = vset.pattern.permute.xlu0 %v7848_v11 }
 0x3f6   :  { %5850 = vmatprep.mubr.f32.mxu0 %v7300_v20  ;;  %5920 = vmatprep.mubr.f32.mxu1 %v7302_v21 }
 0x3f7   :  { %5851 = vmatmul.mubr.f32.vlgmr.msra.gmra.mrb[12].mxu0 %v7299_v24  ;;  %5921 = vmatmul.mubr.f32.vlgmr.msra.gmra.mrb[12].mxu1 %v7301_v27 }
 0x4ca   :  { %v7189_v25 = vpop.f32.mrb[12].mxu0  ;;  %v7224_v36 = vpop.f32.mrb[12].mxu1 }
 0x4cb   :  { %v7190_v43 = vpop.f32.mrb[13].mxu0  ;;  %v7225_v29 = vpop.f32.mrb[13].mxu1 }
 0x4cc   :  { %v7191_v30 = vadd.f32 %v7190_v43, %v7189_v25  ;;  %v7226_v23 = vadd.f32 %v7225_v29, %v7224_v36  ;;  %v7849_v25 = vmov 2  }
 0x4cd   :  { %7408 = vset.pattern.permute.xlu1 %v7849_v25 }
 0x4ce   :  { %v5853_v31 = vadd.f32 %v7191_v30, %v7156_v14  ;;  %v10607_v30 = vld [vmem:[%s10748_s8] sm:$0x3] }
 0x4d0   :  { %v5923_v32 = vadd.f32 %v7226_v23, %v5853_v31 }
 0x4d2   :  { %v5947_v33 = vmul.f32 %v5923_v32, %v5923_v32  ;;  %v10554_v35 = vmul.f32 1.75, %v5923_v32 }
 0x4d4   :  { %5949 = vrot.lane.b32.xlu0 %v5947_v33, %s7842_s26  ;;  %v10558_v37 = vmul.f32 0.0, %v10554_v35 }
 0x4d6   :  { %v10561_v39 = vmul.f32 0.0, %v10558_v37  ;;  %v5939_v38 = vmul.f32 -1.0, %v10558_v37 }
 0x4d8   :  { %5953 = vrot.lane.b32.xlu0 %v5947_v33, %s7843_s6  ;;  %v5940_v9 = vadd.f32 %v5939_v38, %v10561_v39 }
 0x4da   :  { %v10567_v40 = vadd.f32 %v5940_v9, %v10558_v37 }
 0x4dc   :  { %5983 = vrot.lane.b32.xlu0 %v5923_v32, %s7843_s6 }
 0x4e0   :  { %5992 = vrot.lane.b32.xlu0 %v5923_v32, %s7842_s26 }
 0x546   :  { %v5950_v34 = vpop.permute.xlu0 %5949 }
 0x547   :  { %v5952_v41 = vadd.f32 %v5950_v34, %v5947_v33 }
 0x54a   :  { %v5954_v54 = vpop.permute.xlu0 %5953 }
 0x54b   :  { %v5956_v42 = vadd.f32 %v5954_v54, %v5952_v41 }
 0x54d   :  { %7813 = vrsqrt.f32 %v5956_v42  ;;  %vm5959_vm0 = vcmp.eq.f32.partialorder %v5956_v42, inf  ;;  %v5962_v48 = vand.u32 2147483648, %v5956_v42  ;;  %vm5961_vm1 = vcmp.eq.f32.partialorder %v5956_v42, 0.0 }
 0x54e   :  { %v5984_v8 = vpop.permute.xlu0 %5983 }
 0x552   :  { %v5993_v61 = vpop.permute.xlu0 %5992 }
 0x557   :  { %v7814_v10 = vpop.eup %7813 }
 0x558   :  { %v5958_v44 = vmul.f32 %v7814_v10, %v5956_v42  ;;  %v7850_v10 = vmov 4  }
 0x55a   :  { %v5960_v4 = vsel %vm5959_vm0, %v5956_v42, %v5958_v44  ;;  %v7851_v44 = vmov 6   ;;  %vm6142_vm0 = vcmask 91136  }
 0x55b   :  { %v5963_v45 = vsel %vm5961_vm1, %v5962_v48, %v5960_v4  ;;  %v7852_v48 = vmov 7  }
 0x55c   :  { %v5964_v46 = vmax.f32 %v5963_v45, 1e-08 }
 0x55e   :  { %5968 = vrot.lane.b32.xlu1 %v5964_v46, %s7844_s27  ;;  %7815 = vrcp.f32 %v5964_v46 }
 0x562   :  { %5996 = vrot.lane.b32.xlu1 %v5923_v32, %s7845_s28 }
 0x566   :  { %5973 = vrot.lane.b32.xlu1 %v5964_v46, %s7846_s29 }
 0x568   :  { %v7816_v47 = vpop.eup %7815 }
 0x569   :  { %v10573_v13 = vmul.f32 %v7816_v47, %v5923_v32  ;;  %v7853_v47 = vmov 1  }
 0x56a   :  { %5979 = vrot.lane.b32.xlu1 %v5923_v32, %s7847_s30 }
 0x5d0   :  { %v5969_v49 = vpop.permute.xlu1 %5968 }
 0x5d1   :  { %7817 = vrcp.f32 %v5969_v49  ;;  %v7854_v49 = vmov 8  }
 0x5d4   :  { %v5997_v50 = vpop.permute.xlu1 %5996 }
 0x5d5   :  { %v5999_v51 = vmul.f32 %v5997_v50, %v10573_v13  ;;  %v7855_v50 = vmov 0  }
 0x5d7   :  { %6001 = vrot.lane.b32.xlu0 %v5999_v51, %s7846_s29  ;;  %v5935_v51 = vadd.f32 %v10561_v39, %v10558_v37 }
 0x5d8   :  { %v5974_v52 = vpop.permute.xlu1 %5973 }
 0x5d9   :  { %7819 = vrcp.f32 %v5974_v52  ;;  %v10638_v52 = vadd.f32 %v5935_v51, %v10558_v37 }
 0x5db   :  { %v7818_v53 = vpop.eup %7817 }
 0x5dc   :  { %v10577_v55 = vmul.f32 %v7818_v53, %v5923_v32  ;;  %v5980_v2 = vpop.permute.xlu1 %5979  ;;  %v5938_v53 = vsub.f32 0.0, %v10638_v52 }
 0x5dd   :  { %v6005_v3 = vmul.f32 %v5980_v2, %v10573_v13 }
 0x5de   :  { %v6006_v56 = vmul.f32 %v5984_v8, %v10577_v55  ;;  %v5982_v16 = vmul.f32 %v5980_v2, %v10577_v55 }
 0x5e0   :  { %6008 = vrot.lane.b32.xlu1 %v6006_v56, %s7842_s26  ;;  %v5943_v56 = vadd.f32 %v10561_v39, %v10561_v39 }
 0x5e3   :  { %v7820_v58 = vpop.eup %7819 }
 0x5e4   :  { %v10581_v59 = vmul.f32 %v7820_v58, %v5923_v32  ;;  %v5944_v58 = vmul.f32 -1.0, %v10554_v35  ;;  %v7858_v35 = vmov 5  }
 0x5e6   :  { %v5986_v60 = vmul.f32 %v5984_v8, %v10581_v59  ;;  %v5995_v62 = vmul.f32 %v5993_v61, %v10581_v59  ;;  %v7856_v8 = vmov 9   ;;  %v10648_v37 = vadd.f32 %v5944_v58, %v5943_v56 }
 0x5e8   :  { %5988 = vrot.lane.b32.xlu0 %v5986_v60, %s7842_s26  ;;  %v7857_v60 = vmov 10   ;;  %v5946_v61 = vsub.f32 0.0, %v10648_v37 }
 0x649   :  { %v6002_v63 = vpop.permute.xlu0 %6001 }
 0x64a   :  { %v6004_v0 = vsub.f32 %v5995_v62, %v6002_v63 }
 0x64c   :  { %v6013_v1 = vmul.f32 %v6004_v0, %v6004_v0 }
 0x64e   :  { %6015 = vrot.lane.b32.xlu1 %v6013_v1, %s7842_s26 }
 0x652   :  { %v6009_v5 = vpop.permute.xlu1 %6008 }
 0x653   :  { %v6011_v6 = vsub.f32 %v6005_v3, %v6009_v5 }
 0x655   :  { %v6019_v7 = vmul.f32 %v6011_v6, %v6011_v6 }
 0x657   :  { %6021 = vrot.lane.b32.xlu0 %v6019_v7, %s7844_s27 }
 0x65a   :  { %v5989_v15 = vpop.permute.xlu0 %5988 }
 0x65b   :  { %6059 = vrot.lane.b32.xlu0 %v10581_v59, %s7842_s26  ;;  %v5991_v57 = vsub.f32 %v5982_v16, %v5989_v15  ;;  %v5942_v15 = vsub.f32 0.0, %v10567_v40 }
 0x65d   :  { %v6012_v18 = vmul.f32 %v5991_v57, %v5991_v57 }
 0x6c0   :  { %v6016_v17 = vpop.permute.xlu1 %6015 }
 0x6c1   :  { %v6018_v19 = vadd.f32 %v6016_v17, %v6012_v18 }
 0x6c9   :  { %v6022_v20 = vpop.permute.xlu0 %6021 }
 0x6ca   :  { %v6024_v21 = vadd.f32 %v6022_v20, %v6018_v19  ;;  %v7860_v19 = vmov 11  }
 0x6cc   :  { %7821 = vrsqrt.f32 %v6024_v21  ;;  %vm6027_vm2 = vcmp.eq.f32.partialorder %v6024_v21, inf  ;;  %v6030_v24 = vand.u32 2147483648, %v6024_v21  ;;  %vm6029_vm3 = vcmp.eq.f32.partialorder %v6024_v21, 0.0 }
 0x6cd   :  { %v6060_v43 = vpop.permute.xlu0 %6059 }
 0x6d6   :  { %v7822_v22 = vpop.eup %7821 }
 0x6d7   :  { %v6026_v26 = vmul.f32 %v7822_v22, %v6024_v21 }
 0x6d9   :  { %v6028_v27 = vsel %vm6027_vm2, %v6024_v21, %v6026_v26 }
 0x6da   :  { %v6031_v12 = vsel %vm6029_vm3, %v6030_v24, %v6028_v27 }
 0x6db   :  { %v6032_v28 = vmax.f32 %v6031_v12, 1e-08 }
 0x6dd   :  { %7823 = vrcp.f32 %v6032_v28  ;;  %6041 = vrot.lane.b32.xlu0 %v6032_v28, %s7842_s26  ;;  %6036 = vrot.lane.b32.xlu1 %v6032_v28, %s7844_s27 }
 0x6e1   :  { %6070 = vrot.lane.b32.xlu1 %v10573_v13, %s7846_s29 }
 0x6e5   :  { %6048 = vrot.lane.b32.xlu1 %v10577_v55, %s7842_s26 }
 0x6e7   :  { %v7824_v36 = vpop.eup %7823 }
 0x6e8   :  { %v10600_v14 = vmul.f32 %v7824_v36, %v5991_v57 }
 0x6ea   :  { %v6062_v29 = vmul.f32 %v6060_v43, %v10600_v14  ;;  %v6068_v62 = vmul.f32 %v10600_v14, %v10577_v55 }
 0x6ec   :  { %6064 = vrot.lane.b32.xlu0 %v6062_v29, %s7842_s26 }
 0x6f0   :  { %6181 = vperm.xlu0 %7409, %v10607_v30  }
 0x6f4   :  { %6160 = vperm.xlu0 %7409, %v10581_v59  }
 0x6f8   :  { %7415 = vset.pattern.permute.xlu0 %v7849_v25 }
 0x74f   :  { %v6037_v23 = vpop.permute.xlu1 %6036  ;;  %v6042_v31 = vpop.permute.xlu0 %6041 }
 0x750   :  { %7825 = vrcp.f32 %v6037_v23 }
 0x751   :  { %7827 = vrcp.f32 %v6042_v31 }
 0x753   :  { %v6071_v32 = vpop.permute.xlu1 %6070 }
 0x757   :  { %v6049_v54 = vpop.permute.xlu1 %6048 }
 0x75a   :  { %v7826_v33 = vpop.eup %7825 }
 0x75b   :  { %v7828_v38 = vpop.eup %7827  ;;  %v10612_v9 = vmul.f32 %v7826_v33, %v6004_v0  ;;  %v10665_v0 = vld [vmem:[%s10747_s7] sm:$0x3]  ;;  %s7861_s7 = smov 112  }
 0x75c   :  { %v10614_v34 = vmul.f32 %v7828_v38, %v6011_v6 }
 0x75d   :  { %v6073_v41 = vmul.f32 %v6071_v32, %v10612_v9  ;;  %v6046_v17 = vmul.f32 %v10612_v9, %v10581_v59 }
 0x75e   :  { %v6051_v42 = vmul.f32 %v6049_v54, %v10614_v34  ;;  %v6057_v4 = vmul.f32 %v10614_v34, %v10573_v13  ;;  %v6065_v45 = vpop.permute.xlu0 %6064 }
 0x75f   :  { %6075 = vrot.lane.b32.xlu1 %v6073_v41, %s7842_s26 }
 0x760   :  { %6053 = vrot.lane.b32.xlu0 %v6051_v42, %s7846_s29  ;;  %v10628_v46 = vsub.f32 %v6057_v4, %v6065_v45 }
 0x763   :  { %6150 = vperm.xlu1 %7408, %v10577_v55  }
 0x767   :  { %7410 = vset.pattern.permute.xlu1 %v7850_v10 }
 0x768   :  { %6255 = vperm.xlu1 %7410, %v10607_v30  }
 0x76c   :  { %7411 = vset.pattern.permute.xlu1 %v7851_v44 }
 0x76d   :  { %6191 = vperm.xlu1 %7411, %v10607_v30  }
 0x76f   :  { %v6182_v1 = vpop.permute.xlu0 %6181 }
 0x770   :  { %v6184_v5 = vmul.f32 %v6182_v1, %v10665_v0 }
 0x771   :  { %7412 = vset.pattern.permute.xlu1 %v7852_v48 }
 0x772   :  { %6265 = vperm.xlu1 %7412, %v10607_v30  }
 0x773   :  { %v6161_v7 = vpop.permute.xlu0 %6160 }
 0x774   :  { %v6163_v22 = vmul.f32 %v6161_v7, %v10665_v0 }
 0x776   :  { %7413 = vset.pattern.permute.xlu1 %v7848_v11 }
 0x777   :  { %6299 = vperm.xlu1 %7413, %v10612_v9  }
 0x77b   :  { %7414 = vset.pattern.permute.xlu1 %v7853_v47 }
 0x77c   :  { %6225 = vperm.xlu1 %7414, %v10628_v46  }
 0x780   :  { %6309 = vperm.xlu1 %7414, %v10614_v34  }
 0x784   :  { %7417 = vset.pattern.permute.xlu1 %v7854_v49 }
 0x785   :  { %6339 = vperm.xlu1 %7417, %v10607_v30  }
 0x789   :  { %7419 = vset.pattern.permute.xlu1 %v7855_v50 }
 0x78a   :  { %6176 = vperm.xlu1 %7419, %v10607_v30  }
 0x78e   :  { %7420 = vset.pattern.permute.xlu1 %v7849_v25 }
 0x78f   :  { %6294 = vperm.xlu1 %7420, %v10600_v14  }
 0x793   :  { %7422 = vset.pattern.permute.xlu1 %v7855_v50 }
 0x794   :  { %6170 = vperm.xlu1 %7422, %v5938_v53  }
 0x798   :  { %7423 = vset.pattern.permute.xlu1 %v7856_v8 }
 0x799   :  { %6201 = vperm.xlu1 %7423, %v10607_v30  }
 0x79d   :  { %7425 = vset.pattern.permute.xlu1 %v7857_v60 }
 0x79e   :  { %6275 = vperm.xlu1 %7425, %v10607_v30  }
 0x7a2   :  { %7426 = vset.pattern.permute.xlu1 %v7855_v50 }
 0x7a3   :  { %6319 = vperm.xlu1 %7426, %v5946_v61  }
 0x7a7   :  { %7428 = vset.pattern.permute.xlu1 %v7848_v11 }
 0x7d1   :  { %v6076_v39 = vpop.permute.xlu1 %6075 }
 0x7d2   :  { %v10657_v63 = vsub.f32 %v6068_v62, %v6076_v39  ;;  %v6054_v16 = vpop.permute.xlu0 %6053 }
 0x7d3   :  { %v10681_v18 = vsub.f32 %v6046_v17, %v6054_v16 }
 0x7d4   :  { %6235 = vperm.xlu0 %7415, %v10657_v63  }
 0x7d8   :  { %7416 = vset.pattern.permute.xlu0 %v7858_v35 }
 0x7d9   :  { %6329 = vperm.xlu0 %7416, %v10607_v30  }
 0x7dd   :  { %7418 = vset.pattern.permute.xlu0 %v7853_v47 }
 0x7de   :  { %6145 = vperm.xlu0 %7418, %v10573_v13  }
 0x7e2   :  { %v6151_v2 = vpop.permute.xlu1 %6150  ;;  %6250 = vperm.xlu0 %7418, %v10607_v30  }
 0x7e3   :  { %v6153_v3 = vmul.f32 %v6151_v2, %v10665_v0 }
 0x7e5   :  { %6155 = vrot.lane.b32.xlu1 %v6153_v3, %s7859_s12 }
 0x7e6   :  { %7421 = vset.pattern.permute.xlu0 %v7849_v25 }
 0x7e7   :  { %6324 = vperm.xlu0 %7421, %v10607_v30   ;;  %v6256_v6 = vpop.permute.xlu1 %6255 }
 0x7e8   :  { %v6258_v11 = vmul.f32 %v6256_v6, %v10665_v0 }
 0x7e9   :  { %6186 = vrot.lane.b32.xlu1 %v6184_v5, %s7859_s12 }
 0x7eb   :  { %7424 = vset.pattern.permute.xlu0 %v7855_v50 }
 0x7ec   :  { %6245 = vperm.xlu0 %7424, %v5942_v15   ;;  %v6192_v57 = vpop.permute.xlu1 %6191 }
 0x7ed   :  { %6260 = vrot.lane.b32.xlu1 %v6258_v11, %s7859_s12  ;;  %v6194_v20 = vmul.f32 %v6192_v57, %v10665_v0 }
 0x7f0   :  { %7427 = vset.pattern.permute.xlu0 %v7860_v19 }
 0x7f1   :  { %6349 = vperm.xlu0 %7427, %v10607_v30   ;;  %6220 = vperm.xlu1 %7428, %v10681_v18   ;;  %v6266_v21 = vpop.permute.xlu1 %6265 }
 0x7f2   :  { %v6268_v26 = vmul.f32 %v6266_v21, %v10665_v0 }
 0x7f5   :  { %6165 = vrot.lane.b32.xlu0 %v6163_v22, %s7861_s7  ;;  %6196 = vrot.lane.b32.xlu1 %v6194_v20, %s7861_s7 }
 0x7f6   :  { %v6300_v24 = vpop.permute.xlu1 %6299 }
 0x7f7   :  { %v6302_v27 = vmul.f32 %v6300_v24, %v10665_v0 }
 0x7f9   :  { %6304 = vrot.lane.b32.xlu0 %v6302_v27, %s7859_s12  ;;  %6270 = vrot.lane.b32.xlu1 %v6268_v26, %s7861_s7 }
 0x7fb   :  { %v6226_v12 = vpop.permute.xlu1 %6225 }
 0x7fc   :  { %v6228_v28 = vmul.f32 %v6226_v12, %v10665_v0 }
 0x7fe   :  { %6230 = vrot.lane.b32.xlu0 %v6228_v28, %s7859_s12 }
 0x7ff   :  { %v6310_v25 = vpop.permute.xlu1 %6309 }
 0x800   :  { %v6312_v41 = vmul.f32 %v6310_v25, %v10665_v0 }
 0x804   :  { %v6340_v36 = vpop.permute.xlu1 %6339 }
 0x805   :  { %v6342_v44 = vmul.f32 %v6340_v36, %v10665_v0 }
 0x809   :  { %v6177_v43 = vpop.permute.xlu1 %6176 }
 0x80a   :  { %v6179_v56 = vmul.f32 %v6177_v43, %v10665_v0 }
 0x80e   :  { %v6295_v29 = vpop.permute.xlu1 %6294 }
 0x80f   :  { %v6297_v25 = vmul.f32 %v6295_v29, %v10665_v0 }
 0x813   :  { %v6171_v30 = vpop.permute.xlu1 %6170 }
 0x818   :  { %v6202_v23 = vpop.permute.xlu1 %6201 }
 0x81d   :  { %v6276_v31 = vpop.permute.xlu1 %6275 }
 0x822   :  { %v6320_v38 = vpop.permute.xlu1 %6319 }
 0x853   :  { %v6236_v32 = vpop.permute.xlu0 %6235 }
 0x854   :  { %v6238_v33 = vmul.f32 %v6236_v32, %v10665_v0 }
 0x856   :  { %6240 = vrot.lane.b32.xlu0 %v6238_v33, %s7861_s7 }
 0x857   :  { %v6156_v42 = vpop.permute.xlu1 %6155 }
 0x858   :  { %v6330_v54 = vpop.permute.xlu0 %6329 }
 0x859   :  { %v6332_v10 = vmul.f32 %v6330_v54, %v10665_v0 }
 0x85a   :  { %6314 = vrot.lane.b32.xlu0 %v6312_v41, %s7861_s7 }
 0x85b   :  { %6334 = vrot.lane.b32.xlu1 %v6332_v10, %s7859_s12  ;;  %v6187_v4 = vpop.permute.xlu1 %6186 }
 0x85c   :  { %v6189_v39 = vadd.f32 %v6187_v4, %v6179_v56 }
 0x85d   :  { %v6146_v48 = vpop.permute.xlu0 %6145 }
 0x85e   :  { %v6148_v58 = vmul.f32 %v6146_v48, %v10665_v0 }
 0x85f   :  { %6344 = vrot.lane.b32.xlu1 %v6342_v44, %s7861_s7  ;;  %v6261_v49 = vpop.permute.xlu1 %6260 }
 0x860   :  { %v6158_v35 = vadd.f32 %v6156_v42, %v6148_v58 }
 0x861   :  { %v6251_v45 = vpop.permute.xlu0 %6250 }
 0x862   :  { %v6253_v47 = vmul.f32 %v6251_v45, %v10665_v0 }
 0x864   :  { %v6263_v50 = vadd.f32 %v6261_v49, %v6253_v47 }
 0x866   :  { %v6325_v51 = vpop.permute.xlu0 %6324 }
 0x86b   :  { %v6246_v8 = vpop.permute.xlu0 %6245 }
 0x870   :  { %v6350_v60 = vpop.permute.xlu0 %6349  ;;  %v6221_v62 = vpop.permute.xlu1 %6220 }
 0x871   :  { %v6223_v21 = vmul.f32 %v6221_v62, %v10665_v0 }
 0x874   :  { %v6166_v1 = vpop.permute.xlu0 %6165  ;;  %v6197_v2 = vpop.permute.xlu1 %6196 }
 0x875   :  { %v6168_v3 = vadd.f32 %v6166_v1, %v6158_v35  ;;  %v6199_v5 = vadd.f32 %v6197_v2, %v6189_v39 }
 0x877   :  { %v6173_v6 = vadd.f32 %v6171_v30, %v6168_v3  ;;  %v6204_v7 = vadd.f32 %v6202_v23, %v6199_v5  ;;  %v6327_v23 = vmul.f32 %v6325_v51, %v10665_v0 }
 0x878   :  { %v6305_v17 = vpop.permute.xlu0 %6304  ;;  %v6271_v20 = vpop.permute.xlu1 %6270 }
 0x879   :  { %v6205_v11 = vsub.f32 %v6173_v6, %v6204_v7  ;;  %v6273_v26 = vadd.f32 %v6271_v20, %v6263_v50  ;;  %v6307_v32 = vadd.f32 %v6305_v17, %v6297_v25 }
 0x87b   :  { %v6206_v16 = vmul.f32 %v6205_v11, %v6205_v11  ;;  %v6278_v12 = vadd.f32 %v6276_v31, %v6273_v26 }
 0x87c   :  { %v6231_v19 = vpop.permute.xlu0 %6230 }
 0x87d   :  { %v6208_v57 = vsel %vm6207_vm4, %v6206_v16, 0.0  ;;  %v6233_v22 = vadd.f32 %v6231_v19, %v6223_v21 }
 0x87e   :  { %6209 = vadd.xlane.f32.xlu0 %v6208_v57 }
 0x8c8   :  { %v6241_v24 = vpop.permute.xlu0 %6240 }
 0x8c9   :  { %v6243_v27 = vadd.f32 %v6241_v24, %v6233_v22 }
 0x8cb   :  { %v6248_v28 = vadd.f32 %v6246_v8, %v6243_v27 }
 0x8cc   :  { %v6315_v36 = vpop.permute.xlu0 %6314 }
 0x8cd   :  { %v6335_v43 = vpop.permute.xlu1 %6334  ;;  %v6279_v30 = vsub.f32 %v6248_v28, %v6278_v12  ;;  %v6317_v41 = vadd.f32 %v6315_v36, %v6307_v32 }
 0x8ce   :  { %v6337_v54 = vadd.f32 %v6335_v43, %v6327_v23 }
 0x8cf   :  { %v6280_v33 = vmul.f32 %v6279_v30, %v6279_v30  ;;  %v6322_v48 = vadd.f32 %v6320_v38, %v6317_v41 }
 0x8d1   :  { %v6345_v42 = vpop.permute.xlu1 %6344  ;;  %v6281_v10 = vsel %vm6207_vm4, %v6280_v33, 0.0 }
 0x8d2   :  { %v6347_v44 = vadd.f32 %v6345_v42, %v6337_v54  ;;  %6282 = vadd.xlane.f32.xlu1 %v6281_v10 }
 0x8d4   :  { %v6352_v4 = vadd.f32 %v6350_v60, %v6347_v44 }
 0x8d6   :  { %v6353_v31 = vsub.f32 %v6322_v48, %v6352_v4 }
 0x8d8   :  { %v6354_v45 = vmul.f32 %v6353_v31, %v6353_v31 }
 0x8da   :  { %v6355_v29 = vsel %vm6207_vm4, %v6354_v45, 0.0 }
 0x8db   :  { %6356 = vadd.xlane.f32.xlu0 %v6355_v29 }
 0x8e3   :  { %6083 = vrot.lane.b32.xlu1 %v10681_v18, %s7843_s6 }
 0x8e7   :  { %6086 = vrot.lane.b32.xlu1 %v10577_v55, %s7844_s27 }
 0x8eb   :  { %6094 = vrot.lane.b32.xlu1 %v10612_v9, %s7846_s29 }
 0x8ef   :  { %6101 = vrot.lane.b32.xlu1 %v10657_v63, %s7862_s13 }
 0x8f1   :  { %6079 = vrot.lane.b32.xlu0 %v10573_v13, %s7842_s26 }
 0x8f3   :  { %6109 = vrot.lane.b32.xlu1 %v5938_v53, %s7863_s14 }
 0x8f5   :  { %6090 = vrot.lane.b32.xlu0 %v10628_v46, %s7864_s0 }
 0x8f7   :  { %6117 = vrot.lane.b32.xlu1 %v5946_v61, %s7865_s15 }
 0x8f9   :  { %6097 = vrot.lane.b32.xlu0 %v10581_v59, %s7864_s0 }
 0x8fd   :  { %6105 = vrot.lane.b32.xlu0 %v10614_v34, %s7866_s16 }
 0x901   :  { %6113 = vrot.lane.b32.xlu0 %v5942_v15, %s7867_s2 }
 0x90b   :  { %v6210_v13 = vpop.xlane.xlu0 %6209 }
 0x90c   :  { %v6211_v55 = vrot.slane %v6210_v13, 4 }
 0x90e   :  { %v6212_v9 = vadd.f32 %v6211_v55, %v6210_v13 }
 0x910   :  { %v6213_v52 = vrot.slane %v6212_v9, 2 }
 0x912   :  { %v6214_v53 = vadd.f32 %v6213_v52, %v6212_v9 }
 0x914   :  { %v6215_v63 = vrot.slane %v6214_v53, 1 }
 0x916   :  { %v6216_v46 = vadd.f32 %v6215_v63, %v6214_v53 }
 0x918   :  { %7375 = vpush %v6216_v46 }
 0x949   :  { %s7376_s19 = spop %7375 }
 0x95f   :  { %v6283_v0 = vpop.xlane.xlu1 %6282 }
 0x960   :  { %v6284_v37 = vrot.slane %v6283_v0, 4 }
 0x962   :  { %v6285_v61 = vadd.f32 %v6284_v37, %v6283_v0 }
 0x963   :  { %v6084_v18 = vpop.permute.xlu1 %6083 }
 0x964   :  { %v6286_v59 = vrot.slane %v6285_v61, 2 }
 0x966   :  { %v6287_v38 = vadd.f32 %v6286_v59, %v6285_v61 }
 0x967   :  { %v6087_v47 = vpop.permute.xlu1 %6086 }
 0x968   :  { %v6357_v34 = vpop.xlane.xlu0 %6356  ;;  %v6288_v49 = vrot.slane %v6287_v38, 1 }
 0x969   :  { %v6358_v50 = vrot.slane %v6357_v34, 4 }
 0x96a   :  { %v6289_v40 = vadd.f32 %v6288_v49, %v6287_v38 }
 0x96b   :  { %v6359_v15 = vadd.f32 %v6358_v50, %v6357_v34  ;;  %v6095_v51 = vpop.permute.xlu1 %6094 }
 0x96c   :  { %v6080_v8 = vpop.permute.xlu0 %6079  ;;  %7377 = vpush %v6289_v40 }
 0x96d   :  { %v6360_v56 = vrot.slane %v6359_v15, 2  ;;  %v6121_v58 = vsel %vm6120_vm5, %v6080_v8, %v6084_v18 }
 0x96e   :  { %v6123_v60 = vsel %vm6122_vm6, %v6121_v58, %v10600_v14 }
 0x96f   :  { %v6125_v62 = vsel %vm6124_vm7, %v6123_v60, %v6087_v47  ;;  %v6361_v39 = vadd.f32 %v6360_v56, %v6359_v15  ;;  %v6102_v1 = vpop.permute.xlu1 %6101 }
 0x970   :  { %v6091_v35 = vpop.permute.xlu0 %6090 }
 0x971   :  { %v6127_v2 = vsel %vm6126_vm8, %v6125_v62, %v6091_v35  ;;  %v6362_v3 = vrot.slane %v6361_v39, 1 }
 0x972   :  { %v6129_v7 = vsel %vm6128_vm9, %v6127_v2, %v6095_v51 }
 0x973   :  { %v6363_v5 = vadd.f32 %v6362_v3, %v6361_v39  ;;  %v6110_v16 = vpop.permute.xlu1 %6109 }
 0x974   :  { %v6098_v6 = vpop.permute.xlu0 %6097 }
 0x975   :  { %v6131_v11 = vsel %vm6130_vm10, %v6129_v7, %v6098_v6  ;;  %7379 = vpush %v6363_v5 }
 0x976   :  { %v6133_v17 = vsel %vm6132_vm11, %v6131_v11, %v6102_v1 }
 0x977   :  { %v6118_v21 = vpop.permute.xlu1 %6117 }
 0x978   :  { %v6106_v57 = vpop.permute.xlu0 %6105 }
 0x979   :  { %v6135_v14 = vsel %vm6134_vm12, %v6133_v17, %v6106_v57 }
 0x97a   :  { %v6137_v20 = vsel %vm6136_vm13, %v6135_v14, %v6110_v16 }
 0x97c   :  { %v6114_v19 = vpop.permute.xlu0 %6113 }
 0x97d   :  { %v6139_v22 = vsel %vm6138_vm14, %v6137_v20, %v6114_v19 }
 0x97e   :  { %v6141_v26 = vsel %vm6140_vm15, %v6139_v22, %v6118_v21 }
 0x97f   :  { %6143 = vst.msk [vmem:[%s10749_s9] sm:$0x3] %vm6142_vm0, %v6141_v26 }
 0x99d   :  { %s7378_s20 = spop %7377 }
 0x99e   :  { %s6291_s21 = sadd.f32 %s7378_s20, %s7376_s19 }
 0x9a6   :  { %s7380_s22 = spop %7379 }
 0x9a7   :  { %s6365_s23 = sadd.f32 %s7380_s22, %s6291_s21 }
 0x9a9   :  { %s6368_s24 = smul.f32 0.020833334, %s6365_s23 }
 0x9ab   :  { %6370 = sst [smem:[#allocation2]] %s6368_s24 }
 0x9ac   :  { %7839 = shalt.err (!%p7836_p2)
}
 0x9ad   :  { %s7868_s9 = smov [#allocation2]  }
 0x9ae   :  { %6380 = dma.smem_to_hbm %s7868_s9, 16, %s10750_s10, [#allocation3]  }
 0x9af   :  { %7840 = dma.done.wait [#allocation3], 16  }
 0x9b0   :  { %7841 = vsyncadd [#allocation3], 4294967280 }
 0x9b1   :  { %6386 = sfence }
 0x9b2   :  { %6387 = vsyncpa [#allocation3], 1 }

</bundles_post_ra>
